<compile_context>
chip_gen: v7x
topology: tpu7x:2x2x1
jax: 0.10.0
libtpu: 0.0.40
codegen_flags: <defaults>
</compile_context>

<pallas_src>
import functools

import jax
import jax.numpy as jnp
from jax.experimental import pallas as pl
from jax.experimental.pallas import tpu as pltpu

# ----------------------------- dimensions ----------------------------------
B = 2          # video batch
C_LAT = 4      # latent channels
F = 8          # frames
H = 16
W_SP = 16
HW = H * W_SP
C_COND = 3     # controlnet condition channels
D_CROSS = 32   # cross-attention hidden dim
D_TIME = 32    # timestep embedding dim
SEQ = 8        # text-token sequence length
FACE_DIM = 16  # face embedding dim
N_FACE_TOK = 4 # number of projected face tokens


# ----------------------------- small helpers --------------------------------
def _silu(x):
    return x * jax.nn.sigmoid(x)


def _conv1x1(xs, w, bias=None, extra=None, act=None, scale=None):
    """1x1 conv as VPU broadcast-FMAs.

    xs    : list of Cin arrays (same shape), lane-dense tiles
    w     : w[ci][co] scalars (from SMEM)
    bias  : optional list of Cout scalars / broadcastable arrays
    extra : optional list of Cout arrays added pre-activation
    scale : optional scalar applied after bias/extra, before activation
    """
    cout = len(w[0])
    out = []
    for co in range(cout):
        acc = xs[0] * w[0][co]
        for ci in range(1, len(xs)):
            acc = acc + xs[ci] * w[ci][co]
        if bias is not None:
            acc = acc + bias[co]
        if extra is not None:
            acc = acc + extra[co]
        if scale is not None:
            acc = acc * scale
        if act == "silu":
            acc = _silu(acc)
        out.append(acc)
    return out


def _read_wstack(w_sm, n_layers, cin, cout):
    # packed as (cout, n_layers*cin): entry [co, l*cin + ci] = w_l[ci, co]
    return [[[w_sm[co, l * cin + ci] for co in range(cout)]
             for ci in range(cin)] for l in range(n_layers)]


def _read_bstack(b_sm, n, cout):
    return [[b_sm[bi, co] for co in range(cout)] for bi in range(n)]


def timestep_embedding(t, dim):
    # TODO(synk): assumes a scalar timestep (shared across batch/frames); a
    # per-sample timestep would need a per-row time bias like the ctx bias.
    half = dim // 2
    freqs = jnp.exp(-jnp.log(10000.0) *
                    jnp.arange(half, dtype=jnp.float32) / half)
    args = jnp.asarray(t, jnp.float32) * freqs
    return jnp.concatenate([jnp.sin(args), jnp.cos(args)])


# ----------------------------- fused Pallas kernel ---------------------------
def _fused_model_kernel(*refs, c_lat, c_cond, cross_id, has_xbody):
    """Fused controlnet (+ optional xbody controlnet) + UNet for one batch.

    Layout: latent/cond blocks are (channels, 1, frames, H*W).  All
    intermediates stay in vregs; the only stores are the final output tiles.
    """
    o_ref = refs[-1]
    ins = refs[:-1]
    if has_xbody:
        (x_ref, cond_m_ref, bias_m_ref, cond_x_ref, bias_x_ref,
         wm_sm, bm_sm, cwm_sm, wx_sm, bx_sm, cwx_sm,
         bu_sm, wu_sm, ob_sm, scale_sm) = ins
    else:
        (x_ref, cond_m_ref, bias_m_ref,
         wm_sm, bm_sm, cwm_sm,
         bu_sm, wu_sm, ob_sm, scale_sm) = ins
        cond_x_ref = bias_x_ref = wx_sm = bx_sm = cwx_sm = None

    i = pl.program_id(0)
    scale = scale_sm[0, 0]
    f_c = cond_m_ref.shape[2]           # controlnet frame count (f-1 if cross_id)

    # ------------------------- controlnet(s) --------------------------------
    def run_cn(cond_r, bias_r, w_sm, b_sm, cw_sm, acc):
        W = _read_wstack(w_sm, 7, c_lat, c_lat)            # [l][ci][co]
        Bst = _read_bstack(b_sm, 7, c_lat)                 # [layer][co]
        CW = [[cw_sm[co, ci] for co in range(c_lat)] for ci in range(c_cond)]

        if cross_id:
            xs = [x_ref[ci, 0, 1:, :] for ci in range(c_lat)]      # (f_c, HW)
        else:
            xs = [x_ref[ci, 0] for ci in range(c_lat)]             # (f_c, HW)

        cond_rows = [cond_r[ci, 0] for ci in range(c_cond)]        # (f_c, HW)
        cond_feat = _conv1x1(cond_rows, CW, Bst[0], act="silu")
        bias_cols = [bias_r[co, 0] for co in range(c_lat)]         # (f_c, 1)

        h0 = _conv1x1(xs, W[0], bias_cols, extra=cond_feat, act="silu")
        d1 = _conv1x1(h0, W[1], Bst[1], act="silu")
        d2 = _conv1x1(d1, W[2], Bst[2], act="silu")
        mid = _conv1x1(d2, W[3], Bst[3], act="silu")
        r1 = _conv1x1(d1, W[4], Bst[4], scale=scale)
        r2 = _conv1x1(d2, W[5], Bst[5], scale=scale)
        rm = _conv1x1(mid, W[6], Bst[6], scale=scale)
        tot = [r1[c] + r2[c] + rm[c] for c in range(c_lat)]
        if acc is None:
            return tot
        return [acc[c] + tot[c] for c in range(c_lat)]             # xbody sum

    res = run_cn(cond_m_ref, bias_m_ref, wm_sm, bm_sm, cwm_sm, None)
    if has_xbody:
        res = run_cn(cond_x_ref, bias_x_ref, wx_sm, bx_sm, cwx_sm, res)

    # ------------------------- UNet ------------------------------------------
    w_in = [[wu_sm[co, ci] for co in range(c_lat)] for ci in range(c_lat)]
    w_out = [[wu_sm[co, c_lat + ci] for co in range(c_lat)]
             for ci in range(c_lat)]
    bias_in = [bu_sm[i, co] for co in range(c_lat)]
    out_b = [ob_sm[0, co] for co in range(c_lat)]

    xs_full = [x_ref[ci, 0] for ci in range(c_lat)]                # (F, HW)
    h0 = _conv1x1(xs_full, w_in, bias_in, act="silu")
    base = _conv1x1(h0, w_out, out_b)                              # (F, HW)
    # residual folded in via linearity of the out-conv (bias applied once above)
    res_out = _conv1x1(res, w_out)                                 # (f_c, HW)

    if cross_id:
        # zero-frame prepend handled by two disjoint stores (no concat, no RMW)
        for co in range(c_lat):
            o_ref[co, 0, 0:1, :] = base[co][0:1, :]
            o_ref[co, 0, 1:, :] = base[co][1:, :] + res_out[co]
    else:
        for co in range(c_lat):
            o_ref[co, 0] = base[co] + res_out[co]


# ----------------------------- pallas_call wrapper ---------------------------
def _pack_controlnet_params(p):
    ws = [p["in_w"], p["d1_w"], p["d2_w"], p["mid_w"],
          p["zc1_w"], p["zc2_w"], p["zcm_w"]]
    w_pack = jnp.concatenate([w.T for w in ws], axis=1).astype(jnp.float32)
    b_pack = jnp.stack([p["cond_b"], p["d1_b"], p["d2_b"], p["mid_b"],
                        p["zc1_b"], p["zc2_b"], p["zcm_b"]],
                       axis=0).astype(jnp.float32)
    cw_pack = p["cond_w"].T.astype(jnp.float32)
    return w_pack, b_pack, cw_pack


def run_fused_model(x4, cond_m, bias_m, packed_m,
                    cond_x, bias_x, packed_x,
                    bias_u, wu, out_b, scale, *, cross_id, has_xbody):
    c_lat, b, f, hw = x4.shape
    c_cond = cond_m.shape[0]
    f_c = cond_m.shape[2]
    kernel = functools.partial(_fused_model_kernel, c_lat=c_lat, c_cond=c_cond,
                               cross_id=cross_id, has_xbody=has_xbody)

    x_spec = pl.BlockSpec((c_lat, 1, f, hw), lambda i: (0, i, 0, 0))
    cond_spec = pl.BlockSpec((c_cond, 1, f_c, hw), lambda i: (0, i, 0, 0))
    bias_spec = pl.BlockSpec((c_lat, 1, f_c, 1), lambda i: (0, i, 0, 0))
    smem_spec = pl.BlockSpec(memory_space=pltpu.MemorySpace.SMEM)

    in_specs = [x_spec, cond_spec, bias_spec]
    args = [x4, cond_m, bias_m]
    if has_xbody:
        in_specs += [cond_spec, bias_spec]
        args += [cond_x, bias_x]
    in_specs += [smem_spec] * 3
    args += list(packed_m)
    if has_xbody:
        in_specs += [smem_spec] * 3
        args += list(packed_x)
    in_specs += [smem_spec] * 4
    args += [bias_u, wu, out_b, scale]

    return pl.pallas_call(
        kernel,
        grid=(b,),
        in_specs=in_specs,
        out_specs=pl.BlockSpec((c_lat, 1, f, hw), lambda i: (0, i, 0, 0)),
        out_shape=jax.ShapeDtypeStruct((c_lat, b, f, hw), x4.dtype),
        compiler_params=pltpu.CompilerParams(
            dimension_semantics=("parallel",)),
    )(*args)


# ----------------------------- ModelWrapper.forward --------------------------
# TODO(synk): real UNet3DConditionModel / ControlNetModel / Resampler are
# externally injected modules; they are synthesized here as 1x1-conv stacks
# with matching I/O contracts.
def model_wrapper_forward(params, timesteps, noisy_latents,
                          unet_encoder_hidden_states, encoder_hidden_states,
                          controlnet_condition,
                          controlnet_xbody_condition=None, face_emb=None,
                          conditioning_scale=1.0, return_dict=False,
                          cross_id=False):
    del return_dict
    f32 = jnp.float32

    # face_image_proj_model: tiny matmul + token concat, kept in plain XLA
    # (not worth a custom-call launch)
    if face_emb is not None and params.get("face") is not None:
        pf = params["face"]
        face_tokens = (face_emb @ pf["w"] + pf["b"]).reshape(
            face_emb.shape[0], N_FACE_TOK, D_CROSS)
        unet_encoder_hidden_states = jnp.concatenate(
            [unet_encoder_hidden_states, face_tokens], axis=1)

    b, c, f, h, w = noisy_latents.shape
    hw = h * w
    f_c = f - 1 if cross_id else f

    # single entry layout change: channels-first, lane-dense (C, B, F, H*W);
    # the controlnet frame slice happens inside the kernel (one latent DMA)
    x_u = jnp.transpose(noisy_latents, (1, 0, 2, 3, 4)).reshape(c, b, f, hw)

    def cond_to_4d(cond):
        cc = cond.shape[1]
        return jnp.transpose(cond.reshape(b, f_c, cc, h, w),
                             (2, 0, 1, 3, 4)).reshape(cc, b, f_c, hw)

    # tiny conditioning projections kept in plain XLA; per-frame bias is
    # broadcast inside the kernel (no jnp.repeat / HBM blow-up)
    temb = timestep_embedding(timesteps, D_TIME)
    ctx_cn = jnp.mean(encoder_hidden_states, axis=1)        # (b*f_c, D_CROSS)

    def cn_bias(p):
        t_bias = temb @ p["time_w"] + p["time_b"]
        ctx_bias = ctx_cn @ p["ctx_w"] + p["ctx_b"]
        bias = (ctx_bias + t_bias[None, :] + p["in_b"][None, :]
                ).reshape(b, f_c, c)
        # (C, B, f_c, 1): channel on a leading dim; kernel reads bi_ref[co, 0]
        return jnp.transpose(bias, (2, 0, 1))[..., None].astype(f32)

    cond_m = cond_to_4d(controlnet_condition)
    bias_m = cn_bias(params["controlnet"])
    packed_m = _pack_controlnet_params(params["controlnet"])

    has_xbody = (controlnet_xbody_condition is not None
                 and params.get("controlnet_xbody") is not None)
    if has_xbody:
        cond_x = cond_to_4d(controlnet_xbody_condition)
        bias_x = cn_bias(params["controlnet_xbody"])
        packed_x = _pack_controlnet_params(params["controlnet_xbody"])
    else:
        cond_x = bias_x = packed_x = None

    pu = params["unet"]
    t_bias_u = temb @ pu["time_w"] + pu["time_b"]
    ctx_u = jnp.mean(unet_encoder_hidden_states, axis=1)     # (b, D_CROSS)
    bias_u = (ctx_u @ pu["ctx_w"] + pu["ctx_b"] + t_bias_u[None, :]
              + pu["in_b"][None, :]).astype(f32)             # (b, C)
    wu = jnp.concatenate([pu["in_w"].T, pu["out_w"].T], axis=1).astype(f32)
    out_b = pu["out_b"][None, :].astype(f32)
    scale = jnp.asarray(conditioning_scale, f32).reshape(1, 1)

    # ONE fused pallas_call: controlnet(s) + residual sum + UNet
    out4 = run_fused_model(x_u, cond_m, bias_m, packed_m,
                           cond_x, bias_x, packed_x,
                           bias_u, wu, out_b, scale,
                           cross_id=cross_id, has_xbody=has_xbody)

    # single exit layout change back to (b, c, f, h, w)
    return jnp.transpose(out4.reshape(c, b, f, h, w), (1, 0, 2, 3, 4))


# ----------------------------- pure-JAX reference ----------------------------
def _rows_nchw(x):
    n, c, h, w = x.shape
    return jnp.transpose(x, (0, 2, 3, 1)).reshape(n * h * w, c)


def _ref_controlnet(p, lat_nchw, temb, ehs, cond_nchw, scale):
    n, c, h, w = lat_nchw.shape
    x = _rows_nchw(lat_nchw)
    cond = _rows_nchw(cond_nchw)
    cond_feat = _silu(cond @ p["cond_w"] + p["cond_b"])
    t_bias = temb @ p["time_w"] + p["time_b"]
    ctx = jnp.mean(ehs, axis=1) @ p["ctx_w"] + p["ctx_b"]
    ctx_rows = jnp.repeat(ctx, h * w, axis=0)
    h0 = _silu(x @ p["in_w"] + p["in_b"] + t_bias + cond_feat + ctx_rows)
    d1 = _silu(h0 @ p["d1_w"] + p["d1_b"])
    d2 = _silu(d1 @ p["d2_w"] + p["d2_b"])
    mid = _silu(d2 @ p["mid_w"] + p["mid_b"])
    r1 = scale * (d1 @ p["zc1_w"] + p["zc1_b"])
    r2 = scale * (d2 @ p["zc2_w"] + p["zc2_b"])
    rm = scale * (mid @ p["zcm_w"] + p["zcm_b"])
    back = lambda r: jnp.transpose(r.reshape(n, h, w, c), (0, 3, 1, 2))
    return [back(r1), back(r2)], back(rm)


def _ref_unet(p, noisy_latents, temb, ehs_u, down_res, mid_res):
    b, c, f, h, w = noisy_latents.shape
    x4 = jnp.transpose(noisy_latents, (0, 2, 1, 3, 4)).reshape(b * f, c, h, w)
    x = _rows_nchw(x4)
    t_bias = temb @ p["time_w"] + p["time_b"]
    ctx = jnp.mean(ehs_u, axis=1) @ p["ctx_w"] + p["ctx_b"]
    ctx_rows = jnp.repeat(ctx, f * h * w, axis=0)
    h0 = _silu(x @ p["in_w"] + p["in_b"] + t_bias + ctx_rows)
    rows5 = lambda t: jnp.transpose(t, (0, 2, 3, 4, 1)).reshape(-1, t.shape[1])
    res = rows5(down_res[0]) + rows5(down_res[1]) + rows5(mid_res)
    h1 = h0 + res
    out = h1 @ p["out_w"] + p["out_b"]
    out4 = jnp.transpose(out.reshape(b * f, h, w, c), (0, 3, 1, 2))
    return jnp.transpose(out4.reshape(b, f, c, h, w), (0, 2, 1, 3, 4))


def reference_forward(params, timesteps, noisy_latents, unet_ehs, ehs,
                      cond, cond_x=None, face_emb=None,
                      conditioning_scale=1.0, cross_id=False):
    temb = timestep_embedding(timesteps, D_TIME)
    if face_emb is not None and params.get("face") is not None:
        tok = (face_emb @ params["face"]["w"] + params["face"]["b"]
               ).reshape(face_emb.shape[0], N_FACE_TOK, D_CROSS)
        unet_ehs = jnp.concatenate([unet_ehs, tok], axis=1)
    b, c, f, h, w = noisy_latents.shape
    f_c = f - 1 if cross_id else f
    lat = noisy_latents[:, :, 1:] if cross_id else noisy_latents
    cn_in = jnp.transpose(lat, (0, 2, 1, 3, 4)).reshape(b * f_c, c, h, w)
    down, mid = _ref_controlnet(params["controlnet"], cn_in, temb, ehs, cond,
                                conditioning_scale)
    has_x = cond_x is not None and params.get("controlnet_xbody") is not None
    if has_x:
        down_x, mid_x = _ref_controlnet(params["controlnet_xbody"], cn_in,
                                        temb, ehs, cond_x, conditioning_scale)
    to5 = lambda s: jnp.transpose(s.reshape(b, f_c, c, h, w), (0, 2, 1, 3, 4))
    prep = lambda s: jnp.concatenate(
        [jnp.zeros((b, c, 1, h, w), s.dtype), s], axis=2)
    new_down = []
    for idx, s in enumerate(down):
        s5 = to5(s)
        if cross_id:
            s5 = prep(s5)
        if has_x:
            sx5 = to5(down_x[idx])
            if cross_id:
                sx5 = prep(sx5)
            s5 = s5 + sx5
        new_down.append(s5)
    mid5 = to5(mid)
    if cross_id:
        mid5 = prep(mid5)
    if has_x:
        midx5 = to5(mid_x)
        if cross_id:
            midx5 = prep(midx5)
        mid5 = mid5 + midx5
    return _ref_unet(params["unet"], noisy_latents, temb, unet_ehs,
                     new_down, mid5)


# ----------------------------- parameter init --------------------------------
def init_params(key):
    keys = iter(jax.random.split(key, 64))

    def wgt(shape, scale=0.1):
        return (jax.random.normal(next(keys), shape) * scale).astype(jnp.float32)

    def bvec(n):
        return (jax.random.normal(next(keys), (n,)) * 0.01).astype(jnp.float32)

    def controlnet_params():
        return dict(
            cond_w=wgt((C_COND, C_LAT)), cond_b=bvec(C_LAT),
            time_w=wgt((D_TIME, C_LAT)), time_b=bvec(C_LAT),
            ctx_w=wgt((D_CROSS, C_LAT)), ctx_b=bvec(C_LAT),
            in_w=wgt((C_LAT, C_LAT)), in_b=bvec(C_LAT),
            d1_w=wgt((C_LAT, C_LAT)), d1_b=bvec(C_LAT),
            d2_w=wgt((C_LAT, C_LAT)), d2_b=bvec(C_LAT),
            mid_w=wgt((C_LAT, C_LAT)), mid_b=bvec(C_LAT),
            zc1_w=wgt((C_LAT, C_LAT)), zc1_b=bvec(C_LAT),
            zc2_w=wgt((C_LAT, C_LAT)), zc2_b=bvec(C_LAT),
            zcm_w=wgt((C_LAT, C_LAT)), zcm_b=bvec(C_LAT),
        )

    return dict(
        face=dict(w=wgt((FACE_DIM, N_FACE_TOK * D_CROSS)),
                  b=bvec(N_FACE_TOK * D_CROSS)),
        controlnet=controlnet_params(),
        controlnet_xbody=controlnet_params(),
        unet=dict(
            time_w=wgt((D_TIME, C_LAT)), time_b=bvec(C_LAT),
            ctx_w=wgt((D_CROSS, C_LAT)), ctx_b=bvec(C_LAT),
            in_w=wgt((C_LAT, C_LAT)), in_b=bvec(C_LAT),
            out_w=wgt((C_LAT, C_LAT)), out_b=bvec(C_LAT),
        ),
    )


# ----------------------------- demo -----------------------------------------
if __name__ == "__main__":
    key = jax.random.PRNGKey(0)
    k_par, k1, k2, k3, k4, k5, k6 = jax.random.split(key, 7)
    params = init_params(k_par)

    cross_id = True
    f_c = F - 1 if cross_id else F

    timesteps = jnp.array(10.0, dtype=jnp.float32)
    noisy_latents = jax.random.normal(k1, (B, C_LAT, F, H, W_SP), jnp.float32)
    unet_ehs = jax.random.normal(k2, (B, SEQ, D_CROSS), jnp.float32)
    ehs = jax.random.normal(k3, (B * f_c, SEQ, D_CROSS), jnp.float32)
    cond = jax.random.normal(k4, (B * f_c, C_COND, H, W_SP), jnp.float32)
    cond_x = jax.random.normal(k5, (B * f_c, C_COND, H, W_SP), jnp.float32)
    face_emb = jax.random.normal(k6, (B, FACE_DIM), jnp.float32)

    fwd = jax.jit(functools.partial(model_wrapper_forward,
                                    conditioning_scale=1.0, cross_id=cross_id))
    model_pred = fwd(params, timesteps, noisy_latents, unet_ehs, ehs, cond,
                     controlnet_xbody_condition=cond_x, face_emb=face_emb)
    model_pred = jax.block_until_ready(model_pred)

    assert model_pred.shape == (B, C_LAT, F, H, W_SP)
    assert bool(jnp.all(jnp.isfinite(model_pred)))

    ref = reference_forward(params, timesteps, noisy_latents, unet_ehs, ehs,
                            cond, cond_x=cond_x, face_emb=face_emb,
                            conditioning_scale=1.0, cross_id=cross_id)
    err = float(jnp.max(jnp.abs(model_pred - ref)))
    assert err < 1e-3, f"mismatch vs reference: {err}"
    print("KERNEL_OK")
</pallas_src>

<mosaic_0001>
module attributes {stable_mosaic.version = 11 : i64} {
  func.func @_fused_model_kernel(%arg0: i32, %arg1: memref<4x1x8x256xf32, #tpu.memory_space<vmem>>, %arg2: memref<3x1x7x256xf32, #tpu.memory_space<vmem>>, %arg3: memref<4x1x7x1xf32, #tpu.memory_space<vmem>>, %arg4: memref<3x1x7x256xf32, #tpu.memory_space<vmem>>, %arg5: memref<4x1x7x1xf32, #tpu.memory_space<vmem>>, %arg6: memref<4x28xf32, #tpu.memory_space<smem>>, %arg7: memref<7x4xf32, #tpu.memory_space<smem>>, %arg8: memref<4x3xf32, #tpu.memory_space<smem>>, %arg9: memref<4x28xf32, #tpu.memory_space<smem>>, %arg10: memref<7x4xf32, #tpu.memory_space<smem>>, %arg11: memref<4x3xf32, #tpu.memory_space<smem>>, %arg12: memref<2x4xf32, #tpu.memory_space<smem>>, %arg13: memref<4x8xf32, #tpu.memory_space<smem>>, %arg14: memref<1x4xf32, #tpu.memory_space<smem>>, %arg15: memref<1x1xf32, #tpu.memory_space<smem>>, %arg16: memref<4x1x8x256xf32, #tpu.memory_space<vmem>>) attributes {dimension_semantics = [#tpu.dimension_semantics<parallel>], iteration_bounds = array<i64: 2>, scalar_prefetch = 0 : i64, scratch_operands = 0 : i64, tpu.core_type = #tpu.core_type<tc>, window_params = [{transform_indices = @transform_0, window_bounds = array<i64: 4, 1, 8, 256>}, {transform_indices = @transform_1, window_bounds = array<i64: 3, 1, 7, 256>}, {transform_indices = @transform_2, window_bounds = array<i64: 4, 1, 7, 1>}, {transform_indices = @transform_3, window_bounds = array<i64: 3, 1, 7, 256>}, {transform_indices = @transform_4, window_bounds = array<i64: 4, 1, 7, 1>}, {transform_indices = @transform_5, window_bounds = array<i64: 4, 28>}, {transform_indices = @transform_6, window_bounds = array<i64: 7, 4>}, {transform_indices = @transform_7, window_bounds = array<i64: 4, 3>}, {transform_indices = @transform_8, window_bounds = array<i64: 4, 28>}, {transform_indices = @transform_9, window_bounds = array<i64: 7, 4>}, {transform_indices = @transform_10, window_bounds = array<i64: 4, 3>}, {transform_indices = @transform_11, window_bounds = array<i64: 2, 4>}, {transform_indices = @transform_12, window_bounds = array<i64: 4, 8>}, {transform_indices = @transform_13, window_bounds = array<i64: 1, 4>}, {transform_indices = @transform_14, window_bounds = array<i64: 1, 1>}, {transform_indices = @transform_15, window_bounds = array<i64: 4, 1, 8, 256>}]} {
    %c0 = arith.constant 0 : index
    %c0_0 = arith.constant 0 : index
    %0 = memref.load %arg15[%c0, %c0_0] : memref<1x1xf32, #tpu.memory_space<smem>>
    %c0_1 = arith.constant 0 : index
    %c0_2 = arith.constant 0 : index
    %1 = memref.load %arg6[%c0_1, %c0_2] : memref<4x28xf32, #tpu.memory_space<smem>>
    %c1 = arith.constant 1 : index
    %c0_3 = arith.constant 0 : index
    %2 = memref.load %arg6[%c1, %c0_3] : memref<4x28xf32, #tpu.memory_space<smem>>
    %c2 = arith.constant 2 : index
    %c0_4 = arith.constant 0 : index
    %3 = memref.load %arg6[%c2, %c0_4] : memref<4x28xf32, #tpu.memory_space<smem>>
    %c3 = arith.constant 3 : index
    %c0_5 = arith.constant 0 : index
    %4 = memref.load %arg6[%c3, %c0_5] : memref<4x28xf32, #tpu.memory_space<smem>>
    %c0_6 = arith.constant 0 : index
    %c1_7 = arith.constant 1 : index
    %5 = memref.load %arg6[%c0_6, %c1_7] : memref<4x28xf32, #tpu.memory_space<smem>>
    %c1_8 = arith.constant 1 : index
    %c1_9 = arith.constant 1 : index
    %6 = memref.load %arg6[%c1_8, %c1_9] : memref<4x28xf32, #tpu.memory_space<smem>>
    %c2_10 = arith.constant 2 : index
    %c1_11 = arith.constant 1 : index
    %7 = memref.load %arg6[%c2_10, %c1_11] : memref<4x28xf32, #tpu.memory_space<smem>>
    %c3_12 = arith.constant 3 : index
    %c1_13 = arith.constant 1 : index
    %8 = memref.load %arg6[%c3_12, %c1_13] : memref<4x28xf32, #tpu.memory_space<smem>>
    %c0_14 = arith.constant 0 : index
    %c2_15 = arith.constant 2 : index
    %9 = memref.load %arg6[%c0_14, %c2_15] : memref<4x28xf32, #tpu.memory_space<smem>>
    %c1_16 = arith.constant 1 : index
    %c2_17 = arith.constant 2 : index
    %10 = memref.load %arg6[%c1_16, %c2_17] : memref<4x28xf32, #tpu.memory_space<smem>>
    %c2_18 = arith.constant 2 : index
    %c2_19 = arith.constant 2 : index
    %11 = memref.load %arg6[%c2_18, %c2_19] : memref<4x28xf32, #tpu.memory_space<smem>>
    %c3_20 = arith.constant 3 : index
    %c2_21 = arith.constant 2 : index
    %12 = memref.load %arg6[%c3_20, %c2_21] : memref<4x28xf32, #tpu.memory_space<smem>>
    %c0_22 = arith.constant 0 : index
    %c3_23 = arith.constant 3 : index
    %13 = memref.load %arg6[%c0_22, %c3_23] : memref<4x28xf32, #tpu.memory_space<smem>>
    %c1_24 = arith.constant 1 : index
    %c3_25 = arith.constant 3 : index
    %14 = memref.load %arg6[%c1_24, %c3_25] : memref<4x28xf32, #tpu.memory_space<smem>>
    %c2_26 = arith.constant 2 : index
    %c3_27 = arith.constant 3 : index
    %15 = memref.load %arg6[%c2_26, %c3_27] : memref<4x28xf32, #tpu.memory_space<smem>>
    %c3_28 = arith.constant 3 : index
    %c3_29 = arith.constant 3 : index
    %16 = memref.load %arg6[%c3_28, %c3_29] : memref<4x28xf32, #tpu.memory_space<smem>>
    %c0_30 = arith.constant 0 : index
    %c4 = arith.constant 4 : index
    %17 = memref.load %arg6[%c0_30, %c4] : memref<4x28xf32, #tpu.memory_space<smem>>
    %c1_31 = arith.constant 1 : index
    %c4_32 = arith.constant 4 : index
    %18 = memref.load %arg6[%c1_31, %c4_32] : memref<4x28xf32, #tpu.memory_space<smem>>
    %c2_33 = arith.constant 2 : index
    %c4_34 = arith.constant 4 : index
    %19 = memref.load %arg6[%c2_33, %c4_34] : memref<4x28xf32, #tpu.memory_space<smem>>
    %c3_35 = arith.constant 3 : index
    %c4_36 = arith.constant 4 : index
    %20 = memref.load %arg6[%c3_35, %c4_36] : memref<4x28xf32, #tpu.memory_space<smem>>
    %c0_37 = arith.constant 0 : index
    %c5 = arith.constant 5 : index
    %21 = memref.load %arg6[%c0_37, %c5] : memref<4x28xf32, #tpu.memory_space<smem>>
    %c1_38 = arith.constant 1 : index
    %c5_39 = arith.constant 5 : index
    %22 = memref.load %arg6[%c1_38, %c5_39] : memref<4x28xf32, #tpu.memory_space<smem>>
    %c2_40 = arith.constant 2 : index
    %c5_41 = arith.constant 5 : index
    %23 = memref.load %arg6[%c2_40, %c5_41] : memref<4x28xf32, #tpu.memory_space<smem>>
    %c3_42 = arith.constant 3 : index
    %c5_43 = arith.constant 5 : index
    %24 = memref.load %arg6[%c3_42, %c5_43] : memref<4x28xf32, #tpu.memory_space<smem>>
    %c0_44 = arith.constant 0 : index
    %c6 = arith.constant 6 : index
    %25 = memref.load %arg6[%c0_44, %c6] : memref<4x28xf32, #tpu.memory_space<smem>>
    %c1_45 = arith.constant 1 : index
    %c6_46 = arith.constant 6 : index
    %26 = memref.load %arg6[%c1_45, %c6_46] : memref<4x28xf32, #tpu.memory_space<smem>>
    %c2_47 = arith.constant 2 : index
    %c6_48 = arith.constant 6 : index
    %27 = memref.load %arg6[%c2_47, %c6_48] : memref<4x28xf32, #tpu.memory_space<smem>>
    %c3_49 = arith.constant 3 : index
    %c6_50 = arith.constant 6 : index
    %28 = memref.load %arg6[%c3_49, %c6_50] : memref<4x28xf32, #tpu.memory_space<smem>>
    %c0_51 = arith.constant 0 : index
    %c7 = arith.constant 7 : index
    %29 = memref.load %arg6[%c0_51, %c7] : memref<4x28xf32, #tpu.memory_space<smem>>
    %c1_52 = arith.constant 1 : index
    %c7_53 = arith.constant 7 : index
    %30 = memref.load %arg6[%c1_52, %c7_53] : memref<4x28xf32, #tpu.memory_space<smem>>
    %c2_54 = arith.constant 2 : index
    %c7_55 = arith.constant 7 : index
    %31 = memref.load %arg6[%c2_54, %c7_55] : memref<4x28xf32, #tpu.memory_space<smem>>
    %c3_56 = arith.constant 3 : index
    %c7_57 = arith.constant 7 : index
    %32 = memref.load %arg6[%c3_56, %c7_57] : memref<4x28xf32, #tpu.memory_space<smem>>
    %c0_58 = arith.constant 0 : index
    %c8 = arith.constant 8 : index
    %33 = memref.load %arg6[%c0_58, %c8] : memref<4x28xf32, #tpu.memory_space<smem>>
    %c1_59 = arith.constant 1 : index
    %c8_60 = arith.constant 8 : index
    %34 = memref.load %arg6[%c1_59, %c8_60] : memref<4x28xf32, #tpu.memory_space<smem>>
    %c2_61 = arith.constant 2 : index
    %c8_62 = arith.constant 8 : index
    %35 = memref.load %arg6[%c2_61, %c8_62] : memref<4x28xf32, #tpu.memory_space<smem>>
    %c3_63 = arith.constant 3 : index
    %c8_64 = arith.constant 8 : index
    %36 = memref.load %arg6[%c3_63, %c8_64] : memref<4x28xf32, #tpu.memory_space<smem>>
    %c0_65 = arith.constant 0 : index
    %c9 = arith.constant 9 : index
    %37 = memref.load %arg6[%c0_65, %c9] : memref<4x28xf32, #tpu.memory_space<smem>>
    %c1_66 = arith.constant 1 : index
    %c9_67 = arith.constant 9 : index
    %38 = memref.load %arg6[%c1_66, %c9_67] : memref<4x28xf32, #tpu.memory_space<smem>>
    %c2_68 = arith.constant 2 : index
    %c9_69 = arith.constant 9 : index
    %39 = memref.load %arg6[%c2_68, %c9_69] : memref<4x28xf32, #tpu.memory_space<smem>>
    %c3_70 = arith.constant 3 : index
    %c9_71 = arith.constant 9 : index
    %40 = memref.load %arg6[%c3_70, %c9_71] : memref<4x28xf32, #tpu.memory_space<smem>>
    %c0_72 = arith.constant 0 : index
    %c10 = arith.constant 10 : index
    %41 = memref.load %arg6[%c0_72, %c10] : memref<4x28xf32, #tpu.memory_space<smem>>
    %c1_73 = arith.constant 1 : index
    %c10_74 = arith.constant 10 : index
    %42 = memref.load %arg6[%c1_73, %c10_74] : memref<4x28xf32, #tpu.memory_space<smem>>
    %c2_75 = arith.constant 2 : index
    %c10_76 = arith.constant 10 : index
    %43 = memref.load %arg6[%c2_75, %c10_76] : memref<4x28xf32, #tpu.memory_space<smem>>
    %c3_77 = arith.constant 3 : index
    %c10_78 = arith.constant 10 : index
    %44 = memref.load %arg6[%c3_77, %c10_78] : memref<4x28xf32, #tpu.memory_space<smem>>
    %c0_79 = arith.constant 0 : index
    %c11 = arith.constant 11 : index
    %45 = memref.load %arg6[%c0_79, %c11] : memref<4x28xf32, #tpu.memory_space<smem>>
    %c1_80 = arith.constant 1 : index
    %c11_81 = arith.constant 11 : index
    %46 = memref.load %arg6[%c1_80, %c11_81] : memref<4x28xf32, #tpu.memory_space<smem>>
    %c2_82 = arith.constant 2 : index
    %c11_83 = arith.constant 11 : index
    %47 = memref.load %arg6[%c2_82, %c11_83] : memref<4x28xf32, #tpu.memory_space<smem>>
    %c3_84 = arith.constant 3 : index
    %c11_85 = arith.constant 11 : index
    %48 = memref.load %arg6[%c3_84, %c11_85] : memref<4x28xf32, #tpu.memory_space<smem>>
    %c0_86 = arith.constant 0 : index
    %c12 = arith.constant 12 : index
    %49 = memref.load %arg6[%c0_86, %c12] : memref<4x28xf32, #tpu.memory_space<smem>>
    %c1_87 = arith.constant 1 : index
    %c12_88 = arith.constant 12 : index
    %50 = memref.load %arg6[%c1_87, %c12_88] : memref<4x28xf32, #tpu.memory_space<smem>>
    %c2_89 = arith.constant 2 : index
    %c12_90 = arith.constant 12 : index
    %51 = memref.load %arg6[%c2_89, %c12_90] : memref<4x28xf32, #tpu.memory_space<smem>>
    %c3_91 = arith.constant 3 : index
    %c12_92 = arith.constant 12 : index
    %52 = memref.load %arg6[%c3_91, %c12_92] : memref<4x28xf32, #tpu.memory_space<smem>>
    %c0_93 = arith.constant 0 : index
    %c13 = arith.constant 13 : index
    %53 = memref.load %arg6[%c0_93, %c13] : memref<4x28xf32, #tpu.memory_space<smem>>
    %c1_94 = arith.constant 1 : index
    %c13_95 = arith.constant 13 : index
    %54 = memref.load %arg6[%c1_94, %c13_95] : memref<4x28xf32, #tpu.memory_space<smem>>
    %c2_96 = arith.constant 2 : index
    %c13_97 = arith.constant 13 : index
    %55 = memref.load %arg6[%c2_96, %c13_97] : memref<4x28xf32, #tpu.memory_space<smem>>
    %c3_98 = arith.constant 3 : index
    %c13_99 = arith.constant 13 : index
    %56 = memref.load %arg6[%c3_98, %c13_99] : memref<4x28xf32, #tpu.memory_space<smem>>
    %c0_100 = arith.constant 0 : index
    %c14 = arith.constant 14 : index
    %57 = memref.load %arg6[%c0_100, %c14] : memref<4x28xf32, #tpu.memory_space<smem>>
    %c1_101 = arith.constant 1 : index
    %c14_102 = arith.constant 14 : index
    %58 = memref.load %arg6[%c1_101, %c14_102] : memref<4x28xf32, #tpu.memory_space<smem>>
    %c2_103 = arith.constant 2 : index
    %c14_104 = arith.constant 14 : index
    %59 = memref.load %arg6[%c2_103, %c14_104] : memref<4x28xf32, #tpu.memory_space<smem>>
    %c3_105 = arith.constant 3 : index
    %c14_106 = arith.constant 14 : index
    %60 = memref.load %arg6[%c3_105, %c14_106] : memref<4x28xf32, #tpu.memory_space<smem>>
    %c0_107 = arith.constant 0 : index
    %c15 = arith.constant 15 : index
    %61 = memref.load %arg6[%c0_107, %c15] : memref<4x28xf32, #tpu.memory_space<smem>>
    %c1_108 = arith.constant 1 : index
    %c15_109 = arith.constant 15 : index
    %62 = memref.load %arg6[%c1_108, %c15_109] : memref<4x28xf32, #tpu.memory_space<smem>>
    %c2_110 = arith.constant 2 : index
    %c15_111 = arith.constant 15 : index
    %63 = memref.load %arg6[%c2_110, %c15_111] : memref<4x28xf32, #tpu.memory_space<smem>>
    %c3_112 = arith.constant 3 : index
    %c15_113 = arith.constant 15 : index
    %64 = memref.load %arg6[%c3_112, %c15_113] : memref<4x28xf32, #tpu.memory_space<smem>>
    %c0_114 = arith.constant 0 : index
    %c16 = arith.constant 16 : index
    %65 = memref.load %arg6[%c0_114, %c16] : memref<4x28xf32, #tpu.memory_space<smem>>
    %c1_115 = arith.constant 1 : index
    %c16_116 = arith.constant 16 : index
    %66 = memref.load %arg6[%c1_115, %c16_116] : memref<4x28xf32, #tpu.memory_space<smem>>
    %c2_117 = arith.constant 2 : index
    %c16_118 = arith.constant 16 : index
    %67 = memref.load %arg6[%c2_117, %c16_118] : memref<4x28xf32, #tpu.memory_space<smem>>
    %c3_119 = arith.constant 3 : index
    %c16_120 = arith.constant 16 : index
    %68 = memref.load %arg6[%c3_119, %c16_120] : memref<4x28xf32, #tpu.memory_space<smem>>
    %c0_121 = arith.constant 0 : index
    %c17 = arith.constant 17 : index
    %69 = memref.load %arg6[%c0_121, %c17] : memref<4x28xf32, #tpu.memory_space<smem>>
    %c1_122 = arith.constant 1 : index
    %c17_123 = arith.constant 17 : index
    %70 = memref.load %arg6[%c1_122, %c17_123] : memref<4x28xf32, #tpu.memory_space<smem>>
    %c2_124 = arith.constant 2 : index
    %c17_125 = arith.constant 17 : index
    %71 = memref.load %arg6[%c2_124, %c17_125] : memref<4x28xf32, #tpu.memory_space<smem>>
    %c3_126 = arith.constant 3 : index
    %c17_127 = arith.constant 17 : index
    %72 = memref.load %arg6[%c3_126, %c17_127] : memref<4x28xf32, #tpu.memory_space<smem>>
    %c0_128 = arith.constant 0 : index
    %c18 = arith.constant 18 : index
    %73 = memref.load %arg6[%c0_128, %c18] : memref<4x28xf32, #tpu.memory_space<smem>>
    %c1_129 = arith.constant 1 : index
    %c18_130 = arith.constant 18 : index
    %74 = memref.load %arg6[%c1_129, %c18_130] : memref<4x28xf32, #tpu.memory_space<smem>>
    %c2_131 = arith.constant 2 : index
    %c18_132 = arith.constant 18 : index
    %75 = memref.load %arg6[%c2_131, %c18_132] : memref<4x28xf32, #tpu.memory_space<smem>>
    %c3_133 = arith.constant 3 : index
    %c18_134 = arith.constant 18 : index
    %76 = memref.load %arg6[%c3_133, %c18_134] : memref<4x28xf32, #tpu.memory_space<smem>>
    %c0_135 = arith.constant 0 : index
    %c19 = arith.constant 19 : index
    %77 = memref.load %arg6[%c0_135, %c19] : memref<4x28xf32, #tpu.memory_space<smem>>
    %c1_136 = arith.constant 1 : index
    %c19_137 = arith.constant 19 : index
    %78 = memref.load %arg6[%c1_136, %c19_137] : memref<4x28xf32, #tpu.memory_space<smem>>
    %c2_138 = arith.constant 2 : index
    %c19_139 = arith.constant 19 : index
    %79 = memref.load %arg6[%c2_138, %c19_139] : memref<4x28xf32, #tpu.memory_space<smem>>
    %c3_140 = arith.constant 3 : index
    %c19_141 = arith.constant 19 : index
    %80 = memref.load %arg6[%c3_140, %c19_141] : memref<4x28xf32, #tpu.memory_space<smem>>
    %c0_142 = arith.constant 0 : index
    %c20 = arith.constant 20 : index
    %81 = memref.load %arg6[%c0_142, %c20] : memref<4x28xf32, #tpu.memory_space<smem>>
    %c1_143 = arith.constant 1 : index
    %c20_144 = arith.constant 20 : index
    %82 = memref.load %arg6[%c1_143, %c20_144] : memref<4x28xf32, #tpu.memory_space<smem>>
    %c2_145 = arith.constant 2 : index
    %c20_146 = arith.constant 20 : index
    %83 = memref.load %arg6[%c2_145, %c20_146] : memref<4x28xf32, #tpu.memory_space<smem>>
    %c3_147 = arith.constant 3 : index
    %c20_148 = arith.constant 20 : index
    %84 = memref.load %arg6[%c3_147, %c20_148] : memref<4x28xf32, #tpu.memory_space<smem>>
    %c0_149 = arith.constant 0 : index
    %c21 = arith.constant 21 : index
    %85 = memref.load %arg6[%c0_149, %c21] : memref<4x28xf32, #tpu.memory_space<smem>>
    %c1_150 = arith.constant 1 : index
    %c21_151 = arith.constant 21 : index
    %86 = memref.load %arg6[%c1_150, %c21_151] : memref<4x28xf32, #tpu.memory_space<smem>>
    %c2_152 = arith.constant 2 : index
    %c21_153 = arith.constant 21 : index
    %87 = memref.load %arg6[%c2_152, %c21_153] : memref<4x28xf32, #tpu.memory_space<smem>>
    %c3_154 = arith.constant 3 : index
    %c21_155 = arith.constant 21 : index
    %88 = memref.load %arg6[%c3_154, %c21_155] : memref<4x28xf32, #tpu.memory_space<smem>>
    %c0_156 = arith.constant 0 : index
    %c22 = arith.constant 22 : index
    %89 = memref.load %arg6[%c0_156, %c22] : memref<4x28xf32, #tpu.memory_space<smem>>
    %c1_157 = arith.constant 1 : index
    %c22_158 = arith.constant 22 : index
    %90 = memref.load %arg6[%c1_157, %c22_158] : memref<4x28xf32, #tpu.memory_space<smem>>
    %c2_159 = arith.constant 2 : index
    %c22_160 = arith.constant 22 : index
    %91 = memref.load %arg6[%c2_159, %c22_160] : memref<4x28xf32, #tpu.memory_space<smem>>
    %c3_161 = arith.constant 3 : index
    %c22_162 = arith.constant 22 : index
    %92 = memref.load %arg6[%c3_161, %c22_162] : memref<4x28xf32, #tpu.memory_space<smem>>
    %c0_163 = arith.constant 0 : index
    %c23 = arith.constant 23 : index
    %93 = memref.load %arg6[%c0_163, %c23] : memref<4x28xf32, #tpu.memory_space<smem>>
    %c1_164 = arith.constant 1 : index
    %c23_165 = arith.constant 23 : index
    %94 = memref.load %arg6[%c1_164, %c23_165] : memref<4x28xf32, #tpu.memory_space<smem>>
    %c2_166 = arith.constant 2 : index
    %c23_167 = arith.constant 23 : index
    %95 = memref.load %arg6[%c2_166, %c23_167] : memref<4x28xf32, #tpu.memory_space<smem>>
    %c3_168 = arith.constant 3 : index
    %c23_169 = arith.constant 23 : index
    %96 = memref.load %arg6[%c3_168, %c23_169] : memref<4x28xf32, #tpu.memory_space<smem>>
    %c0_170 = arith.constant 0 : index
    %c24 = arith.constant 24 : index
    %97 = memref.load %arg6[%c0_170, %c24] : memref<4x28xf32, #tpu.memory_space<smem>>
    %c1_171 = arith.constant 1 : index
    %c24_172 = arith.constant 24 : index
    %98 = memref.load %arg6[%c1_171, %c24_172] : memref<4x28xf32, #tpu.memory_space<smem>>
    %c2_173 = arith.constant 2 : index
    %c24_174 = arith.constant 24 : index
    %99 = memref.load %arg6[%c2_173, %c24_174] : memref<4x28xf32, #tpu.memory_space<smem>>
    %c3_175 = arith.constant 3 : index
    %c24_176 = arith.constant 24 : index
    %100 = memref.load %arg6[%c3_175, %c24_176] : memref<4x28xf32, #tpu.memory_space<smem>>
    %c0_177 = arith.constant 0 : index
    %c25 = arith.constant 25 : index
    %101 = memref.load %arg6[%c0_177, %c25] : memref<4x28xf32, #tpu.memory_space<smem>>
    %c1_178 = arith.constant 1 : index
    %c25_179 = arith.constant 25 : index
    %102 = memref.load %arg6[%c1_178, %c25_179] : memref<4x28xf32, #tpu.memory_space<smem>>
    %c2_180 = arith.constant 2 : index
    %c25_181 = arith.constant 25 : index
    %103 = memref.load %arg6[%c2_180, %c25_181] : memref<4x28xf32, #tpu.memory_space<smem>>
    %c3_182 = arith.constant 3 : index
    %c25_183 = arith.constant 25 : index
    %104 = memref.load %arg6[%c3_182, %c25_183] : memref<4x28xf32, #tpu.memory_space<smem>>
    %c0_184 = arith.constant 0 : index
    %c26 = arith.constant 26 : index
    %105 = memref.load %arg6[%c0_184, %c26] : memref<4x28xf32, #tpu.memory_space<smem>>
    %c1_185 = arith.constant 1 : index
    %c26_186 = arith.constant 26 : index
    %106 = memref.load %arg6[%c1_185, %c26_186] : memref<4x28xf32, #tpu.memory_space<smem>>
    %c2_187 = arith.constant 2 : index
    %c26_188 = arith.constant 26 : index
    %107 = memref.load %arg6[%c2_187, %c26_188] : memref<4x28xf32, #tpu.memory_space<smem>>
    %c3_189 = arith.constant 3 : index
    %c26_190 = arith.constant 26 : index
    %108 = memref.load %arg6[%c3_189, %c26_190] : memref<4x28xf32, #tpu.memory_space<smem>>
    %c0_191 = arith.constant 0 : index
    %c27 = arith.constant 27 : index
    %109 = memref.load %arg6[%c0_191, %c27] : memref<4x28xf32, #tpu.memory_space<smem>>
    %c1_192 = arith.constant 1 : index
    %c27_193 = arith.constant 27 : index
    %110 = memref.load %arg6[%c1_192, %c27_193] : memref<4x28xf32, #tpu.memory_space<smem>>
    %c2_194 = arith.constant 2 : index
    %c27_195 = arith.constant 27 : index
    %111 = memref.load %arg6[%c2_194, %c27_195] : memref<4x28xf32, #tpu.memory_space<smem>>
    %c3_196 = arith.constant 3 : index
    %c27_197 = arith.constant 27 : index
    %112 = memref.load %arg6[%c3_196, %c27_197] : memref<4x28xf32, #tpu.memory_space<smem>>
    %c0_198 = arith.constant 0 : index
    %c0_199 = arith.constant 0 : index
    %113 = memref.load %arg7[%c0_198, %c0_199] : memref<7x4xf32, #tpu.memory_space<smem>>
    %c0_200 = arith.constant 0 : index
    %c1_201 = arith.constant 1 : index
    %114 = memref.load %arg7[%c0_200, %c1_201] : memref<7x4xf32, #tpu.memory_space<smem>>
    %c0_202 = arith.constant 0 : index
    %c2_203 = arith.constant 2 : index
    %115 = memref.load %arg7[%c0_202, %c2_203] : memref<7x4xf32, #tpu.memory_space<smem>>
    %c0_204 = arith.constant 0 : index
    %c3_205 = arith.constant 3 : index
    %116 = memref.load %arg7[%c0_204, %c3_205] : memref<7x4xf32, #tpu.memory_space<smem>>
    %c1_206 = arith.constant 1 : index
    %c0_207 = arith.constant 0 : index
    %117 = memref.load %arg7[%c1_206, %c0_207] : memref<7x4xf32, #tpu.memory_space<smem>>
    %c1_208 = arith.constant 1 : index
    %c1_209 = arith.constant 1 : index
    %118 = memref.load %arg7[%c1_208, %c1_209] : memref<7x4xf32, #tpu.memory_space<smem>>
    %c1_210 = arith.constant 1 : index
    %c2_211 = arith.constant 2 : index
    %119 = memref.load %arg7[%c1_210, %c2_211] : memref<7x4xf32, #tpu.memory_space<smem>>
    %c1_212 = arith.constant 1 : index
    %c3_213 = arith.constant 3 : index
    %120 = memref.load %arg7[%c1_212, %c3_213] : memref<7x4xf32, #tpu.memory_space<smem>>
    %c2_214 = arith.constant 2 : index
    %c0_215 = arith.constant 0 : index
    %121 = memref.load %arg7[%c2_214, %c0_215] : memref<7x4xf32, #tpu.memory_space<smem>>
    %c2_216 = arith.constant 2 : index
    %c1_217 = arith.constant 1 : index
    %122 = memref.load %arg7[%c2_216, %c1_217] : memref<7x4xf32, #tpu.memory_space<smem>>
    %c2_218 = arith.constant 2 : index
    %c2_219 = arith.constant 2 : index
    %123 = memref.load %arg7[%c2_218, %c2_219] : memref<7x4xf32, #tpu.memory_space<smem>>
    %c2_220 = arith.constant 2 : index
    %c3_221 = arith.constant 3 : index
    %124 = memref.load %arg7[%c2_220, %c3_221] : memref<7x4xf32, #tpu.memory_space<smem>>
    %c3_222 = arith.constant 3 : index
    %c0_223 = arith.constant 0 : index
    %125 = memref.load %arg7[%c3_222, %c0_223] : memref<7x4xf32, #tpu.memory_space<smem>>
    %c3_224 = arith.constant 3 : index
    %c1_225 = arith.constant 1 : index
    %126 = memref.load %arg7[%c3_224, %c1_225] : memref<7x4xf32, #tpu.memory_space<smem>>
    %c3_226 = arith.constant 3 : index
    %c2_227 = arith.constant 2 : index
    %127 = memref.load %arg7[%c3_226, %c2_227] : memref<7x4xf32, #tpu.memory_space<smem>>
    %c3_228 = arith.constant 3 : index
    %c3_229 = arith.constant 3 : index
    %128 = memref.load %arg7[%c3_228, %c3_229] : memref<7x4xf32, #tpu.memory_space<smem>>
    %c4_230 = arith.constant 4 : index
    %c0_231 = arith.constant 0 : index
    %129 = memref.load %arg7[%c4_230, %c0_231] : memref<7x4xf32, #tpu.memory_space<smem>>
    %c4_232 = arith.constant 4 : index
    %c1_233 = arith.constant 1 : index
    %130 = memref.load %arg7[%c4_232, %c1_233] : memref<7x4xf32, #tpu.memory_space<smem>>
    %c4_234 = arith.constant 4 : index
    %c2_235 = arith.constant 2 : index
    %131 = memref.load %arg7[%c4_234, %c2_235] : memref<7x4xf32, #tpu.memory_space<smem>>
    %c4_236 = arith.constant 4 : index
    %c3_237 = arith.constant 3 : index
    %132 = memref.load %arg7[%c4_236, %c3_237] : memref<7x4xf32, #tpu.memory_space<smem>>
    %c5_238 = arith.constant 5 : index
    %c0_239 = arith.constant 0 : index
    %133 = memref.load %arg7[%c5_238, %c0_239] : memref<7x4xf32, #tpu.memory_space<smem>>
    %c5_240 = arith.constant 5 : index
    %c1_241 = arith.constant 1 : index
    %134 = memref.load %arg7[%c5_240, %c1_241] : memref<7x4xf32, #tpu.memory_space<smem>>
    %c5_242 = arith.constant 5 : index
    %c2_243 = arith.constant 2 : index
    %135 = memref.load %arg7[%c5_242, %c2_243] : memref<7x4xf32, #tpu.memory_space<smem>>
    %c5_244 = arith.constant 5 : index
    %c3_245 = arith.constant 3 : index
    %136 = memref.load %arg7[%c5_244, %c3_245] : memref<7x4xf32, #tpu.memory_space<smem>>
    %c6_246 = arith.constant 6 : index
    %c0_247 = arith.constant 0 : index
    %137 = memref.load %arg7[%c6_246, %c0_247] : memref<7x4xf32, #tpu.memory_space<smem>>
    %c6_248 = arith.constant 6 : index
    %c1_249 = arith.constant 1 : index
    %138 = memref.load %arg7[%c6_248, %c1_249] : memref<7x4xf32, #tpu.memory_space<smem>>
    %c6_250 = arith.constant 6 : index
    %c2_251 = arith.constant 2 : index
    %139 = memref.load %arg7[%c6_250, %c2_251] : memref<7x4xf32, #tpu.memory_space<smem>>
    %c6_252 = arith.constant 6 : index
    %c3_253 = arith.constant 3 : index
    %140 = memref.load %arg7[%c6_252, %c3_253] : memref<7x4xf32, #tpu.memory_space<smem>>
    %c0_254 = arith.constant 0 : index
    %c0_255 = arith.constant 0 : index
    %141 = memref.load %arg8[%c0_254, %c0_255] : memref<4x3xf32, #tpu.memory_space<smem>>
    %c1_256 = arith.constant 1 : index
    %c0_257 = arith.constant 0 : index
    %142 = memref.load %arg8[%c1_256, %c0_257] : memref<4x3xf32, #tpu.memory_space<smem>>
    %c2_258 = arith.constant 2 : index
    %c0_259 = arith.constant 0 : index
    %143 = memref.load %arg8[%c2_258, %c0_259] : memref<4x3xf32, #tpu.memory_space<smem>>
    %c3_260 = arith.constant 3 : index
    %c0_261 = arith.constant 0 : index
    %144 = memref.load %arg8[%c3_260, %c0_261] : memref<4x3xf32, #tpu.memory_space<smem>>
    %c0_262 = arith.constant 0 : index
    %c1_263 = arith.constant 1 : index
    %145 = memref.load %arg8[%c0_262, %c1_263] : memref<4x3xf32, #tpu.memory_space<smem>>
    %c1_264 = arith.constant 1 : index
    %c1_265 = arith.constant 1 : index
    %146 = memref.load %arg8[%c1_264, %c1_265] : memref<4x3xf32, #tpu.memory_space<smem>>
    %c2_266 = arith.constant 2 : index
    %c1_267 = arith.constant 1 : index
    %147 = memref.load %arg8[%c2_266, %c1_267] : memref<4x3xf32, #tpu.memory_space<smem>>
    %c3_268 = arith.constant 3 : index
    %c1_269 = arith.constant 1 : index
    %148 = memref.load %arg8[%c3_268, %c1_269] : memref<4x3xf32, #tpu.memory_space<smem>>
    %c0_270 = arith.constant 0 : index
    %c2_271 = arith.constant 2 : index
    %149 = memref.load %arg8[%c0_270, %c2_271] : memref<4x3xf32, #tpu.memory_space<smem>>
    %c1_272 = arith.constant 1 : index
    %c2_273 = arith.constant 2 : index
    %150 = memref.load %arg8[%c1_272, %c2_273] : memref<4x3xf32, #tpu.memory_space<smem>>
    %c2_274 = arith.constant 2 : index
    %c2_275 = arith.constant 2 : index
    %151 = memref.load %arg8[%c2_274, %c2_275] : memref<4x3xf32, #tpu.memory_space<smem>>
    %c3_276 = arith.constant 3 : index
    %c2_277 = arith.constant 2 : index
    %152 = memref.load %arg8[%c3_276, %c2_277] : memref<4x3xf32, #tpu.memory_space<smem>>
    %c0_278 = arith.constant 0 : index
    %c0_279 = arith.constant 0 : index
    %c1_280 = arith.constant 1 : index
    %c0_281 = arith.constant 0 : index
    %153 = vector.load %arg1[%c0_278, %c0_279, %c1_280, %c0_281] : memref<4x1x8x256xf32, #tpu.memory_space<vmem>>, vector<1x1x7x256xf32>
    %154 = vector.shape_cast %153 : vector<1x1x7x256xf32> to vector<7x256xf32>
    %c1_282 = arith.constant 1 : index
    %c0_283 = arith.constant 0 : index
    %c1_284 = arith.constant 1 : index
    %c0_285 = arith.constant 0 : index
    %155 = vector.load %arg1[%c1_282, %c0_283, %c1_284, %c0_285] : memref<4x1x8x256xf32, #tpu.memory_space<vmem>>, vector<1x1x7x256xf32>
    %156 = vector.shape_cast %155 : vector<1x1x7x256xf32> to vector<7x256xf32>
    %c2_286 = arith.constant 2 : index
    %c0_287 = arith.constant 0 : index
    %c1_288 = arith.constant 1 : index
    %c0_289 = arith.constant 0 : index
    %157 = vector.load %arg1[%c2_286, %c0_287, %c1_288, %c0_289] : memref<4x1x8x256xf32, #tpu.memory_space<vmem>>, vector<1x1x7x256xf32>
    %158 = vector.shape_cast %157 : vector<1x1x7x256xf32> to vector<7x256xf32>
    %c3_290 = arith.constant 3 : index
    %c0_291 = arith.constant 0 : index
    %c1_292 = arith.constant 1 : index
    %c0_293 = arith.constant 0 : index
    %159 = vector.load %arg1[%c3_290, %c0_291, %c1_292, %c0_293] : memref<4x1x8x256xf32, #tpu.memory_space<vmem>>, vector<1x1x7x256xf32>
    %160 = vector.shape_cast %159 : vector<1x1x7x256xf32> to vector<7x256xf32>
    %c0_294 = arith.constant 0 : index
    %c0_295 = arith.constant 0 : index
    %c0_296 = arith.constant 0 : index
    %c0_297 = arith.constant 0 : index
    %161 = vector.load %arg2[%c0_294, %c0_295, %c0_296, %c0_297] : memref<3x1x7x256xf32, #tpu.memory_space<vmem>>, vector<1x1x7x256xf32>
    %162 = vector.shape_cast %161 : vector<1x1x7x256xf32> to vector<7x256xf32>
    %c1_298 = arith.constant 1 : index
    %c0_299 = arith.constant 0 : index
    %c0_300 = arith.constant 0 : index
    %c0_301 = arith.constant 0 : index
    %163 = vector.load %arg2[%c1_298, %c0_299, %c0_300, %c0_301] : memref<3x1x7x256xf32, #tpu.memory_space<vmem>>, vector<1x1x7x256xf32>
    %164 = vector.shape_cast %163 : vector<1x1x7x256xf32> to vector<7x256xf32>
    %c2_302 = arith.constant 2 : index
    %c0_303 = arith.constant 0 : index
    %c0_304 = arith.constant 0 : index
    %c0_305 = arith.constant 0 : index
    %165 = vector.load %arg2[%c2_302, %c0_303, %c0_304, %c0_305] : memref<3x1x7x256xf32, #tpu.memory_space<vmem>>, vector<1x1x7x256xf32>
    %166 = vector.shape_cast %165 : vector<1x1x7x256xf32> to vector<7x256xf32>
    %167 = vector.broadcast %141 : f32 to vector<7x256xf32>
    %168 = arith.mulf %162, %167 : vector<7x256xf32>
    %169 = vector.broadcast %145 : f32 to vector<7x256xf32>
    %170 = arith.mulf %164, %169 : vector<7x256xf32>
    %171 = arith.addf %168, %170 : vector<7x256xf32>
    %172 = vector.broadcast %149 : f32 to vector<7x256xf32>
    %173 = arith.mulf %166, %172 : vector<7x256xf32>
    %174 = arith.addf %171, %173 : vector<7x256xf32>
    %175 = vector.broadcast %113 : f32 to vector<7x256xf32>
    %176 = arith.addf %174, %175 : vector<7x256xf32>
    %177 = arith.negf %176 : vector<7x256xf32>
    %178 = math.exp %177 : vector<7x256xf32>
    %cst = arith.constant 1.000000e+00 : f32
    %179 = vector.broadcast %cst : f32 to vector<7x256xf32>
    %180 = arith.addf %179, %178 : vector<7x256xf32>
    %181 = arith.divf %179, %180 : vector<7x256xf32>
    %182 = arith.mulf %176, %181 : vector<7x256xf32>
    %183 = vector.broadcast %142 : f32 to vector<7x256xf32>
    %184 = arith.mulf %162, %183 : vector<7x256xf32>
    %185 = vector.broadcast %146 : f32 to vector<7x256xf32>
    %186 = arith.mulf %164, %185 : vector<7x256xf32>
    %187 = arith.addf %184, %186 : vector<7x256xf32>
    %188 = vector.broadcast %150 : f32 to vector<7x256xf32>
    %189 = arith.mulf %166, %188 : vector<7x256xf32>
    %190 = arith.addf %187, %189 : vector<7x256xf32>
    %191 = vector.broadcast %114 : f32 to vector<7x256xf32>
    %192 = arith.addf %190, %191 : vector<7x256xf32>
    %193 = arith.negf %192 : vector<7x256xf32>
    %194 = math.exp %193 : vector<7x256xf32>
    %cst_306 = arith.constant 1.000000e+00 : f32
    %195 = vector.broadcast %cst_306 : f32 to vector<7x256xf32>
    %196 = arith.addf %195, %194 : vector<7x256xf32>
    %197 = arith.divf %195, %196 : vector<7x256xf32>
    %198 = arith.mulf %192, %197 : vector<7x256xf32>
    %199 = vector.broadcast %143 : f32 to vector<7x256xf32>
    %200 = arith.mulf %162, %199 : vector<7x256xf32>
    %201 = vector.broadcast %147 : f32 to vector<7x256xf32>
    %202 = arith.mulf %164, %201 : vector<7x256xf32>
    %203 = arith.addf %200, %202 : vector<7x256xf32>
    %204 = vector.broadcast %151 : f32 to vector<7x256xf32>
    %205 = arith.mulf %166, %204 : vector<7x256xf32>
    %206 = arith.addf %203, %205 : vector<7x256xf32>
    %207 = vector.broadcast %115 : f32 to vector<7x256xf32>
    %208 = arith.addf %206, %207 : vector<7x256xf32>
    %209 = arith.negf %208 : vector<7x256xf32>
    %210 = math.exp %209 : vector<7x256xf32>
    %cst_307 = arith.constant 1.000000e+00 : f32
    %211 = vector.broadcast %cst_307 : f32 to vector<7x256xf32>
    %212 = arith.addf %211, %210 : vector<7x256xf32>
    %213 = arith.divf %211, %212 : vector<7x256xf32>
    %214 = arith.mulf %208, %213 : vector<7x256xf32>
    %215 = vector.broadcast %144 : f32 to vector<7x256xf32>
    %216 = arith.mulf %162, %215 : vector<7x256xf32>
    %217 = vector.broadcast %148 : f32 to vector<7x256xf32>
    %218 = arith.mulf %164, %217 : vector<7x256xf32>
    %219 = arith.addf %216, %218 : vector<7x256xf32>
    %220 = vector.broadcast %152 : f32 to vector<7x256xf32>
    %221 = arith.mulf %166, %220 : vector<7x256xf32>
    %222 = arith.addf %219, %221 : vector<7x256xf32>
    %223 = vector.broadcast %116 : f32 to vector<7x256xf32>
    %224 = arith.addf %222, %223 : vector<7x256xf32>
    %225 = arith.negf %224 : vector<7x256xf32>
    %226 = math.exp %225 : vector<7x256xf32>
    %cst_308 = arith.constant 1.000000e+00 : f32
    %227 = vector.broadcast %cst_308 : f32 to vector<7x256xf32>
    %228 = arith.addf %227, %226 : vector<7x256xf32>
    %229 = arith.divf %227, %228 : vector<7x256xf32>
    %230 = arith.mulf %224, %229 : vector<7x256xf32>
    %c0_309 = arith.constant 0 : index
    %c0_310 = arith.constant 0 : index
    %c0_311 = arith.constant 0 : index
    %c0_312 = arith.constant 0 : index
    %231 = vector.load %arg3[%c0_309, %c0_310, %c0_311, %c0_312] : memref<4x1x7x1xf32, #tpu.memory_space<vmem>>, vector<1x1x7x1xf32>
    %232 = vector.shape_cast %231 : vector<1x1x7x1xf32> to vector<7x1xf32>
    %c1_313 = arith.constant 1 : index
    %c0_314 = arith.constant 0 : index
    %c0_315 = arith.constant 0 : index
    %c0_316 = arith.constant 0 : index
    %233 = vector.load %arg3[%c1_313, %c0_314, %c0_315, %c0_316] : memref<4x1x7x1xf32, #tpu.memory_space<vmem>>, vector<1x1x7x1xf32>
    %234 = vector.shape_cast %233 : vector<1x1x7x1xf32> to vector<7x1xf32>
    %c2_317 = arith.constant 2 : index
    %c0_318 = arith.constant 0 : index
    %c0_319 = arith.constant 0 : index
    %c0_320 = arith.constant 0 : index
    %235 = vector.load %arg3[%c2_317, %c0_318, %c0_319, %c0_320] : memref<4x1x7x1xf32, #tpu.memory_space<vmem>>, vector<1x1x7x1xf32>
    %236 = vector.shape_cast %235 : vector<1x1x7x1xf32> to vector<7x1xf32>
    %c3_321 = arith.constant 3 : index
    %c0_322 = arith.constant 0 : index
    %c0_323 = arith.constant 0 : index
    %c0_324 = arith.constant 0 : index
    %237 = vector.load %arg3[%c3_321, %c0_322, %c0_323, %c0_324] : memref<4x1x7x1xf32, #tpu.memory_space<vmem>>, vector<1x1x7x1xf32>
    %238 = vector.shape_cast %237 : vector<1x1x7x1xf32> to vector<7x1xf32>
    %239 = vector.broadcast %1 : f32 to vector<7x256xf32>
    %240 = arith.mulf %154, %239 : vector<7x256xf32>
    %241 = vector.broadcast %5 : f32 to vector<7x256xf32>
    %242 = arith.mulf %156, %241 : vector<7x256xf32>
    %243 = arith.addf %240, %242 : vector<7x256xf32>
    %244 = vector.broadcast %9 : f32 to vector<7x256xf32>
    %245 = arith.mulf %158, %244 : vector<7x256xf32>
    %246 = arith.addf %243, %245 : vector<7x256xf32>
    %247 = vector.broadcast %13 : f32 to vector<7x256xf32>
    %248 = arith.mulf %160, %247 : vector<7x256xf32>
    %249 = arith.addf %246, %248 : vector<7x256xf32>
    %250 = vector.broadcast %232 : vector<7x1xf32> to vector<7x256xf32>
    %251 = arith.addf %249, %250 : vector<7x256xf32>
    %252 = arith.addf %251, %182 : vector<7x256xf32>
    %253 = arith.negf %252 : vector<7x256xf32>
    %254 = math.exp %253 : vector<7x256xf32>
    %cst_325 = arith.constant 1.000000e+00 : f32
    %255 = vector.broadcast %cst_325 : f32 to vector<7x256xf32>
    %256 = arith.addf %255, %254 : vector<7x256xf32>
    %257 = arith.divf %255, %256 : vector<7x256xf32>
    %258 = arith.mulf %252, %257 : vector<7x256xf32>
    %259 = vector.broadcast %2 : f32 to vector<7x256xf32>
    %260 = arith.mulf %154, %259 : vector<7x256xf32>
    %261 = vector.broadcast %6 : f32 to vector<7x256xf32>
    %262 = arith.mulf %156, %261 : vector<7x256xf32>
    %263 = arith.addf %260, %262 : vector<7x256xf32>
    %264 = vector.broadcast %10 : f32 to vector<7x256xf32>
    %265 = arith.mulf %158, %264 : vector<7x256xf32>
    %266 = arith.addf %263, %265 : vector<7x256xf32>
    %267 = vector.broadcast %14 : f32 to vector<7x256xf32>
    %268 = arith.mulf %160, %267 : vector<7x256xf32>
    %269 = arith.addf %266, %268 : vector<7x256xf32>
    %270 = vector.broadcast %234 : vector<7x1xf32> to vector<7x256xf32>
    %271 = arith.addf %269, %270 : vector<7x256xf32>
    %272 = arith.addf %271, %198 : vector<7x256xf32>
    %273 = arith.negf %272 : vector<7x256xf32>
    %274 = math.exp %273 : vector<7x256xf32>
    %cst_326 = arith.constant 1.000000e+00 : f32
    %275 = vector.broadcast %cst_326 : f32 to vector<7x256xf32>
    %276 = arith.addf %275, %274 : vector<7x256xf32>
    %277 = arith.divf %275, %276 : vector<7x256xf32>
    %278 = arith.mulf %272, %277 : vector<7x256xf32>
    %279 = vector.broadcast %3 : f32 to vector<7x256xf32>
    %280 = arith.mulf %154, %279 : vector<7x256xf32>
    %281 = vector.broadcast %7 : f32 to vector<7x256xf32>
    %282 = arith.mulf %156, %281 : vector<7x256xf32>
    %283 = arith.addf %280, %282 : vector<7x256xf32>
    %284 = vector.broadcast %11 : f32 to vector<7x256xf32>
    %285 = arith.mulf %158, %284 : vector<7x256xf32>
    %286 = arith.addf %283, %285 : vector<7x256xf32>
    %287 = vector.broadcast %15 : f32 to vector<7x256xf32>
    %288 = arith.mulf %160, %287 : vector<7x256xf32>
    %289 = arith.addf %286, %288 : vector<7x256xf32>
    %290 = vector.broadcast %236 : vector<7x1xf32> to vector<7x256xf32>
    %291 = arith.addf %289, %290 : vector<7x256xf32>
    %292 = arith.addf %291, %214 : vector<7x256xf32>
    %293 = arith.negf %292 : vector<7x256xf32>
    %294 = math.exp %293 : vector<7x256xf32>
    %cst_327 = arith.constant 1.000000e+00 : f32
    %295 = vector.broadcast %cst_327 : f32 to vector<7x256xf32>
    %296 = arith.addf %295, %294 : vector<7x256xf32>
    %297 = arith.divf %295, %296 : vector<7x256xf32>
    %298 = arith.mulf %292, %297 : vector<7x256xf32>
    %299 = vector.broadcast %4 : f32 to vector<7x256xf32>
    %300 = arith.mulf %154, %299 : vector<7x256xf32>
    %301 = vector.broadcast %8 : f32 to vector<7x256xf32>
    %302 = arith.mulf %156, %301 : vector<7x256xf32>
    %303 = arith.addf %300, %302 : vector<7x256xf32>
    %304 = vector.broadcast %12 : f32 to vector<7x256xf32>
    %305 = arith.mulf %158, %304 : vector<7x256xf32>
    %306 = arith.addf %303, %305 : vector<7x256xf32>
    %307 = vector.broadcast %16 : f32 to vector<7x256xf32>
    %308 = arith.mulf %160, %307 : vector<7x256xf32>
    %309 = arith.addf %306, %308 : vector<7x256xf32>
    %310 = vector.broadcast %238 : vector<7x1xf32> to vector<7x256xf32>
    %311 = arith.addf %309, %310 : vector<7x256xf32>
    %312 = arith.addf %311, %230 : vector<7x256xf32>
    %313 = arith.negf %312 : vector<7x256xf32>
    %314 = math.exp %313 : vector<7x256xf32>
    %cst_328 = arith.constant 1.000000e+00 : f32
    %315 = vector.broadcast %cst_328 : f32 to vector<7x256xf32>
    %316 = arith.addf %315, %314 : vector<7x256xf32>
    %317 = arith.divf %315, %316 : vector<7x256xf32>
    %318 = arith.mulf %312, %317 : vector<7x256xf32>
    %319 = vector.broadcast %17 : f32 to vector<7x256xf32>
    %320 = arith.mulf %258, %319 : vector<7x256xf32>
    %321 = vector.broadcast %21 : f32 to vector<7x256xf32>
    %322 = arith.mulf %278, %321 : vector<7x256xf32>
    %323 = arith.addf %320, %322 : vector<7x256xf32>
    %324 = vector.broadcast %25 : f32 to vector<7x256xf32>
    %325 = arith.mulf %298, %324 : vector<7x256xf32>
    %326 = arith.addf %323, %325 : vector<7x256xf32>
    %327 = vector.broadcast %29 : f32 to vector<7x256xf32>
    %328 = arith.mulf %318, %327 : vector<7x256xf32>
    %329 = arith.addf %326, %328 : vector<7x256xf32>
    %330 = vector.broadcast %117 : f32 to vector<7x256xf32>
    %331 = arith.addf %329, %330 : vector<7x256xf32>
    %332 = arith.negf %331 : vector<7x256xf32>
    %333 = math.exp %332 : vector<7x256xf32>
    %cst_329 = arith.constant 1.000000e+00 : f32
    %334 = vector.broadcast %cst_329 : f32 to vector<7x256xf32>
    %335 = arith.addf %334, %333 : vector<7x256xf32>
    %336 = arith.divf %334, %335 : vector<7x256xf32>
    %337 = arith.mulf %331, %336 : vector<7x256xf32>
    %338 = vector.broadcast %18 : f32 to vector<7x256xf32>
    %339 = arith.mulf %258, %338 : vector<7x256xf32>
    %340 = vector.broadcast %22 : f32 to vector<7x256xf32>
    %341 = arith.mulf %278, %340 : vector<7x256xf32>
    %342 = arith.addf %339, %341 : vector<7x256xf32>
    %343 = vector.broadcast %26 : f32 to vector<7x256xf32>
    %344 = arith.mulf %298, %343 : vector<7x256xf32>
    %345 = arith.addf %342, %344 : vector<7x256xf32>
    %346 = vector.broadcast %30 : f32 to vector<7x256xf32>
    %347 = arith.mulf %318, %346 : vector<7x256xf32>
    %348 = arith.addf %345, %347 : vector<7x256xf32>
    %349 = vector.broadcast %118 : f32 to vector<7x256xf32>
    %350 = arith.addf %348, %349 : vector<7x256xf32>
    %351 = arith.negf %350 : vector<7x256xf32>
    %352 = math.exp %351 : vector<7x256xf32>
    %cst_330 = arith.constant 1.000000e+00 : f32
    %353 = vector.broadcast %cst_330 : f32 to vector<7x256xf32>
    %354 = arith.addf %353, %352 : vector<7x256xf32>
    %355 = arith.divf %353, %354 : vector<7x256xf32>
    %356 = arith.mulf %350, %355 : vector<7x256xf32>
    %357 = vector.broadcast %19 : f32 to vector<7x256xf32>
    %358 = arith.mulf %258, %357 : vector<7x256xf32>
    %359 = vector.broadcast %23 : f32 to vector<7x256xf32>
    %360 = arith.mulf %278, %359 : vector<7x256xf32>
    %361 = arith.addf %358, %360 : vector<7x256xf32>
    %362 = vector.broadcast %27 : f32 to vector<7x256xf32>
    %363 = arith.mulf %298, %362 : vector<7x256xf32>
    %364 = arith.addf %361, %363 : vector<7x256xf32>
    %365 = vector.broadcast %31 : f32 to vector<7x256xf32>
    %366 = arith.mulf %318, %365 : vector<7x256xf32>
    %367 = arith.addf %364, %366 : vector<7x256xf32>
    %368 = vector.broadcast %119 : f32 to vector<7x256xf32>
    %369 = arith.addf %367, %368 : vector<7x256xf32>
    %370 = arith.negf %369 : vector<7x256xf32>
    %371 = math.exp %370 : vector<7x256xf32>
    %cst_331 = arith.constant 1.000000e+00 : f32
    %372 = vector.broadcast %cst_331 : f32 to vector<7x256xf32>
    %373 = arith.addf %372, %371 : vector<7x256xf32>
    %374 = arith.divf %372, %373 : vector<7x256xf32>
    %375 = arith.mulf %369, %374 : vector<7x256xf32>
    %376 = vector.broadcast %20 : f32 to vector<7x256xf32>
    %377 = arith.mulf %258, %376 : vector<7x256xf32>
    %378 = vector.broadcast %24 : f32 to vector<7x256xf32>
    %379 = arith.mulf %278, %378 : vector<7x256xf32>
    %380 = arith.addf %377, %379 : vector<7x256xf32>
    %381 = vector.broadcast %28 : f32 to vector<7x256xf32>
    %382 = arith.mulf %298, %381 : vector<7x256xf32>
    %383 = arith.addf %380, %382 : vector<7x256xf32>
    %384 = vector.broadcast %32 : f32 to vector<7x256xf32>
    %385 = arith.mulf %318, %384 : vector<7x256xf32>
    %386 = arith.addf %383, %385 : vector<7x256xf32>
    %387 = vector.broadcast %120 : f32 to vector<7x256xf32>
    %388 = arith.addf %386, %387 : vector<7x256xf32>
    %389 = arith.negf %388 : vector<7x256xf32>
    %390 = math.exp %389 : vector<7x256xf32>
    %cst_332 = arith.constant 1.000000e+00 : f32
    %391 = vector.broadcast %cst_332 : f32 to vector<7x256xf32>
    %392 = arith.addf %391, %390 : vector<7x256xf32>
    %393 = arith.divf %391, %392 : vector<7x256xf32>
    %394 = arith.mulf %388, %393 : vector<7x256xf32>
    %395 = vector.broadcast %33 : f32 to vector<7x256xf32>
    %396 = arith.mulf %337, %395 : vector<7x256xf32>
    %397 = vector.broadcast %37 : f32 to vector<7x256xf32>
    %398 = arith.mulf %356, %397 : vector<7x256xf32>
    %399 = arith.addf %396, %398 : vector<7x256xf32>
    %400 = vector.broadcast %41 : f32 to vector<7x256xf32>
    %401 = arith.mulf %375, %400 : vector<7x256xf32>
    %402 = arith.addf %399, %401 : vector<7x256xf32>
    %403 = vector.broadcast %45 : f32 to vector<7x256xf32>
    %404 = arith.mulf %394, %403 : vector<7x256xf32>
    %405 = arith.addf %402, %404 : vector<7x256xf32>
    %406 = vector.broadcast %121 : f32 to vector<7x256xf32>
    %407 = arith.addf %405, %406 : vector<7x256xf32>
    %408 = arith.negf %407 : vector<7x256xf32>
    %409 = math.exp %408 : vector<7x256xf32>
    %cst_333 = arith.constant 1.000000e+00 : f32
    %410 = vector.broadcast %cst_333 : f32 to vector<7x256xf32>
    %411 = arith.addf %410, %409 : vector<7x256xf32>
    %412 = arith.divf %410, %411 : vector<7x256xf32>
    %413 = arith.mulf %407, %412 : vector<7x256xf32>
    %414 = vector.broadcast %34 : f32 to vector<7x256xf32>
    %415 = arith.mulf %337, %414 : vector<7x256xf32>
    %416 = vector.broadcast %38 : f32 to vector<7x256xf32>
    %417 = arith.mulf %356, %416 : vector<7x256xf32>
    %418 = arith.addf %415, %417 : vector<7x256xf32>
    %419 = vector.broadcast %42 : f32 to vector<7x256xf32>
    %420 = arith.mulf %375, %419 : vector<7x256xf32>
    %421 = arith.addf %418, %420 : vector<7x256xf32>
    %422 = vector.broadcast %46 : f32 to vector<7x256xf32>
    %423 = arith.mulf %394, %422 : vector<7x256xf32>
    %424 = arith.addf %421, %423 : vector<7x256xf32>
    %425 = vector.broadcast %122 : f32 to vector<7x256xf32>
    %426 = arith.addf %424, %425 : vector<7x256xf32>
    %427 = arith.negf %426 : vector<7x256xf32>
    %428 = math.exp %427 : vector<7x256xf32>
    %cst_334 = arith.constant 1.000000e+00 : f32
    %429 = vector.broadcast %cst_334 : f32 to vector<7x256xf32>
    %430 = arith.addf %429, %428 : vector<7x256xf32>
    %431 = arith.divf %429, %430 : vector<7x256xf32>
    %432 = arith.mulf %426, %431 : vector<7x256xf32>
    %433 = vector.broadcast %35 : f32 to vector<7x256xf32>
    %434 = arith.mulf %337, %433 : vector<7x256xf32>
    %435 = vector.broadcast %39 : f32 to vector<7x256xf32>
    %436 = arith.mulf %356, %435 : vector<7x256xf32>
    %437 = arith.addf %434, %436 : vector<7x256xf32>
    %438 = vector.broadcast %43 : f32 to vector<7x256xf32>
    %439 = arith.mulf %375, %438 : vector<7x256xf32>
    %440 = arith.addf %437, %439 : vector<7x256xf32>
    %441 = vector.broadcast %47 : f32 to vector<7x256xf32>
    %442 = arith.mulf %394, %441 : vector<7x256xf32>
    %443 = arith.addf %440, %442 : vector<7x256xf32>
    %444 = vector.broadcast %123 : f32 to vector<7x256xf32>
    %445 = arith.addf %443, %444 : vector<7x256xf32>
    %446 = arith.negf %445 : vector<7x256xf32>
    %447 = math.exp %446 : vector<7x256xf32>
    %cst_335 = arith.constant 1.000000e+00 : f32
    %448 = vector.broadcast %cst_335 : f32 to vector<7x256xf32>
    %449 = arith.addf %448, %447 : vector<7x256xf32>
    %450 = arith.divf %448, %449 : vector<7x256xf32>
    %451 = arith.mulf %445, %450 : vector<7x256xf32>
    %452 = vector.broadcast %36 : f32 to vector<7x256xf32>
    %453 = arith.mulf %337, %452 : vector<7x256xf32>
    %454 = vector.broadcast %40 : f32 to vector<7x256xf32>
    %455 = arith.mulf %356, %454 : vector<7x256xf32>
    %456 = arith.addf %453, %455 : vector<7x256xf32>
    %457 = vector.broadcast %44 : f32 to vector<7x256xf32>
    %458 = arith.mulf %375, %457 : vector<7x256xf32>
    %459 = arith.addf %456, %458 : vector<7x256xf32>
    %460 = vector.broadcast %48 : f32 to vector<7x256xf32>
    %461 = arith.mulf %394, %460 : vector<7x256xf32>
    %462 = arith.addf %459, %461 : vector<7x256xf32>
    %463 = vector.broadcast %124 : f32 to vector<7x256xf32>
    %464 = arith.addf %462, %463 : vector<7x256xf32>
    %465 = arith.negf %464 : vector<7x256xf32>
    %466 = math.exp %465 : vector<7x256xf32>
    %cst_336 = arith.constant 1.000000e+00 : f32
    %467 = vector.broadcast %cst_336 : f32 to vector<7x256xf32>
    %468 = arith.addf %467, %466 : vector<7x256xf32>
    %469 = arith.divf %467, %468 : vector<7x256xf32>
    %470 = arith.mulf %464, %469 : vector<7x256xf32>
    %471 = vector.broadcast %49 : f32 to vector<7x256xf32>
    %472 = arith.mulf %413, %471 : vector<7x256xf32>
    %473 = vector.broadcast %53 : f32 to vector<7x256xf32>
    %474 = arith.mulf %432, %473 : vector<7x256xf32>
    %475 = arith.addf %472, %474 : vector<7x256xf32>
    %476 = vector.broadcast %57 : f32 to vector<7x256xf32>
    %477 = arith.mulf %451, %476 : vector<7x256xf32>
    %478 = arith.addf %475, %477 : vector<7x256xf32>
    %479 = vector.broadcast %61 : f32 to vector<7x256xf32>
    %480 = arith.mulf %470, %479 : vector<7x256xf32>
    %481 = arith.addf %478, %480 : vector<7x256xf32>
    %482 = vector.broadcast %125 : f32 to vector<7x256xf32>
    %483 = arith.addf %481, %482 : vector<7x256xf32>
    %484 = arith.negf %483 : vector<7x256xf32>
    %485 = math.exp %484 : vector<7x256xf32>
    %cst_337 = arith.constant 1.000000e+00 : f32
    %486 = vector.broadcast %cst_337 : f32 to vector<7x256xf32>
    %487 = arith.addf %486, %485 : vector<7x256xf32>
    %488 = arith.divf %486, %487 : vector<7x256xf32>
    %489 = arith.mulf %483, %488 : vector<7x256xf32>
    %490 = vector.broadcast %50 : f32 to vector<7x256xf32>
    %491 = arith.mulf %413, %490 : vector<7x256xf32>
    %492 = vector.broadcast %54 : f32 to vector<7x256xf32>
    %493 = arith.mulf %432, %492 : vector<7x256xf32>
    %494 = arith.addf %491, %493 : vector<7x256xf32>
    %495 = vector.broadcast %58 : f32 to vector<7x256xf32>
    %496 = arith.mulf %451, %495 : vector<7x256xf32>
    %497 = arith.addf %494, %496 : vector<7x256xf32>
    %498 = vector.broadcast %62 : f32 to vector<7x256xf32>
    %499 = arith.mulf %470, %498 : vector<7x256xf32>
    %500 = arith.addf %497, %499 : vector<7x256xf32>
    %501 = vector.broadcast %126 : f32 to vector<7x256xf32>
    %502 = arith.addf %500, %501 : vector<7x256xf32>
    %503 = arith.negf %502 : vector<7x256xf32>
    %504 = math.exp %503 : vector<7x256xf32>
    %cst_338 = arith.constant 1.000000e+00 : f32
    %505 = vector.broadcast %cst_338 : f32 to vector<7x256xf32>
    %506 = arith.addf %505, %504 : vector<7x256xf32>
    %507 = arith.divf %505, %506 : vector<7x256xf32>
    %508 = arith.mulf %502, %507 : vector<7x256xf32>
    %509 = vector.broadcast %51 : f32 to vector<7x256xf32>
    %510 = arith.mulf %413, %509 : vector<7x256xf32>
    %511 = vector.broadcast %55 : f32 to vector<7x256xf32>
    %512 = arith.mulf %432, %511 : vector<7x256xf32>
    %513 = arith.addf %510, %512 : vector<7x256xf32>
    %514 = vector.broadcast %59 : f32 to vector<7x256xf32>
    %515 = arith.mulf %451, %514 : vector<7x256xf32>
    %516 = arith.addf %513, %515 : vector<7x256xf32>
    %517 = vector.broadcast %63 : f32 to vector<7x256xf32>
    %518 = arith.mulf %470, %517 : vector<7x256xf32>
    %519 = arith.addf %516, %518 : vector<7x256xf32>
    %520 = vector.broadcast %127 : f32 to vector<7x256xf32>
    %521 = arith.addf %519, %520 : vector<7x256xf32>
    %522 = arith.negf %521 : vector<7x256xf32>
    %523 = math.exp %522 : vector<7x256xf32>
    %cst_339 = arith.constant 1.000000e+00 : f32
    %524 = vector.broadcast %cst_339 : f32 to vector<7x256xf32>
    %525 = arith.addf %524, %523 : vector<7x256xf32>
    %526 = arith.divf %524, %525 : vector<7x256xf32>
    %527 = arith.mulf %521, %526 : vector<7x256xf32>
    %528 = vector.broadcast %52 : f32 to vector<7x256xf32>
    %529 = arith.mulf %413, %528 : vector<7x256xf32>
    %530 = vector.broadcast %56 : f32 to vector<7x256xf32>
    %531 = arith.mulf %432, %530 : vector<7x256xf32>
    %532 = arith.addf %529, %531 : vector<7x256xf32>
    %533 = vector.broadcast %60 : f32 to vector<7x256xf32>
    %534 = arith.mulf %451, %533 : vector<7x256xf32>
    %535 = arith.addf %532, %534 : vector<7x256xf32>
    %536 = vector.broadcast %64 : f32 to vector<7x256xf32>
    %537 = arith.mulf %470, %536 : vector<7x256xf32>
    %538 = arith.addf %535, %537 : vector<7x256xf32>
    %539 = vector.broadcast %128 : f32 to vector<7x256xf32>
    %540 = arith.addf %538, %539 : vector<7x256xf32>
    %541 = arith.negf %540 : vector<7x256xf32>
    %542 = math.exp %541 : vector<7x256xf32>
    %cst_340 = arith.constant 1.000000e+00 : f32
    %543 = vector.broadcast %cst_340 : f32 to vector<7x256xf32>
    %544 = arith.addf %543, %542 : vector<7x256xf32>
    %545 = arith.divf %543, %544 : vector<7x256xf32>
    %546 = arith.mulf %540, %545 : vector<7x256xf32>
    %547 = vector.broadcast %65 : f32 to vector<7x256xf32>
    %548 = arith.mulf %337, %547 : vector<7x256xf32>
    %549 = vector.broadcast %69 : f32 to vector<7x256xf32>
    %550 = arith.mulf %356, %549 : vector<7x256xf32>
    %551 = arith.addf %548, %550 : vector<7x256xf32>
    %552 = vector.broadcast %73 : f32 to vector<7x256xf32>
    %553 = arith.mulf %375, %552 : vector<7x256xf32>
    %554 = arith.addf %551, %553 : vector<7x256xf32>
    %555 = vector.broadcast %77 : f32 to vector<7x256xf32>
    %556 = arith.mulf %394, %555 : vector<7x256xf32>
    %557 = arith.addf %554, %556 : vector<7x256xf32>
    %558 = vector.broadcast %129 : f32 to vector<7x256xf32>
    %559 = arith.addf %557, %558 : vector<7x256xf32>
    %560 = vector.broadcast %0 : f32 to vector<7x256xf32>
    %561 = arith.mulf %559, %560 : vector<7x256xf32>
    %562 = vector.broadcast %66 : f32 to vector<7x256xf32>
    %563 = arith.mulf %337, %562 : vector<7x256xf32>
    %564 = vector.broadcast %70 : f32 to vector<7x256xf32>
    %565 = arith.mulf %356, %564 : vector<7x256xf32>
    %566 = arith.addf %563, %565 : vector<7x256xf32>
    %567 = vector.broadcast %74 : f32 to vector<7x256xf32>
    %568 = arith.mulf %375, %567 : vector<7x256xf32>
    %569 = arith.addf %566, %568 : vector<7x256xf32>
    %570 = vector.broadcast %78 : f32 to vector<7x256xf32>
    %571 = arith.mulf %394, %570 : vector<7x256xf32>
    %572 = arith.addf %569, %571 : vector<7x256xf32>
    %573 = vector.broadcast %130 : f32 to vector<7x256xf32>
    %574 = arith.addf %572, %573 : vector<7x256xf32>
    %575 = vector.broadcast %0 : f32 to vector<7x256xf32>
    %576 = arith.mulf %574, %575 : vector<7x256xf32>
    %577 = vector.broadcast %67 : f32 to vector<7x256xf32>
    %578 = arith.mulf %337, %577 : vector<7x256xf32>
    %579 = vector.broadcast %71 : f32 to vector<7x256xf32>
    %580 = arith.mulf %356, %579 : vector<7x256xf32>
    %581 = arith.addf %578, %580 : vector<7x256xf32>
    %582 = vector.broadcast %75 : f32 to vector<7x256xf32>
    %583 = arith.mulf %375, %582 : vector<7x256xf32>
    %584 = arith.addf %581, %583 : vector<7x256xf32>
    %585 = vector.broadcast %79 : f32 to vector<7x256xf32>
    %586 = arith.mulf %394, %585 : vector<7x256xf32>
    %587 = arith.addf %584, %586 : vector<7x256xf32>
    %588 = vector.broadcast %131 : f32 to vector<7x256xf32>
    %589 = arith.addf %587, %588 : vector<7x256xf32>
    %590 = vector.broadcast %0 : f32 to vector<7x256xf32>
    %591 = arith.mulf %589, %590 : vector<7x256xf32>
    %592 = vector.broadcast %68 : f32 to vector<7x256xf32>
    %593 = arith.mulf %337, %592 : vector<7x256xf32>
    %594 = vector.broadcast %72 : f32 to vector<7x256xf32>
    %595 = arith.mulf %356, %594 : vector<7x256xf32>
    %596 = arith.addf %593, %595 : vector<7x256xf32>
    %597 = vector.broadcast %76 : f32 to vector<7x256xf32>
    %598 = arith.mulf %375, %597 : vector<7x256xf32>
    %599 = arith.addf %596, %598 : vector<7x256xf32>
    %600 = vector.broadcast %80 : f32 to vector<7x256xf32>
    %601 = arith.mulf %394, %600 : vector<7x256xf32>
    %602 = arith.addf %599, %601 : vector<7x256xf32>
    %603 = vector.broadcast %132 : f32 to vector<7x256xf32>
    %604 = arith.addf %602, %603 : vector<7x256xf32>
    %605 = vector.broadcast %0 : f32 to vector<7x256xf32>
    %606 = arith.mulf %604, %605 : vector<7x256xf32>
    %607 = vector.broadcast %81 : f32 to vector<7x256xf32>
    %608 = arith.mulf %413, %607 : vector<7x256xf32>
    %609 = vector.broadcast %85 : f32 to vector<7x256xf32>
    %610 = arith.mulf %432, %609 : vector<7x256xf32>
    %611 = arith.addf %608, %610 : vector<7x256xf32>
    %612 = vector.broadcast %89 : f32 to vector<7x256xf32>
    %613 = arith.mulf %451, %612 : vector<7x256xf32>
    %614 = arith.addf %611, %613 : vector<7x256xf32>
    %615 = vector.broadcast %93 : f32 to vector<7x256xf32>
    %616 = arith.mulf %470, %615 : vector<7x256xf32>
    %617 = arith.addf %614, %616 : vector<7x256xf32>
    %618 = vector.broadcast %133 : f32 to vector<7x256xf32>
    %619 = arith.addf %617, %618 : vector<7x256xf32>
    %620 = vector.broadcast %0 : f32 to vector<7x256xf32>
    %621 = arith.mulf %619, %620 : vector<7x256xf32>
    %622 = vector.broadcast %82 : f32 to vector<7x256xf32>
    %623 = arith.mulf %413, %622 : vector<7x256xf32>
    %624 = vector.broadcast %86 : f32 to vector<7x256xf32>
    %625 = arith.mulf %432, %624 : vector<7x256xf32>
    %626 = arith.addf %623, %625 : vector<7x256xf32>
    %627 = vector.broadcast %90 : f32 to vector<7x256xf32>
    %628 = arith.mulf %451, %627 : vector<7x256xf32>
    %629 = arith.addf %626, %628 : vector<7x256xf32>
    %630 = vector.broadcast %94 : f32 to vector<7x256xf32>
    %631 = arith.mulf %470, %630 : vector<7x256xf32>
    %632 = arith.addf %629, %631 : vector<7x256xf32>
    %633 = vector.broadcast %134 : f32 to vector<7x256xf32>
    %634 = arith.addf %632, %633 : vector<7x256xf32>
    %635 = vector.broadcast %0 : f32 to vector<7x256xf32>
    %636 = arith.mulf %634, %635 : vector<7x256xf32>
    %637 = vector.broadcast %83 : f32 to vector<7x256xf32>
    %638 = arith.mulf %413, %637 : vector<7x256xf32>
    %639 = vector.broadcast %87 : f32 to vector<7x256xf32>
    %640 = arith.mulf %432, %639 : vector<7x256xf32>
    %641 = arith.addf %638, %640 : vector<7x256xf32>
    %642 = vector.broadcast %91 : f32 to vector<7x256xf32>
    %643 = arith.mulf %451, %642 : vector<7x256xf32>
    %644 = arith.addf %641, %643 : vector<7x256xf32>
    %645 = vector.broadcast %95 : f32 to vector<7x256xf32>
    %646 = arith.mulf %470, %645 : vector<7x256xf32>
    %647 = arith.addf %644, %646 : vector<7x256xf32>
    %648 = vector.broadcast %135 : f32 to vector<7x256xf32>
    %649 = arith.addf %647, %648 : vector<7x256xf32>
    %650 = vector.broadcast %0 : f32 to vector<7x256xf32>
    %651 = arith.mulf %649, %650 : vector<7x256xf32>
    %652 = vector.broadcast %84 : f32 to vector<7x256xf32>
    %653 = arith.mulf %413, %652 : vector<7x256xf32>
    %654 = vector.broadcast %88 : f32 to vector<7x256xf32>
    %655 = arith.mulf %432, %654 : vector<7x256xf32>
    %656 = arith.addf %653, %655 : vector<7x256xf32>
    %657 = vector.broadcast %92 : f32 to vector<7x256xf32>
    %658 = arith.mulf %451, %657 : vector<7x256xf32>
    %659 = arith.addf %656, %658 : vector<7x256xf32>
    %660 = vector.broadcast %96 : f32 to vector<7x256xf32>
    %661 = arith.mulf %470, %660 : vector<7x256xf32>
    %662 = arith.addf %659, %661 : vector<7x256xf32>
    %663 = vector.broadcast %136 : f32 to vector<7x256xf32>
    %664 = arith.addf %662, %663 : vector<7x256xf32>
    %665 = vector.broadcast %0 : f32 to vector<7x256xf32>
    %666 = arith.mulf %664, %665 : vector<7x256xf32>
    %667 = vector.broadcast %97 : f32 to vector<7x256xf32>
    %668 = arith.mulf %489, %667 : vector<7x256xf32>
    %669 = vector.broadcast %101 : f32 to vector<7x256xf32>
    %670 = arith.mulf %508, %669 : vector<7x256xf32>
    %671 = arith.addf %668, %670 : vector<7x256xf32>
    %672 = vector.broadcast %105 : f32 to vector<7x256xf32>
    %673 = arith.mulf %527, %672 : vector<7x256xf32>
    %674 = arith.addf %671, %673 : vector<7x256xf32>
    %675 = vector.broadcast %109 : f32 to vector<7x256xf32>
    %676 = arith.mulf %546, %675 : vector<7x256xf32>
    %677 = arith.addf %674, %676 : vector<7x256xf32>
    %678 = vector.broadcast %137 : f32 to vector<7x256xf32>
    %679 = arith.addf %677, %678 : vector<7x256xf32>
    %680 = vector.broadcast %0 : f32 to vector<7x256xf32>
    %681 = arith.mulf %679, %680 : vector<7x256xf32>
    %682 = vector.broadcast %98 : f32 to vector<7x256xf32>
    %683 = arith.mulf %489, %682 : vector<7x256xf32>
    %684 = vector.broadcast %102 : f32 to vector<7x256xf32>
    %685 = arith.mulf %508, %684 : vector<7x256xf32>
    %686 = arith.addf %683, %685 : vector<7x256xf32>
    %687 = vector.broadcast %106 : f32 to vector<7x256xf32>
    %688 = arith.mulf %527, %687 : vector<7x256xf32>
    %689 = arith.addf %686, %688 : vector<7x256xf32>
    %690 = vector.broadcast %110 : f32 to vector<7x256xf32>
    %691 = arith.mulf %546, %690 : vector<7x256xf32>
    %692 = arith.addf %689, %691 : vector<7x256xf32>
    %693 = vector.broadcast %138 : f32 to vector<7x256xf32>
    %694 = arith.addf %692, %693 : vector<7x256xf32>
    %695 = vector.broadcast %0 : f32 to vector<7x256xf32>
    %696 = arith.mulf %694, %695 : vector<7x256xf32>
    %697 = vector.broadcast %99 : f32 to vector<7x256xf32>
    %698 = arith.mulf %489, %697 : vector<7x256xf32>
    %699 = vector.broadcast %103 : f32 to vector<7x256xf32>
    %700 = arith.mulf %508, %699 : vector<7x256xf32>
    %701 = arith.addf %698, %700 : vector<7x256xf32>
    %702 = vector.broadcast %107 : f32 to vector<7x256xf32>
    %703 = arith.mulf %527, %702 : vector<7x256xf32>
    %704 = arith.addf %701, %703 : vector<7x256xf32>
    %705 = vector.broadcast %111 : f32 to vector<7x256xf32>
    %706 = arith.mulf %546, %705 : vector<7x256xf32>
    %707 = arith.addf %704, %706 : vector<7x256xf32>
    %708 = vector.broadcast %139 : f32 to vector<7x256xf32>
    %709 = arith.addf %707, %708 : vector<7x256xf32>
    %710 = vector.broadcast %0 : f32 to vector<7x256xf32>
    %711 = arith.mulf %709, %710 : vector<7x256xf32>
    %712 = vector.broadcast %100 : f32 to vector<7x256xf32>
    %713 = arith.mulf %489, %712 : vector<7x256xf32>
    %714 = vector.broadcast %104 : f32 to vector<7x256xf32>
    %715 = arith.mulf %508, %714 : vector<7x256xf32>
    %716 = arith.addf %713, %715 : vector<7x256xf32>
    %717 = vector.broadcast %108 : f32 to vector<7x256xf32>
    %718 = arith.mulf %527, %717 : vector<7x256xf32>
    %719 = arith.addf %716, %718 : vector<7x256xf32>
    %720 = vector.broadcast %112 : f32 to vector<7x256xf32>
    %721 = arith.mulf %546, %720 : vector<7x256xf32>
    %722 = arith.addf %719, %721 : vector<7x256xf32>
    %723 = vector.broadcast %140 : f32 to vector<7x256xf32>
    %724 = arith.addf %722, %723 : vector<7x256xf32>
    %725 = vector.broadcast %0 : f32 to vector<7x256xf32>
    %726 = arith.mulf %724, %725 : vector<7x256xf32>
    %727 = arith.addf %561, %621 : vector<7x256xf32>
    %728 = arith.addf %727, %681 : vector<7x256xf32>
    %729 = arith.addf %576, %636 : vector<7x256xf32>
    %730 = arith.addf %729, %696 : vector<7x256xf32>
    %731 = arith.addf %591, %651 : vector<7x256xf32>
    %732 = arith.addf %731, %711 : vector<7x256xf32>
    %733 = arith.addf %606, %666 : vector<7x256xf32>
    %734 = arith.addf %733, %726 : vector<7x256xf32>
    %c0_341 = arith.constant 0 : index
    %c0_342 = arith.constant 0 : index
    %735 = memref.load %arg9[%c0_341, %c0_342] : memref<4x28xf32, #tpu.memory_space<smem>>
    %c1_343 = arith.constant 1 : index
    %c0_344 = arith.constant 0 : index
    %736 = memref.load %arg9[%c1_343, %c0_344] : memref<4x28xf32, #tpu.memory_space<smem>>
    %c2_345 = arith.constant 2 : index
    %c0_346 = arith.constant 0 : index
    %737 = memref.load %arg9[%c2_345, %c0_346] : memref<4x28xf32, #tpu.memory_space<smem>>
    %c3_347 = arith.constant 3 : index
    %c0_348 = arith.constant 0 : index
    %738 = memref.load %arg9[%c3_347, %c0_348] : memref<4x28xf32, #tpu.memory_space<smem>>
    %c0_349 = arith.constant 0 : index
    %c1_350 = arith.constant 1 : index
    %739 = memref.load %arg9[%c0_349, %c1_350] : memref<4x28xf32, #tpu.memory_space<smem>>
    %c1_351 = arith.constant 1 : index
    %c1_352 = arith.constant 1 : index
    %740 = memref.load %arg9[%c1_351, %c1_352] : memref<4x28xf32, #tpu.memory_space<smem>>
    %c2_353 = arith.constant 2 : index
    %c1_354 = arith.constant 1 : index
    %741 = memref.load %arg9[%c2_353, %c1_354] : memref<4x28xf32, #tpu.memory_space<smem>>
    %c3_355 = arith.constant 3 : index
    %c1_356 = arith.constant 1 : index
    %742 = memref.load %arg9[%c3_355, %c1_356] : memref<4x28xf32, #tpu.memory_space<smem>>
    %c0_357 = arith.constant 0 : index
    %c2_358 = arith.constant 2 : index
    %743 = memref.load %arg9[%c0_357, %c2_358] : memref<4x28xf32, #tpu.memory_space<smem>>
    %c1_359 = arith.constant 1 : index
    %c2_360 = arith.constant 2 : index
    %744 = memref.load %arg9[%c1_359, %c2_360] : memref<4x28xf32, #tpu.memory_space<smem>>
    %c2_361 = arith.constant 2 : index
    %c2_362 = arith.constant 2 : index
    %745 = memref.load %arg9[%c2_361, %c2_362] : memref<4x28xf32, #tpu.memory_space<smem>>
    %c3_363 = arith.constant 3 : index
    %c2_364 = arith.constant 2 : index
    %746 = memref.load %arg9[%c3_363, %c2_364] : memref<4x28xf32, #tpu.memory_space<smem>>
    %c0_365 = arith.constant 0 : index
    %c3_366 = arith.constant 3 : index
    %747 = memref.load %arg9[%c0_365, %c3_366] : memref<4x28xf32, #tpu.memory_space<smem>>
    %c1_367 = arith.constant 1 : index
    %c3_368 = arith.constant 3 : index
    %748 = memref.load %arg9[%c1_367, %c3_368] : memref<4x28xf32, #tpu.memory_space<smem>>
    %c2_369 = arith.constant 2 : index
    %c3_370 = arith.constant 3 : index
    %749 = memref.load %arg9[%c2_369, %c3_370] : memref<4x28xf32, #tpu.memory_space<smem>>
    %c3_371 = arith.constant 3 : index
    %c3_372 = arith.constant 3 : index
    %750 = memref.load %arg9[%c3_371, %c3_372] : memref<4x28xf32, #tpu.memory_space<smem>>
    %c0_373 = arith.constant 0 : index
    %c4_374 = arith.constant 4 : index
    %751 = memref.load %arg9[%c0_373, %c4_374] : memref<4x28xf32, #tpu.memory_space<smem>>
    %c1_375 = arith.constant 1 : index
    %c4_376 = arith.constant 4 : index
    %752 = memref.load %arg9[%c1_375, %c4_376] : memref<4x28xf32, #tpu.memory_space<smem>>
    %c2_377 = arith.constant 2 : index
    %c4_378 = arith.constant 4 : index
    %753 = memref.load %arg9[%c2_377, %c4_378] : memref<4x28xf32, #tpu.memory_space<smem>>
    %c3_379 = arith.constant 3 : index
    %c4_380 = arith.constant 4 : index
    %754 = memref.load %arg9[%c3_379, %c4_380] : memref<4x28xf32, #tpu.memory_space<smem>>
    %c0_381 = arith.constant 0 : index
    %c5_382 = arith.constant 5 : index
    %755 = memref.load %arg9[%c0_381, %c5_382] : memref<4x28xf32, #tpu.memory_space<smem>>
    %c1_383 = arith.constant 1 : index
    %c5_384 = arith.constant 5 : index
    %756 = memref.load %arg9[%c1_383, %c5_384] : memref<4x28xf32, #tpu.memory_space<smem>>
    %c2_385 = arith.constant 2 : index
    %c5_386 = arith.constant 5 : index
    %757 = memref.load %arg9[%c2_385, %c5_386] : memref<4x28xf32, #tpu.memory_space<smem>>
    %c3_387 = arith.constant 3 : index
    %c5_388 = arith.constant 5 : index
    %758 = memref.load %arg9[%c3_387, %c5_388] : memref<4x28xf32, #tpu.memory_space<smem>>
    %c0_389 = arith.constant 0 : index
    %c6_390 = arith.constant 6 : index
    %759 = memref.load %arg9[%c0_389, %c6_390] : memref<4x28xf32, #tpu.memory_space<smem>>
    %c1_391 = arith.constant 1 : index
    %c6_392 = arith.constant 6 : index
    %760 = memref.load %arg9[%c1_391, %c6_392] : memref<4x28xf32, #tpu.memory_space<smem>>
    %c2_393 = arith.constant 2 : index
    %c6_394 = arith.constant 6 : index
    %761 = memref.load %arg9[%c2_393, %c6_394] : memref<4x28xf32, #tpu.memory_space<smem>>
    %c3_395 = arith.constant 3 : index
    %c6_396 = arith.constant 6 : index
    %762 = memref.load %arg9[%c3_395, %c6_396] : memref<4x28xf32, #tpu.memory_space<smem>>
    %c0_397 = arith.constant 0 : index
    %c7_398 = arith.constant 7 : index
    %763 = memref.load %arg9[%c0_397, %c7_398] : memref<4x28xf32, #tpu.memory_space<smem>>
    %c1_399 = arith.constant 1 : index
    %c7_400 = arith.constant 7 : index
    %764 = memref.load %arg9[%c1_399, %c7_400] : memref<4x28xf32, #tpu.memory_space<smem>>
    %c2_401 = arith.constant 2 : index
    %c7_402 = arith.constant 7 : index
    %765 = memref.load %arg9[%c2_401, %c7_402] : memref<4x28xf32, #tpu.memory_space<smem>>
    %c3_403 = arith.constant 3 : index
    %c7_404 = arith.constant 7 : index
    %766 = memref.load %arg9[%c3_403, %c7_404] : memref<4x28xf32, #tpu.memory_space<smem>>
    %c0_405 = arith.constant 0 : index
    %c8_406 = arith.constant 8 : index
    %767 = memref.load %arg9[%c0_405, %c8_406] : memref<4x28xf32, #tpu.memory_space<smem>>
    %c1_407 = arith.constant 1 : index
    %c8_408 = arith.constant 8 : index
    %768 = memref.load %arg9[%c1_407, %c8_408] : memref<4x28xf32, #tpu.memory_space<smem>>
    %c2_409 = arith.constant 2 : index
    %c8_410 = arith.constant 8 : index
    %769 = memref.load %arg9[%c2_409, %c8_410] : memref<4x28xf32, #tpu.memory_space<smem>>
    %c3_411 = arith.constant 3 : index
    %c8_412 = arith.constant 8 : index
    %770 = memref.load %arg9[%c3_411, %c8_412] : memref<4x28xf32, #tpu.memory_space<smem>>
    %c0_413 = arith.constant 0 : index
    %c9_414 = arith.constant 9 : index
    %771 = memref.load %arg9[%c0_413, %c9_414] : memref<4x28xf32, #tpu.memory_space<smem>>
    %c1_415 = arith.constant 1 : index
    %c9_416 = arith.constant 9 : index
    %772 = memref.load %arg9[%c1_415, %c9_416] : memref<4x28xf32, #tpu.memory_space<smem>>
    %c2_417 = arith.constant 2 : index
    %c9_418 = arith.constant 9 : index
    %773 = memref.load %arg9[%c2_417, %c9_418] : memref<4x28xf32, #tpu.memory_space<smem>>
    %c3_419 = arith.constant 3 : index
    %c9_420 = arith.constant 9 : index
    %774 = memref.load %arg9[%c3_419, %c9_420] : memref<4x28xf32, #tpu.memory_space<smem>>
    %c0_421 = arith.constant 0 : index
    %c10_422 = arith.constant 10 : index
    %775 = memref.load %arg9[%c0_421, %c10_422] : memref<4x28xf32, #tpu.memory_space<smem>>
    %c1_423 = arith.constant 1 : index
    %c10_424 = arith.constant 10 : index
    %776 = memref.load %arg9[%c1_423, %c10_424] : memref<4x28xf32, #tpu.memory_space<smem>>
    %c2_425 = arith.constant 2 : index
    %c10_426 = arith.constant 10 : index
    %777 = memref.load %arg9[%c2_425, %c10_426] : memref<4x28xf32, #tpu.memory_space<smem>>
    %c3_427 = arith.constant 3 : index
    %c10_428 = arith.constant 10 : index
    %778 = memref.load %arg9[%c3_427, %c10_428] : memref<4x28xf32, #tpu.memory_space<smem>>
    %c0_429 = arith.constant 0 : index
    %c11_430 = arith.constant 11 : index
    %779 = memref.load %arg9[%c0_429, %c11_430] : memref<4x28xf32, #tpu.memory_space<smem>>
    %c1_431 = arith.constant 1 : index
    %c11_432 = arith.constant 11 : index
    %780 = memref.load %arg9[%c1_431, %c11_432] : memref<4x28xf32, #tpu.memory_space<smem>>
    %c2_433 = arith.constant 2 : index
    %c11_434 = arith.constant 11 : index
    %781 = memref.load %arg9[%c2_433, %c11_434] : memref<4x28xf32, #tpu.memory_space<smem>>
    %c3_435 = arith.constant 3 : index
    %c11_436 = arith.constant 11 : index
    %782 = memref.load %arg9[%c3_435, %c11_436] : memref<4x28xf32, #tpu.memory_space<smem>>
    %c0_437 = arith.constant 0 : index
    %c12_438 = arith.constant 12 : index
    %783 = memref.load %arg9[%c0_437, %c12_438] : memref<4x28xf32, #tpu.memory_space<smem>>
    %c1_439 = arith.constant 1 : index
    %c12_440 = arith.constant 12 : index
    %784 = memref.load %arg9[%c1_439, %c12_440] : memref<4x28xf32, #tpu.memory_space<smem>>
    %c2_441 = arith.constant 2 : index
    %c12_442 = arith.constant 12 : index
    %785 = memref.load %arg9[%c2_441, %c12_442] : memref<4x28xf32, #tpu.memory_space<smem>>
    %c3_443 = arith.constant 3 : index
    %c12_444 = arith.constant 12 : index
    %786 = memref.load %arg9[%c3_443, %c12_444] : memref<4x28xf32, #tpu.memory_space<smem>>
    %c0_445 = arith.constant 0 : index
    %c13_446 = arith.constant 13 : index
    %787 = memref.load %arg9[%c0_445, %c13_446] : memref<4x28xf32, #tpu.memory_space<smem>>
    %c1_447 = arith.constant 1 : index
    %c13_448 = arith.constant 13 : index
    %788 = memref.load %arg9[%c1_447, %c13_448] : memref<4x28xf32, #tpu.memory_space<smem>>
    %c2_449 = arith.constant 2 : index
    %c13_450 = arith.constant 13 : index
    %789 = memref.load %arg9[%c2_449, %c13_450] : memref<4x28xf32, #tpu.memory_space<smem>>
    %c3_451 = arith.constant 3 : index
    %c13_452 = arith.constant 13 : index
    %790 = memref.load %arg9[%c3_451, %c13_452] : memref<4x28xf32, #tpu.memory_space<smem>>
    %c0_453 = arith.constant 0 : index
    %c14_454 = arith.constant 14 : index
    %791 = memref.load %arg9[%c0_453, %c14_454] : memref<4x28xf32, #tpu.memory_space<smem>>
    %c1_455 = arith.constant 1 : index
    %c14_456 = arith.constant 14 : index
    %792 = memref.load %arg9[%c1_455, %c14_456] : memref<4x28xf32, #tpu.memory_space<smem>>
    %c2_457 = arith.constant 2 : index
    %c14_458 = arith.constant 14 : index
    %793 = memref.load %arg9[%c2_457, %c14_458] : memref<4x28xf32, #tpu.memory_space<smem>>
    %c3_459 = arith.constant 3 : index
    %c14_460 = arith.constant 14 : index
    %794 = memref.load %arg9[%c3_459, %c14_460] : memref<4x28xf32, #tpu.memory_space<smem>>
    %c0_461 = arith.constant 0 : index
    %c15_462 = arith.constant 15 : index
    %795 = memref.load %arg9[%c0_461, %c15_462] : memref<4x28xf32, #tpu.memory_space<smem>>
    %c1_463 = arith.constant 1 : index
    %c15_464 = arith.constant 15 : index
    %796 = memref.load %arg9[%c1_463, %c15_464] : memref<4x28xf32, #tpu.memory_space<smem>>
    %c2_465 = arith.constant 2 : index
    %c15_466 = arith.constant 15 : index
    %797 = memref.load %arg9[%c2_465, %c15_466] : memref<4x28xf32, #tpu.memory_space<smem>>
    %c3_467 = arith.constant 3 : index
    %c15_468 = arith.constant 15 : index
    %798 = memref.load %arg9[%c3_467, %c15_468] : memref<4x28xf32, #tpu.memory_space<smem>>
    %c0_469 = arith.constant 0 : index
    %c16_470 = arith.constant 16 : index
    %799 = memref.load %arg9[%c0_469, %c16_470] : memref<4x28xf32, #tpu.memory_space<smem>>
    %c1_471 = arith.constant 1 : index
    %c16_472 = arith.constant 16 : index
    %800 = memref.load %arg9[%c1_471, %c16_472] : memref<4x28xf32, #tpu.memory_space<smem>>
    %c2_473 = arith.constant 2 : index
    %c16_474 = arith.constant 16 : index
    %801 = memref.load %arg9[%c2_473, %c16_474] : memref<4x28xf32, #tpu.memory_space<smem>>
    %c3_475 = arith.constant 3 : index
    %c16_476 = arith.constant 16 : index
    %802 = memref.load %arg9[%c3_475, %c16_476] : memref<4x28xf32, #tpu.memory_space<smem>>
    %c0_477 = arith.constant 0 : index
    %c17_478 = arith.constant 17 : index
    %803 = memref.load %arg9[%c0_477, %c17_478] : memref<4x28xf32, #tpu.memory_space<smem>>
    %c1_479 = arith.constant 1 : index
    %c17_480 = arith.constant 17 : index
    %804 = memref.load %arg9[%c1_479, %c17_480] : memref<4x28xf32, #tpu.memory_space<smem>>
    %c2_481 = arith.constant 2 : index
    %c17_482 = arith.constant 17 : index
    %805 = memref.load %arg9[%c2_481, %c17_482] : memref<4x28xf32, #tpu.memory_space<smem>>
    %c3_483 = arith.constant 3 : index
    %c17_484 = arith.constant 17 : index
    %806 = memref.load %arg9[%c3_483, %c17_484] : memref<4x28xf32, #tpu.memory_space<smem>>
    %c0_485 = arith.constant 0 : index
    %c18_486 = arith.constant 18 : index
    %807 = memref.load %arg9[%c0_485, %c18_486] : memref<4x28xf32, #tpu.memory_space<smem>>
    %c1_487 = arith.constant 1 : index
    %c18_488 = arith.constant 18 : index
    %808 = memref.load %arg9[%c1_487, %c18_488] : memref<4x28xf32, #tpu.memory_space<smem>>
    %c2_489 = arith.constant 2 : index
    %c18_490 = arith.constant 18 : index
    %809 = memref.load %arg9[%c2_489, %c18_490] : memref<4x28xf32, #tpu.memory_space<smem>>
    %c3_491 = arith.constant 3 : index
    %c18_492 = arith.constant 18 : index
    %810 = memref.load %arg9[%c3_491, %c18_492] : memref<4x28xf32, #tpu.memory_space<smem>>
    %c0_493 = arith.constant 0 : index
    %c19_494 = arith.constant 19 : index
    %811 = memref.load %arg9[%c0_493, %c19_494] : memref<4x28xf32, #tpu.memory_space<smem>>
    %c1_495 = arith.constant 1 : index
    %c19_496 = arith.constant 19 : index
    %812 = memref.load %arg9[%c1_495, %c19_496] : memref<4x28xf32, #tpu.memory_space<smem>>
    %c2_497 = arith.constant 2 : index
    %c19_498 = arith.constant 19 : index
    %813 = memref.load %arg9[%c2_497, %c19_498] : memref<4x28xf32, #tpu.memory_space<smem>>
    %c3_499 = arith.constant 3 : index
    %c19_500 = arith.constant 19 : index
    %814 = memref.load %arg9[%c3_499, %c19_500] : memref<4x28xf32, #tpu.memory_space<smem>>
    %c0_501 = arith.constant 0 : index
    %c20_502 = arith.constant 20 : index
    %815 = memref.load %arg9[%c0_501, %c20_502] : memref<4x28xf32, #tpu.memory_space<smem>>
    %c1_503 = arith.constant 1 : index
    %c20_504 = arith.constant 20 : index
    %816 = memref.load %arg9[%c1_503, %c20_504] : memref<4x28xf32, #tpu.memory_space<smem>>
    %c2_505 = arith.constant 2 : index
    %c20_506 = arith.constant 20 : index
    %817 = memref.load %arg9[%c2_505, %c20_506] : memref<4x28xf32, #tpu.memory_space<smem>>
    %c3_507 = arith.constant 3 : index
    %c20_508 = arith.constant 20 : index
    %818 = memref.load %arg9[%c3_507, %c20_508] : memref<4x28xf32, #tpu.memory_space<smem>>
    %c0_509 = arith.constant 0 : index
    %c21_510 = arith.constant 21 : index
    %819 = memref.load %arg9[%c0_509, %c21_510] : memref<4x28xf32, #tpu.memory_space<smem>>
    %c1_511 = arith.constant 1 : index
    %c21_512 = arith.constant 21 : index
    %820 = memref.load %arg9[%c1_511, %c21_512] : memref<4x28xf32, #tpu.memory_space<smem>>
    %c2_513 = arith.constant 2 : index
    %c21_514 = arith.constant 21 : index
    %821 = memref.load %arg9[%c2_513, %c21_514] : memref<4x28xf32, #tpu.memory_space<smem>>
    %c3_515 = arith.constant 3 : index
    %c21_516 = arith.constant 21 : index
    %822 = memref.load %arg9[%c3_515, %c21_516] : memref<4x28xf32, #tpu.memory_space<smem>>
    %c0_517 = arith.constant 0 : index
    %c22_518 = arith.constant 22 : index
    %823 = memref.load %arg9[%c0_517, %c22_518] : memref<4x28xf32, #tpu.memory_space<smem>>
    %c1_519 = arith.constant 1 : index
    %c22_520 = arith.constant 22 : index
    %824 = memref.load %arg9[%c1_519, %c22_520] : memref<4x28xf32, #tpu.memory_space<smem>>
    %c2_521 = arith.constant 2 : index
    %c22_522 = arith.constant 22 : index
    %825 = memref.load %arg9[%c2_521, %c22_522] : memref<4x28xf32, #tpu.memory_space<smem>>
    %c3_523 = arith.constant 3 : index
    %c22_524 = arith.constant 22 : index
    %826 = memref.load %arg9[%c3_523, %c22_524] : memref<4x28xf32, #tpu.memory_space<smem>>
    %c0_525 = arith.constant 0 : index
    %c23_526 = arith.constant 23 : index
    %827 = memref.load %arg9[%c0_525, %c23_526] : memref<4x28xf32, #tpu.memory_space<smem>>
    %c1_527 = arith.constant 1 : index
    %c23_528 = arith.constant 23 : index
    %828 = memref.load %arg9[%c1_527, %c23_528] : memref<4x28xf32, #tpu.memory_space<smem>>
    %c2_529 = arith.constant 2 : index
    %c23_530 = arith.constant 23 : index
    %829 = memref.load %arg9[%c2_529, %c23_530] : memref<4x28xf32, #tpu.memory_space<smem>>
    %c3_531 = arith.constant 3 : index
    %c23_532 = arith.constant 23 : index
    %830 = memref.load %arg9[%c3_531, %c23_532] : memref<4x28xf32, #tpu.memory_space<smem>>
    %c0_533 = arith.constant 0 : index
    %c24_534 = arith.constant 24 : index
    %831 = memref.load %arg9[%c0_533, %c24_534] : memref<4x28xf32, #tpu.memory_space<smem>>
    %c1_535 = arith.constant 1 : index
    %c24_536 = arith.constant 24 : index
    %832 = memref.load %arg9[%c1_535, %c24_536] : memref<4x28xf32, #tpu.memory_space<smem>>
    %c2_537 = arith.constant 2 : index
    %c24_538 = arith.constant 24 : index
    %833 = memref.load %arg9[%c2_537, %c24_538] : memref<4x28xf32, #tpu.memory_space<smem>>
    %c3_539 = arith.constant 3 : index
    %c24_540 = arith.constant 24 : index
    %834 = memref.load %arg9[%c3_539, %c24_540] : memref<4x28xf32, #tpu.memory_space<smem>>
    %c0_541 = arith.constant 0 : index
    %c25_542 = arith.constant 25 : index
    %835 = memref.load %arg9[%c0_541, %c25_542] : memref<4x28xf32, #tpu.memory_space<smem>>
    %c1_543 = arith.constant 1 : index
    %c25_544 = arith.constant 25 : index
    %836 = memref.load %arg9[%c1_543, %c25_544] : memref<4x28xf32, #tpu.memory_space<smem>>
    %c2_545 = arith.constant 2 : index
    %c25_546 = arith.constant 25 : index
    %837 = memref.load %arg9[%c2_545, %c25_546] : memref<4x28xf32, #tpu.memory_space<smem>>
    %c3_547 = arith.constant 3 : index
    %c25_548 = arith.constant 25 : index
    %838 = memref.load %arg9[%c3_547, %c25_548] : memref<4x28xf32, #tpu.memory_space<smem>>
    %c0_549 = arith.constant 0 : index
    %c26_550 = arith.constant 26 : index
    %839 = memref.load %arg9[%c0_549, %c26_550] : memref<4x28xf32, #tpu.memory_space<smem>>
    %c1_551 = arith.constant 1 : index
    %c26_552 = arith.constant 26 : index
    %840 = memref.load %arg9[%c1_551, %c26_552] : memref<4x28xf32, #tpu.memory_space<smem>>
    %c2_553 = arith.constant 2 : index
    %c26_554 = arith.constant 26 : index
    %841 = memref.load %arg9[%c2_553, %c26_554] : memref<4x28xf32, #tpu.memory_space<smem>>
    %c3_555 = arith.constant 3 : index
    %c26_556 = arith.constant 26 : index
    %842 = memref.load %arg9[%c3_555, %c26_556] : memref<4x28xf32, #tpu.memory_space<smem>>
    %c0_557 = arith.constant 0 : index
    %c27_558 = arith.constant 27 : index
    %843 = memref.load %arg9[%c0_557, %c27_558] : memref<4x28xf32, #tpu.memory_space<smem>>
    %c1_559 = arith.constant 1 : index
    %c27_560 = arith.constant 27 : index
    %844 = memref.load %arg9[%c1_559, %c27_560] : memref<4x28xf32, #tpu.memory_space<smem>>
    %c2_561 = arith.constant 2 : index
    %c27_562 = arith.constant 27 : index
    %845 = memref.load %arg9[%c2_561, %c27_562] : memref<4x28xf32, #tpu.memory_space<smem>>
    %c3_563 = arith.constant 3 : index
    %c27_564 = arith.constant 27 : index
    %846 = memref.load %arg9[%c3_563, %c27_564] : memref<4x28xf32, #tpu.memory_space<smem>>
    %c0_565 = arith.constant 0 : index
    %c0_566 = arith.constant 0 : index
    %847 = memref.load %arg10[%c0_565, %c0_566] : memref<7x4xf32, #tpu.memory_space<smem>>
    %c0_567 = arith.constant 0 : index
    %c1_568 = arith.constant 1 : index
    %848 = memref.load %arg10[%c0_567, %c1_568] : memref<7x4xf32, #tpu.memory_space<smem>>
    %c0_569 = arith.constant 0 : index
    %c2_570 = arith.constant 2 : index
    %849 = memref.load %arg10[%c0_569, %c2_570] : memref<7x4xf32, #tpu.memory_space<smem>>
    %c0_571 = arith.constant 0 : index
    %c3_572 = arith.constant 3 : index
    %850 = memref.load %arg10[%c0_571, %c3_572] : memref<7x4xf32, #tpu.memory_space<smem>>
    %c1_573 = arith.constant 1 : index
    %c0_574 = arith.constant 0 : index
    %851 = memref.load %arg10[%c1_573, %c0_574] : memref<7x4xf32, #tpu.memory_space<smem>>
    %c1_575 = arith.constant 1 : index
    %c1_576 = arith.constant 1 : index
    %852 = memref.load %arg10[%c1_575, %c1_576] : memref<7x4xf32, #tpu.memory_space<smem>>
    %c1_577 = arith.constant 1 : index
    %c2_578 = arith.constant 2 : index
    %853 = memref.load %arg10[%c1_577, %c2_578] : memref<7x4xf32, #tpu.memory_space<smem>>
    %c1_579 = arith.constant 1 : index
    %c3_580 = arith.constant 3 : index
    %854 = memref.load %arg10[%c1_579, %c3_580] : memref<7x4xf32, #tpu.memory_space<smem>>
    %c2_581 = arith.constant 2 : index
    %c0_582 = arith.constant 0 : index
    %855 = memref.load %arg10[%c2_581, %c0_582] : memref<7x4xf32, #tpu.memory_space<smem>>
    %c2_583 = arith.constant 2 : index
    %c1_584 = arith.constant 1 : index
    %856 = memref.load %arg10[%c2_583, %c1_584] : memref<7x4xf32, #tpu.memory_space<smem>>
    %c2_585 = arith.constant 2 : index
    %c2_586 = arith.constant 2 : index
    %857 = memref.load %arg10[%c2_585, %c2_586] : memref<7x4xf32, #tpu.memory_space<smem>>
    %c2_587 = arith.constant 2 : index
    %c3_588 = arith.constant 3 : index
    %858 = memref.load %arg10[%c2_587, %c3_588] : memref<7x4xf32, #tpu.memory_space<smem>>
    %c3_589 = arith.constant 3 : index
    %c0_590 = arith.constant 0 : index
    %859 = memref.load %arg10[%c3_589, %c0_590] : memref<7x4xf32, #tpu.memory_space<smem>>
    %c3_591 = arith.constant 3 : index
    %c1_592 = arith.constant 1 : index
    %860 = memref.load %arg10[%c3_591, %c1_592] : memref<7x4xf32, #tpu.memory_space<smem>>
    %c3_593 = arith.constant 3 : index
    %c2_594 = arith.constant 2 : index
    %861 = memref.load %arg10[%c3_593, %c2_594] : memref<7x4xf32, #tpu.memory_space<smem>>
    %c3_595 = arith.constant 3 : index
    %c3_596 = arith.constant 3 : index
    %862 = memref.load %arg10[%c3_595, %c3_596] : memref<7x4xf32, #tpu.memory_space<smem>>
    %c4_597 = arith.constant 4 : index
    %c0_598 = arith.constant 0 : index
    %863 = memref.load %arg10[%c4_597, %c0_598] : memref<7x4xf32, #tpu.memory_space<smem>>
    %c4_599 = arith.constant 4 : index
    %c1_600 = arith.constant 1 : index
    %864 = memref.load %arg10[%c4_599, %c1_600] : memref<7x4xf32, #tpu.memory_space<smem>>
    %c4_601 = arith.constant 4 : index
    %c2_602 = arith.constant 2 : index
    %865 = memref.load %arg10[%c4_601, %c2_602] : memref<7x4xf32, #tpu.memory_space<smem>>
    %c4_603 = arith.constant 4 : index
    %c3_604 = arith.constant 3 : index
    %866 = memref.load %arg10[%c4_603, %c3_604] : memref<7x4xf32, #tpu.memory_space<smem>>
    %c5_605 = arith.constant 5 : index
    %c0_606 = arith.constant 0 : index
    %867 = memref.load %arg10[%c5_605, %c0_606] : memref<7x4xf32, #tpu.memory_space<smem>>
    %c5_607 = arith.constant 5 : index
    %c1_608 = arith.constant 1 : index
    %868 = memref.load %arg10[%c5_607, %c1_608] : memref<7x4xf32, #tpu.memory_space<smem>>
    %c5_609 = arith.constant 5 : index
    %c2_610 = arith.constant 2 : index
    %869 = memref.load %arg10[%c5_609, %c2_610] : memref<7x4xf32, #tpu.memory_space<smem>>
    %c5_611 = arith.constant 5 : index
    %c3_612 = arith.constant 3 : index
    %870 = memref.load %arg10[%c5_611, %c3_612] : memref<7x4xf32, #tpu.memory_space<smem>>
    %c6_613 = arith.constant 6 : index
    %c0_614 = arith.constant 0 : index
    %871 = memref.load %arg10[%c6_613, %c0_614] : memref<7x4xf32, #tpu.memory_space<smem>>
    %c6_615 = arith.constant 6 : index
    %c1_616 = arith.constant 1 : index
    %872 = memref.load %arg10[%c6_615, %c1_616] : memref<7x4xf32, #tpu.memory_space<smem>>
    %c6_617 = arith.constant 6 : index
    %c2_618 = arith.constant 2 : index
    %873 = memref.load %arg10[%c6_617, %c2_618] : memref<7x4xf32, #tpu.memory_space<smem>>
    %c6_619 = arith.constant 6 : index
    %c3_620 = arith.constant 3 : index
    %874 = memref.load %arg10[%c6_619, %c3_620] : memref<7x4xf32, #tpu.memory_space<smem>>
    %c0_621 = arith.constant 0 : index
    %c0_622 = arith.constant 0 : index
    %875 = memref.load %arg11[%c0_621, %c0_622] : memref<4x3xf32, #tpu.memory_space<smem>>
    %c1_623 = arith.constant 1 : index
    %c0_624 = arith.constant 0 : index
    %876 = memref.load %arg11[%c1_623, %c0_624] : memref<4x3xf32, #tpu.memory_space<smem>>
    %c2_625 = arith.constant 2 : index
    %c0_626 = arith.constant 0 : index
    %877 = memref.load %arg11[%c2_625, %c0_626] : memref<4x3xf32, #tpu.memory_space<smem>>
    %c3_627 = arith.constant 3 : index
    %c0_628 = arith.constant 0 : index
    %878 = memref.load %arg11[%c3_627, %c0_628] : memref<4x3xf32, #tpu.memory_space<smem>>
    %c0_629 = arith.constant 0 : index
    %c1_630 = arith.constant 1 : index
    %879 = memref.load %arg11[%c0_629, %c1_630] : memref<4x3xf32, #tpu.memory_space<smem>>
    %c1_631 = arith.constant 1 : index
    %c1_632 = arith.constant 1 : index
    %880 = memref.load %arg11[%c1_631, %c1_632] : memref<4x3xf32, #tpu.memory_space<smem>>
    %c2_633 = arith.constant 2 : index
    %c1_634 = arith.constant 1 : index
    %881 = memref.load %arg11[%c2_633, %c1_634] : memref<4x3xf32, #tpu.memory_space<smem>>
    %c3_635 = arith.constant 3 : index
    %c1_636 = arith.constant 1 : index
    %882 = memref.load %arg11[%c3_635, %c1_636] : memref<4x3xf32, #tpu.memory_space<smem>>
    %c0_637 = arith.constant 0 : index
    %c2_638 = arith.constant 2 : index
    %883 = memref.load %arg11[%c0_637, %c2_638] : memref<4x3xf32, #tpu.memory_space<smem>>
    %c1_639 = arith.constant 1 : index
    %c2_640 = arith.constant 2 : index
    %884 = memref.load %arg11[%c1_639, %c2_640] : memref<4x3xf32, #tpu.memory_space<smem>>
    %c2_641 = arith.constant 2 : index
    %c2_642 = arith.constant 2 : index
    %885 = memref.load %arg11[%c2_641, %c2_642] : memref<4x3xf32, #tpu.memory_space<smem>>
    %c3_643 = arith.constant 3 : index
    %c2_644 = arith.constant 2 : index
    %886 = memref.load %arg11[%c3_643, %c2_644] : memref<4x3xf32, #tpu.memory_space<smem>>
    %c0_645 = arith.constant 0 : index
    %c0_646 = arith.constant 0 : index
    %c1_647 = arith.constant 1 : index
    %c0_648 = arith.constant 0 : index
    %887 = vector.load %arg1[%c0_645, %c0_646, %c1_647, %c0_648] : memref<4x1x8x256xf32, #tpu.memory_space<vmem>>, vector<1x1x7x256xf32>
    %888 = vector.shape_cast %887 : vector<1x1x7x256xf32> to vector<7x256xf32>
    %c1_649 = arith.constant 1 : index
    %c0_650 = arith.constant 0 : index
    %c1_651 = arith.constant 1 : index
    %c0_652 = arith.constant 0 : index
    %889 = vector.load %arg1[%c1_649, %c0_650, %c1_651, %c0_652] : memref<4x1x8x256xf32, #tpu.memory_space<vmem>>, vector<1x1x7x256xf32>
    %890 = vector.shape_cast %889 : vector<1x1x7x256xf32> to vector<7x256xf32>
    %c2_653 = arith.constant 2 : index
    %c0_654 = arith.constant 0 : index
    %c1_655 = arith.constant 1 : index
    %c0_656 = arith.constant 0 : index
    %891 = vector.load %arg1[%c2_653, %c0_654, %c1_655, %c0_656] : memref<4x1x8x256xf32, #tpu.memory_space<vmem>>, vector<1x1x7x256xf32>
    %892 = vector.shape_cast %891 : vector<1x1x7x256xf32> to vector<7x256xf32>
    %c3_657 = arith.constant 3 : index
    %c0_658 = arith.constant 0 : index
    %c1_659 = arith.constant 1 : index
    %c0_660 = arith.constant 0 : index
    %893 = vector.load %arg1[%c3_657, %c0_658, %c1_659, %c0_660] : memref<4x1x8x256xf32, #tpu.memory_space<vmem>>, vector<1x1x7x256xf32>
    %894 = vector.shape_cast %893 : vector<1x1x7x256xf32> to vector<7x256xf32>
    %c0_661 = arith.constant 0 : index
    %c0_662 = arith.constant 0 : index
    %c0_663 = arith.constant 0 : index
    %c0_664 = arith.constant 0 : index
    %895 = vector.load %arg4[%c0_661, %c0_662, %c0_663, %c0_664] : memref<3x1x7x256xf32, #tpu.memory_space<vmem>>, vector<1x1x7x256xf32>
    %896 = vector.shape_cast %895 : vector<1x1x7x256xf32> to vector<7x256xf32>
    %c1_665 = arith.constant 1 : index
    %c0_666 = arith.constant 0 : index
    %c0_667 = arith.constant 0 : index
    %c0_668 = arith.constant 0 : index
    %897 = vector.load %arg4[%c1_665, %c0_666, %c0_667, %c0_668] : memref<3x1x7x256xf32, #tpu.memory_space<vmem>>, vector<1x1x7x256xf32>
    %898 = vector.shape_cast %897 : vector<1x1x7x256xf32> to vector<7x256xf32>
    %c2_669 = arith.constant 2 : index
    %c0_670 = arith.constant 0 : index
    %c0_671 = arith.constant 0 : index
    %c0_672 = arith.constant 0 : index
    %899 = vector.load %arg4[%c2_669, %c0_670, %c0_671, %c0_672] : memref<3x1x7x256xf32, #tpu.memory_space<vmem>>, vector<1x1x7x256xf32>
    %900 = vector.shape_cast %899 : vector<1x1x7x256xf32> to vector<7x256xf32>
    %901 = vector.broadcast %875 : f32 to vector<7x256xf32>
    %902 = arith.mulf %896, %901 : vector<7x256xf32>
    %903 = vector.broadcast %879 : f32 to vector<7x256xf32>
    %904 = arith.mulf %898, %903 : vector<7x256xf32>
    %905 = arith.addf %902, %904 : vector<7x256xf32>
    %906 = vector.broadcast %883 : f32 to vector<7x256xf32>
    %907 = arith.mulf %900, %906 : vector<7x256xf32>
    %908 = arith.addf %905, %907 : vector<7x256xf32>
    %909 = vector.broadcast %847 : f32 to vector<7x256xf32>
    %910 = arith.addf %908, %909 : vector<7x256xf32>
    %911 = arith.negf %910 : vector<7x256xf32>
    %912 = math.exp %911 : vector<7x256xf32>
    %cst_673 = arith.constant 1.000000e+00 : f32
    %913 = vector.broadcast %cst_673 : f32 to vector<7x256xf32>
    %914 = arith.addf %913, %912 : vector<7x256xf32>
    %915 = arith.divf %913, %914 : vector<7x256xf32>
    %916 = arith.mulf %910, %915 : vector<7x256xf32>
    %917 = vector.broadcast %876 : f32 to vector<7x256xf32>
    %918 = arith.mulf %896, %917 : vector<7x256xf32>
    %919 = vector.broadcast %880 : f32 to vector<7x256xf32>
    %920 = arith.mulf %898, %919 : vector<7x256xf32>
    %921 = arith.addf %918, %920 : vector<7x256xf32>
    %922 = vector.broadcast %884 : f32 to vector<7x256xf32>
    %923 = arith.mulf %900, %922 : vector<7x256xf32>
    %924 = arith.addf %921, %923 : vector<7x256xf32>
    %925 = vector.broadcast %848 : f32 to vector<7x256xf32>
    %926 = arith.addf %924, %925 : vector<7x256xf32>
    %927 = arith.negf %926 : vector<7x256xf32>
    %928 = math.exp %927 : vector<7x256xf32>
    %cst_674 = arith.constant 1.000000e+00 : f32
    %929 = vector.broadcast %cst_674 : f32 to vector<7x256xf32>
    %930 = arith.addf %929, %928 : vector<7x256xf32>
    %931 = arith.divf %929, %930 : vector<7x256xf32>
    %932 = arith.mulf %926, %931 : vector<7x256xf32>
    %933 = vector.broadcast %877 : f32 to vector<7x256xf32>
    %934 = arith.mulf %896, %933 : vector<7x256xf32>
    %935 = vector.broadcast %881 : f32 to vector<7x256xf32>
    %936 = arith.mulf %898, %935 : vector<7x256xf32>
    %937 = arith.addf %934, %936 : vector<7x256xf32>
    %938 = vector.broadcast %885 : f32 to vector<7x256xf32>
    %939 = arith.mulf %900, %938 : vector<7x256xf32>
    %940 = arith.addf %937, %939 : vector<7x256xf32>
    %941 = vector.broadcast %849 : f32 to vector<7x256xf32>
    %942 = arith.addf %940, %941 : vector<7x256xf32>
    %943 = arith.negf %942 : vector<7x256xf32>
    %944 = math.exp %943 : vector<7x256xf32>
    %cst_675 = arith.constant 1.000000e+00 : f32
    %945 = vector.broadcast %cst_675 : f32 to vector<7x256xf32>
    %946 = arith.addf %945, %944 : vector<7x256xf32>
    %947 = arith.divf %945, %946 : vector<7x256xf32>
    %948 = arith.mulf %942, %947 : vector<7x256xf32>
    %949 = vector.broadcast %878 : f32 to vector<7x256xf32>
    %950 = arith.mulf %896, %949 : vector<7x256xf32>
    %951 = vector.broadcast %882 : f32 to vector<7x256xf32>
    %952 = arith.mulf %898, %951 : vector<7x256xf32>
    %953 = arith.addf %950, %952 : vector<7x256xf32>
    %954 = vector.broadcast %886 : f32 to vector<7x256xf32>
    %955 = arith.mulf %900, %954 : vector<7x256xf32>
    %956 = arith.addf %953, %955 : vector<7x256xf32>
    %957 = vector.broadcast %850 : f32 to vector<7x256xf32>
    %958 = arith.addf %956, %957 : vector<7x256xf32>
    %959 = arith.negf %958 : vector<7x256xf32>
    %960 = math.exp %959 : vector<7x256xf32>
    %cst_676 = arith.constant 1.000000e+00 : f32
    %961 = vector.broadcast %cst_676 : f32 to vector<7x256xf32>
    %962 = arith.addf %961, %960 : vector<7x256xf32>
    %963 = arith.divf %961, %962 : vector<7x256xf32>
    %964 = arith.mulf %958, %963 : vector<7x256xf32>
    %c0_677 = arith.constant 0 : index
    %c0_678 = arith.constant 0 : index
    %c0_679 = arith.constant 0 : index
    %c0_680 = arith.constant 0 : index
    %965 = vector.load %arg5[%c0_677, %c0_678, %c0_679, %c0_680] : memref<4x1x7x1xf32, #tpu.memory_space<vmem>>, vector<1x1x7x1xf32>
    %966 = vector.shape_cast %965 : vector<1x1x7x1xf32> to vector<7x1xf32>
    %c1_681 = arith.constant 1 : index
    %c0_682 = arith.constant 0 : index
    %c0_683 = arith.constant 0 : index
    %c0_684 = arith.constant 0 : index
    %967 = vector.load %arg5[%c1_681, %c0_682, %c0_683, %c0_684] : memref<4x1x7x1xf32, #tpu.memory_space<vmem>>, vector<1x1x7x1xf32>
    %968 = vector.shape_cast %967 : vector<1x1x7x1xf32> to vector<7x1xf32>
    %c2_685 = arith.constant 2 : index
    %c0_686 = arith.constant 0 : index
    %c0_687 = arith.constant 0 : index
    %c0_688 = arith.constant 0 : index
    %969 = vector.load %arg5[%c2_685, %c0_686, %c0_687, %c0_688] : memref<4x1x7x1xf32, #tpu.memory_space<vmem>>, vector<1x1x7x1xf32>
    %970 = vector.shape_cast %969 : vector<1x1x7x1xf32> to vector<7x1xf32>
    %c3_689 = arith.constant 3 : index
    %c0_690 = arith.constant 0 : index
    %c0_691 = arith.constant 0 : index
    %c0_692 = arith.constant 0 : index
    %971 = vector.load %arg5[%c3_689, %c0_690, %c0_691, %c0_692] : memref<4x1x7x1xf32, #tpu.memory_space<vmem>>, vector<1x1x7x1xf32>
    %972 = vector.shape_cast %971 : vector<1x1x7x1xf32> to vector<7x1xf32>
    %973 = vector.broadcast %735 : f32 to vector<7x256xf32>
    %974 = arith.mulf %888, %973 : vector<7x256xf32>
    %975 = vector.broadcast %739 : f32 to vector<7x256xf32>
    %976 = arith.mulf %890, %975 : vector<7x256xf32>
    %977 = arith.addf %974, %976 : vector<7x256xf32>
    %978 = vector.broadcast %743 : f32 to vector<7x256xf32>
    %979 = arith.mulf %892, %978 : vector<7x256xf32>
    %980 = arith.addf %977, %979 : vector<7x256xf32>
    %981 = vector.broadcast %747 : f32 to vector<7x256xf32>
    %982 = arith.mulf %894, %981 : vector<7x256xf32>
    %983 = arith.addf %980, %982 : vector<7x256xf32>
    %984 = vector.broadcast %966 : vector<7x1xf32> to vector<7x256xf32>
    %985 = arith.addf %983, %984 : vector<7x256xf32>
    %986 = arith.addf %985, %916 : vector<7x256xf32>
    %987 = arith.negf %986 : vector<7x256xf32>
    %988 = math.exp %987 : vector<7x256xf32>
    %cst_693 = arith.constant 1.000000e+00 : f32
    %989 = vector.broadcast %cst_693 : f32 to vector<7x256xf32>
    %990 = arith.addf %989, %988 : vector<7x256xf32>
    %991 = arith.divf %989, %990 : vector<7x256xf32>
    %992 = arith.mulf %986, %991 : vector<7x256xf32>
    %993 = vector.broadcast %736 : f32 to vector<7x256xf32>
    %994 = arith.mulf %888, %993 : vector<7x256xf32>
    %995 = vector.broadcast %740 : f32 to vector<7x256xf32>
    %996 = arith.mulf %890, %995 : vector<7x256xf32>
    %997 = arith.addf %994, %996 : vector<7x256xf32>
    %998 = vector.broadcast %744 : f32 to vector<7x256xf32>
    %999 = arith.mulf %892, %998 : vector<7x256xf32>
    %1000 = arith.addf %997, %999 : vector<7x256xf32>
    %1001 = vector.broadcast %748 : f32 to vector<7x256xf32>
    %1002 = arith.mulf %894, %1001 : vector<7x256xf32>
    %1003 = arith.addf %1000, %1002 : vector<7x256xf32>
    %1004 = vector.broadcast %968 : vector<7x1xf32> to vector<7x256xf32>
    %1005 = arith.addf %1003, %1004 : vector<7x256xf32>
    %1006 = arith.addf %1005, %932 : vector<7x256xf32>
    %1007 = arith.negf %1006 : vector<7x256xf32>
    %1008 = math.exp %1007 : vector<7x256xf32>
    %cst_694 = arith.constant 1.000000e+00 : f32
    %1009 = vector.broadcast %cst_694 : f32 to vector<7x256xf32>
    %1010 = arith.addf %1009, %1008 : vector<7x256xf32>
    %1011 = arith.divf %1009, %1010 : vector<7x256xf32>
    %1012 = arith.mulf %1006, %1011 : vector<7x256xf32>
    %1013 = vector.broadcast %737 : f32 to vector<7x256xf32>
    %1014 = arith.mulf %888, %1013 : vector<7x256xf32>
    %1015 = vector.broadcast %741 : f32 to vector<7x256xf32>
    %1016 = arith.mulf %890, %1015 : vector<7x256xf32>
    %1017 = arith.addf %1014, %1016 : vector<7x256xf32>
    %1018 = vector.broadcast %745 : f32 to vector<7x256xf32>
    %1019 = arith.mulf %892, %1018 : vector<7x256xf32>
    %1020 = arith.addf %1017, %1019 : vector<7x256xf32>
    %1021 = vector.broadcast %749 : f32 to vector<7x256xf32>
    %1022 = arith.mulf %894, %1021 : vector<7x256xf32>
    %1023 = arith.addf %1020, %1022 : vector<7x256xf32>
    %1024 = vector.broadcast %970 : vector<7x1xf32> to vector<7x256xf32>
    %1025 = arith.addf %1023, %1024 : vector<7x256xf32>
    %1026 = arith.addf %1025, %948 : vector<7x256xf32>
    %1027 = arith.negf %1026 : vector<7x256xf32>
    %1028 = math.exp %1027 : vector<7x256xf32>
    %cst_695 = arith.constant 1.000000e+00 : f32
    %1029 = vector.broadcast %cst_695 : f32 to vector<7x256xf32>
    %1030 = arith.addf %1029, %1028 : vector<7x256xf32>
    %1031 = arith.divf %1029, %1030 : vector<7x256xf32>
    %1032 = arith.mulf %1026, %1031 : vector<7x256xf32>
    %1033 = vector.broadcast %738 : f32 to vector<7x256xf32>
    %1034 = arith.mulf %888, %1033 : vector<7x256xf32>
    %1035 = vector.broadcast %742 : f32 to vector<7x256xf32>
    %1036 = arith.mulf %890, %1035 : vector<7x256xf32>
    %1037 = arith.addf %1034, %1036 : vector<7x256xf32>
    %1038 = vector.broadcast %746 : f32 to vector<7x256xf32>
    %1039 = arith.mulf %892, %1038 : vector<7x256xf32>
    %1040 = arith.addf %1037, %1039 : vector<7x256xf32>
    %1041 = vector.broadcast %750 : f32 to vector<7x256xf32>
    %1042 = arith.mulf %894, %1041 : vector<7x256xf32>
    %1043 = arith.addf %1040, %1042 : vector<7x256xf32>
    %1044 = vector.broadcast %972 : vector<7x1xf32> to vector<7x256xf32>
    %1045 = arith.addf %1043, %1044 : vector<7x256xf32>
    %1046 = arith.addf %1045, %964 : vector<7x256xf32>
    %1047 = arith.negf %1046 : vector<7x256xf32>
    %1048 = math.exp %1047 : vector<7x256xf32>
    %cst_696 = arith.constant 1.000000e+00 : f32
    %1049 = vector.broadcast %cst_696 : f32 to vector<7x256xf32>
    %1050 = arith.addf %1049, %1048 : vector<7x256xf32>
    %1051 = arith.divf %1049, %1050 : vector<7x256xf32>
    %1052 = arith.mulf %1046, %1051 : vector<7x256xf32>
    %1053 = vector.broadcast %751 : f32 to vector<7x256xf32>
    %1054 = arith.mulf %992, %1053 : vector<7x256xf32>
    %1055 = vector.broadcast %755 : f32 to vector<7x256xf32>
    %1056 = arith.mulf %1012, %1055 : vector<7x256xf32>
    %1057 = arith.addf %1054, %1056 : vector<7x256xf32>
    %1058 = vector.broadcast %759 : f32 to vector<7x256xf32>
    %1059 = arith.mulf %1032, %1058 : vector<7x256xf32>
    %1060 = arith.addf %1057, %1059 : vector<7x256xf32>
    %1061 = vector.broadcast %763 : f32 to vector<7x256xf32>
    %1062 = arith.mulf %1052, %1061 : vector<7x256xf32>
    %1063 = arith.addf %1060, %1062 : vector<7x256xf32>
    %1064 = vector.broadcast %851 : f32 to vector<7x256xf32>
    %1065 = arith.addf %1063, %1064 : vector<7x256xf32>
    %1066 = arith.negf %1065 : vector<7x256xf32>
    %1067 = math.exp %1066 : vector<7x256xf32>
    %cst_697 = arith.constant 1.000000e+00 : f32
    %1068 = vector.broadcast %cst_697 : f32 to vector<7x256xf32>
    %1069 = arith.addf %1068, %1067 : vector<7x256xf32>
    %1070 = arith.divf %1068, %1069 : vector<7x256xf32>
    %1071 = arith.mulf %1065, %1070 : vector<7x256xf32>
    %1072 = vector.broadcast %752 : f32 to vector<7x256xf32>
    %1073 = arith.mulf %992, %1072 : vector<7x256xf32>
    %1074 = vector.broadcast %756 : f32 to vector<7x256xf32>
    %1075 = arith.mulf %1012, %1074 : vector<7x256xf32>
    %1076 = arith.addf %1073, %1075 : vector<7x256xf32>
    %1077 = vector.broadcast %760 : f32 to vector<7x256xf32>
    %1078 = arith.mulf %1032, %1077 : vector<7x256xf32>
    %1079 = arith.addf %1076, %1078 : vector<7x256xf32>
    %1080 = vector.broadcast %764 : f32 to vector<7x256xf32>
    %1081 = arith.mulf %1052, %1080 : vector<7x256xf32>
    %1082 = arith.addf %1079, %1081 : vector<7x256xf32>
    %1083 = vector.broadcast %852 : f32 to vector<7x256xf32>
    %1084 = arith.addf %1082, %1083 : vector<7x256xf32>
    %1085 = arith.negf %1084 : vector<7x256xf32>
    %1086 = math.exp %1085 : vector<7x256xf32>
    %cst_698 = arith.constant 1.000000e+00 : f32
    %1087 = vector.broadcast %cst_698 : f32 to vector<7x256xf32>
    %1088 = arith.addf %1087, %1086 : vector<7x256xf32>
    %1089 = arith.divf %1087, %1088 : vector<7x256xf32>
    %1090 = arith.mulf %1084, %1089 : vector<7x256xf32>
    %1091 = vector.broadcast %753 : f32 to vector<7x256xf32>
    %1092 = arith.mulf %992, %1091 : vector<7x256xf32>
    %1093 = vector.broadcast %757 : f32 to vector<7x256xf32>
    %1094 = arith.mulf %1012, %1093 : vector<7x256xf32>
    %1095 = arith.addf %1092, %1094 : vector<7x256xf32>
    %1096 = vector.broadcast %761 : f32 to vector<7x256xf32>
    %1097 = arith.mulf %1032, %1096 : vector<7x256xf32>
    %1098 = arith.addf %1095, %1097 : vector<7x256xf32>
    %1099 = vector.broadcast %765 : f32 to vector<7x256xf32>
    %1100 = arith.mulf %1052, %1099 : vector<7x256xf32>
    %1101 = arith.addf %1098, %1100 : vector<7x256xf32>
    %1102 = vector.broadcast %853 : f32 to vector<7x256xf32>
    %1103 = arith.addf %1101, %1102 : vector<7x256xf32>
    %1104 = arith.negf %1103 : vector<7x256xf32>
    %1105 = math.exp %1104 : vector<7x256xf32>
    %cst_699 = arith.constant 1.000000e+00 : f32
    %1106 = vector.broadcast %cst_699 : f32 to vector<7x256xf32>
    %1107 = arith.addf %1106, %1105 : vector<7x256xf32>
    %1108 = arith.divf %1106, %1107 : vector<7x256xf32>
    %1109 = arith.mulf %1103, %1108 : vector<7x256xf32>
    %1110 = vector.broadcast %754 : f32 to vector<7x256xf32>
    %1111 = arith.mulf %992, %1110 : vector<7x256xf32>
    %1112 = vector.broadcast %758 : f32 to vector<7x256xf32>
    %1113 = arith.mulf %1012, %1112 : vector<7x256xf32>
    %1114 = arith.addf %1111, %1113 : vector<7x256xf32>
    %1115 = vector.broadcast %762 : f32 to vector<7x256xf32>
    %1116 = arith.mulf %1032, %1115 : vector<7x256xf32>
    %1117 = arith.addf %1114, %1116 : vector<7x256xf32>
    %1118 = vector.broadcast %766 : f32 to vector<7x256xf32>
    %1119 = arith.mulf %1052, %1118 : vector<7x256xf32>
    %1120 = arith.addf %1117, %1119 : vector<7x256xf32>
    %1121 = vector.broadcast %854 : f32 to vector<7x256xf32>
    %1122 = arith.addf %1120, %1121 : vector<7x256xf32>
    %1123 = arith.negf %1122 : vector<7x256xf32>
    %1124 = math.exp %1123 : vector<7x256xf32>
    %cst_700 = arith.constant 1.000000e+00 : f32
    %1125 = vector.broadcast %cst_700 : f32 to vector<7x256xf32>
    %1126 = arith.addf %1125, %1124 : vector<7x256xf32>
    %1127 = arith.divf %1125, %1126 : vector<7x256xf32>
    %1128 = arith.mulf %1122, %1127 : vector<7x256xf32>
    %1129 = vector.broadcast %767 : f32 to vector<7x256xf32>
    %1130 = arith.mulf %1071, %1129 : vector<7x256xf32>
    %1131 = vector.broadcast %771 : f32 to vector<7x256xf32>
    %1132 = arith.mulf %1090, %1131 : vector<7x256xf32>
    %1133 = arith.addf %1130, %1132 : vector<7x256xf32>
    %1134 = vector.broadcast %775 : f32 to vector<7x256xf32>
    %1135 = arith.mulf %1109, %1134 : vector<7x256xf32>
    %1136 = arith.addf %1133, %1135 : vector<7x256xf32>
    %1137 = vector.broadcast %779 : f32 to vector<7x256xf32>
    %1138 = arith.mulf %1128, %1137 : vector<7x256xf32>
    %1139 = arith.addf %1136, %1138 : vector<7x256xf32>
    %1140 = vector.broadcast %855 : f32 to vector<7x256xf32>
    %1141 = arith.addf %1139, %1140 : vector<7x256xf32>
    %1142 = arith.negf %1141 : vector<7x256xf32>
    %1143 = math.exp %1142 : vector<7x256xf32>
    %cst_701 = arith.constant 1.000000e+00 : f32
    %1144 = vector.broadcast %cst_701 : f32 to vector<7x256xf32>
    %1145 = arith.addf %1144, %1143 : vector<7x256xf32>
    %1146 = arith.divf %1144, %1145 : vector<7x256xf32>
    %1147 = arith.mulf %1141, %1146 : vector<7x256xf32>
    %1148 = vector.broadcast %768 : f32 to vector<7x256xf32>
    %1149 = arith.mulf %1071, %1148 : vector<7x256xf32>
    %1150 = vector.broadcast %772 : f32 to vector<7x256xf32>
    %1151 = arith.mulf %1090, %1150 : vector<7x256xf32>
    %1152 = arith.addf %1149, %1151 : vector<7x256xf32>
    %1153 = vector.broadcast %776 : f32 to vector<7x256xf32>
    %1154 = arith.mulf %1109, %1153 : vector<7x256xf32>
    %1155 = arith.addf %1152, %1154 : vector<7x256xf32>
    %1156 = vector.broadcast %780 : f32 to vector<7x256xf32>
    %1157 = arith.mulf %1128, %1156 : vector<7x256xf32>
    %1158 = arith.addf %1155, %1157 : vector<7x256xf32>
    %1159 = vector.broadcast %856 : f32 to vector<7x256xf32>
    %1160 = arith.addf %1158, %1159 : vector<7x256xf32>
    %1161 = arith.negf %1160 : vector<7x256xf32>
    %1162 = math.exp %1161 : vector<7x256xf32>
    %cst_702 = arith.constant 1.000000e+00 : f32
    %1163 = vector.broadcast %cst_702 : f32 to vector<7x256xf32>
    %1164 = arith.addf %1163, %1162 : vector<7x256xf32>
    %1165 = arith.divf %1163, %1164 : vector<7x256xf32>
    %1166 = arith.mulf %1160, %1165 : vector<7x256xf32>
    %1167 = vector.broadcast %769 : f32 to vector<7x256xf32>
    %1168 = arith.mulf %1071, %1167 : vector<7x256xf32>
    %1169 = vector.broadcast %773 : f32 to vector<7x256xf32>
    %1170 = arith.mulf %1090, %1169 : vector<7x256xf32>
    %1171 = arith.addf %1168, %1170 : vector<7x256xf32>
    %1172 = vector.broadcast %777 : f32 to vector<7x256xf32>
    %1173 = arith.mulf %1109, %1172 : vector<7x256xf32>
    %1174 = arith.addf %1171, %1173 : vector<7x256xf32>
    %1175 = vector.broadcast %781 : f32 to vector<7x256xf32>
    %1176 = arith.mulf %1128, %1175 : vector<7x256xf32>
    %1177 = arith.addf %1174, %1176 : vector<7x256xf32>
    %1178 = vector.broadcast %857 : f32 to vector<7x256xf32>
    %1179 = arith.addf %1177, %1178 : vector<7x256xf32>
    %1180 = arith.negf %1179 : vector<7x256xf32>
    %1181 = math.exp %1180 : vector<7x256xf32>
    %cst_703 = arith.constant 1.000000e+00 : f32
    %1182 = vector.broadcast %cst_703 : f32 to vector<7x256xf32>
    %1183 = arith.addf %1182, %1181 : vector<7x256xf32>
    %1184 = arith.divf %1182, %1183 : vector<7x256xf32>
    %1185 = arith.mulf %1179, %1184 : vector<7x256xf32>
    %1186 = vector.broadcast %770 : f32 to vector<7x256xf32>
    %1187 = arith.mulf %1071, %1186 : vector<7x256xf32>
    %1188 = vector.broadcast %774 : f32 to vector<7x256xf32>
    %1189 = arith.mulf %1090, %1188 : vector<7x256xf32>
    %1190 = arith.addf %1187, %1189 : vector<7x256xf32>
    %1191 = vector.broadcast %778 : f32 to vector<7x256xf32>
    %1192 = arith.mulf %1109, %1191 : vector<7x256xf32>
    %1193 = arith.addf %1190, %1192 : vector<7x256xf32>
    %1194 = vector.broadcast %782 : f32 to vector<7x256xf32>
    %1195 = arith.mulf %1128, %1194 : vector<7x256xf32>
    %1196 = arith.addf %1193, %1195 : vector<7x256xf32>
    %1197 = vector.broadcast %858 : f32 to vector<7x256xf32>
    %1198 = arith.addf %1196, %1197 : vector<7x256xf32>
    %1199 = arith.negf %1198 : vector<7x256xf32>
    %1200 = math.exp %1199 : vector<7x256xf32>
    %cst_704 = arith.constant 1.000000e+00 : f32
    %1201 = vector.broadcast %cst_704 : f32 to vector<7x256xf32>
    %1202 = arith.addf %1201, %1200 : vector<7x256xf32>
    %1203 = arith.divf %1201, %1202 : vector<7x256xf32>
    %1204 = arith.mulf %1198, %1203 : vector<7x256xf32>
    %1205 = vector.broadcast %783 : f32 to vector<7x256xf32>
    %1206 = arith.mulf %1147, %1205 : vector<7x256xf32>
    %1207 = vector.broadcast %787 : f32 to vector<7x256xf32>
    %1208 = arith.mulf %1166, %1207 : vector<7x256xf32>
    %1209 = arith.addf %1206, %1208 : vector<7x256xf32>
    %1210 = vector.broadcast %791 : f32 to vector<7x256xf32>
    %1211 = arith.mulf %1185, %1210 : vector<7x256xf32>
    %1212 = arith.addf %1209, %1211 : vector<7x256xf32>
    %1213 = vector.broadcast %795 : f32 to vector<7x256xf32>
    %1214 = arith.mulf %1204, %1213 : vector<7x256xf32>
    %1215 = arith.addf %1212, %1214 : vector<7x256xf32>
    %1216 = vector.broadcast %859 : f32 to vector<7x256xf32>
    %1217 = arith.addf %1215, %1216 : vector<7x256xf32>
    %1218 = arith.negf %1217 : vector<7x256xf32>
    %1219 = math.exp %1218 : vector<7x256xf32>
    %cst_705 = arith.constant 1.000000e+00 : f32
    %1220 = vector.broadcast %cst_705 : f32 to vector<7x256xf32>
    %1221 = arith.addf %1220, %1219 : vector<7x256xf32>
    %1222 = arith.divf %1220, %1221 : vector<7x256xf32>
    %1223 = arith.mulf %1217, %1222 : vector<7x256xf32>
    %1224 = vector.broadcast %784 : f32 to vector<7x256xf32>
    %1225 = arith.mulf %1147, %1224 : vector<7x256xf32>
    %1226 = vector.broadcast %788 : f32 to vector<7x256xf32>
    %1227 = arith.mulf %1166, %1226 : vector<7x256xf32>
    %1228 = arith.addf %1225, %1227 : vector<7x256xf32>
    %1229 = vector.broadcast %792 : f32 to vector<7x256xf32>
    %1230 = arith.mulf %1185, %1229 : vector<7x256xf32>
    %1231 = arith.addf %1228, %1230 : vector<7x256xf32>
    %1232 = vector.broadcast %796 : f32 to vector<7x256xf32>
    %1233 = arith.mulf %1204, %1232 : vector<7x256xf32>
    %1234 = arith.addf %1231, %1233 : vector<7x256xf32>
    %1235 = vector.broadcast %860 : f32 to vector<7x256xf32>
    %1236 = arith.addf %1234, %1235 : vector<7x256xf32>
    %1237 = arith.negf %1236 : vector<7x256xf32>
    %1238 = math.exp %1237 : vector<7x256xf32>
    %cst_706 = arith.constant 1.000000e+00 : f32
    %1239 = vector.broadcast %cst_706 : f32 to vector<7x256xf32>
    %1240 = arith.addf %1239, %1238 : vector<7x256xf32>
    %1241 = arith.divf %1239, %1240 : vector<7x256xf32>
    %1242 = arith.mulf %1236, %1241 : vector<7x256xf32>
    %1243 = vector.broadcast %785 : f32 to vector<7x256xf32>
    %1244 = arith.mulf %1147, %1243 : vector<7x256xf32>
    %1245 = vector.broadcast %789 : f32 to vector<7x256xf32>
    %1246 = arith.mulf %1166, %1245 : vector<7x256xf32>
    %1247 = arith.addf %1244, %1246 : vector<7x256xf32>
    %1248 = vector.broadcast %793 : f32 to vector<7x256xf32>
    %1249 = arith.mulf %1185, %1248 : vector<7x256xf32>
    %1250 = arith.addf %1247, %1249 : vector<7x256xf32>
    %1251 = vector.broadcast %797 : f32 to vector<7x256xf32>
    %1252 = arith.mulf %1204, %1251 : vector<7x256xf32>
    %1253 = arith.addf %1250, %1252 : vector<7x256xf32>
    %1254 = vector.broadcast %861 : f32 to vector<7x256xf32>
    %1255 = arith.addf %1253, %1254 : vector<7x256xf32>
    %1256 = arith.negf %1255 : vector<7x256xf32>
    %1257 = math.exp %1256 : vector<7x256xf32>
    %cst_707 = arith.constant 1.000000e+00 : f32
    %1258 = vector.broadcast %cst_707 : f32 to vector<7x256xf32>
    %1259 = arith.addf %1258, %1257 : vector<7x256xf32>
    %1260 = arith.divf %1258, %1259 : vector<7x256xf32>
    %1261 = arith.mulf %1255, %1260 : vector<7x256xf32>
    %1262 = vector.broadcast %786 : f32 to vector<7x256xf32>
    %1263 = arith.mulf %1147, %1262 : vector<7x256xf32>
    %1264 = vector.broadcast %790 : f32 to vector<7x256xf32>
    %1265 = arith.mulf %1166, %1264 : vector<7x256xf32>
    %1266 = arith.addf %1263, %1265 : vector<7x256xf32>
    %1267 = vector.broadcast %794 : f32 to vector<7x256xf32>
    %1268 = arith.mulf %1185, %1267 : vector<7x256xf32>
    %1269 = arith.addf %1266, %1268 : vector<7x256xf32>
    %1270 = vector.broadcast %798 : f32 to vector<7x256xf32>
    %1271 = arith.mulf %1204, %1270 : vector<7x256xf32>
    %1272 = arith.addf %1269, %1271 : vector<7x256xf32>
    %1273 = vector.broadcast %862 : f32 to vector<7x256xf32>
    %1274 = arith.addf %1272, %1273 : vector<7x256xf32>
    %1275 = arith.negf %1274 : vector<7x256xf32>
    %1276 = math.exp %1275 : vector<7x256xf32>
    %cst_708 = arith.constant 1.000000e+00 : f32
    %1277 = vector.broadcast %cst_708 : f32 to vector<7x256xf32>
    %1278 = arith.addf %1277, %1276 : vector<7x256xf32>
    %1279 = arith.divf %1277, %1278 : vector<7x256xf32>
    %1280 = arith.mulf %1274, %1279 : vector<7x256xf32>
    %1281 = vector.broadcast %799 : f32 to vector<7x256xf32>
    %1282 = arith.mulf %1071, %1281 : vector<7x256xf32>
    %1283 = vector.broadcast %803 : f32 to vector<7x256xf32>
    %1284 = arith.mulf %1090, %1283 : vector<7x256xf32>
    %1285 = arith.addf %1282, %1284 : vector<7x256xf32>
    %1286 = vector.broadcast %807 : f32 to vector<7x256xf32>
    %1287 = arith.mulf %1109, %1286 : vector<7x256xf32>
    %1288 = arith.addf %1285, %1287 : vector<7x256xf32>
    %1289 = vector.broadcast %811 : f32 to vector<7x256xf32>
    %1290 = arith.mulf %1128, %1289 : vector<7x256xf32>
    %1291 = arith.addf %1288, %1290 : vector<7x256xf32>
    %1292 = vector.broadcast %863 : f32 to vector<7x256xf32>
    %1293 = arith.addf %1291, %1292 : vector<7x256xf32>
    %1294 = vector.broadcast %0 : f32 to vector<7x256xf32>
    %1295 = arith.mulf %1293, %1294 : vector<7x256xf32>
    %1296 = vector.broadcast %800 : f32 to vector<7x256xf32>
    %1297 = arith.mulf %1071, %1296 : vector<7x256xf32>
    %1298 = vector.broadcast %804 : f32 to vector<7x256xf32>
    %1299 = arith.mulf %1090, %1298 : vector<7x256xf32>
    %1300 = arith.addf %1297, %1299 : vector<7x256xf32>
    %1301 = vector.broadcast %808 : f32 to vector<7x256xf32>
    %1302 = arith.mulf %1109, %1301 : vector<7x256xf32>
    %1303 = arith.addf %1300, %1302 : vector<7x256xf32>
    %1304 = vector.broadcast %812 : f32 to vector<7x256xf32>
    %1305 = arith.mulf %1128, %1304 : vector<7x256xf32>
    %1306 = arith.addf %1303, %1305 : vector<7x256xf32>
    %1307 = vector.broadcast %864 : f32 to vector<7x256xf32>
    %1308 = arith.addf %1306, %1307 : vector<7x256xf32>
    %1309 = vector.broadcast %0 : f32 to vector<7x256xf32>
    %1310 = arith.mulf %1308, %1309 : vector<7x256xf32>
    %1311 = vector.broadcast %801 : f32 to vector<7x256xf32>
    %1312 = arith.mulf %1071, %1311 : vector<7x256xf32>
    %1313 = vector.broadcast %805 : f32 to vector<7x256xf32>
    %1314 = arith.mulf %1090, %1313 : vector<7x256xf32>
    %1315 = arith.addf %1312, %1314 : vector<7x256xf32>
    %1316 = vector.broadcast %809 : f32 to vector<7x256xf32>
    %1317 = arith.mulf %1109, %1316 : vector<7x256xf32>
    %1318 = arith.addf %1315, %1317 : vector<7x256xf32>
    %1319 = vector.broadcast %813 : f32 to vector<7x256xf32>
    %1320 = arith.mulf %1128, %1319 : vector<7x256xf32>
    %1321 = arith.addf %1318, %1320 : vector<7x256xf32>
    %1322 = vector.broadcast %865 : f32 to vector<7x256xf32>
    %1323 = arith.addf %1321, %1322 : vector<7x256xf32>
    %1324 = vector.broadcast %0 : f32 to vector<7x256xf32>
    %1325 = arith.mulf %1323, %1324 : vector<7x256xf32>
    %1326 = vector.broadcast %802 : f32 to vector<7x256xf32>
    %1327 = arith.mulf %1071, %1326 : vector<7x256xf32>
    %1328 = vector.broadcast %806 : f32 to vector<7x256xf32>
    %1329 = arith.mulf %1090, %1328 : vector<7x256xf32>
    %1330 = arith.addf %1327, %1329 : vector<7x256xf32>
    %1331 = vector.broadcast %810 : f32 to vector<7x256xf32>
    %1332 = arith.mulf %1109, %1331 : vector<7x256xf32>
    %1333 = arith.addf %1330, %1332 : vector<7x256xf32>
    %1334 = vector.broadcast %814 : f32 to vector<7x256xf32>
    %1335 = arith.mulf %1128, %1334 : vector<7x256xf32>
    %1336 = arith.addf %1333, %1335 : vector<7x256xf32>
    %1337 = vector.broadcast %866 : f32 to vector<7x256xf32>
    %1338 = arith.addf %1336, %1337 : vector<7x256xf32>
    %1339 = vector.broadcast %0 : f32 to vector<7x256xf32>
    %1340 = arith.mulf %1338, %1339 : vector<7x256xf32>
    %1341 = vector.broadcast %815 : f32 to vector<7x256xf32>
    %1342 = arith.mulf %1147, %1341 : vector<7x256xf32>
    %1343 = vector.broadcast %819 : f32 to vector<7x256xf32>
    %1344 = arith.mulf %1166, %1343 : vector<7x256xf32>
    %1345 = arith.addf %1342, %1344 : vector<7x256xf32>
    %1346 = vector.broadcast %823 : f32 to vector<7x256xf32>
    %1347 = arith.mulf %1185, %1346 : vector<7x256xf32>
    %1348 = arith.addf %1345, %1347 : vector<7x256xf32>
    %1349 = vector.broadcast %827 : f32 to vector<7x256xf32>
    %1350 = arith.mulf %1204, %1349 : vector<7x256xf32>
    %1351 = arith.addf %1348, %1350 : vector<7x256xf32>
    %1352 = vector.broadcast %867 : f32 to vector<7x256xf32>
    %1353 = arith.addf %1351, %1352 : vector<7x256xf32>
    %1354 = vector.broadcast %0 : f32 to vector<7x256xf32>
    %1355 = arith.mulf %1353, %1354 : vector<7x256xf32>
    %1356 = vector.broadcast %816 : f32 to vector<7x256xf32>
    %1357 = arith.mulf %1147, %1356 : vector<7x256xf32>
    %1358 = vector.broadcast %820 : f32 to vector<7x256xf32>
    %1359 = arith.mulf %1166, %1358 : vector<7x256xf32>
    %1360 = arith.addf %1357, %1359 : vector<7x256xf32>
    %1361 = vector.broadcast %824 : f32 to vector<7x256xf32>
    %1362 = arith.mulf %1185, %1361 : vector<7x256xf32>
    %1363 = arith.addf %1360, %1362 : vector<7x256xf32>
    %1364 = vector.broadcast %828 : f32 to vector<7x256xf32>
    %1365 = arith.mulf %1204, %1364 : vector<7x256xf32>
    %1366 = arith.addf %1363, %1365 : vector<7x256xf32>
    %1367 = vector.broadcast %868 : f32 to vector<7x256xf32>
    %1368 = arith.addf %1366, %1367 : vector<7x256xf32>
    %1369 = vector.broadcast %0 : f32 to vector<7x256xf32>
    %1370 = arith.mulf %1368, %1369 : vector<7x256xf32>
    %1371 = vector.broadcast %817 : f32 to vector<7x256xf32>
    %1372 = arith.mulf %1147, %1371 : vector<7x256xf32>
    %1373 = vector.broadcast %821 : f32 to vector<7x256xf32>
    %1374 = arith.mulf %1166, %1373 : vector<7x256xf32>
    %1375 = arith.addf %1372, %1374 : vector<7x256xf32>
    %1376 = vector.broadcast %825 : f32 to vector<7x256xf32>
    %1377 = arith.mulf %1185, %1376 : vector<7x256xf32>
    %1378 = arith.addf %1375, %1377 : vector<7x256xf32>
    %1379 = vector.broadcast %829 : f32 to vector<7x256xf32>
    %1380 = arith.mulf %1204, %1379 : vector<7x256xf32>
    %1381 = arith.addf %1378, %1380 : vector<7x256xf32>
    %1382 = vector.broadcast %869 : f32 to vector<7x256xf32>
    %1383 = arith.addf %1381, %1382 : vector<7x256xf32>
    %1384 = vector.broadcast %0 : f32 to vector<7x256xf32>
    %1385 = arith.mulf %1383, %1384 : vector<7x256xf32>
    %1386 = vector.broadcast %818 : f32 to vector<7x256xf32>
    %1387 = arith.mulf %1147, %1386 : vector<7x256xf32>
    %1388 = vector.broadcast %822 : f32 to vector<7x256xf32>
    %1389 = arith.mulf %1166, %1388 : vector<7x256xf32>
    %1390 = arith.addf %1387, %1389 : vector<7x256xf32>
    %1391 = vector.broadcast %826 : f32 to vector<7x256xf32>
    %1392 = arith.mulf %1185, %1391 : vector<7x256xf32>
    %1393 = arith.addf %1390, %1392 : vector<7x256xf32>
    %1394 = vector.broadcast %830 : f32 to vector<7x256xf32>
    %1395 = arith.mulf %1204, %1394 : vector<7x256xf32>
    %1396 = arith.addf %1393, %1395 : vector<7x256xf32>
    %1397 = vector.broadcast %870 : f32 to vector<7x256xf32>
    %1398 = arith.addf %1396, %1397 : vector<7x256xf32>
    %1399 = vector.broadcast %0 : f32 to vector<7x256xf32>
    %1400 = arith.mulf %1398, %1399 : vector<7x256xf32>
    %1401 = vector.broadcast %831 : f32 to vector<7x256xf32>
    %1402 = arith.mulf %1223, %1401 : vector<7x256xf32>
    %1403 = vector.broadcast %835 : f32 to vector<7x256xf32>
    %1404 = arith.mulf %1242, %1403 : vector<7x256xf32>
    %1405 = arith.addf %1402, %1404 : vector<7x256xf32>
    %1406 = vector.broadcast %839 : f32 to vector<7x256xf32>
    %1407 = arith.mulf %1261, %1406 : vector<7x256xf32>
    %1408 = arith.addf %1405, %1407 : vector<7x256xf32>
    %1409 = vector.broadcast %843 : f32 to vector<7x256xf32>
    %1410 = arith.mulf %1280, %1409 : vector<7x256xf32>
    %1411 = arith.addf %1408, %1410 : vector<7x256xf32>
    %1412 = vector.broadcast %871 : f32 to vector<7x256xf32>
    %1413 = arith.addf %1411, %1412 : vector<7x256xf32>
    %1414 = vector.broadcast %0 : f32 to vector<7x256xf32>
    %1415 = arith.mulf %1413, %1414 : vector<7x256xf32>
    %1416 = vector.broadcast %832 : f32 to vector<7x256xf32>
    %1417 = arith.mulf %1223, %1416 : vector<7x256xf32>
    %1418 = vector.broadcast %836 : f32 to vector<7x256xf32>
    %1419 = arith.mulf %1242, %1418 : vector<7x256xf32>
    %1420 = arith.addf %1417, %1419 : vector<7x256xf32>
    %1421 = vector.broadcast %840 : f32 to vector<7x256xf32>
    %1422 = arith.mulf %1261, %1421 : vector<7x256xf32>
    %1423 = arith.addf %1420, %1422 : vector<7x256xf32>
    %1424 = vector.broadcast %844 : f32 to vector<7x256xf32>
    %1425 = arith.mulf %1280, %1424 : vector<7x256xf32>
    %1426 = arith.addf %1423, %1425 : vector<7x256xf32>
    %1427 = vector.broadcast %872 : f32 to vector<7x256xf32>
    %1428 = arith.addf %1426, %1427 : vector<7x256xf32>
    %1429 = vector.broadcast %0 : f32 to vector<7x256xf32>
    %1430 = arith.mulf %1428, %1429 : vector<7x256xf32>
    %1431 = vector.broadcast %833 : f32 to vector<7x256xf32>
    %1432 = arith.mulf %1223, %1431 : vector<7x256xf32>
    %1433 = vector.broadcast %837 : f32 to vector<7x256xf32>
    %1434 = arith.mulf %1242, %1433 : vector<7x256xf32>
    %1435 = arith.addf %1432, %1434 : vector<7x256xf32>
    %1436 = vector.broadcast %841 : f32 to vector<7x256xf32>
    %1437 = arith.mulf %1261, %1436 : vector<7x256xf32>
    %1438 = arith.addf %1435, %1437 : vector<7x256xf32>
    %1439 = vector.broadcast %845 : f32 to vector<7x256xf32>
    %1440 = arith.mulf %1280, %1439 : vector<7x256xf32>
    %1441 = arith.addf %1438, %1440 : vector<7x256xf32>
    %1442 = vector.broadcast %873 : f32 to vector<7x256xf32>
    %1443 = arith.addf %1441, %1442 : vector<7x256xf32>
    %1444 = vector.broadcast %0 : f32 to vector<7x256xf32>
    %1445 = arith.mulf %1443, %1444 : vector<7x256xf32>
    %1446 = vector.broadcast %834 : f32 to vector<7x256xf32>
    %1447 = arith.mulf %1223, %1446 : vector<7x256xf32>
    %1448 = vector.broadcast %838 : f32 to vector<7x256xf32>
    %1449 = arith.mulf %1242, %1448 : vector<7x256xf32>
    %1450 = arith.addf %1447, %1449 : vector<7x256xf32>
    %1451 = vector.broadcast %842 : f32 to vector<7x256xf32>
    %1452 = arith.mulf %1261, %1451 : vector<7x256xf32>
    %1453 = arith.addf %1450, %1452 : vector<7x256xf32>
    %1454 = vector.broadcast %846 : f32 to vector<7x256xf32>
    %1455 = arith.mulf %1280, %1454 : vector<7x256xf32>
    %1456 = arith.addf %1453, %1455 : vector<7x256xf32>
    %1457 = vector.broadcast %874 : f32 to vector<7x256xf32>
    %1458 = arith.addf %1456, %1457 : vector<7x256xf32>
    %1459 = vector.broadcast %0 : f32 to vector<7x256xf32>
    %1460 = arith.mulf %1458, %1459 : vector<7x256xf32>
    %1461 = arith.addf %1295, %1355 : vector<7x256xf32>
    %1462 = arith.addf %1461, %1415 : vector<7x256xf32>
    %1463 = arith.addf %1310, %1370 : vector<7x256xf32>
    %1464 = arith.addf %1463, %1430 : vector<7x256xf32>
    %1465 = arith.addf %1325, %1385 : vector<7x256xf32>
    %1466 = arith.addf %1465, %1445 : vector<7x256xf32>
    %1467 = arith.addf %1340, %1400 : vector<7x256xf32>
    %1468 = arith.addf %1467, %1460 : vector<7x256xf32>
    %1469 = arith.addf %728, %1462 : vector<7x256xf32>
    %1470 = arith.addf %730, %1464 : vector<7x256xf32>
    %1471 = arith.addf %732, %1466 : vector<7x256xf32>
    %1472 = arith.addf %734, %1468 : vector<7x256xf32>
    %c0_709 = arith.constant 0 : index
    %c0_710 = arith.constant 0 : index
    %1473 = memref.load %arg13[%c0_709, %c0_710] : memref<4x8xf32, #tpu.memory_space<smem>>
    %c1_711 = arith.constant 1 : index
    %c0_712 = arith.constant 0 : index
    %1474 = memref.load %arg13[%c1_711, %c0_712] : memref<4x8xf32, #tpu.memory_space<smem>>
    %c2_713 = arith.constant 2 : index
    %c0_714 = arith.constant 0 : index
    %1475 = memref.load %arg13[%c2_713, %c0_714] : memref<4x8xf32, #tpu.memory_space<smem>>
    %c3_715 = arith.constant 3 : index
    %c0_716 = arith.constant 0 : index
    %1476 = memref.load %arg13[%c3_715, %c0_716] : memref<4x8xf32, #tpu.memory_space<smem>>
    %c0_717 = arith.constant 0 : index
    %c1_718 = arith.constant 1 : index
    %1477 = memref.load %arg13[%c0_717, %c1_718] : memref<4x8xf32, #tpu.memory_space<smem>>
    %c1_719 = arith.constant 1 : index
    %c1_720 = arith.constant 1 : index
    %1478 = memref.load %arg13[%c1_719, %c1_720] : memref<4x8xf32, #tpu.memory_space<smem>>
    %c2_721 = arith.constant 2 : index
    %c1_722 = arith.constant 1 : index
    %1479 = memref.load %arg13[%c2_721, %c1_722] : memref<4x8xf32, #tpu.memory_space<smem>>
    %c3_723 = arith.constant 3 : index
    %c1_724 = arith.constant 1 : index
    %1480 = memref.load %arg13[%c3_723, %c1_724] : memref<4x8xf32, #tpu.memory_space<smem>>
    %c0_725 = arith.constant 0 : index
    %c2_726 = arith.constant 2 : index
    %1481 = memref.load %arg13[%c0_725, %c2_726] : memref<4x8xf32, #tpu.memory_space<smem>>
    %c1_727 = arith.constant 1 : index
    %c2_728 = arith.constant 2 : index
    %1482 = memref.load %arg13[%c1_727, %c2_728] : memref<4x8xf32, #tpu.memory_space<smem>>
    %c2_729 = arith.constant 2 : index
    %c2_730 = arith.constant 2 : index
    %1483 = memref.load %arg13[%c2_729, %c2_730] : memref<4x8xf32, #tpu.memory_space<smem>>
    %c3_731 = arith.constant 3 : index
    %c2_732 = arith.constant 2 : index
    %1484 = memref.load %arg13[%c3_731, %c2_732] : memref<4x8xf32, #tpu.memory_space<smem>>
    %c0_733 = arith.constant 0 : index
    %c3_734 = arith.constant 3 : index
    %1485 = memref.load %arg13[%c0_733, %c3_734] : memref<4x8xf32, #tpu.memory_space<smem>>
    %c1_735 = arith.constant 1 : index
    %c3_736 = arith.constant 3 : index
    %1486 = memref.load %arg13[%c1_735, %c3_736] : memref<4x8xf32, #tpu.memory_space<smem>>
    %c2_737 = arith.constant 2 : index
    %c3_738 = arith.constant 3 : index
    %1487 = memref.load %arg13[%c2_737, %c3_738] : memref<4x8xf32, #tpu.memory_space<smem>>
    %c3_739 = arith.constant 3 : index
    %c3_740 = arith.constant 3 : index
    %1488 = memref.load %arg13[%c3_739, %c3_740] : memref<4x8xf32, #tpu.memory_space<smem>>
    %c0_741 = arith.constant 0 : index
    %c4_742 = arith.constant 4 : index
    %1489 = memref.load %arg13[%c0_741, %c4_742] : memref<4x8xf32, #tpu.memory_space<smem>>
    %c1_743 = arith.constant 1 : index
    %c4_744 = arith.constant 4 : index
    %1490 = memref.load %arg13[%c1_743, %c4_744] : memref<4x8xf32, #tpu.memory_space<smem>>
    %c2_745 = arith.constant 2 : index
    %c4_746 = arith.constant 4 : index
    %1491 = memref.load %arg13[%c2_745, %c4_746] : memref<4x8xf32, #tpu.memory_space<smem>>
    %c3_747 = arith.constant 3 : index
    %c4_748 = arith.constant 4 : index
    %1492 = memref.load %arg13[%c3_747, %c4_748] : memref<4x8xf32, #tpu.memory_space<smem>>
    %c0_749 = arith.constant 0 : index
    %c5_750 = arith.constant 5 : index
    %1493 = memref.load %arg13[%c0_749, %c5_750] : memref<4x8xf32, #tpu.memory_space<smem>>
    %c1_751 = arith.constant 1 : index
    %c5_752 = arith.constant 5 : index
    %1494 = memref.load %arg13[%c1_751, %c5_752] : memref<4x8xf32, #tpu.memory_space<smem>>
    %c2_753 = arith.constant 2 : index
    %c5_754 = arith.constant 5 : index
    %1495 = memref.load %arg13[%c2_753, %c5_754] : memref<4x8xf32, #tpu.memory_space<smem>>
    %c3_755 = arith.constant 3 : index
    %c5_756 = arith.constant 5 : index
    %1496 = memref.load %arg13[%c3_755, %c5_756] : memref<4x8xf32, #tpu.memory_space<smem>>
    %c0_757 = arith.constant 0 : index
    %c6_758 = arith.constant 6 : index
    %1497 = memref.load %arg13[%c0_757, %c6_758] : memref<4x8xf32, #tpu.memory_space<smem>>
    %c1_759 = arith.constant 1 : index
    %c6_760 = arith.constant 6 : index
    %1498 = memref.load %arg13[%c1_759, %c6_760] : memref<4x8xf32, #tpu.memory_space<smem>>
    %c2_761 = arith.constant 2 : index
    %c6_762 = arith.constant 6 : index
    %1499 = memref.load %arg13[%c2_761, %c6_762] : memref<4x8xf32, #tpu.memory_space<smem>>
    %c3_763 = arith.constant 3 : index
    %c6_764 = arith.constant 6 : index
    %1500 = memref.load %arg13[%c3_763, %c6_764] : memref<4x8xf32, #tpu.memory_space<smem>>
    %c0_765 = arith.constant 0 : index
    %c7_766 = arith.constant 7 : index
    %1501 = memref.load %arg13[%c0_765, %c7_766] : memref<4x8xf32, #tpu.memory_space<smem>>
    %c1_767 = arith.constant 1 : index
    %c7_768 = arith.constant 7 : index
    %1502 = memref.load %arg13[%c1_767, %c7_768] : memref<4x8xf32, #tpu.memory_space<smem>>
    %c2_769 = arith.constant 2 : index
    %c7_770 = arith.constant 7 : index
    %1503 = memref.load %arg13[%c2_769, %c7_770] : memref<4x8xf32, #tpu.memory_space<smem>>
    %c3_771 = arith.constant 3 : index
    %c7_772 = arith.constant 7 : index
    %1504 = memref.load %arg13[%c3_771, %c7_772] : memref<4x8xf32, #tpu.memory_space<smem>>
    %1505 = arith.index_cast %arg0 : i32 to index
    %c0_773 = arith.constant 0 : index
    %1506 = memref.load %arg12[%1505, %c0_773] : memref<2x4xf32, #tpu.memory_space<smem>>
    %1507 = arith.index_cast %arg0 : i32 to index
    %c1_774 = arith.constant 1 : index
    %1508 = memref.load %arg12[%1507, %c1_774] : memref<2x4xf32, #tpu.memory_space<smem>>
    %1509 = arith.index_cast %arg0 : i32 to index
    %c2_775 = arith.constant 2 : index
    %1510 = memref.load %arg12[%1509, %c2_775] : memref<2x4xf32, #tpu.memory_space<smem>>
    %1511 = arith.index_cast %arg0 : i32 to index
    %c3_776 = arith.constant 3 : index
    %1512 = memref.load %arg12[%1511, %c3_776] : memref<2x4xf32, #tpu.memory_space<smem>>
    %c0_777 = arith.constant 0 : index
    %c0_778 = arith.constant 0 : index
    %1513 = memref.load %arg14[%c0_777, %c0_778] : memref<1x4xf32, #tpu.memory_space<smem>>
    %c0_779 = arith.constant 0 : index
    %c1_780 = arith.constant 1 : index
    %1514 = memref.load %arg14[%c0_779, %c1_780] : memref<1x4xf32, #tpu.memory_space<smem>>
    %c0_781 = arith.constant 0 : index
    %c2_782 = arith.constant 2 : index
    %1515 = memref.load %arg14[%c0_781, %c2_782] : memref<1x4xf32, #tpu.memory_space<smem>>
    %c0_783 = arith.constant 0 : index
    %c3_784 = arith.constant 3 : index
    %1516 = memref.load %arg14[%c0_783, %c3_784] : memref<1x4xf32, #tpu.memory_space<smem>>
    %c0_785 = arith.constant 0 : index
    %c0_786 = arith.constant 0 : index
    %c0_787 = arith.constant 0 : index
    %c0_788 = arith.constant 0 : index
    %1517 = vector.load %arg1[%c0_785, %c0_786, %c0_787, %c0_788] : memref<4x1x8x256xf32, #tpu.memory_space<vmem>>, vector<1x1x8x256xf32>
    %1518 = vector.shape_cast %1517 : vector<1x1x8x256xf32> to vector<8x256xf32>
    %c1_789 = arith.constant 1 : index
    %c0_790 = arith.constant 0 : index
    %c0_791 = arith.constant 0 : index
    %c0_792 = arith.constant 0 : index
    %1519 = vector.load %arg1[%c1_789, %c0_790, %c0_791, %c0_792] : memref<4x1x8x256xf32, #tpu.memory_space<vmem>>, vector<1x1x8x256xf32>
    %1520 = vector.shape_cast %1519 : vector<1x1x8x256xf32> to vector<8x256xf32>
    %c2_793 = arith.constant 2 : index
    %c0_794 = arith.constant 0 : index
    %c0_795 = arith.constant 0 : index
    %c0_796 = arith.constant 0 : index
    %1521 = vector.load %arg1[%c2_793, %c0_794, %c0_795, %c0_796] : memref<4x1x8x256xf32, #tpu.memory_space<vmem>>, vector<1x1x8x256xf32>
    %1522 = vector.shape_cast %1521 : vector<1x1x8x256xf32> to vector<8x256xf32>
    %c3_797 = arith.constant 3 : index
    %c0_798 = arith.constant 0 : index
    %c0_799 = arith.constant 0 : index
    %c0_800 = arith.constant 0 : index
    %1523 = vector.load %arg1[%c3_797, %c0_798, %c0_799, %c0_800] : memref<4x1x8x256xf32, #tpu.memory_space<vmem>>, vector<1x1x8x256xf32>
    %1524 = vector.shape_cast %1523 : vector<1x1x8x256xf32> to vector<8x256xf32>
    %1525 = vector.broadcast %1473 : f32 to vector<8x256xf32>
    %1526 = arith.mulf %1518, %1525 : vector<8x256xf32>
    %1527 = vector.broadcast %1477 : f32 to vector<8x256xf32>
    %1528 = arith.mulf %1520, %1527 : vector<8x256xf32>
    %1529 = arith.addf %1526, %1528 : vector<8x256xf32>
    %1530 = vector.broadcast %1481 : f32 to vector<8x256xf32>
    %1531 = arith.mulf %1522, %1530 : vector<8x256xf32>
    %1532 = arith.addf %1529, %1531 : vector<8x256xf32>
    %1533 = vector.broadcast %1485 : f32 to vector<8x256xf32>
    %1534 = arith.mulf %1524, %1533 : vector<8x256xf32>
    %1535 = arith.addf %1532, %1534 : vector<8x256xf32>
    %1536 = vector.broadcast %1506 : f32 to vector<8x256xf32>
    %1537 = arith.addf %1535, %1536 : vector<8x256xf32>
    %1538 = arith.negf %1537 : vector<8x256xf32>
    %1539 = math.exp %1538 : vector<8x256xf32>
    %cst_801 = arith.constant 1.000000e+00 : f32
    %1540 = vector.broadcast %cst_801 : f32 to vector<8x256xf32>
    %1541 = arith.addf %1540, %1539 : vector<8x256xf32>
    %1542 = arith.divf %1540, %1541 : vector<8x256xf32>
    %1543 = arith.mulf %1537, %1542 : vector<8x256xf32>
    %1544 = vector.broadcast %1474 : f32 to vector<8x256xf32>
    %1545 = arith.mulf %1518, %1544 : vector<8x256xf32>
    %1546 = vector.broadcast %1478 : f32 to vector<8x256xf32>
    %1547 = arith.mulf %1520, %1546 : vector<8x256xf32>
    %1548 = arith.addf %1545, %1547 : vector<8x256xf32>
    %1549 = vector.broadcast %1482 : f32 to vector<8x256xf32>
    %1550 = arith.mulf %1522, %1549 : vector<8x256xf32>
    %1551 = arith.addf %1548, %1550 : vector<8x256xf32>
    %1552 = vector.broadcast %1486 : f32 to vector<8x256xf32>
    %1553 = arith.mulf %1524, %1552 : vector<8x256xf32>
    %1554 = arith.addf %1551, %1553 : vector<8x256xf32>
    %1555 = vector.broadcast %1508 : f32 to vector<8x256xf32>
    %1556 = arith.addf %1554, %1555 : vector<8x256xf32>
    %1557 = arith.negf %1556 : vector<8x256xf32>
    %1558 = math.exp %1557 : vector<8x256xf32>
    %cst_802 = arith.constant 1.000000e+00 : f32
    %1559 = vector.broadcast %cst_802 : f32 to vector<8x256xf32>
    %1560 = arith.addf %1559, %1558 : vector<8x256xf32>
    %1561 = arith.divf %1559, %1560 : vector<8x256xf32>
    %1562 = arith.mulf %1556, %1561 : vector<8x256xf32>
    %1563 = vector.broadcast %1475 : f32 to vector<8x256xf32>
    %1564 = arith.mulf %1518, %1563 : vector<8x256xf32>
    %1565 = vector.broadcast %1479 : f32 to vector<8x256xf32>
    %1566 = arith.mulf %1520, %1565 : vector<8x256xf32>
    %1567 = arith.addf %1564, %1566 : vector<8x256xf32>
    %1568 = vector.broadcast %1483 : f32 to vector<8x256xf32>
    %1569 = arith.mulf %1522, %1568 : vector<8x256xf32>
    %1570 = arith.addf %1567, %1569 : vector<8x256xf32>
    %1571 = vector.broadcast %1487 : f32 to vector<8x256xf32>
    %1572 = arith.mulf %1524, %1571 : vector<8x256xf32>
    %1573 = arith.addf %1570, %1572 : vector<8x256xf32>
    %1574 = vector.broadcast %1510 : f32 to vector<8x256xf32>
    %1575 = arith.addf %1573, %1574 : vector<8x256xf32>
    %1576 = arith.negf %1575 : vector<8x256xf32>
    %1577 = math.exp %1576 : vector<8x256xf32>
    %cst_803 = arith.constant 1.000000e+00 : f32
    %1578 = vector.broadcast %cst_803 : f32 to vector<8x256xf32>
    %1579 = arith.addf %1578, %1577 : vector<8x256xf32>
    %1580 = arith.divf %1578, %1579 : vector<8x256xf32>
    %1581 = arith.mulf %1575, %1580 : vector<8x256xf32>
    %1582 = vector.broadcast %1476 : f32 to vector<8x256xf32>
    %1583 = arith.mulf %1518, %1582 : vector<8x256xf32>
    %1584 = vector.broadcast %1480 : f32 to vector<8x256xf32>
    %1585 = arith.mulf %1520, %1584 : vector<8x256xf32>
    %1586 = arith.addf %1583, %1585 : vector<8x256xf32>
    %1587 = vector.broadcast %1484 : f32 to vector<8x256xf32>
    %1588 = arith.mulf %1522, %1587 : vector<8x256xf32>
    %1589 = arith.addf %1586, %1588 : vector<8x256xf32>
    %1590 = vector.broadcast %1488 : f32 to vector<8x256xf32>
    %1591 = arith.mulf %1524, %1590 : vector<8x256xf32>
    %1592 = arith.addf %1589, %1591 : vector<8x256xf32>
    %1593 = vector.broadcast %1512 : f32 to vector<8x256xf32>
    %1594 = arith.addf %1592, %1593 : vector<8x256xf32>
    %1595 = arith.negf %1594 : vector<8x256xf32>
    %1596 = math.exp %1595 : vector<8x256xf32>
    %cst_804 = arith.constant 1.000000e+00 : f32
    %1597 = vector.broadcast %cst_804 : f32 to vector<8x256xf32>
    %1598 = arith.addf %1597, %1596 : vector<8x256xf32>
    %1599 = arith.divf %1597, %1598 : vector<8x256xf32>
    %1600 = arith.mulf %1594, %1599 : vector<8x256xf32>
    %1601 = vector.broadcast %1489 : f32 to vector<8x256xf32>
    %1602 = arith.mulf %1543, %1601 : vector<8x256xf32>
    %1603 = vector.broadcast %1493 : f32 to vector<8x256xf32>
    %1604 = arith.mulf %1562, %1603 : vector<8x256xf32>
    %1605 = arith.addf %1602, %1604 : vector<8x256xf32>
    %1606 = vector.broadcast %1497 : f32 to vector<8x256xf32>
    %1607 = arith.mulf %1581, %1606 : vector<8x256xf32>
    %1608 = arith.addf %1605, %1607 : vector<8x256xf32>
    %1609 = vector.broadcast %1501 : f32 to vector<8x256xf32>
    %1610 = arith.mulf %1600, %1609 : vector<8x256xf32>
    %1611 = arith.addf %1608, %1610 : vector<8x256xf32>
    %1612 = vector.broadcast %1513 : f32 to vector<8x256xf32>
    %1613 = arith.addf %1611, %1612 : vector<8x256xf32>
    %1614 = vector.broadcast %1490 : f32 to vector<8x256xf32>
    %1615 = arith.mulf %1543, %1614 : vector<8x256xf32>
    %1616 = vector.broadcast %1494 : f32 to vector<8x256xf32>
    %1617 = arith.mulf %1562, %1616 : vector<8x256xf32>
    %1618 = arith.addf %1615, %1617 : vector<8x256xf32>
    %1619 = vector.broadcast %1498 : f32 to vector<8x256xf32>
    %1620 = arith.mulf %1581, %1619 : vector<8x256xf32>
    %1621 = arith.addf %1618, %1620 : vector<8x256xf32>
    %1622 = vector.broadcast %1502 : f32 to vector<8x256xf32>
    %1623 = arith.mulf %1600, %1622 : vector<8x256xf32>
    %1624 = arith.addf %1621, %1623 : vector<8x256xf32>
    %1625 = vector.broadcast %1514 : f32 to vector<8x256xf32>
    %1626 = arith.addf %1624, %1625 : vector<8x256xf32>
    %1627 = vector.broadcast %1491 : f32 to vector<8x256xf32>
    %1628 = arith.mulf %1543, %1627 : vector<8x256xf32>
    %1629 = vector.broadcast %1495 : f32 to vector<8x256xf32>
    %1630 = arith.mulf %1562, %1629 : vector<8x256xf32>
    %1631 = arith.addf %1628, %1630 : vector<8x256xf32>
    %1632 = vector.broadcast %1499 : f32 to vector<8x256xf32>
    %1633 = arith.mulf %1581, %1632 : vector<8x256xf32>
    %1634 = arith.addf %1631, %1633 : vector<8x256xf32>
    %1635 = vector.broadcast %1503 : f32 to vector<8x256xf32>
    %1636 = arith.mulf %1600, %1635 : vector<8x256xf32>
    %1637 = arith.addf %1634, %1636 : vector<8x256xf32>
    %1638 = vector.broadcast %1515 : f32 to vector<8x256xf32>
    %1639 = arith.addf %1637, %1638 : vector<8x256xf32>
    %1640 = vector.broadcast %1492 : f32 to vector<8x256xf32>
    %1641 = arith.mulf %1543, %1640 : vector<8x256xf32>
    %1642 = vector.broadcast %1496 : f32 to vector<8x256xf32>
    %1643 = arith.mulf %1562, %1642 : vector<8x256xf32>
    %1644 = arith.addf %1641, %1643 : vector<8x256xf32>
    %1645 = vector.broadcast %1500 : f32 to vector<8x256xf32>
    %1646 = arith.mulf %1581, %1645 : vector<8x256xf32>
    %1647 = arith.addf %1644, %1646 : vector<8x256xf32>
    %1648 = vector.broadcast %1504 : f32 to vector<8x256xf32>
    %1649 = arith.mulf %1600, %1648 : vector<8x256xf32>
    %1650 = arith.addf %1647, %1649 : vector<8x256xf32>
    %1651 = vector.broadcast %1516 : f32 to vector<8x256xf32>
    %1652 = arith.addf %1650, %1651 : vector<8x256xf32>
    %1653 = vector.broadcast %1489 : f32 to vector<7x256xf32>
    %1654 = arith.mulf %1469, %1653 : vector<7x256xf32>
    %1655 = vector.broadcast %1493 : f32 to vector<7x256xf32>
    %1656 = arith.mulf %1470, %1655 : vector<7x256xf32>
    %1657 = arith.addf %1654, %1656 : vector<7x256xf32>
    %1658 = vector.broadcast %1497 : f32 to vector<7x256xf32>
    %1659 = arith.mulf %1471, %1658 : vector<7x256xf32>
    %1660 = arith.addf %1657, %1659 : vector<7x256xf32>
    %1661 = vector.broadcast %1501 : f32 to vector<7x256xf32>
    %1662 = arith.mulf %1472, %1661 : vector<7x256xf32>
    %1663 = arith.addf %1660, %1662 : vector<7x256xf32>
    %1664 = vector.broadcast %1490 : f32 to vector<7x256xf32>
    %1665 = arith.mulf %1469, %1664 : vector<7x256xf32>
    %1666 = vector.broadcast %1494 : f32 to vector<7x256xf32>
    %1667 = arith.mulf %1470, %1666 : vector<7x256xf32>
    %1668 = arith.addf %1665, %1667 : vector<7x256xf32>
    %1669 = vector.broadcast %1498 : f32 to vector<7x256xf32>
    %1670 = arith.mulf %1471, %1669 : vector<7x256xf32>
    %1671 = arith.addf %1668, %1670 : vector<7x256xf32>
    %1672 = vector.broadcast %1502 : f32 to vector<7x256xf32>
    %1673 = arith.mulf %1472, %1672 : vector<7x256xf32>
    %1674 = arith.addf %1671, %1673 : vector<7x256xf32>
    %1675 = vector.broadcast %1491 : f32 to vector<7x256xf32>
    %1676 = arith.mulf %1469, %1675 : vector<7x256xf32>
    %1677 = vector.broadcast %1495 : f32 to vector<7x256xf32>
    %1678 = arith.mulf %1470, %1677 : vector<7x256xf32>
    %1679 = arith.addf %1676, %1678 : vector<7x256xf32>
    %1680 = vector.broadcast %1499 : f32 to vector<7x256xf32>
    %1681 = arith.mulf %1471, %1680 : vector<7x256xf32>
    %1682 = arith.addf %1679, %1681 : vector<7x256xf32>
    %1683 = vector.broadcast %1503 : f32 to vector<7x256xf32>
    %1684 = arith.mulf %1472, %1683 : vector<7x256xf32>
    %1685 = arith.addf %1682, %1684 : vector<7x256xf32>
    %1686 = vector.broadcast %1492 : f32 to vector<7x256xf32>
    %1687 = arith.mulf %1469, %1686 : vector<7x256xf32>
    %1688 = vector.broadcast %1496 : f32 to vector<7x256xf32>
    %1689 = arith.mulf %1470, %1688 : vector<7x256xf32>
    %1690 = arith.addf %1687, %1689 : vector<7x256xf32>
    %1691 = vector.broadcast %1500 : f32 to vector<7x256xf32>
    %1692 = arith.mulf %1471, %1691 : vector<7x256xf32>
    %1693 = arith.addf %1690, %1692 : vector<7x256xf32>
    %1694 = vector.broadcast %1504 : f32 to vector<7x256xf32>
    %1695 = arith.mulf %1472, %1694 : vector<7x256xf32>
    %1696 = arith.addf %1693, %1695 : vector<7x256xf32>
    %1697 = vector.extract_strided_slice %1613 {offsets = [0, 0], sizes = [1, 256], strides = [1, 1]} : vector<8x256xf32> to vector<1x256xf32>
    %c0_805 = arith.constant 0 : index
    %c0_806 = arith.constant 0 : index
    %c0_807 = arith.constant 0 : index
    %c0_808 = arith.constant 0 : index
    %1698 = vector.load %arg16[%c0_805, %c0_806, %c0_807, %c0_808] : memref<4x1x8x256xf32, #tpu.memory_space<vmem>>, vector<1x1x1x256xf32>
    %1699 = vector.shape_cast %1698 : vector<1x1x1x256xf32> to vector<1x256xf32>
    %1700 = vector.shape_cast %1697 : vector<1x256xf32> to vector<1x1x1x256xf32>
    tpu.vector_store %arg16[%c0_805, %c0_806, %c0_807, %c0_808], %1700 {strides = array<i32>} : memref<4x1x8x256xf32, #tpu.memory_space<vmem>>, vector<1x1x1x256xf32>,
    %1701 = vector.extract_strided_slice %1613 {offsets = [1, 0], sizes = [7, 256], strides = [1, 1]} : vector<8x256xf32> to vector<7x256xf32>
    %1702 = arith.addf %1701, %1663 : vector<7x256xf32>
    %c0_809 = arith.constant 0 : index
    %c0_810 = arith.constant 0 : index
    %c1_811 = arith.constant 1 : index
    %c0_812 = arith.constant 0 : index
    %1703 = vector.load %arg16[%c0_809, %c0_810, %c1_811, %c0_812] : memref<4x1x8x256xf32, #tpu.memory_space<vmem>>, vector<1x1x7x256xf32>
    %1704 = vector.shape_cast %1703 : vector<1x1x7x256xf32> to vector<7x256xf32>
    %1705 = vector.shape_cast %1702 : vector<7x256xf32> to vector<1x1x7x256xf32>
    tpu.vector_store %arg16[%c0_809, %c0_810, %c1_811, %c0_812], %1705 {strides = array<i32>} : memref<4x1x8x256xf32, #tpu.memory_space<vmem>>, vector<1x1x7x256xf32>,
    %1706 = vector.extract_strided_slice %1626 {offsets = [0, 0], sizes = [1, 256], strides = [1, 1]} : vector<8x256xf32> to vector<1x256xf32>
    %c1_813 = arith.constant 1 : index
    %c0_814 = arith.constant 0 : index
    %c0_815 = arith.constant 0 : index
    %c0_816 = arith.constant 0 : index
    %1707 = vector.load %arg16[%c1_813, %c0_814, %c0_815, %c0_816] : memref<4x1x8x256xf32, #tpu.memory_space<vmem>>, vector<1x1x1x256xf32>
    %1708 = vector.shape_cast %1707 : vector<1x1x1x256xf32> to vector<1x256xf32>
    %1709 = vector.shape_cast %1706 : vector<1x256xf32> to vector<1x1x1x256xf32>
    tpu.vector_store %arg16[%c1_813, %c0_814, %c0_815, %c0_816], %1709 {strides = array<i32>} : memref<4x1x8x256xf32, #tpu.memory_space<vmem>>, vector<1x1x1x256xf32>,
    %1710 = vector.extract_strided_slice %1626 {offsets = [1, 0], sizes = [7, 256], strides = [1, 1]} : vector<8x256xf32> to vector<7x256xf32>
    %1711 = arith.addf %1710, %1674 : vector<7x256xf32>
    %c1_817 = arith.constant 1 : index
    %c0_818 = arith.constant 0 : index
    %c1_819 = arith.constant 1 : index
    %c0_820 = arith.constant 0 : index
    %1712 = vector.load %arg16[%c1_817, %c0_818, %c1_819, %c0_820] : memref<4x1x8x256xf32, #tpu.memory_space<vmem>>, vector<1x1x7x256xf32>
    %1713 = vector.shape_cast %1712 : vector<1x1x7x256xf32> to vector<7x256xf32>
    %1714 = vector.shape_cast %1711 : vector<7x256xf32> to vector<1x1x7x256xf32>
    tpu.vector_store %arg16[%c1_817, %c0_818, %c1_819, %c0_820], %1714 {strides = array<i32>} : memref<4x1x8x256xf32, #tpu.memory_space<vmem>>, vector<1x1x7x256xf32>,
    %1715 = vector.extract_strided_slice %1639 {offsets = [0, 0], sizes = [1, 256], strides = [1, 1]} : vector<8x256xf32> to vector<1x256xf32>
    %c2_821 = arith.constant 2 : index
    %c0_822 = arith.constant 0 : index
    %c0_823 = arith.constant 0 : index
    %c0_824 = arith.constant 0 : index
    %1716 = vector.load %arg16[%c2_821, %c0_822, %c0_823, %c0_824] : memref<4x1x8x256xf32, #tpu.memory_space<vmem>>, vector<1x1x1x256xf32>
    %1717 = vector.shape_cast %1716 : vector<1x1x1x256xf32> to vector<1x256xf32>
    %1718 = vector.shape_cast %1715 : vector<1x256xf32> to vector<1x1x1x256xf32>
    tpu.vector_store %arg16[%c2_821, %c0_822, %c0_823, %c0_824], %1718 {strides = array<i32>} : memref<4x1x8x256xf32, #tpu.memory_space<vmem>>, vector<1x1x1x256xf32>,
    %1719 = vector.extract_strided_slice %1639 {offsets = [1, 0], sizes = [7, 256], strides = [1, 1]} : vector<8x256xf32> to vector<7x256xf32>
    %1720 = arith.addf %1719, %1685 : vector<7x256xf32>
    %c2_825 = arith.constant 2 : index
    %c0_826 = arith.constant 0 : index
    %c1_827 = arith.constant 1 : index
    %c0_828 = arith.constant 0 : index
    %1721 = vector.load %arg16[%c2_825, %c0_826, %c1_827, %c0_828] : memref<4x1x8x256xf32, #tpu.memory_space<vmem>>, vector<1x1x7x256xf32>
    %1722 = vector.shape_cast %1721 : vector<1x1x7x256xf32> to vector<7x256xf32>
    %1723 = vector.shape_cast %1720 : vector<7x256xf32> to vector<1x1x7x256xf32>
    tpu.vector_store %arg16[%c2_825, %c0_826, %c1_827, %c0_828], %1723 {strides = array<i32>} : memref<4x1x8x256xf32, #tpu.memory_space<vmem>>, vector<1x1x7x256xf32>,
    %1724 = vector.extract_strided_slice %1652 {offsets = [0, 0], sizes = [1, 256], strides = [1, 1]} : vector<8x256xf32> to vector<1x256xf32>
    %c3_829 = arith.constant 3 : index
    %c0_830 = arith.constant 0 : index
    %c0_831 = arith.constant 0 : index
    %c0_832 = arith.constant 0 : index
    %1725 = vector.load %arg16[%c3_829, %c0_830, %c0_831, %c0_832] : memref<4x1x8x256xf32, #tpu.memory_space<vmem>>, vector<1x1x1x256xf32>
    %1726 = vector.shape_cast %1725 : vector<1x1x1x256xf32> to vector<1x256xf32>
    %1727 = vector.shape_cast %1724 : vector<1x256xf32> to vector<1x1x1x256xf32>
    tpu.vector_store %arg16[%c3_829, %c0_830, %c0_831, %c0_832], %1727 {strides = array<i32>} : memref<4x1x8x256xf32, #tpu.memory_space<vmem>>, vector<1x1x1x256xf32>,
    %1728 = vector.extract_strided_slice %1652 {offsets = [1, 0], sizes = [7, 256], strides = [1, 1]} : vector<8x256xf32> to vector<7x256xf32>
    %1729 = arith.addf %1728, %1696 : vector<7x256xf32>
    %c3_833 = arith.constant 3 : index
    %c0_834 = arith.constant 0 : index
    %c1_835 = arith.constant 1 : index
    %c0_836 = arith.constant 0 : index
    %1730 = vector.load %arg16[%c3_833, %c0_834, %c1_835, %c0_836] : memref<4x1x8x256xf32, #tpu.memory_space<vmem>>, vector<1x1x7x256xf32>
    %1731 = vector.shape_cast %1730 : vector<1x1x7x256xf32> to vector<7x256xf32>
    %1732 = vector.shape_cast %1729 : vector<7x256xf32> to vector<1x1x7x256xf32>
    tpu.vector_store %arg16[%c3_833, %c0_834, %c1_835, %c0_836], %1732 {strides = array<i32>} : memref<4x1x8x256xf32, #tpu.memory_space<vmem>>, vector<1x1x7x256xf32>,
    return
  }
  func.func @transform_0(%arg0: i32) -> (i32, i32, i32, i32) {
    %c0_i32 = arith.constant 0 : i32
    %c0_i32_0 = arith.constant 0 : i32
    %c0_i32_1 = arith.constant 0 : i32
    %c0_i32_2 = arith.constant 0 : i32
    return %c0_i32, %arg0, %c0_i32_0, %c0_i32_1 : i32, i32, i32, i32
  }
  func.func @transform_1(%arg0: i32) -> (i32, i32, i32, i32) {
    %c0_i32 = arith.constant 0 : i32
    %c0_i32_0 = arith.constant 0 : i32
    %c0_i32_1 = arith.constant 0 : i32
    %c0_i32_2 = arith.constant 0 : i32
    return %c0_i32, %arg0, %c0_i32_0, %c0_i32_1 : i32, i32, i32, i32
  }
  func.func @transform_2(%arg0: i32) -> (i32, i32, i32, i32) {
    %c0_i32 = arith.constant 0 : i32
    %c0_i32_0 = arith.constant 0 : i32
    %c0_i32_1 = arith.constant 0 : i32
    %c0_i32_2 = arith.constant 0 : i32
    return %c0_i32, %arg0, %c0_i32_0, %c0_i32_1 : i32, i32, i32, i32
  }
  func.func @transform_3(%arg0: i32) -> (i32, i32, i32, i32) {
    %c0_i32 = arith.constant 0 : i32
    %c0_i32_0 = arith.constant 0 : i32
    %c0_i32_1 = arith.constant 0 : i32
    %c0_i32_2 = arith.constant 0 : i32
    return %c0_i32, %arg0, %c0_i32_0, %c0_i32_1 : i32, i32, i32, i32
  }
  func.func @transform_4(%arg0: i32) -> (i32, i32, i32, i32) {
    %c0_i32 = arith.constant 0 : i32
    %c0_i32_0 = arith.constant 0 : i32
    %c0_i32_1 = arith.constant 0 : i32
    %c0_i32_2 = arith.constant 0 : i32
    return %c0_i32, %arg0, %c0_i32_0, %c0_i32_1 : i32, i32, i32, i32
  }
  func.func @transform_5(%arg0: i32) -> (i32, i32) {
    %c0_i32 = arith.constant 0 : i32
    %c0_i32_0 = arith.constant 0 : i32
    %c0_i32_1 = arith.constant 0 : i32
    return %c0_i32, %c0_i32_0 : i32, i32
  }
  func.func @transform_6(%arg0: i32) -> (i32, i32) {
    %c0_i32 = arith.constant 0 : i32
    %c0_i32_0 = arith.constant 0 : i32
    %c0_i32_1 = arith.constant 0 : i32
    return %c0_i32, %c0_i32_0 : i32, i32
  }
  func.func @transform_7(%arg0: i32) -> (i32, i32) {
    %c0_i32 = arith.constant 0 : i32
    %c0_i32_0 = arith.constant 0 : i32
    %c0_i32_1 = arith.constant 0 : i32
    return %c0_i32, %c0_i32_0 : i32, i32
  }
  func.func @transform_8(%arg0: i32) -> (i32, i32) {
    %c0_i32 = arith.constant 0 : i32
    %c0_i32_0 = arith.constant 0 : i32
    %c0_i32_1 = arith.constant 0 : i32
    return %c0_i32, %c0_i32_0 : i32, i32
  }
  func.func @transform_9(%arg0: i32) -> (i32, i32) {
    %c0_i32 = arith.constant 0 : i32
    %c0_i32_0 = arith.constant 0 : i32
    %c0_i32_1 = arith.constant 0 : i32
    return %c0_i32, %c0_i32_0 : i32, i32
  }
  func.func @transform_10(%arg0: i32) -> (i32, i32) {
    %c0_i32 = arith.constant 0 : i32
    %c0_i32_0 = arith.constant 0 : i32
    %c0_i32_1 = arith.constant 0 : i32
    return %c0_i32, %c0_i32_0 : i32, i32
  }
  func.func @transform_11(%arg0: i32) -> (i32, i32) {
    %c0_i32 = arith.constant 0 : i32
    %c0_i32_0 = arith.constant 0 : i32
    %c0_i32_1 = arith.constant 0 : i32
    return %c0_i32, %c0_i32_0 : i32, i32
  }
  func.func @transform_12(%arg0: i32) -> (i32, i32) {
    %c0_i32 = arith.constant 0 : i32
    %c0_i32_0 = arith.constant 0 : i32
    %c0_i32_1 = arith.constant 0 : i32
    return %c0_i32, %c0_i32_0 : i32, i32
  }
  func.func @transform_13(%arg0: i32) -> (i32, i32) {
    %c0_i32 = arith.constant 0 : i32
    %c0_i32_0 = arith.constant 0 : i32
    %c0_i32_1 = arith.constant 0 : i32
    return %c0_i32, %c0_i32_0 : i32, i32
  }
  func.func @transform_14(%arg0: i32) -> (i32, i32) {
    %c0_i32 = arith.constant 0 : i32
    %c0_i32_0 = arith.constant 0 : i32
    %c0_i32_1 = arith.constant 0 : i32
    return %c0_i32, %c0_i32_0 : i32, i32
  }
  func.func @transform_15(%arg0: i32) -> (i32, i32, i32, i32) {
    %c0_i32 = arith.constant 0 : i32
    %c0_i32_0 = arith.constant 0 : i32
    %c0_i32_1 = arith.constant 0 : i32
    %c0_i32_2 = arith.constant 0 : i32
    return %c0_i32, %arg0, %c0_i32_0, %c0_i32_1 : i32, i32, i32, i32
  }
}

</mosaic_0001>

<bundles_post_ra>
// kernel: model_wrapper_forward.1
= control target key start
LH: loop header
LB: loop body
LE: loop exit
PB: predicated region body
PF: predicated region fallthrough
CT: control target
= control target key end

     0   :  { %s9023_s0 = inlined_call_operand.vmem [shape: f32[4,2,8,256], index: 0, kind: input, shape index: {}]   ;;  %s9024_s1 = inlined_call_operand.vmem [shape: f32[3,2,7,256], index: 1, kind: input, shape index: {}]   ;;  %s9025_s2 = inlined_call_operand.vmem [shape: f32[4,2,7,1], index: 2, kind: input, shape index: {}]   ;;  %s9026_s3 = inlined_call_operand.vmem [shape: f32[3,2,7,256], index: 3, kind: input, shape index: {}]   ;;  %s9027_s4 = inlined_call_operand.vmem [shape: f32[4,2,7,1], index: 4, kind: input, shape index: {}]   ;;  %s9028_s5 = inlined_call_operand.vmem [shape: f32[4,28], index: 5, kind: input, shape index: {}]   ;;  %s9029_s6 = inlined_call_operand.vmem [shape: f32[7,4], index: 6, kind: input, shape index: {}]   ;;  %s9030_s7 = inlined_call_operand.vmem [shape: f32[4,3], index: 7, kind: input, shape index: {}]   ;;  %s9031_s8 = inlined_call_operand.vmem [shape: f32[4,28], index: 8, kind: input, shape index: {}]   ;;  %s9032_s9 = inlined_call_operand.vmem [shape: f32[7,4], index: 9, kind: input, shape index: {}]   ;;  %s9033_s10 = inlined_call_operand.vmem [shape: f32[4,3], index: 10, kind: input, shape index: {}]   ;;  %s9034_s11 = inlined_call_operand.vmem [shape: f32[2,4], index: 11, kind: input, shape index: {}]   ;;  %s9035_s12 = inlined_call_operand.vmem [shape: f32[4,8], index: 12, kind: input, shape index: {}]   ;;  %s9036_s13 = inlined_call_operand.vmem [shape: f32[1,4], index: 13, kind: input, shape index: {}]   ;;  %s9037_s14 = inlined_call_operand.<no memory space> [shape: f32[1,1], index: 14, kind: input, shape index: {}]   ;;  %s9038_s15 = inlined_call_operand.vmem [shape: f32[4,2,8,256], index: 15, kind: output, shape index: {}]  }
   0x1   :  { %9430 = sst [smem:[#allocation125_spill]] %s9023_s0 }
   0x2   :  { %9431 = sst [smem:[#allocation126_spill]] %s9024_s1 }
   0x3   :  { %9432 = sst [smem:[#allocation127_spill]] %s9025_s2 }
   0x4   :  { %9433 = sst [smem:[#allocation128_spill]] %s9026_s3 }
   0x5   :  { %9434 = sst [smem:[#allocation129_spill]] %s9027_s4 }
   0x6   :  { %9435 = sst [smem:[#allocation130_spill]] %s9028_s5 }
   0x7   :  { %9436 = sst [smem:[#allocation131_spill]] %s9029_s6 }
   0x8   :  { %9437 = sst [smem:[#allocation132_spill]] %s9030_s7 }
   0x9   :  { %9438 = sst [smem:[#allocation133_spill]] %s9031_s8 }
   0xa   :  { %9439 = sst [smem:[#allocation134_spill]] %s9032_s9 }
   0xb   :  { %9440 = sst [smem:[#allocation135_spill]] %s9033_s10 }
   0xc   :  { %9441 = sst [smem:[#allocation136_spill]] %s9034_s11 }
   0xd   :  { %9442 = sst [smem:[#allocation137_spill]] %s9035_s12 }
   0xe   :  { %9443 = sst [smem:[#allocation138_spill]] %s9036_s13 }
   0xf   :  { %9444 = sst [smem:[#allocation139_spill]] %s9038_s15 }
  0x10   :  { %20 = sst [smem:[#allocation2]] %s9037_s14 }
  0x11   :  { %21 = vsyncpa [#allocation9], 0 }
  0x12   :  { %22 = vsyncpa [#allocation11], 0 }
  0x13   :  { %23 = vsyncpa [#allocation14], 0 }
  0x14   :  { %24 = vsyncpa [#allocation17], 0 }
  0x15   :  { %25 = vsyncpa [#allocation20], 0  ;;  %s5240_s20 = smov 0   ;;  %s5242_s21 = smov 0  }
  0x16   :  { %s5244_s22 = smov 0  }
  0x17 LB: > { %9445 = sst [smem:[#allocation28_spill]] %s5140_s21  ;;  %s5256_s14 = sadd.s32 4294967295, %s5144_s22   ;;  %s5144_s22 = sphi %s5244_s22, %s10279_s22   ;;  %s5140_s21 = sphi %s5242_s21, %s10281_s21   ;;  %s5136_s20 = sphi %s5240_s20, %s10280_s20  }
  0x18   : > { %9446 = sst [smem:[#allocation29_spill]] %s5256_s14  ;;  %s5259_s23 = sadd.s32 1, %s5144_s22  }
  0x19   : > { %9447 = sst [smem:[#allocation30_spill]] %s5259_s23  ;;  %s35_s24 = ssub.s32 %s5144_s22, %s5259_s23 }
  0x1a   : > { %s38_s25 = sadd.s32 1, %s5140_s21  ;;  %p36_p0 = scmp.eq.s32.totalorder %s35_s24, 0 }
  0x1b   : > { %p45_p1 = scmp.ne.s32.totalorder %s5140_s21, %s5136_s20  ;;  %p46_p2 = scmp.eq.s32.totalorder %s5144_s22, 0 }
  0x1c   : > { %p389_p3 = scmp.eq.s32.totalorder %s5256_s14, 1  ;;  %p3967_p6 = scmp.ge.s32.totalorder %s5144_s22, 1 }
  0x1d   : > { %s5269_s26 = scalar_select %p36_p0, %s5140_s21, %s38_s25  }
  0x1e   : > { %p5271_p4 = por %p46_p2, %p45_p1  ;;  %p5275_p5 = por %p389_p3, %p45_p1 }
  0x1f   : > { %9448 = sst [smem:[#allocation31_spill]] %s5269_s26  ;;  %p402_p7 = scmp.lt.s32.totalorder %s5144_s22, 3 }
  0x20   : > { %s9449_s27 = scalar_select %p5271_p4, 1, 0 }
  0x21   : > { %s9450_s28 = scalar_select %p5275_p5, 1, 0 }
  0x22   : > { %p9042_p8 = scmp.eq.s32.totalorder %s5256_s14, 0  ;;  %p5282_p9 = pnand %p3967_p6, %p402_p7 }
  0x23   : > { %9451 = sst [smem:[#allocation32_spill]] %s9450_s28  ;;  %s9453_s6 = sld [smem:[#allocation131_spill]] }
  0x24   : > { %s9452_s29 = scalar_select %p5282_p9, 1, 0 }
  0x25   : > { %p4507_p10 = pneg %p5282_p9  ;;  %s9454_s8 = sld [smem:[#allocation133_spill]] }
  0x26   : > { %s9456_s10 = sld [smem:[#allocation135_spill]]  ;;  %s9457_s12 = sld [smem:[#allocation137_spill]] }
  0x27   : > { %p5296_p11 = pnand %p9042_p8, %p4507_p10 }
  0x29   : > { %s426_s17 = sshll.u32 %s9453_s6, 4  ;;  %p5310_p13 = pneg %p5296_p11  ;;  %s427_s17 = int_to_ptr.vmem [resolvable:$true] %s426_s17 }
  0x2a   : > { %s4967_s28 = scalar_lea.vmem %s427_s17, 128  ;;  %p4975_p2 = scmp.lt.s32.totalorder %s427_s17, %s427_s17 }
  0x2b   : > { %s448_s24 = sshll.u32 %s9454_s8, 4  ;;  %p4968_p12 = scmp.ne.s32.totalorder %s427_s17, %s4967_s28  ;;  %s449_s24 = int_to_ptr.vmem [resolvable:$true] %s448_s24 }
  0x2c   : > { %s470_s30 = sshll.u32 %s9456_s10, 4  ;;  %s492_s15 = sshll.u32 %s9457_s12, 4  ;;  %s5303_s30 = int_to_ptr.vmem [resolvable:$true] %s470_s30  ;;  %s493_s15 = int_to_ptr.vmem [resolvable:$true] %s492_s15 }
  0x2d   : > { %p4970_p0 = pnand %p5310_p13, %p4968_p12  ;;  %p4976_p3 = scmp.lt.s32.totalorder %s4967_s28, %s4967_s28 }
  0x2f   : > { %p4971_p1 = pneg %p4970_p0  ;;  %p4977_p6 = por %p4976_p3, %p4975_p2 }
  0x31   : > { %p4978_p7 = pnand %p4977_p6, %p4971_p1 }
  0x33   : > { %4981 = shalt.err (!%p4978_p7)
}
  0x34   : > { %s5146_s23 = smov [#allocation10]   ;;  %s4982_s6 = scalar_lea.vmem %s449_s24, 64 }
  0x35   : > { %4513 = dma.vmem_to_smem (!%p5296_p11), %s427_s17, 128, %s5146_s23, [#allocation11]  }
  0x36   : > { %p4983_p10 = scmp.ne.s32.totalorder %s449_s24, %s4982_s6  ;;  %p4990_p9 = scmp.lt.s32.totalorder %s449_s24, %s449_s24 }
  0x37   : > { %p4991_p4 = scmp.lt.s32.totalorder %s4982_s6, %s4982_s6 }
  0x38   : > { %p4985_p8 = pnand %p4983_p10, %p5310_p13 }
  0x39   : > { %p4992_p12 = por %p4991_p4, %p4990_p9 }
  0x3a   : > { %p4986_p5 = pneg %p4985_p8 }
  0x3c   : > { %p4993_p0 = pnand %p4992_p12, %p4986_p5 }
  0x3e   : > { %4996 = shalt.err (!%p4993_p0)
}
  0x3f   : > { %s5147_s26 = smov [#allocation13]   ;;  %s4997_s28 = scalar_lea.vmem %s5303_s30, 64 }
  0x40   : > { %4519 = dma.vmem_to_smem (!%p5296_p11), %s449_s24, 64, %s5147_s26, [#allocation14]  }
  0x41   : > { %p4998_p1 = scmp.ne.s32.totalorder %s5303_s30, %s4997_s28  ;;  %p5005_p8 = scmp.lt.s32.totalorder %s5303_s30, %s5303_s30 }
  0x42   : > { %p5006_p6 = scmp.lt.s32.totalorder %s4997_s28, %s4997_s28 }
  0x43   : > { %p5000_p2 = pnand %p4998_p1, %p5310_p13 }
  0x44   : > { %p5007_p7 = por %p5006_p6, %p5005_p8 }
  0x45   : > { %p5001_p3 = pneg %p5000_p2 }
  0x47   : > { %p5008_p4 = pnand %p5007_p7, %p5001_p3 }
  0x49   : > { %5011 = shalt.err (!%p5008_p4)
}
  0x4a   : > { %s5148_s17 = smov [#allocation16]   ;;  %s5012_s24 = scalar_lea.vmem %s493_s15, 64 }
  0x4b   : > { %4525 = dma.vmem_to_smem (!%p5296_p11), %s5303_s30, 64, %s5148_s17, [#allocation17]  }
  0x4c   : > { %p5013_p5 = scmp.ne.s32.totalorder %s493_s15, %s5012_s24  ;;  %p5020_p12 = scmp.lt.s32.totalorder %s493_s15, %s493_s15 }
  0x4d   : > { %p5021_p0 = scmp.lt.s32.totalorder %s5012_s24, %s5012_s24 }
  0x4e   : > { %p5015_p9 = pnand %p5013_p5, %p5310_p13 }
  0x4f   : > { %p5022_p1 = por %p5021_p0, %p5020_p12 }
  0x50   : > { %p5016_p10 = pneg %p5015_p9 }
  0x52   : > { %p5023_p2 = pnand %p5022_p1, %p5016_p10 }
  0x54   : > { %5026 = shalt.err (!%p5023_p2)
}
  0x55   : > { %s5149_s23 = smov [#allocation19]   ;;  %s9459_s5 = sld [smem:[#allocation130_spill]] }
  0x56   : > { %4531 = dma.vmem_to_smem (!%p5296_p11), %s493_s15, 64, %s5149_s23, [#allocation20]  }
  0x57   : > { %s9460_s7 = sld [smem:[#allocation132_spill]] }
  0x5b   : > { %s415_s26 = sshll.u32 %s9459_s5, 4  ;;  %s416_s26 = int_to_ptr.vmem [resolvable:$true] %s415_s26 }
  0x5c   : > { %s5027_s16 = scalar_lea.vmem %s416_s26, 64  ;;  %p5035_p7 = scmp.lt.s32.totalorder %s416_s26, %s416_s26 }
  0x5d   : > { %s437_s19 = sshll.u32 %s9460_s7, 4  ;;  %p5028_p3 = scmp.ne.s32.totalorder %s416_s26, %s5027_s16  ;;  %s438_s19 = int_to_ptr.vmem [resolvable:$true] %s437_s19 }
  0x5e   : > { %p5036_p4 = scmp.lt.s32.totalorder %s5027_s16, %s5027_s16 }
  0x5f   : > { %p5030_p8 = pnand %p5028_p3, %p5310_p13 }
  0x60   : > { %p5037_p5 = por %p5036_p4, %p5035_p7 }
  0x61   : > { %p5031_p6 = pneg %p5030_p8 }
  0x63   : > { %p5038_p9 = pnand %p5037_p5, %p5031_p6 }
  0x65   : > { %5041 = shalt.err (!%p5038_p9)
}
  0x66   : > { %s5150_s15 = smov [#allocation8]   ;;  %s5042_s24 = scalar_lea.vmem %s438_s19, 64 }
  0x67   : > { %4510 = dma.vmem_to_smem (!%p5296_p11), %s416_s26, 64, %s5150_s15, [#allocation9]  }
  0x68   : > { %p5043_p10 = scmp.ne.s32.totalorder %s438_s19, %s5042_s24  ;;  %p5050_p1 = scmp.lt.s32.totalorder %s438_s19, %s438_s19 }
  0x69   : > { %p5051_p2 = scmp.lt.s32.totalorder %s5042_s24, %s5042_s24 }
  0x6a   : > { %p5045_p12 = pnand %p5043_p10, %p5310_p13 }
  0x6b   : > { %p5052_p3 = por %p5051_p2, %p5050_p1 }
  0x6c   : > { %p5046_p0 = pneg %p5045_p12 }
  0x6e   : > { %p5053_p8 = pnand %p5052_p3, %p5046_p0 }
  0x70   : > { %5056 = shalt.err (!%p5053_p8)
}
  0x71   : > { %s5151_s23 = smov [#allocation12]   ;;  %s9461_s9 = sld [smem:[#allocation134_spill]] }
  0x72   : > { %4516 = dma.vmem_to_smem (!%p5296_p11), %s438_s19, 64, %s5151_s23, [#allocation11]  }
  0x73   : > { %s9462_s11 = sld [smem:[#allocation136_spill]] }
  0x77   : > { %s459_s26 = sshll.u32 %s9461_s9, 4  ;;  %s460_s26 = int_to_ptr.vmem [resolvable:$true] %s459_s26 }
  0x78   : > { %s5057_s15 = scalar_lea.vmem %s460_s26, 128  ;;  %p5065_p5 = scmp.lt.s32.totalorder %s460_s26, %s460_s26 }
  0x79   : > { %s481_s16 = sshll.u32 %s9462_s11, 4  ;;  %p5058_p6 = scmp.ne.s32.totalorder %s460_s26, %s5057_s15  ;;  %s482_s16 = int_to_ptr.vmem [resolvable:$true] %s481_s16 }
  0x7a   : > { %p5066_p9 = scmp.lt.s32.totalorder %s5057_s15, %s5057_s15 }
  0x7b   : > { %p5060_p7 = pnand %p5058_p6, %p5310_p13 }
  0x7c   : > { %p5067_p10 = por %p5066_p9, %p5065_p5 }
  0x7d   : > { %p5061_p4 = pneg %p5060_p7 }
  0x7f   : > { %p5068_p12 = pnand %p5067_p10, %p5061_p4 }
  0x81   : > { %5071 = shalt.err (!%p5068_p12)
}
  0x82   : > { %s5152_s19 = smov [#allocation15]   ;;  %s5072_s24 = scalar_lea.vmem %s482_s16, 32 }
  0x83   : > { %4522 = dma.vmem_to_smem (!%p5296_p11), %s460_s26, 128, %s5152_s19, [#allocation14]  }
  0x84   : > { %p5073_p0 = scmp.ne.s32.totalorder %s482_s16, %s5072_s24  ;;  %p5080_p3 = scmp.lt.s32.totalorder %s482_s16, %s482_s16 }
  0x85   : > { %p5081_p8 = scmp.lt.s32.totalorder %s5072_s24, %s5072_s24 }
  0x86   : > { %p5075_p1 = pnand %p5073_p0, %p5310_p13 }
  0x87   : > { %p5082_p6 = por %p5081_p8, %p5080_p3 }
  0x88   : > { %p5076_p2 = pneg %p5075_p1 }
  0x8a   : > { %p5083_p7 = pnand %p5082_p6, %p5076_p2 }
  0x8c   : > { %5086 = shalt.err (!%p5083_p7)
}
  0x8d   : > { %s5153_s23 = smov [#allocation18]   ;;  %s9463_s13 = sld [smem:[#allocation138_spill]] }
  0x8e   : > { %4528 = dma.vmem_to_smem (!%p5296_p11), %s482_s16, 32, %s5153_s23, [#allocation17]  }
  0x93   : > { %s503_s26 = sshll.u32 %s9463_s13, 4  ;;  %s504_s26 = int_to_ptr.vmem [resolvable:$true] %s503_s26 }
  0x94   : > { %s5087_s28 = scalar_lea.vmem %s504_s26, 16  ;;  %p5095_p10 = scmp.lt.s32.totalorder %s504_s26, %s504_s26 }
  0x95   : > { %p5088_p4 = scmp.ne.s32.totalorder %s504_s26, %s5087_s28  ;;  %p5096_p12 = scmp.lt.s32.totalorder %s5087_s28, %s5087_s28 }
  0x97   : > { %p5090_p5 = pnand %p5088_p4, %p5310_p13  ;;  %p5097_p0 = por %p5096_p12, %p5095_p10 }
  0x99   : > { %p5091_p9 = pneg %p5090_p5 }
  0x9b   : > { %p5098_p1 = pnand %p5097_p0, %p5091_p9 }
  0x9d   : > { %5101 = shalt.err (!%p5098_p1)
}
  0x9e   : > { %s5154_s17 = smov [#allocation21]   ;;  %p3977_p2 = scmp.ge.s32.totalorder %s5144_s22, 2 }
  0x9f   : > { %4534 = dma.vmem_to_smem (!%p5296_p11), %s504_s26, 16, %s5154_s17, [#allocation20]  }
  0xa0   : > { %513 = sbr.rel (%p3977_p2) target bundleno = 233 (0xe9), region = 56  ;;  %p9464_p3 = scmp.ne.s32.totalorder (!%p3977_p2), %s9449_s27, 0 }
  0xa7   : > { %516 = sbr.rel (!%p9464_p3) target bundleno = 181 (0xb5), region = 60  ;;  %s518_s18 = sand.u32 (%p9464_p3), 1, %s5140_s21  }
  0xa8   : > { %s4464_s16 = sshll.u32 (%p9464_p3), %s5144_s22, 4  ;;  %s3978_s15 = sshll.u32 (%p9464_p3), %s518_s18, 6 }
  0xa9   : > { %s9465_s0 = sld [smem:[#allocation125_spill]] (%p9464_p3)  ;;  %s520_s25 = scalar_lea.vmem (%p9464_p3), [#allocation3], %s3978_s15 }
  0xaf   : > { %s523_s23 = scalar_lea.vmem %s9465_s0, %s4464_s16 }
  0xb0   : > { %v536_v0 = vld [vmem:[%s523_s23] sm:$0xff]  ;;  %v538_v1 = vld [vmem:[%s523_s23 + $0x8] sm:$0xff] }
  0xb1   : > { %v540_v2 = vld [vmem:[%s523_s23 + $0x20] sm:$0xff]  ;;  %537 = vst [vmem:[%s520_s25] sm:$0xff] %v536_v0  ;;  %539 = vst [vmem:[%s520_s25 + $0x8] sm:$0xff] %v538_v1  ;;  %v542_v3 = vld [vmem:[%s523_s23 + $0x28] sm:$0xff] }
  0xb2   : > { %541 = vst [vmem:[%s520_s25 + $0x10] sm:$0xff] %v540_v2  ;;  %v544_v4 = vld [vmem:[%s523_s23 + $0x40] sm:$0xff]  ;;  %v546_v5 = vld [vmem:[%s523_s23 + $0x48] sm:$0xff]  ;;  %543 = vst [vmem:[%s520_s25 + $0x18] sm:$0xff] %v542_v3 }
  0xb3   : > { %545 = vst [vmem:[%s520_s25 + $0x20] sm:$0xff] %v544_v4  ;;  %547 = vst [vmem:[%s520_s25 + $0x28] sm:$0xff] %v546_v5  ;;  %v548_v6 = vld [vmem:[%s523_s23 + $0x60] sm:$0xff]  ;;  %v550_v7 = vld [vmem:[%s523_s23 + $0x68] sm:$0xff] }
  0xb4   : > { %549 = vst [vmem:[%s520_s25 + $0x30] sm:$0xff] %v548_v6  ;;  %551 = vst [vmem:[%s520_s25 + $0x38] sm:$0xff] %v550_v7 }
  0xb5 PF: > { %p9466_p11 = scmp.ne.s32.totalorder %s9449_s27, 0 }
  0xb6   : > { %s559_s30 = sand.u32 (%p9466_p11), 1, %s5140_s21   ;;  %s4465_s6 = sshll.u32 (%p9466_p11), %s5144_s22, 4 }
  0xb7   : > { %557 = sbr.rel (!%p9466_p11) target bundleno = 194 (0xc2), region = 83  ;;  %s9467_s1 = sld [smem:[#allocation126_spill]] (%p9466_p11) }
  0xb8   : > { %s4468_s26 = smul.u32 (%p9466_p11), 48, %s559_s30 }
  0xba   : > { %s561_s16 = scalar_lea.vmem (%p9466_p11), [#allocation4], %s4468_s26 }
  0xbd   : > { %s564_s18 = scalar_lea.vmem (%p9466_p11), %s9467_s1, %s4465_s6 }
  0xbe   : > { %v577_v8 = vld [vmem:[%s564_s18] sm:$0xff]  ;;  %v579_v9 = vld [vmem:[%s564_s18 + $0x8] sm:$0xff] }
  0xbf   : > { %v581_v10 = vld [vmem:[%s564_s18 + $0x20] sm:$0xff]  ;;  %v583_v11 = vld [vmem:[%s564_s18 + $0x28] sm:$0xff]  ;;  %578 = vst [vmem:[%s561_s16] sm:$0xff] %v577_v8  ;;  %580 = vst [vmem:[%s561_s16 + $0x8] sm:$0xff] %v579_v9 }
  0xc0   : > { %v585_v12 = vld [vmem:[%s564_s18 + $0x40] sm:$0xff]  ;;  %v587_v13 = vld [vmem:[%s564_s18 + $0x48] sm:$0xff]  ;;  %582 = vst [vmem:[%s561_s16 + $0x10] sm:$0xff] %v581_v10  ;;  %584 = vst [vmem:[%s561_s16 + $0x18] sm:$0xff] %v583_v11 }
  0xc1   : > { %586 = vst [vmem:[%s561_s16 + $0x20] sm:$0xff] %v585_v12  ;;  %588 = vst [vmem:[%s561_s16 + $0x28] sm:$0xff] %v587_v13 }
  0xc2 PF: > { %p9468_p13 = scmp.ne.s32.totalorder %s9449_s27, 0 }
  0xc3   : > { %s596_s15 = sand.u32 (%p9468_p13), 1, %s5140_s21   ;;  %s3984_s19 = sshll.u32 (%p9468_p13), %s5144_s22, 3 }
  0xc4   : > { %594 = sbr.rel (!%p9468_p13) target bundleno = 207 (0xcf), region = 106  ;;  %s3983_s24 = sshll.u32 (%p9468_p13), %s596_s15, 5 }
  0xc5   : > { %s9469_s2 = sld [smem:[#allocation127_spill]] (%p9468_p13)  ;;  %s598_s6 = scalar_lea.vmem (%p9468_p13), [#allocation5], %s3983_s24 }
  0xcb   : > { %s600_s30 = scalar_lea.vmem %s9469_s2, %s3984_s19 }
  0xcc   : > { %v634_v14 = vld [vmem:[%s600_s30] sm:$0xff]  ;;  %v636_v15 = vld [vmem:[%s600_s30 + $0x10] sm:$0xff] }
  0xcd   : > { %v638_v16 = vld [vmem:[%s600_s30 + $0x20] sm:$0xff]  ;;  %635 = vst [vmem:[%s598_s6] sm:$0xff] %v634_v14  ;;  %637 = vst [vmem:[%s598_s6 + $0x8] sm:$0xff] %v636_v15  ;;  %v640_v17 = vld [vmem:[%s600_s30 + $0x30] sm:$0xff] }
  0xce   : > { %639 = vst [vmem:[%s598_s6 + $0x10] sm:$0xff] %v638_v16  ;;  %641 = vst [vmem:[%s598_s6 + $0x18] sm:$0xff] %v640_v17 }
  0xcf PF: > { %p9470_p8 = scmp.ne.s32.totalorder %s9449_s27, 0 }
  0xd0   : > { %s649_s26 = sand.u32 (%p9470_p8), 1, %s5140_s21   ;;  %s4466_s28 = sshll.u32 (%p9470_p8), %s5144_s22, 4 }
  0xd1   : > { %647 = sbr.rel (!%p9470_p8) target bundleno = 220 (0xdc), region = 144  ;;  %s9471_s3 = sld [smem:[#allocation128_spill]] (%p9470_p8) }
  0xd2   : > { %s4469_s17 = smul.u32 (%p9470_p8), 48, %s649_s26 }
  0xd4   : > { %s651_s19 = scalar_lea.vmem (%p9470_p8), [#allocation6], %s4469_s17 }
  0xd7   : > { %s654_s15 = scalar_lea.vmem (%p9470_p8), %s9471_s3, %s4466_s28 }
  0xd8   : > { %v667_v18 = vld [vmem:[%s654_s15] sm:$0xff]  ;;  %v669_v19 = vld [vmem:[%s654_s15 + $0x8] sm:$0xff] }
  0xd9   : > { %v671_v20 = vld [vmem:[%s654_s15 + $0x20] sm:$0xff]  ;;  %v673_v21 = vld [vmem:[%s654_s15 + $0x28] sm:$0xff]  ;;  %668 = vst [vmem:[%s651_s19] sm:$0xff] %v667_v18  ;;  %670 = vst [vmem:[%s651_s19 + $0x8] sm:$0xff] %v669_v19 }
  0xda   : > { %v675_v22 = vld [vmem:[%s654_s15 + $0x40] sm:$0xff]  ;;  %v677_v23 = vld [vmem:[%s654_s15 + $0x48] sm:$0xff]  ;;  %672 = vst [vmem:[%s651_s19 + $0x10] sm:$0xff] %v671_v20  ;;  %674 = vst [vmem:[%s651_s19 + $0x18] sm:$0xff] %v673_v21 }
  0xdb   : > { %676 = vst [vmem:[%s651_s19 + $0x20] sm:$0xff] %v675_v22  ;;  %678 = vst [vmem:[%s651_s19 + $0x28] sm:$0xff] %v677_v23 }
  0xdc PF: > { %p9472_p6 = scmp.ne.s32.totalorder %s9449_s27, 0 }
  0xdd   : > { %s686_s24 = sand.u32 (%p9472_p6), 1, %s5140_s21   ;;  %s3988_s23 = sshll.u32 (%p9472_p6), %s5144_s22, 3 }
  0xde   : > { %684 = sbr.rel (!%p9472_p6) target bundleno = 233 (0xe9), region = 167  ;;  %s3987_s25 = sshll.u32 (%p9472_p6), %s686_s24, 5 }
  0xdf   : > { %s9473_s4 = sld [smem:[#allocation129_spill]] (%p9472_p6)  ;;  %s688_s28 = scalar_lea.vmem (%p9472_p6), [#allocation7], %s3987_s25 }
  0xe5   : > { %s690_s26 = scalar_lea.vmem %s9473_s4, %s3988_s23 }
  0xe6   : > { %v724_v24 = vld [vmem:[%s690_s26] sm:$0xff]  ;;  %v726_v25 = vld [vmem:[%s690_s26 + $0x10] sm:$0xff] }
  0xe7   : > { %v728_v26 = vld [vmem:[%s690_s26 + $0x20] sm:$0xff]  ;;  %725 = vst [vmem:[%s688_s28] sm:$0xff] %v724_v24  ;;  %727 = vst [vmem:[%s688_s28 + $0x8] sm:$0xff] %v726_v25  ;;  %v730_v27 = vld [vmem:[%s690_s26 + $0x30] sm:$0xff] }
  0xe8   : > { %729 = vst [vmem:[%s688_s28 + $0x10] sm:$0xff] %v728_v26  ;;  %731 = vst [vmem:[%s688_s28 + $0x18] sm:$0xff] %v730_v27 }
  0xe9 PF: > { %p9474_p7 = scmp.ne.s32.totalorder %s9452_s29, 0 }
  0xeb   : > { %740 = sbr.rel (%p9474_p7) target bundleno = 996 (0x3e4), region = 205 }
  0xf2   : > { %s5413_s22 = sand.u32 1, %s5136_s20   ;;  %p9478_p4 = scmp.eq.s32.totalorder %s5256_s14, 0 }
  0xf3   : > { %9475 = sst [smem:[#allocation33_spill]] %s5413_s22  ;;  %s9044_s27 = sshll.u32 %s5413_s22, 6 }
  0xf4   : > { %s4470_s17 = smul.u32 48, %s5413_s22  ;;  %s3991_s18 = sshll.u32 %s5413_s22, 5 }
  0xf5   : > { %s5420_s16 = scalar_lea.vmem [#allocation3], %s9044_s27  ;;  %s5424_s19 = scalar_lea.vmem [#allocation5], %s3991_s18 }
  0xf6   : > { %9476 = sst [smem:[#allocation34_spill]] %s5420_s16  ;;  %s5422_s15 = scalar_lea.vmem [#allocation4], %s4470_s17 }
  0xf7   : > { %s5426_s29 = scalar_lea.vmem [#allocation6], %s4470_s17  ;;  %s773_s24 = scalar_lea.vmem [#allocation7], %s3991_s18 }
  0xf8   : > { %9477 = sst [smem:[#allocation35_spill]] %s5426_s29 }
  0xf9   : > { %5115 = dma.done.wait (%p9478_p4), [#allocation9], 64   ;;  %p9479_p5 = pmov %p9478_p4 }
  0xfa   : > { %p9480_p9 = pmov %p9478_p4 }
  0xfb   : > { %5117 = vsyncadd (%p9479_p5), [#allocation9], 4294967232 }
  0xfc   : > { %5119 = dma.done.wait (%p9480_p9), [#allocation11], 192   ;;  %p9481_p10 = pmov %p9478_p4 }
  0xfd   : > { %p9482_p12 = pmov %p9478_p4 }
  0xfe   : > { %5121 = vsyncadd (%p9481_p10), [#allocation11], 4294967104 }
  0xff   : > { %5123 = dma.done.wait (%p9482_p12), [#allocation14], 192   ;;  %p9483_p0 = pmov %p9478_p4 }
 0x101   : > { %5125 = vsyncadd (%p9483_p0), [#allocation14], 4294967104  ;;  %p9484_p1 = pmov %p9483_p0 }
 0x102   : > { %p9485_p2 = pmov %p9483_p0 }
 0x103   : > { %5127 = dma.done.wait (%p9484_p1), [#allocation17], 96  }
 0x104   : > { %5129 = vsyncadd (%p9485_p2), [#allocation17], 4294967200  ;;  %p9486_p3 = pmov %p9483_p0 }
 0x105   : > { %p9487_p11 = pmov %p9483_p0 }
 0x106   : > { %5131 = dma.done.wait (%p9486_p3), [#allocation20], 80  }
 0x107   : > { %5133 = vsyncadd (%p9487_p11), [#allocation20], 4294967216 }
 0x108   : > { %813 = sfence }
 0x109   : > { %v2354_v28 = vld [vmem:[%s773_s24] sm:$0x7f]  ;;  %v5155_v30 = vmov 0   ;;  %v4366_v31 = vld [vmem:[%s773_s24 + $0x8] sm:$0x7f]  ;;  %s871_s20 = sld [smem:[#allocation8]] }
 0x10a   : > { %v1162_v29 = vld [vmem:[%s5424_s19] sm:$0x7f]  ;;  %4589 = vset.pattern.permute.xlu1 %v5155_v30  ;;  %4588 = vset.pattern.permute.xlu0 %v5155_v30  ;;  %v4170_v32 = vld [vmem:[%s5424_s19 + $0x8] sm:$0x7f]  ;;  %v4367_v33 = vld [vmem:[%s773_s24 + $0x10] sm:$0x7f] }
 0x10b   : > { %2381 = vperm.xlu1 %4589, %v2354_v28   ;;  %1189 = vperm.xlu0 %4588, %v1162_v29   ;;  %v4171_v34 = vld [vmem:[%s5424_s19 + $0x10] sm:$0x7f]  ;;  %v4368_v35 = vld [vmem:[%s773_s24 + $0x18] sm:$0x7f]  ;;  %s4006_s23 = sld [smem:[#allocation8 + $0x1]]  ;;  %s4003_s25 = sld [smem:[#allocation8 + $0x80]] }
 0x10c   : > { %v4172_v36 = vld [vmem:[%s5424_s19 + $0x18] sm:$0x7f]  ;;  %s5452_s30 = sld [smem:[#allocation8 + $0x81]]  ;;  %s5454_s6 = sld [smem:[#allocation8 + $0x2]]  ;;  %v5461_v37 = vld [vmem:[%s5420_s16] sm:$0xfe] }
 0x10d   : > { %s5456_s26 = sld [smem:[#allocation8 + $0x100]]  ;;  %s5458_s28 = sld [smem:[#allocation8 + $0x101]]  ;;  %v5464_v38 = vld [vmem:[%s5420_s16 + $0x10] sm:$0xfe]  ;;  %v5473_v41 = vld [vmem:[%s5420_s16 + $0x8] sm:$0xfe] }
 0x10e   : > { %s5466_s17 = sld [smem:[#allocation8 + $0x82]]  ;;  %s5468_s18 = sld [smem:[#allocation8 + $0x3]]  ;;  %v5476_v43 = vld [vmem:[%s5420_s16 + $0x18] sm:$0xfe]  ;;  %v5486_v47 = vld [vmem:[%s5420_s16 + $0x20] sm:$0xfe] }
 0x10f   : > { %2429 = vperm.xlu1 %4589, %v4366_v31   ;;  %1237 = vperm.xlu0 %4588, %v4170_v32   ;;  %v1169_v39 = vstv %s871_s20  ;;  %s5470_s19 = sld [smem:[#allocation8 + $0x102]]  ;;  %s5481_s24 = sld [smem:[#allocation8 + $0x180]]  ;;  %v5506_v55 = vld [vmem:[%s5420_s16 + $0x28] sm:$0xfe]  ;;  %v5516_v60 = vld [vmem:[%s5420_s16 + $0x30] sm:$0xfe] }
 0x110   : > { %v1170_v44 = vmul.f32 %v1169_v39, %v5461_v37  ;;  %s5483_s20 = sld [smem:[#allocation10]]  ;;  %v1171_v49 = vmul.f32 %v1169_v39, %v5473_v41  ;;  %s5503_s27 = sld [smem:[#allocation10 + $0x2]]  ;;  %v5519_v61 = vld [vmem:[%s5420_s16 + $0x38] sm:$0xfe]  ;;  %v5569_v30 = vld [vmem:[%s5422_s15] sm:$0x7f] }
 0x111   : > { %v1172_v40 = vstv %s4006_s23  ;;  %v1217_v42 = vstv %s4003_s25  ;;  %s5489_s23 = sld [smem:[#allocation8 + $0x181]]  ;;  %s5511_s0 = sld [smem:[#allocation8 + $0x182]] }
 0x112   : > { %v1173_v45 = vmul.f32 %v5464_v38, %v1172_v40  ;;  %v1220_v46 = vstv %s5452_s30  ;;  %v1177_v48 = vstv %s5454_s6  ;;  %s5491_s25 = sld [smem:[#allocation10 + $0x1]]  ;;  %v1218_v50 = vmul.f32 %v1217_v42, %v5461_v37  ;;  %s5495_s30 = sld [smem:[#allocation8 + $0x83]] }
 0x113   : > { %2477 = vperm.xlu1 %4589, %v4367_v33   ;;  %1285 = vperm.xlu0 %4588, %v4171_v34   ;;  %v1174_v51 = vmul.f32 %v5476_v43, %v1172_v40  ;;  %v1219_v52 = vmul.f32 %v1217_v42, %v5473_v41  ;;  %v1221_v53 = vmul.f32 %v5464_v38, %v1220_v46  ;;  %v1265_v54 = vstv %s5456_s26  ;;  %s5501_s6 = sld [smem:[#allocation8 + $0x103]]  ;;  %s5601_s2 = sld [smem:[#allocation12 + $0x102]] }
 0x114   : > { %v1175_v56 = vadd.f32 %v1173_v45, %v1170_v44  ;;  %v1178_v57 = vmul.f32 %v5486_v47, %v1177_v48  ;;  %v1222_v58 = vmul.f32 %v5476_v43, %v1220_v46  ;;  %v1268_v59 = vstv %s5458_s28  ;;  %s5513_s1 = sld [smem:[#allocation10 + $0x3]]  ;;  %s5545_s28 = sld [smem:[#allocation12]]  ;;  %v5611_v46 = vld [vmem:[%s5422_s15 + $0x10] sm:$0x7f] }
 0x115   : > { %v1182_v62 = vstv %s5468_s18  ;;  %v1225_v63 = vstv %s5466_s17  ;;  %v1266_v0 = vmul.f32 %v1265_v54, %v5461_v37  ;;  %v1267_v1 = vmul.f32 %v1265_v54, %v5473_v41  ;;  %s5528_s26 = sld [smem:[#allocation8 + $0x183]]  ;;  %s5547_s17 = sld [smem:[#allocation12 + $0x80]] }
 0x116   : > { %v1176_v2 = vadd.f32 %v1174_v51, %v1171_v49  ;;  %v1179_v3 = vmul.f32 %v5506_v55, %v1177_v48  ;;  %v1269_v4 = vmul.f32 %v5464_v38, %v1268_v59  ;;  %v1273_v5 = vstv %s5470_s19  ;;  %s5553_s18 = sld [smem:[#allocation12 + $0x100]]  ;;  %s5735_s3 = sld [smem:[#allocation8 + $0x107]] }
 0x117   : > { %2525 = vperm.xlu1 %4589, %v4368_v35   ;;  %1333 = vperm.xlu0 %4588, %v4172_v36   ;;  %v5530_v6 = vadd.f32 %v1178_v57, %v1175_v56  ;;  %v1223_v7 = vadd.f32 %v1221_v53, %v1218_v50  ;;  %v1224_v8 = vadd.f32 %v1222_v58, %v1219_v52  ;;  %v1055_v10 = vstv %s5483_s20  ;;  %s5555_s19 = sld [smem:[#allocation12 + $0x180]]  ;;  %v5586_v35 = vld [vmem:[%s5422_s15 + $0x8] sm:$0x7f]  ;;  %s5685_s20 = sld [smem:[#allocation8 + $0x184]] }
 0x118   : > { %v1270_v9 = vmul.f32 %v5476_v43, %v1268_v59  ;;  %v5535_v11 = vmul.f32 %v5516_v60, %v1182_v62  ;;  %v5538_v12 = vmul.f32 %v5519_v61, %v1182_v62  ;;  %v1226_v13 = vmul.f32 %v5486_v47, %v1225_v63  ;;  %s5737_s4 = sld [smem:[#allocation8 + $0x187]]  ;;  %s5753_s5 = sld [smem:[#allocation16]] }
 0x119   : > { %v1085_v14 = vstv %s5491_s25  ;;  %v1227_v15 = vmul.f32 %v5506_v55, %v1225_v63  ;;  %v1313_v16 = vstv %s5481_s24  ;;  %v1316_v17 = vstv %s5489_s23  ;;  %s5560_s24 = sld [smem:[#allocation12 + $0x1]]  ;;  %s5687_s25 = sld [smem:[#allocation8 + $0x5]] }
 0x11a   : > { %v5549_v18 = vadd.f32 %v1179_v3, %v1176_v2  ;;  %v1230_v19 = vstv %s5495_s30  ;;  %v1271_v20 = vadd.f32 %v1269_v4, %v1266_v0  ;;  %v1274_v21 = vmul.f32 %v5486_v47, %v1273_v5  ;;  %s5562_s23 = sld [smem:[#allocation12 + $0x81]]  ;;  %s5581_s30 = sld [smem:[#allocation12 + $0x2]] }
 0x11b   : > { %v1115_v22 = vstv %s5503_s27  ;;  %v1272_v23 = vadd.f32 %v1270_v9, %v1267_v1  ;;  %v1275_v24 = vmul.f32 %v5506_v55, %v1273_v5  ;;  %v1278_v25 = vstv %s5501_s6  ;;  %s5599_s6 = sld [smem:[#allocation12 + $0x101]]  ;;  %s5728_s27 = sld [smem:[#allocation8 + $0x7]] }
 0x11c   : > { %v1145_v26 = vstv %s5513_s1  ;;  %v1314_v27 = vmul.f32 %v1313_v16, %v5461_v37  ;;  %v1317_v28 = vmul.f32 %v5464_v38, %v1316_v17  ;;  %v1321_v29 = vstv %s5511_s0  ;;  %s5583_s0 = sld [smem:[#allocation12 + $0x82]]  ;;  %9495 = sst [smem:[#allocation43_spill]] %s5735_s3 }
 0x11d   : > { %v5571_v31 = vadd.f32 %v1226_v13, %v1223_v7  ;;  %v5573_v32 = vadd.f32 %v1227_v15, %v1224_v8  ;;  %v5576_v33 = vmul.f32 %v5516_v60, %v1230_v19  ;;  %v5579_v34 = vmul.f32 %v5519_v61, %v1230_v19  ;;  %s5755_s7 = sld [smem:[#allocation10 + $0x81]]  ;;  %s5757_s8 = sld [smem:[#allocation10 + $0x82]] }
 0x11e   : > { %v5588_v36 = vadd.f32 %v1274_v21, %v1271_v20  ;;  %v5591_v37 = vmul.f32 %v5516_v60, %v1278_v25  ;;  %v5594_v38 = vmul.f32 %v5519_v61, %v1278_v25  ;;  %v5597_v39 = vmul.f32 %v1313_v16, %v5473_v41  ;;  %v5614_v41 = vld [vmem:[%s5422_s15 + $0x18] sm:$0x7f]  ;;  %9496 = sst [smem:[#allocation44_spill]] %s5737_s4  ;;  %s5771_s9 = sld [smem:[#allocation10 + $0x83]] }
 0x11f   : > { %v5603_v40 = vadd.f32 %v1275_v24, %v1272_v23  ;;  %v1318_v42 = vmul.f32 %v5476_v43, %v1316_v17  ;;  %v5607_v44 = vmul.f32 %v5486_v47, %v1321_v29  ;;  %v1326_v45 = vstv %s5528_s26  ;;  %v5624_v43 = vld [vmem:[%s5422_s15 + $0x20] sm:$0x7f]  ;;  %v5627_v47 = vld [vmem:[%s5422_s15 + $0x28] sm:$0x7f]  ;;  %s5645_s15 = sld [smem:[#allocation12 + $0x181]]  ;;  %s5743_s26 = sld [smem:[#allocation10 + $0x80]] }
 0x120   : > { %v1042_v48 = vstv %s5545_s28  ;;  %v1072_v49 = vstv %s5547_s17  ;;  %v5618_v50 = vadd.f32 %v1317_v28, %v1314_v27  ;;  %v5621_v51 = vmul.f32 %v5506_v55, %v1321_v29  ;;  %s5647_s28 = sld [smem:[#allocation12 + $0x182]]  ;;  %s5667_s17 = sld [smem:[#allocation8 + $0x4]] }
 0x121   : > { %v1043_v52 = vmul.f32 %v1042_v48, %v5569_v30  ;;  %v1044_v53 = vmul.f32 %v1042_v48, %v5586_v35  ;;  %v1073_v54 = vmul.f32 %v1072_v49, %v5569_v30  ;;  %v1074_v56 = vmul.f32 %v1072_v49, %v5586_v35  ;;  %9493 = sst [smem:[#allocation41_spill]] %s5728_s27  ;;  %s5785_s10 = sld [smem:[#allocation16 + $0x1]] }
 0x122   : > { %v1045_v57 = vstv %s5560_s24  ;;  %v1075_v58 = vstv %s5562_s23  ;;  %v1102_v59 = vstv %s5553_s18  ;;  %v1132_v62 = vstv %s5555_s19  ;;  %s5669_s18 = sld [smem:[#allocation8 + $0x84]]  ;;  %s5691_s19 = sld [smem:[#allocation8 + $0x85]] }
 0x123   : > { %v1046_v55 = vmul.f32 %v5611_v46, %v1045_v57  ;;  %v1047_v63 = vmul.f32 %v5614_v41, %v1045_v57  ;;  %v1076_v0 = vmul.f32 %v5611_v46, %v1075_v58  ;;  %v1077_v1 = vmul.f32 %v5614_v41, %v1075_v58  ;;  %s5693_s24 = sld [smem:[#allocation8 + $0x105]]  ;;  %9498 = sst [smem:[#allocation46_spill]] %s5755_s7 }
 0x124   : > { %v1050_v2 = vstv %s5581_s30  ;;  %v1080_v3 = vstv %s5583_s0  ;;  %v1103_v4 = vmul.f32 %v1102_v59, %v5569_v30  ;;  %v1104_v5 = vmul.f32 %v1102_v59, %v5586_v35  ;;  %s5698_s23 = sld [smem:[#allocation8 + $0x185]]  ;;  %s5700_s30 = sld [smem:[#allocation8 + $0x6]] }
 0x125   : > { %v1048_v7 = vadd.f32 %v1046_v55, %v1043_v52  ;;  %v1049_v8 = vadd.f32 %v1047_v63, %v1044_v53  ;;  %v1051_v9 = vmul.f32 %v5624_v43, %v1050_v2  ;;  %v1052_v13 = vmul.f32 %v5627_v47, %v1050_v2  ;;  %s5711_s0 = sld [smem:[#allocation8 + $0x86]]  ;;  %9497 = sst [smem:[#allocation45_spill]] %s5743_s26 }
 0x126   : > { %v1078_v15 = vadd.f32 %v1076_v0, %v1073_v54  ;;  %v1079_v16 = vadd.f32 %v1077_v1, %v1074_v56  ;;  %v1081_v17 = vmul.f32 %v5624_v43, %v1080_v3  ;;  %v1082_v19 = vmul.f32 %v5627_v47, %v1080_v3  ;;  %9499 = sst [smem:[#allocation47_spill]] %s5757_s8  ;;  %s5787_s11 = sld [smem:[#allocation8 + $0x8]] }
 0x127   : > { %v1053_v20 = vadd.f32 %v1051_v9, %v1048_v7  ;;  %v1054_v21 = vadd.f32 %v1052_v13, %v1049_v8  ;;  %v1105_v23 = vstv %s5599_s6  ;;  %v1110_v24 = vstv %s5601_s2  ;;  %s5679_s2 = sld [smem:[#allocation8 + $0x104]]  ;;  %s5713_s6 = sld [smem:[#allocation8 + $0x106]] }
 0x128   : > { %v1083_v25 = vadd.f32 %v1081_v17, %v1078_v15  ;;  %v1084_v27 = vadd.f32 %v1082_v19, %v1079_v16  ;;  %v1106_v28 = vmul.f32 %v5611_v46, %v1105_v23  ;;  %v1107_v29 = vmul.f32 %v5614_v41, %v1105_v23  ;;  %9500 = sst [smem:[#allocation48_spill]] %s5771_s9  ;;  %s5789_s1 = sld [smem:[#allocation8 + $0x9]]  ;;  %v5802_v17 = vld [vmem:[%s5426_s29] sm:$0x7f]  ;;  %v5805_v19 = vld [vmem:[%s5426_s29 + $0x8] sm:$0x7f] }
 0x129   : > { %v5659_v48 = vadd.f32 %v1055_v10, %v1053_v20  ;;  %v5663_v49 = vadd.f32 %v1055_v10, %v1054_v21  ;;  %v1111_v52 = vmul.f32 %v5624_v43, %v1110_v24  ;;  %v1112_v53 = vmul.f32 %v5627_v47, %v1110_v24  ;;  %s5799_s12 = sld [smem:[#allocation16 + $0x2]]  ;;  %s5811_s13 = sld [smem:[#allocation15]] }
 0x12a   : > { %v5673_v54 = vadd.f32 %v1085_v14, %v1083_v25  ;;  %v5677_v56 = vadd.f32 %v1085_v14, %v1084_v27  ;;  %v1108_v57 = vadd.f32 %v1106_v28, %v1103_v4  ;;  %v1109_v58 = vadd.f32 %v1107_v29, %v1104_v5  ;;  %9488 = sst [smem:[#allocation36_spill]] %s5698_s23  ;;  %s5817_s22 = sld [smem:[#allocation16 + $0x81]] }
 0x12b   : > { %v4162_v10 = vmul.f32 -1.442695, %v5659_v48  ;;  %v4163_v59 = vmul.f32 -1.442695, %v5663_v49  ;;  %v1133_v55 = vmul.f32 %v1132_v62, %v5569_v30  ;;  %v1320_v63 = vadd.f32 %v1318_v42, %v5597_v39  ;;  %9489 = sst [smem:[#allocation37_spill]] %s5700_s30  ;;  %s5815_s21 = sld [smem:[#allocation16 + $0x80]] }
 0x12c   : > { %v4164_v14 = vmul.f32 -1.442695, %v5673_v54  ;;  %v1113_v0 = vadd.f32 %v1111_v52, %v1108_v57  ;;  %v1114_v1 = vadd.f32 %v1112_v53, %v1109_v58  ;;  %v1134_v2 = vmul.f32 %v1132_v62, %v5586_v35  ;;  %9490 = sst [smem:[#allocation38_spill]] %s5711_s0  ;;  %v5820_v52 = vld [vmem:[%s5426_s29 + $0x10] sm:$0x7f]  ;;  %s5824_s16 = sld [smem:[#allocation8 + $0xb]] }
 0x12d   : > { %4590 = vpow2.f32 %v4162_v10  ;;  %v4165_v30 = vmul.f32 -1.442695, %v5677_v56  ;;  %v1135_v39 = vstv %s5645_s15  ;;  %v1140_v42 = vstv %s5647_s28  ;;  %9491 = sst [smem:[#allocation39_spill]] %s5713_s6  ;;  %s5721_s15 = sld [smem:[#allocation8 + $0x186]]  ;;  %v5830_v10 = vld [vmem:[%s5426_s29 + $0x18] sm:$0x7f] }
 0x12e   : > { %4592 = vpow2.f32 %v4163_v59  ;;  %v5704_v3 = vadd.f32 %v1115_v22, %v1113_v0  ;;  %v5708_v35 = vadd.f32 %v1115_v22, %v1114_v1  ;;  %v1136_v62 = vmul.f32 %v5611_v46, %v1135_v39  ;;  %s5730_s28 = sld [smem:[#allocation8 + $0x87]]  ;;  %9501 = sst [smem:[#allocation49_spill]] %s5787_s11  ;;  %v5837_v0 = vld [vmem:[%s5426_s29 + $0x20] sm:$0x7f] }
 0x12f   : > { %v1137_v4 = vmul.f32 %v5614_v41, %v1135_v39  ;;  %v1141_v5 = vmul.f32 %v5624_v43, %v1140_v42  ;;  %v1142_v7 = vmul.f32 %v5627_v47, %v1140_v42  ;;  %v1327_v8 = vmul.f32 %v5516_v60, %v1326_v45  ;;  %9502 = sst [smem:[#allocation50_spill]] %s5789_s1  ;;  %s5822_s14 = sld [smem:[#allocation8 + $0xa]] }
 0x130   : > { %v4166_v22 = vmul.f32 -1.442695, %v5704_v3  ;;  %v4167_v9 = vmul.f32 -1.442695, %v5708_v35  ;;  %v1138_v46 = vadd.f32 %v1136_v62, %v1133_v55  ;;  %v1328_v13 = vmul.f32 %v5519_v61, %v1326_v45  ;;  %s5848_s26 = sld [smem:[#allocation8 + $0x89]]  ;;  %s5860_s8 = sld [smem:[#allocation8 + $0x8b]] }
 0x131   : > { %4594 = vpow2.f32 %v4164_v14  ;;  %v1139_v41 = vadd.f32 %v1137_v4, %v1134_v2  ;;  %v1324_v43 = vadd.f32 %v5607_v44, %v5618_v50  ;;  %v1325_v60 = vadd.f32 %v5621_v51, %v1320_v63  ;;  %s5865_s9 = sld [smem:[#allocation8 + $0x188]]  ;;  %s5876_s7 = sld [smem:[#allocation8 + $0x10a]] }
 0x132   : > { %4596 = vpow2.f32 %v4165_v30  ;;  %v1143_v47 = vadd.f32 %v1141_v5, %v1138_v46  ;;  %v5741_v61 = vadd.f32 %v5535_v11, %v5530_v6  ;;  %v5747_v44 = vadd.f32 %v5538_v12, %v5549_v18  ;;  %9504 = sst [smem:[#allocation52_spill]] %s5824_s16  ;;  %s5883_s1 = sld [smem:[#allocation8 + $0x18a]] }
 0x133   : > { %9492 = sst [smem:[#allocation40_spill]] %s5721_s15  ;;  %4598 = vpow2.f32 %v4166_v22  ;;  %v1144_v45 = vadd.f32 %v1142_v7, %v1139_v41  ;;  %v5751_v50 = vadd.f32 %v5576_v33, %v5571_v31  ;;  %v5765_v11 = vadd.f32 %v5579_v34, %v5573_v32  ;;  %v5854_v7 = vld [vmem:[%s5426_s29 + $0x28] sm:$0x7f]  ;;  %s5867_s29 = sld [smem:[#allocation10 + $0x101]] }
 0x134   : > { %9494 = sst [smem:[#allocation42_spill]] %s5730_s28  ;;  %4600 = vpow2.f32 %v4167_v9  ;;  %v5761_v6 = vadd.f32 %v1145_v26, %v1143_v47  ;;  %v5769_v12 = vadd.f32 %v5591_v37, %v5588_v36  ;;  %v5779_v31 = vadd.f32 %v5594_v38, %v5603_v40  ;;  %s5885_s11 = sld [smem:[#allocation10 + $0x102]] }
 0x135   : > { %v5775_v18 = vadd.f32 %v1145_v26, %v1144_v45  ;;  %v5781_v33 = vadd.f32 %v1327_v8, %v1324_v43  ;;  %v5783_v32 = vadd.f32 %v1328_v13, %v1325_v60  ;;  %v1361_v34 = vstv %s5667_s17  ;;  %9503 = sst [smem:[#allocation51_spill]] %s5822_s14  ;;  %s5910_s16 = sld [smem:[#allocation8 + $0x13]] }
 0x136   : > { %v4168_v26 = vmul.f32 -1.442695, %v5761_v6  ;;  %v1396_v36 = vstv %s5669_s18  ;;  %v1431_v37 = vstv %s5679_s2  ;;  %v1364_v51 = vstv %s5687_s25  ;;  %9508 = sst [smem:[#allocation56_spill]] %s5848_s26  ;;  %s5915_s14 = sld [smem:[#allocation16 + $0x101]] }
 0x137   : > { %v4591_v38 = vpop.eup %4590  ;;  %v4169_v40 = vmul.f32 -1.442695, %v5775_v18  ;;  %v1399_v15 = vstv %s5691_s19  ;;  %v1466_v16 = vstv %s5685_s20  ;;  %v1369_v21 = vstv %s5700_s30  ;;  %9510 = sst [smem:[#allocation58_spill]] %s5860_s8  ;;  %s5924_s26 = sld [smem:[#allocation16 + $0x102]] }
 0x138   : > { %v4593_v20 = vpop.eup %4592  ;;  %v1404_v23 = vstv %s5711_s0  ;;  %v1434_v24 = vstv %s5693_s24  ;;  %v1469_v25 = vstv %s5698_s23  ;;  %v1064_v27 = vadd.f32 1.0, %v4591_v38  ;;  %9511 = sst [smem:[#allocation59_spill]] %s5865_s9  ;;  %s5891_s0 = sld [smem:[#allocation8 + $0x10]] }
 0x139   : > { %4602 = vpow2.f32 %v4168_v26  ;;  %v1439_v28 = vstv %s5713_s6  ;;  %v1474_v29 = vstv %s5721_s15  ;;  %v1374_v53 = vstv %s5728_s27  ;;  %s5832_s15 = sld [smem:[#allocation10 + $0x100]]  ;;  %9515 = sst [smem:[#allocation63_spill]] %s5876_s7 }
 0x13a   : > { %4604 = vpow2.f32 %v4169_v40  ;;  %v1409_v57 = vstv %s5730_s28  ;;  %v1444_v58 = vstv %s5735_s3  ;;  %v1065_v55 = vadd.f32 1.0, %v4593_v20  ;;  %s5840_s6 = sld [smem:[#allocation8 + $0x88]]  ;;  %s5878_s3 = sld [smem:[#allocation8 + $0x10b]] }
 0x13b   : > { %v4595_v59 = vpop.eup %4594  ;;  %v1479_v14 = vstv %s5737_s4  ;;  %v2234_v1 = vstv %s5753_s5  ;;  %s5842_s28 = sld [smem:[#allocation8 + $0x108]]  ;;  %4606 = vrcp.f32 %v1064_v27  ;;  %s5851_s4 = sld [smem:[#allocation16 + $0x82]]  ;;  %v2237_v8 = vstv %s5785_s10 }
 0x13c   : > { %v4597_v2 = vpop.eup %4596  ;;  %v2235_v42 = vmul.f32 %v2234_v1, %v5802_v17  ;;  %v2236_v62 = vmul.f32 %v2234_v1, %v5805_v19  ;;  %v2242_v22 = vstv %s5799_s12  ;;  %s5858_s5 = sld [smem:[#allocation8 + $0x8a]]  ;;  %v1094_v46 = vadd.f32 1.0, %v4595_v59  ;;  %9512 = sst [smem:[#allocation60_spill]] %s5867_s29 }
 0x13d   : > { %v4599_v4 = vpop.eup %4598  ;;  %v2238_v13 = vmul.f32 %v5820_v52, %v2237_v8  ;;  %v2239_v41 = vmul.f32 %v5830_v10, %v2237_v8  ;;  %v2243_v43 = vmul.f32 %v5837_v0, %v2242_v22  ;;  %4608 = vrcp.f32 %v1065_v55  ;;  %s5871_s10 = sld [smem:[#allocation8 + $0x109]]  ;;  %9517 = sst [smem:[#allocation65_spill]] %s5883_s1 }
 0x13e   : > { %v4601_v9 = vpop.eup %4600  ;;  %v1095_v60 = vadd.f32 1.0, %v4597_v2  ;;  %s5873_s12 = sld [smem:[#allocation8 + $0x189]]  ;;  %v1124_v26 = vadd.f32 1.0, %v4599_v4  ;;  %v2244_v20 = vmul.f32 %v5854_v7, %v2242_v22  ;;  %v2247_v59 = vstv %s5811_s13  ;;  %9518 = sst [smem:[#allocation66_spill]] %s5885_s11 }
 0x13f   : > { %9505 = sst [smem:[#allocation53_spill]] %s5832_s15  ;;  %v2240_v38 = vadd.f32 %v2238_v13, %v2235_v42  ;;  %v2241_v40 = vadd.f32 %v2239_v41, %v2236_v62  ;;  %v1125_v27 = vadd.f32 1.0, %v4601_v9  ;;  %v2264_v55 = vstv %s5815_s21  ;;  %s5889_s27 = sld [smem:[#allocation8 + $0x18b]] }
 0x140   : > { %9506 = sst [smem:[#allocation54_spill]] %s5840_s6  ;;  %v2267_v1 = vstv %s5817_s22  ;;  %4610 = vrcp.f32 %v1094_v46  ;;  %v2265_v22 = vmul.f32 %v2264_v55, %v5802_v17  ;;  %s5897_s13 = sld [smem:[#allocation15 + $0x1]]  ;;  %v2297_v47 = vstv %s5915_s14 }
 0x141   : > { %9507 = sst [smem:[#allocation55_spill]] %s5842_s28  ;;  %v2245_v62 = vadd.f32 %v2243_v43, %v2240_v38  ;;  %4612 = vrcp.f32 %v1095_v60  ;;  %v2268_v9 = vmul.f32 %v5820_v52, %v2267_v1  ;;  %s5899_s21 = sld [smem:[#allocation16 + $0x100]]  ;;  %v2246_v41 = vadd.f32 %v2244_v20, %v2241_v40 }
 0x142   : > { %9509 = sst [smem:[#allocation57_spill]] %s5858_s5  ;;  %4614 = vrcp.f32 %v1124_v26  ;;  %s5903_s22 = sld [smem:[#allocation8 + $0x11]]  ;;  %v2266_v60 = vmul.f32 %v2264_v55, %v5805_v19  ;;  %v2269_v26 = vmul.f32 %v5830_v10, %v2267_v1  ;;  %v2272_v38 = vstv %s5851_s4 }
 0x143   : > { %9513 = sst [smem:[#allocation61_spill]] %s5871_s10  ;;  %v4603_v4 = vpop.eup %4602  ;;  %v5901_v43 = vadd.f32 %v2247_v59, %v2245_v62  ;;  %s5905_s15 = sld [smem:[#allocation8 + $0x12]]  ;;  %4616 = vrcp.f32 %v1125_v27  ;;  %v2270_v1 = vadd.f32 %v2268_v9, %v2265_v22  ;;  %v5926_v20 = vadd.f32 %v2247_v59, %v2246_v41 }
 0x144   : > { %9514 = sst [smem:[#allocation62_spill]] %s5873_s12  ;;  %v4605_v13 = vpop.eup %4604  ;;  %v1154_v8 = vadd.f32 1.0, %v4603_v4  ;;  %s5917_s6 = sld [smem:[#allocation8 + $0x90]]  ;;  %v2273_v42 = vmul.f32 %v5837_v0, %v2272_v38  ;;  %v2271_v22 = vadd.f32 %v2269_v26, %v2266_v60  ;;  %v2274_v9 = vmul.f32 %v5854_v7, %v2272_v38 }
 0x145   : > { %9516 = sst [smem:[#allocation64_spill]] %s5878_s3  ;;  %v4607_v62 = vpop.eup %4606  ;;  %v1155_v27 = vadd.f32 1.0, %v4605_v13  ;;  %s5921_s4 = sld [smem:[#allocation8 + $0x91]]  ;;  %v4358_v40 = vmul.f32 -1.442695, %v5901_v43  ;;  %v2298_v59 = vmul.f32 %v5820_v52, %v2297_v47 }
 0x146   : > { %9519 = sst [smem:[#allocation67_spill]] %s5889_s27  ;;  %s5930_s29 = sld [smem:[#allocation8 + $0x92]]  ;;  %4618 = vrcp.f32 %v1154_v8  ;;  %v2275_v2 = vadd.f32 %v2273_v42, %v2270_v1  ;;  %v4359_v8 = vmul.f32 -1.442695, %v5926_v20  ;;  %v2277_v60 = vstv %s5897_s13 }
 0x147   : > { %9520 = sst [smem:[#allocation68_spill]] %s5891_s0  ;;  %v4609_v13 = vpop.eup %4608  ;;  %s5938_s8 = sld [smem:[#allocation10 + $0x103]]  ;;  %4620 = vrcp.f32 %v1155_v27  ;;  %v2294_v26 = vstv %s5899_s21  ;;  %v2276_v27 = vadd.f32 %v2274_v9, %v2271_v22  ;;  %v1070_v42 = vmul.f32 %v4607_v62, %v5659_v48 }
 0x148   : > { %9521 = sst [smem:[#allocation69_spill]] %s5903_s22  ;;  %s5942_s3 = sld [smem:[#allocation8 + $0x93]]  ;;  %4622 = vpow2.f32 %v4358_v40  ;;  %v1071_v1 = vmul.f32 %v4609_v13, %v5663_v49  ;;  %v5957_v39 = vadd.f32 %v2277_v60, %v2275_v2  ;;  %v2295_v41 = vmul.f32 %v2294_v26, %v5802_v17 }
 0x149   : > { %9522 = sst [smem:[#allocation70_spill]] %s5905_s15  ;;  %4624 = vpow2.f32 %v4359_v8  ;;  %v2302_v48 = vstv %s5924_s26  ;;  %v5969_v2 = vadd.f32 %v2277_v60, %v2276_v27  ;;  %v1197_v30 = vrot.slane %v1070_v42, 7  ;;  %s5980_s14 = sld [smem:[#allocation2]] }
 0x14a   : > { %9523 = sst [smem:[#allocation71_spill]] %s5910_s16  ;;  %v4611_v45 = vpop.eup %4610  ;;  %s5955_s27 = sld [smem:[#allocation15 + $0x2]]  ;;  %v1198_v63 = vrot.slane %v1071_v1, 7  ;;  %v2300_v8 = vadd.f32 %v2298_v59, %v2295_v41  ;;  %v2303_v9 = vmul.f32 %v5837_v0, %v2302_v48  ;;  %v2296_v59 = vmul.f32 %v2294_v26, %v5805_v19 }
 0x14b   : > { %9524 = sst [smem:[#allocation72_spill]] %s5917_s6  ;;  %v4613_v38 = vpop.eup %4612  ;;  %v1100_v22 = vmul.f32 %v4611_v45, %v5673_v54  ;;  %v4360_v45 = vmul.f32 -1.442695, %v5957_v39  ;;  %v4361_v1 = vmul.f32 -1.442695, %v5969_v2  ;;  %s5994_s21 = sld [smem:[#allocation8 + $0x110]] }
 0x14c   : > { %9525 = sst [smem:[#allocation73_spill]] %s5921_s4  ;;  %v4615_v46 = vpop.eup %4614  ;;  %v1101_v62 = vmul.f32 %v4613_v38, %v5677_v56  ;;  %s5985_s26 = sld [smem:[#allocation8 + $0xc]]  ;;  %v2305_v26 = vadd.f32 %v2303_v9, %v2300_v8 }
 0x14d   : > { %9526 = sst [smem:[#allocation74_spill]] %s5930_s29  ;;  %v4617_v40 = vpop.eup %4616  ;;  %v5966_v13 = vmul.f32 %v4615_v46, %v5704_v3  ;;  %v1624_v54 = vstv %s5938_s8  ;;  %v1245_v46 = vrot.slane %v1100_v22, 7  ;;  %s5987_s13 = sld [smem:[#allocation8 + $0x8c]]  ;;  %4626 = vpow2.f32 %v4360_v45 }
 0x14e   : > { %9527 = sst [smem:[#allocation75_spill]] %s5938_s8  ;;  %v5972_v55 = vmul.f32 %v4617_v40, %v5708_v35  ;;  %v1818_v60 = vstv %s5942_s3  ;;  %v1246_v35 = vrot.slane %v1101_v62, 7  ;;  %v2299_v22 = vmul.f32 %v5830_v10, %v2297_v47  ;;  %s6000_s29 = sld [smem:[#allocation8 + $0x190]] }
 0x14f   : > { %9528 = sst [smem:[#allocation76_spill]] %s5942_s3  ;;  %v1293_v42 = vrot.slane %v5966_v13, 7  ;;  %s6006_s4 = sld [smem:[#allocation8 + $0x111]]  ;;  %4628 = vpow2.f32 %v4361_v1 }
 0x150   : > { %v4619_v56 = vpop.eup %4618  ;;  %v1294_v40 = vrot.slane %v5972_v55, 7  ;;  %s5996_s3 = sld [smem:[#allocation10 + $0x200]]  ;;  %s6008_s6 = sld [smem:[#allocation8 + $0x112]] }
 0x151   : > { %v4621_v27 = vpop.eup %4620  ;;  %9531 = sst [smem:[#allocation79_spill]] %s5994_s21  ;;  %v1160_v13 = vmul.f32 %v4619_v56, %v5761_v6  ;;  %s6012_s8 = sld [smem:[#allocation8 + $0x191]]  ;;  %v2301_v6 = vadd.f32 %v2299_v22, %v2296_v59 }
 0x152   : > { %v4623_v41 = vpop.eup %4622  ;;  %9529 = sst [smem:[#allocation77_spill]] %s5985_s26  ;;  %v1161_v47 = vmul.f32 %v4621_v27, %v5775_v18  ;;  %s6014_s16 = sld [smem:[#allocation8 + $0x113]]  ;;  %v2304_v18 = vmul.f32 %v5854_v7, %v2302_v48 }
 0x153   : > { %9530 = sst [smem:[#allocation78_spill]] %s5987_s13  ;;  %v2256_v9 = vadd.f32 1.0, %v4623_v41  ;;  %v4625_v45 = vpop.eup %4624  ;;  %s6020_s15 = sld [smem:[#allocation10 + $0x201]]  ;;  %v1341_v1 = vrot.slane %v1160_v13, 7 }
 0x154   : > { %9533 = sst [smem:[#allocation81_spill]] %s6000_s29  ;;  %s6022_s22 = sld [smem:[#allocation10 + $0x202]]  ;;  %v1342_v7 = vrot.slane %v1161_v47, 7  ;;  %v2257_v48 = vadd.f32 1.0, %v4625_v45  ;;  %v2306_v13 = vadd.f32 %v2304_v18, %v2301_v6 }
 0x155   : > { %9534 = sst [smem:[#allocation82_spill]] %s6006_s4  ;;  %s6029_s0 = sld [smem:[#allocation8 + $0x192]] }
 0x156   : > { %9532 = sst [smem:[#allocation80_spill]] %s5996_s3  ;;  %s6035_s1 = sld [smem:[#allocation8 + $0x193]] }
 0x157   : > { %9535 = sst [smem:[#allocation83_spill]] %s6008_s6  ;;  %s6037_s11 = sld [smem:[#allocation8 + $0x10c]] }
 0x158   : > { %9536 = sst [smem:[#allocation84_spill]] %s6012_s8  ;;  %s6039_s12 = sld [smem:[#allocation8 + $0xd]] }
 0x159   : > { %9537 = sst [smem:[#allocation85_spill]] %s6014_s16  ;;  %s6045_s9 = sld [smem:[#allocation8 + $0x8d]] }
 0x15a   : > { %9538 = sst [smem:[#allocation86_spill]] %s6020_s15  ;;  %s6047_s7 = sld [smem:[#allocation8 + $0xe]] }
 0x15b   : > { %9539 = sst [smem:[#allocation87_spill]] %s6022_s22  ;;  %s6052_s5 = sld [smem:[#allocation8 + $0xf]] }
 0x15c   : > { %9540 = sst [smem:[#allocation88_spill]] %s6029_s0  ;;  %s6060_s28 = sld [smem:[#allocation8 + $0x8e]] }
 0x15d   : > { %9541 = sst [smem:[#allocation89_spill]] %s6035_s1  ;;  %s6058_s10 = sld [smem:[#allocation8 + $0x18c]] }
 0x15e   : > { %9542 = sst [smem:[#allocation90_spill]] %s6037_s11  ;;  %s6075_s30 = sld [smem:[#allocation8 + $0x18d]] }
 0x15f   : > { %9543 = sst [smem:[#allocation91_spill]] %s6039_s12  ;;  %s6089_s23 = sld [smem:[#allocation8 + $0x18e]] }
 0x160   : > { %9544 = sst [smem:[#allocation92_spill]] %s6045_s9  ;;  %s6094_s22 = sld [smem:[#allocation8 + $0x18f]] }
 0x161   : > { %9545 = sst [smem:[#allocation93_spill]] %s6047_s7  ;;  %s6096_s16 = sld [smem:[#allocation10 + $0x203]] }
 0x162   : > { %9546 = sst [smem:[#allocation94_spill]] %s6052_s5  ;;  %s6102_s8 = sld [smem:[#allocation10 + $0x181]] }
 0x163   : > { %9547 = sst [smem:[#allocation95_spill]] %s6058_s10  ;;  %s6104_s29 = sld [smem:[#allocation10 + $0x182]] }
 0x164   : > { %9548 = sst [smem:[#allocation96_spill]] %s6060_s28  ;;  %s6109_s1 = sld [smem:[#allocation10 + $0x183]] }
 0x165   : > { %9551 = sst [smem:[#allocation99_spill]] %s6075_s30  ;;  %s6117_s12 = sld [smem:[#allocation16 + $0x181]] }
 0x166   : > { %9555 = sst [smem:[#allocation103_spill]] %s6089_s23  ;;  %s6124_s5 = sld [smem:[#allocation16 + $0x182]] }
 0x167   : > { %9556 = sst [smem:[#allocation104_spill]] %s6094_s22  ;;  %s6216_s25 = sld [smem:[#allocation8 + $0x115]] }
 0x168   : > { %9557 = sst [smem:[#allocation105_spill]] %s6096_s16  ;;  %s6185_s17 = sld [smem:[#allocation8 + $0x14]] }
 0x169   : > { %9558 = sst [smem:[#allocation106_spill]] %s6102_s8  ;;  %s6187_s18 = sld [smem:[#allocation8 + $0x94]] }
 0x16a   : > { %9559 = sst [smem:[#allocation107_spill]] %s6104_s29  ;;  %s6197_s2 = sld [smem:[#allocation8 + $0x114]] }
 0x16b   : > { %9560 = sst [smem:[#allocation108_spill]] %s6109_s1  ;;  %s6199_s20 = sld [smem:[#allocation8 + $0x194]] }
 0x16c   : > { %9561 = sst [smem:[#allocation109_spill]] %s6124_s5  ;;  %s6209_s16 = sld [smem:[#allocation8 + $0x15]] }
 0x16d   : > { %s6211_s29 = sld [smem:[#allocation8 + $0x95]]  ;;  %s6221_s24 = sld [smem:[#allocation8 + $0x16]] }
 0x16e   : > { %9563 = sst [smem:[#allocation36_spill]] %s6185_s17  ;;  %s6218_s19 = sld [smem:[#allocation8 + $0x195]] }
 0x16f   : > { %s6233_s22 = sld [smem:[#allocation8 + $0x196]]  ;;  %s6241_s23 = sld [smem:[#allocation8 + $0x17]] }
 0x170   : > { %9564 = sst [smem:[#allocation110_spill]] %s6197_s2  ;;  %s6243_s10 = sld [smem:[#allocation8 + $0x97]] }
 0x171   : > { %s6248_s1 = sld [smem:[#allocation8 + $0x197]]  ;;  %s6252_s28 = sld [smem:[#allocation8 + $0x18]] }
 0x172   : > { %9566 = sst [smem:[#allocation37_spill]] %s6209_s16  ;;  %s6254_s7 = sld [smem:[#allocation8 + $0x98]] }
 0x173   : > { %9568 = sst [smem:[#allocation38_spill]] %s6211_s29  ;;  %s6266_s9 = sld [smem:[#allocation8 + $0x198]] }
 0x174   : > { %9570 = sst [smem:[#allocation39_spill]] %s6221_s24  ;;  %s9581_s11 = sld [smem:[#allocation45_spill]] }
 0x175   : > { %9571 = sst [smem:[#allocation111_spill]] %s6233_s22  ;;  %s9582_s13 = sld [smem:[#allocation46_spill]] }
 0x176   : > { %9575 = sst [smem:[#allocation40_spill]] %s6243_s10  ;;  %s6272_s26 = sld [smem:[#allocation8 + $0x19]] }
 0x177   : > { %s6274_s0 = sld [smem:[#allocation10 + $0x280]]  ;;  %s9586_s17 = sld [smem:[#allocation48_spill]] }
 0x178   : > { %s6304_s30 = sld [smem:[#allocation8 + $0x9a]]  ;;  %s6317_s8 = sld [smem:[#allocation10 + $0x283]] }
 0x179   : > { %9580 = sst [smem:[#allocation43_spill]] %s6266_s9  ;;  %s6288_s9 = sld [smem:[#allocation8 + $0x1a]] }
 0x17a   : > { %s6359_s24 = sld [smem:[#allocation8 + $0x199]]  ;;  %s6361_s16 = sld [smem:[#allocation8 + $0x19a]] }
 0x17b   : > { %s6368_s29 = sld [smem:[#allocation10 + $0x303]]  ;;  %s6389_s22 = sld [smem:[#allocation13]] }
 0x17c   : > { %s9608_s10 = sld [smem:[#allocation35_spill]]  ;;  %s6405_s2 = sld [smem:[#allocation13 + $0x2]] }
 0x17d   : > { %9584 = sst [smem:[#allocation44_spill]] %s6274_s0  ;;  %s6366_s0 = sld [smem:[#allocation8 + $0x19b]] }
 0x180   : > { %9601 = sst [smem:[#allocation115_spill]] %s6361_s16  ;;  %s9637_s16 = sld [smem:[#allocation58_spill]] }
 0x181   : > { %9603 = sst [smem:[#allocation117_spill]] %s6368_s29  ;;  %s9611_s29 = sld [smem:[#allocation34_spill]] }
 0x183   : > { %9602 = sst [smem:[#allocation116_spill]] %s6366_s0 }
 0x184   : > { %s6424_s0 = sld [smem:[#allocation13 + $0x80]] }
 0x18a   : > { %v1190_v49 = vpop.permute.xlu0 %1189 }
 0x18b   : > { %v1191_v4 = vrot.slane %v1190_v49, 7  ;;  %v2307_v49 = vstv %s5955_s27  ;;  %s6115_s27 = sld [smem:[#allocation16 + $0x180]] }
 0x18c   : > { %v6027_v56 = vadd.f32 %v2307_v49, %v2305_v26 }
 0x18d   : > { %v1193_v38 = vadd.f32 %v1191_v4, %v5741_v61  ;;  %v1194_v3 = vadd.f32 %v1191_v4, %v5747_v44 }
 0x18e   : > { %v1238_v5 = vpop.permute.xlu0 %1237  ;;  %v4362_v22 = vmul.f32 -1.442695, %v6027_v56 }
 0x18f   : > { %v5989_v61 = vadd.f32 %v1197_v30, %v1193_v38  ;;  %v5991_v44 = vadd.f32 %v1198_v63, %v1194_v3  ;;  %v1239_v4 = vrot.slane %v1238_v5, 7 }
 0x191   : > { %v4173_v62 = vmul.f32 -1.442695, %v5989_v61  ;;  %v4174_v30 = vmul.f32 -1.442695, %v5991_v44  ;;  %v1241_v63 = vadd.f32 %v1239_v4, %v5751_v50  ;;  %v1242_v5 = vadd.f32 %v1239_v4, %v5765_v11 }
 0x192   : > { %v1286_v55 = vpop.permute.xlu0 %1285  ;;  %v1828_v4 = vstv %s5994_s21  ;;  %s6067_s21 = sld [smem:[#allocation8 + $0x10d]] }
 0x193   : > { %4630 = vpow2.f32 %v4173_v62  ;;  %v6016_v50 = vadd.f32 %v1245_v46, %v1241_v63  ;;  %v6018_v11 = vadd.f32 %v1246_v35, %v1242_v5  ;;  %v1287_v8 = vrot.slane %v1286_v55, 7 }
 0x194   : > { %4632 = vpow2.f32 %v4174_v30  ;;  %v4627_v30 = vpop.eup %4626  ;;  %v6063_v63 = vstv %s5980_s14  ;;  %v1831_v5 = vstv %s6006_s4  ;;  %v1836_v55 = vstv %s6008_s6  ;;  %s6077_s14 = sld [smem:[#allocation8 + $0x8f]]  ;;  %s6082_s6 = sld [smem:[#allocation8 + $0x10e]] }
 0x195   : > { %v4175_v38 = vmul.f32 -1.442695, %v6016_v50  ;;  %v4176_v3 = vmul.f32 -1.442695, %v6018_v11  ;;  %v1289_v46 = vadd.f32 %v1287_v8, %v5769_v12  ;;  %v1290_v27 = vadd.f32 %v1287_v8, %v5779_v31  ;;  %v4629_v47 = vpop.eup %4628  ;;  %s6084_s4 = sld [smem:[#allocation8 + $0x10f]] }
 0x196   : > { %v1334_v35 = vpop.permute.xlu0 %1333  ;;  %4634 = vrcp.f32 %v2256_v9  ;;  %v1799_v31 = vstv %s5996_s3  ;;  %s6069_s3 = sld [smem:[#allocation10 + $0x180]]  ;;  %v1823_v9 = vstv %s6020_s15  ;;  %s6276_s15 = sld [smem:[#allocation8 + $0x99]] }
 0x197   : > { %4636 = vpow2.f32 %v4175_v38  ;;  %v6041_v59 = vadd.f32 %v1293_v42, %v1289_v46  ;;  %v6043_v41 = vadd.f32 %v1294_v40, %v1290_v27  ;;  %v1335_v12 = vrot.slane %v1334_v35, 7 }
 0x198   : > { %4638 = vpow2.f32 %v4176_v3  ;;  %9549 = sst [smem:[#allocation97_spill]] %s6067_s21  ;;  %s6264_s21 = sld [smem:[#allocation8 + $0x118]] }
 0x199   : > { %v4177_v42 = vmul.f32 -1.442695, %v6041_v59  ;;  %v4178_v40 = vmul.f32 -1.442695, %v6043_v41  ;;  %v1337_v26 = vadd.f32 %v1335_v12, %v5781_v33  ;;  %v1338_v62 = vadd.f32 %v1335_v12, %v5783_v32 }
 0x19a   : > { %4640 = vrcp.f32 %v2257_v48  ;;  %9552 = sst [smem:[#allocation100_spill]] %s6077_s14  ;;  %v2286_v12 = vadd.f32 1.0, %v4627_v30  ;;  %s6315_s14 = sld [smem:[#allocation8 + $0x11a]] }
 0x19b   : > { %4642 = vpow2.f32 %v4177_v42  ;;  %v6071_v33 = vadd.f32 %v1341_v1, %v1337_v26  ;;  %v6073_v32 = vadd.f32 %v1342_v7, %v1338_v62  ;;  %9553 = sst [smem:[#allocation101_spill]] %s6082_s6  ;;  %s6306_s6 = sld [smem:[#allocation10 + $0x282]] }
 0x19c   : > { %9550 = sst [smem:[#allocation98_spill]] %s6069_s3  ;;  %4644 = vpow2.f32 %v4178_v40 }
 0x19d   : > { %v4631_v38 = vpop.eup %4630  ;;  %9554 = sst [smem:[#allocation102_spill]] %s6084_s4  ;;  %v4179_v3 = vmul.f32 -1.442695, %v6071_v33  ;;  %4646 = vpow2.f32 %v4362_v22  ;;  %v4180_v35 = vmul.f32 -1.442695, %v6073_v32  ;;  %v6100_v22 = vadd.f32 %v2307_v49, %v2306_v13  ;;  %s6231_s3 = sld [smem:[#allocation8 + $0x116]] }
 0x19e   : > { %v4633_v46 = vpop.eup %4632  ;;  %v1209_v27 = vadd.f32 1.0, %v4631_v38  ;;  %9579 = sst [smem:[#allocation42_spill]] %s6264_s21  ;;  %s9583_s4 = sld [smem:[#allocation47_spill]] }
 0x19f   : > { %v1210_v48 = vadd.f32 1.0, %v4633_v46  ;;  %4648 = vpow2.f32 %v4179_v3  ;;  %v4363_v3 = vmul.f32 -1.442695, %v6100_v22  ;;  %s6290_s21 = sld [smem:[#allocation10 + $0x281]]  ;;  %9591 = sst [smem:[#allocation47_spill]] %s6304_s30 }
 0x1a0   : > { %v4635_v42 = vpop.eup %4634  ;;  %4650 = vrcp.f32 %v1209_v27  ;;  %v2287_v27 = vadd.f32 1.0, %v4629_v47  ;;  %s6337_s30 = sld [smem:[#allocation10 + $0x300]] }
 0x1a1   : > { %v4637_v38 = vpop.eup %4636  ;;  %4652 = vrcp.f32 %v1210_v48  ;;  %v6137_v48 = vmul.f32 %v4635_v42, %v5901_v43  ;;  %9592 = sst [smem:[#allocation48_spill]] %s6306_s6  ;;  %s9607_s6 = sld [smem:[#allocation43_spill]] }
 0x1a2   : > { %v4639_v13 = vpop.eup %4638  ;;  %v1257_v46 = vadd.f32 1.0, %v4637_v38  ;;  %4654 = vpow2.f32 %v4180_v35  ;;  %9612 = sst [smem:[#allocation43_spill]] %s6424_s0  ;;  %s9634_s0 = sld [smem:[#allocation52_spill]] }
 0x1a3   : > { %v1258_v8 = vadd.f32 1.0, %v4639_v13  ;;  %4656 = vrcp.f32 %v2286_v12 }
 0x1a4   : > { %v4641_v62 = vpop.eup %4640  ;;  %4658 = vrcp.f32 %v1257_v46 }
 0x1a5   : > { %v4643_v49 = vpop.eup %4642  ;;  %4660 = vrcp.f32 %v1258_v8  ;;  %9587 = sst [smem:[#allocation46_spill]] %s6290_s21  ;;  %s6407_s21 = sld [smem:[#allocation13 + $0x3]] }
 0x1a6   : > { %v4645_v12 = vpop.eup %4644  ;;  %v1305_v26 = vadd.f32 1.0, %v4643_v49  ;;  %4662 = vrcp.f32 %v2287_v27  ;;  %v6140_v49 = vmul.f32 %v4641_v62, %v5926_v20  ;;  %9598 = sst [smem:[#allocation112_spill]] %s6337_s30  ;;  %s6398_s30 = sld [smem:[#allocation13 + $0x1]] }
 0x1a7   : > { %v4647_v46 = vpop.eup %4646  ;;  %v1306_v38 = vadd.f32 1.0, %v4645_v12  ;;  %4664 = vpow2.f32 %v4363_v3  ;;  %v2324_v3 = vstv %s6115_s27  ;;  %s6246_s27 = sld [smem:[#allocation8 + $0x117]] }
 0x1a8   : > { %4666 = vrcp.f32 %v1305_v26  ;;  %v2316_v18 = vadd.f32 1.0, %v4647_v46  ;;  %v2327_v26 = vstv %s6117_s12  ;;  %v2325_v43 = vmul.f32 %v2324_v3, %v5802_v17  ;;  %s6223_s12 = sld [smem:[#allocation8 + $0x96]] }
 0x1a9   : > { %v4649_v47 = vpop.eup %4648  ;;  %4668 = vrcp.f32 %v1306_v38  ;;  %v2326_v42 = vmul.f32 %v2324_v3, %v5805_v19  ;;  %v2328_v20 = vmul.f32 %v5820_v52, %v2327_v26  ;;  %v2332_v46 = vstv %s6124_s5  ;;  %s6278_s5 = sld [smem:[#allocation8 + $0x119]] }
 0x1aa   : > { %v4651_v27 = vpop.eup %4650  ;;  %v1353_v12 = vadd.f32 1.0, %v4649_v47  ;;  %4670 = vrcp.f32 %v2316_v18  ;;  %v2329_v47 = vmul.f32 %v5830_v10, %v2327_v26 }
 0x1ab   : > { %v4653_v7 = vpop.eup %4652  ;;  %v1215_v38 = vmul.f32 %v4651_v27, %v5989_v61 }
 0x1ac   : > { %v4655_v62 = vpop.eup %4654  ;;  %v1216_v18 = vmul.f32 %v4653_v7, %v5991_v44  ;;  %4672 = vrcp.f32 %v1353_v12 }
 0x1ad   : > { %v4657_v13 = vpop.eup %4656  ;;  %v1354_v8 = vadd.f32 1.0, %v4655_v62  ;;  %v1362_v61 = vmul.f32 %v1361_v34, %v1215_v38  ;;  %v1397_v17 = vmul.f32 %v1396_v36, %v1215_v38  ;;  %v1432_v19 = vmul.f32 %v1431_v37, %v1215_v38  ;;  %9577 = sst [smem:[#allocation41_spill]] %s6246_s27  ;;  %s6383_s27 = sld [smem:[#allocation15 + $0x3]] }
 0x1ae   : > { %v4659_v27 = vpop.eup %4658  ;;  %v1363_v52 = vmul.f32 %v1361_v34, %v1216_v18  ;;  %v1398_v3 = vmul.f32 %v1396_v36, %v1216_v18  ;;  %v1433_v44 = vmul.f32 %v1431_v37, %v1216_v18  ;;  %v1467_v10 = vmul.f32 %v1466_v16, %v1215_v38 }
 0x1af   : > { %v4661_v7 = vpop.eup %4660  ;;  %v1263_v12 = vmul.f32 %v4659_v27, %v6016_v50  ;;  %4674 = vrcp.f32 %v1354_v8  ;;  %v1468_v26 = vmul.f32 %v1466_v16, %v1216_v18  ;;  %v6169_v62 = vmul.f32 %v4657_v13, %v5957_v39  ;;  %9585 = sst [smem:[#allocation45_spill]] %s6278_s5  ;;  %s6335_s5 = sld [smem:[#allocation8 + $0x1b]] }
 0x1b0   : > { %v6171_v34 = vpop.eup %4662  ;;  %v1264_v36 = vmul.f32 %v4661_v7, %v6018_v11  ;;  %v6174_v37 = vadd.f32 %v2328_v20, %v2325_v43  ;;  %v6176_v38 = vadd.f32 %v2329_v47, %v2326_v42  ;;  %v6181_v50 = vmul.f32 %v5837_v0, %v2332_v46 }
 0x1b1   : > { %v6183_v16 = vpop.eup %4664  ;;  %v1365_v39 = vmul.f32 %v1364_v51, %v1263_v12  ;;  %v1400_v11 = vmul.f32 %v1399_v15, %v1263_v12  ;;  %v1435_v13 = vmul.f32 %v1434_v24, %v1263_v12  ;;  %v1470_v8 = vmul.f32 %v1469_v25, %v1263_v12 }
 0x1b2   : > { %v4667_v43 = vpop.eup %4666  ;;  %v1366_v0 = vmul.f32 %v1364_v51, %v1264_v36  ;;  %v1401_v42 = vmul.f32 %v1399_v15, %v1264_v36  ;;  %v1436_v20 = vmul.f32 %v1434_v24, %v1264_v36  ;;  %v1471_v18 = vmul.f32 %v1469_v25, %v1264_v36 }
 0x1b3   : > { %v4669_v47 = vpop.eup %4668  ;;  %v1311_v27 = vmul.f32 %v4667_v43, %v6041_v59  ;;  %v1367_v7 = vadd.f32 %v1365_v39, %v1362_v61  ;;  %v1402_v12 = vadd.f32 %v1400_v11, %v1397_v17  ;;  %v1437_v1 = vadd.f32 %v1435_v13, %v1432_v19 }
 0x1b4   : > { %v6214_v51 = vpop.eup %4670  ;;  %v1312_v15 = vmul.f32 %v4669_v47, %v6043_v41  ;;  %v1368_v24 = vadd.f32 %v1366_v0, %v1363_v52  ;;  %v1403_v25 = vadd.f32 %v1401_v42, %v1398_v3  ;;  %v1438_v36 = vadd.f32 %v1436_v20, %v1433_v44 }
 0x1b5   : > { %v1370_v59 = vmul.f32 %v1369_v21, %v1311_v27  ;;  %v1405_v61 = vmul.f32 %v1404_v23, %v1311_v27  ;;  %v1440_v17 = vmul.f32 %v1439_v28, %v1311_v27  ;;  %v1472_v19 = vadd.f32 %v1470_v8, %v1467_v10 }
 0x1b6   : > { %v4673_v39 = vpop.eup %4672  ;;  %v1371_v41 = vmul.f32 %v1369_v21, %v1312_v15  ;;  %v1406_v52 = vmul.f32 %v1404_v23, %v1312_v15  ;;  %v1441_v3 = vmul.f32 %v1439_v28, %v1312_v15  ;;  %v1473_v44 = vadd.f32 %v1471_v18, %v1468_v26 }
 0x1b7   : > { %v1359_v10 = vmul.f32 %v4673_v39, %v6071_v33  ;;  %v1372_v11 = vadd.f32 %v1370_v59, %v1367_v7  ;;  %v1407_v13 = vadd.f32 %v1405_v61, %v1402_v12  ;;  %v1442_v8 = vadd.f32 %v1440_v17, %v1437_v1 }
 0x1b8   : > { %v1373_v21 = vadd.f32 %v1371_v41, %v1368_v24  ;;  %v1408_v23 = vadd.f32 %v1406_v52, %v1403_v25  ;;  %v1443_v28 = vadd.f32 %v1441_v3, %v1438_v36  ;;  %v1475_v26 = vmul.f32 %v1474_v29, %v1311_v27 }
 0x1b9   : > { %v4675_v43 = vpop.eup %4674  ;;  %v1375_v33 = vmul.f32 %v1374_v53, %v1359_v10  ;;  %v1410_v1 = vmul.f32 %v1409_v57, %v1359_v10  ;;  %v1445_v0 = vmul.f32 %v1444_v58, %v1359_v10  ;;  %v1476_v42 = vmul.f32 %v1474_v29, %v1312_v15 }
 0x1ba   : > { %v1360_v20 = vmul.f32 %v4675_v43, %v6073_v32  ;;  %v1477_v18 = vadd.f32 %v1475_v26, %v1472_v19  ;;  %v1480_v47 = vmul.f32 %v1479_v14, %v1359_v10  ;;  %v9588_v59 = vstv %s9581_s11  ;;  %s6345_s11 = sld [smem:[#allocation8 + $0x9b]] }
 0x1bb   : > { %v1377_v29 = vadd.f32 %v1375_v33, %v1372_v11  ;;  %v1412_v7 = vadd.f32 %v1410_v1, %v1407_v13  ;;  %v1447_v12 = vadd.f32 %v1445_v0, %v1442_v8  ;;  %v1478_v15 = vadd.f32 %v1476_v42, %v1473_v44 }
 0x1bc   : > { %v1376_v32 = vmul.f32 %v1374_v53, %v1360_v20  ;;  %v1411_v24 = vmul.f32 %v1409_v57, %v1360_v20  ;;  %v1446_v25 = vmul.f32 %v1444_v58, %v1360_v20  ;;  %v1481_v36 = vmul.f32 %v1479_v14, %v1360_v20 }
 0x1bd   : > { %v6294_v61 = vadd.f32 %v9588_v59, %v1377_v29  ;;  %v9589_v17 = vstv %s9582_s13  ;;  %v9590_v39 = vstv %s9583_s4  ;;  %v1482_v57 = vadd.f32 %v1480_v47, %v1477_v18  ;;  %s6347_s13 = sld [smem:[#allocation10 + $0x301]]  ;;  %s6354_s4 = sld [smem:[#allocation10 + $0x302]] }
 0x1be   : > { %v6298_v19 = vadd.f32 %v9589_v17, %v1412_v7  ;;  %v6302_v53 = vadd.f32 %v9590_v39, %v1447_v12  ;;  %v1378_v58 = vadd.f32 %v1376_v32, %v1373_v21  ;;  %v1413_v14 = vadd.f32 %v1411_v24, %v1408_v23 }
 0x1bf   : > { %v1448_v41 = vadd.f32 %v1446_v25, %v1443_v28  ;;  %v1483_v52 = vadd.f32 %v1481_v36, %v1478_v15  ;;  %v4181_v3 = vmul.f32 -1.442695, %v6294_v61  ;;  %v9593_v11 = vstv %s9586_s17  ;;  %s6352_s17 = sld [smem:[#allocation8 + $0x11b]] }
 0x1c0   : > { %v4183_v44 = vmul.f32 -1.442695, %v6298_v19  ;;  %v4185_v10 = vmul.f32 -1.442695, %v6302_v53  ;;  %v6313_v13 = vadd.f32 %v9593_v11, %v1482_v57  ;;  %v9594_v8 = vmov %v9588_v59 }
 0x1c1   : > { %v6321_v21 = vadd.f32 %v9594_v8, %v1378_v58  ;;  %v9595_v23 = vmov %v9589_v17  ;;  %v9596_v26 = vmov %v9590_v39  ;;  %v9597_v33 = vmov %v9593_v11 }
 0x1c2   : > { %v6325_v28 = vadd.f32 %v9595_v23, %v1413_v14  ;;  %v6329_v43 = vadd.f32 %v9596_v26, %v1448_v41  ;;  %v6333_v1 = vadd.f32 %v9597_v33, %v1483_v52  ;;  %4676 = vpow2.f32 %v4181_v3  ;;  %v4942_v23 = vld [vmem:[%s9608_s10 + $0x28] sm:$0x7f]  ;;  %v4949_v14 = vld [vmem:[%s9611_s29 + $0x30] sm:$0xfe]  ;;  %s9615_s10 = sld [smem:[#allocation49_spill]] }
 0x1c3   : > { %v4187_v0 = vmul.f32 -1.442695, %v6313_v13  ;;  %v4182_v18 = vmul.f32 -1.442695, %v6321_v21  ;;  %4678 = vpow2.f32 %v4183_v44  ;;  %9599 = sst [smem:[#allocation113_spill]] %s6347_s13  ;;  %v2317_v52 = vadd.f32 1.0, %v6183_v16 }
 0x1c4   : > { %v4184_v47 = vmul.f32 -1.442695, %v6325_v28  ;;  %v4186_v29 = vmul.f32 -1.442695, %v6329_v43  ;;  %4680 = vpow2.f32 %v4185_v10  ;;  %v4188_v7 = vmul.f32 -1.442695, %v6333_v1 }
 0x1c5   : > { %9600 = sst [smem:[#allocation114_spill]] %s6354_s4  ;;  %4682 = vpow2.f32 %v4182_v18  ;;  %v2334_v8 = vmul.f32 %v4942_v23, %v2332_v46  ;;  %s9621_s13 = sld [smem:[#allocation51_spill]] }
 0x1c6   : > { %4684 = vpow2.f32 %v4184_v47  ;;  %s9623_s4 = sld [smem:[#allocation63_spill]] }
 0x1c7   : > { %4686 = vpow2.f32 %v4186_v29 }
 0x1c8   : > { %4688 = vpow2.f32 %v4187_v0 }
 0x1c9   : > { %4690 = vpow2.f32 %v4188_v7 }
 0x1cc   : > { %v4677_v29 = vpop.eup %4676 }
 0x1cd   : > { %v4679_v26 = vpop.eup %4678  ;;  %v1388_v11 = vadd.f32 1.0, %v4677_v29 }
 0x1ce   : > { %v4681_v18 = vpop.eup %4680  ;;  %v1423_v47 = vadd.f32 1.0, %v4679_v26  ;;  %v6411_v26 = vmul.f32 %v6171_v34, %v5969_v2  ;;  %v2335_v2 = vadd.f32 %v6181_v50, %v6174_v37  ;;  %v2337_v34 = vstv %s6383_s27  ;;  %v4944_v50 = vld [vmem:[%s9611_s29 + $0x8] sm:$0xfe]  ;;  %s9617_s27 = sld [smem:[#allocation55_spill]] }
 0x1cf   : > { %v4683_v41 = vpop.eup %4682  ;;  %4692 = vrcp.f32 %v1388_v11  ;;  %v1458_v10 = vadd.f32 1.0, %v4681_v18  ;;  %v6416_v18 = vmul.f32 %v6214_v51, %v6027_v56  ;;  %v2336_v56 = vadd.f32 %v2334_v8, %v6176_v38  ;;  %v4945_v8 = vld [vmem:[%s9611_s29 + $0x10] sm:$0xfe] }
 0x1d0   : > { %v4685_v29 = vpop.eup %4684  ;;  %v1389_v33 = vadd.f32 1.0, %v4683_v41  ;;  %4694 = vrcp.f32 %v1423_v47  ;;  %v2361_v51 = vstv %s6389_s22  ;;  %v6428_v23 = vadd.f32 %v2337_v34, %v2335_v2  ;;  %s9616_s22 = sld [smem:[#allocation54_spill]] }
 0x1d1   : > { %v4687_v3 = vpop.eup %4686  ;;  %v1424_v11 = vadd.f32 1.0, %v4685_v29  ;;  %4696 = vrcp.f32 %v1458_v10  ;;  %9610 = vst [vmem:[#allocation118_spill] sm:$0xff] %v6416_v18  ;;  %v6431_v37 = vadd.f32 %v2337_v34, %v2336_v56  ;;  %v2363_v29 = vmul.f32 %v4944_v50, %v2361_v51 }
 0x1d2   : > { %v4689_v41 = vpop.eup %4688  ;;  %4698 = vrcp.f32 %v1389_v33  ;;  %v1459_v47 = vadd.f32 1.0, %v4687_v3  ;;  %9613 = vst [vmem:[#allocation119_spill] sm:$0xff] %v6428_v23  ;;  %v4943_v3 = vld [vmem:[%s9611_s29] sm:$0xfe]  ;;  %v4364_v38 = vmul.f32 -1.442695, %v6428_v23  ;;  %v2374_v56 = vstv %s6407_s21 }
 0x1d3   : > { %v4691_v16 = vpop.eup %4690  ;;  %4700 = vrcp.f32 %v1424_v11  ;;  %v1493_v10 = vadd.f32 1.0, %v4689_v41  ;;  %v2362_v33 = vmul.f32 %v4943_v3, %v2361_v51  ;;  %9614 = vst [vmem:[#allocation120_spill] sm:$0xff] %v6431_v37  ;;  %v2364_v11 = vstv %s6398_s30  ;;  %s9618_s21 = sld [smem:[#allocation50_spill]]  ;;  %s9620_s30 = sld [smem:[#allocation61_spill]] }
 0x1d4   : > { %4702 = vrcp.f32 %v1459_v47  ;;  %v1494_v46 = vadd.f32 1.0, %v4691_v16  ;;  %v2365_v41 = vmul.f32 %v4945_v8, %v2364_v11  ;;  %v4946_v47 = vld [vmem:[%s9611_s29 + $0x18] sm:$0xfe]  ;;  %v6438_v16 = vpop.permute.xlu1 %2381  ;;  %v4365_v34 = vmul.f32 -1.442695, %v6431_v37 }
 0x1d5   : > { %4704 = vrcp.f32 %v1493_v10  ;;  %v2366_v2 = vmul.f32 %v4946_v47, %v2364_v11  ;;  %v2369_v10 = vstv %s6405_s2  ;;  %v4948_v8 = vld [vmem:[%s9611_s29 + $0x28] sm:$0xfe]  ;;  %v6446_v11 = vmul.f32 %v4949_v14, %v2374_v56  ;;  %s9619_s2 = sld [smem:[#allocation56_spill]] }
 0x1d6   : > { %4706 = vrcp.f32 %v1494_v46  ;;  %v2367_v51 = vadd.f32 %v2365_v41, %v2362_v33  ;;  %v4947_v46 = vld [vmem:[%s9611_s29 + $0x20] sm:$0xfe]  ;;  %v2371_v44 = vmul.f32 %v4948_v8, %v2369_v10  ;;  %v9635_v59 = vstv %s9616_s22 }
 0x1d7   : > { %4708 = vrcp.f32 %v2317_v52  ;;  %v2368_v3 = vadd.f32 %v2366_v2, %v2363_v29  ;;  %v2370_v50 = vmul.f32 %v4947_v46, %v2369_v10  ;;  %v4950_v52 = vld [vmem:[%s9611_s29 + $0x38] sm:$0xfe]  ;;  %s9622_s29 = sld [smem:[#allocation57_spill]] }
 0x1d8   : > { %4710 = vpow2.f32 %v4364_v38  ;;  %v6449_v47 = vmul.f32 %v4950_v52, %v2374_v56 }
 0x1d9   : > { %v4693_v0 = vpop.eup %4692  ;;  %4712 = vpow2.f32 %v4365_v34  ;;  %v6454_v29 = vadd.f32 %v2370_v50, %v2367_v51  ;;  %v6461_v34 = vadd.f32 %v2371_v44, %v2368_v3  ;;  %v9624_v51 = vstv %s9615_s10 }
 0x1da   : > { %v4695_v7 = vpop.eup %4694  ;;  %v6452_v33 = vmul.f32 %v4693_v0, %v6294_v61  ;;  %v9625_v50 = vstv %s9616_s22  ;;  %v9627_v52 = vstv %s9618_s21  ;;  %v9636_v15 = vstv %s9618_s21  ;;  %s9643_s22 = sld [smem:[#allocation53_spill]]  ;;  %s9649_s21 = sld [smem:[#allocation59_spill]] }
 0x1db   : > { %v4697_v14 = vpop.eup %4696  ;;  %v6459_v2 = vmul.f32 %v4695_v7, %v6298_v19  ;;  %v9626_v7 = vstv %s9617_s27 }
 0x1dc   : > { %v4699_v10 = vpop.eup %4698  ;;  %v6466_v56 = vmul.f32 %v4697_v14, %v6302_v53  ;;  %v1502_v46 = vmul.f32 %v9624_v51, %v6452_v33  ;;  %v1537_v19 = vmul.f32 %v9625_v50, %v6452_v33  ;;  %v1572_v44 = vmul.f32 %v9626_v7, %v6452_v33 }
 0x1dd   : > { %v4701_v3 = vpop.eup %4700  ;;  %v6478_v8 = vmul.f32 %v4699_v10, %v6321_v21  ;;  %v1505_v53 = vmul.f32 %v9627_v52, %v6459_v2  ;;  %v9628_v14 = vstv %s9619_s2  ;;  %v9629_v51 = vstv %s9620_s30 }
 0x1de   : > { %v1540_v61 = vmul.f32 %v9628_v14, %v6459_v2  ;;  %v1575_v41 = vmul.f32 %v9629_v51, %v6459_v2  ;;  %v4703_v50 = vpop.eup %4702  ;;  %v6490_v38 = vmul.f32 %v4701_v3, %v6325_v28  ;;  %v9630_v7 = vstv %s9621_s13 }
 0x1df   : > { %v1510_v21 = vmul.f32 %v9630_v7, %v6466_v56  ;;  %v9631_v10 = vstv %s9622_s29  ;;  %v9632_v52 = vstv %s9623_s4  ;;  %v4705_v57 = vpop.eup %4704  ;;  %v6502_v14 = vmul.f32 %v4703_v50, %v6329_v43 }
 0x1e0   : > { %v1545_v0 = vmul.f32 %v9631_v10, %v6466_v56  ;;  %v1580_v58 = vmul.f32 %v9632_v52, %v6466_v56  ;;  %v9633_v51 = vstv %s9615_s10  ;;  %v1507_v3 = vadd.f32 %v1505_v53, %v1502_v46  ;;  %v4707_v7 = vpop.eup %4706  ;;  %s9642_s10 = sld [smem:[#allocation64_spill]] }
 0x1e1   : > { %v1503_v28 = vmul.f32 %v9633_v51, %v6478_v8  ;;  %v1538_v39 = vmul.f32 %v9635_v59, %v6478_v8  ;;  %v6511_v10 = vmul.f32 %v4705_v57, %v6313_v13  ;;  %v1506_v52 = vmul.f32 %v9636_v15, %v6490_v38  ;;  %v6519_v51 = vpop.eup %4708 }
 0x1e2   : > { %v9638_v43 = vstv %s9619_s2  ;;  %v1542_v17 = vadd.f32 %v1540_v61, %v1537_v19  ;;  %v6522_v46 = vmul.f32 %v4707_v7, %v6333_v1  ;;  %v9639_v59 = vstv %s9621_s13  ;;  %v6530_v15 = vpop.eup %4710  ;;  %s9665_s2 = sld [smem:[#allocation68_spill]]  ;;  %s9672_s13 = sld [smem:[#allocation70_spill]] }
 0x1e3   : > { %v1541_v50 = vmul.f32 %v9638_v43, %v6490_v38  ;;  %v1511_v53 = vmul.f32 %v9639_v59, %v6502_v14  ;;  %v1512_v13 = vadd.f32 %v1510_v21, %v1507_v3  ;;  %v9640_v57 = vstv %s9622_s29  ;;  %v6535_v7 = vpop.eup %4712  ;;  %s9646_s29 = sld [smem:[#allocation60_spill]] }
 0x1e4   : > { %v1546_v36 = vmul.f32 %v9640_v57, %v6502_v14  ;;  %v1508_v25 = vadd.f32 %v1506_v52, %v1503_v28  ;;  %v9641_v43 = vstv %s9634_s0  ;;  %v1547_v1 = vadd.f32 %v1545_v0, %v1542_v17  ;;  %s9657_s0 = sld [smem:[#allocation66_spill]] }
 0x1e5   : > { %v1515_v61 = vmul.f32 %v9641_v43, %v6511_v10  ;;  %v1543_v19 = vadd.f32 %v1541_v50, %v1538_v39  ;;  %v9644_v59 = vmov %v9641_v43  ;;  %v9645_v21 = vstv %s9637_s16  ;;  %s9653_s16 = sld [smem:[#allocation62_spill]] }
 0x1e6   : > { %v1516_v24 = vmul.f32 %v9644_v59, %v6522_v46  ;;  %v1550_v3 = vmul.f32 %v9645_v21, %v6511_v10  ;;  %v9647_v57 = vmov %v9645_v21  ;;  %v9648_v28 = vstv %s9617_s27  ;;  %s9664_s27 = sld [smem:[#allocation67_spill]] }
 0x1e7   : > { %v1551_v32 = vmul.f32 %v9647_v57, %v6522_v46  ;;  %v1573_v52 = vmul.f32 %v9648_v28, %v6478_v8  ;;  %v1513_v39 = vadd.f32 %v1511_v53, %v1508_v25  ;;  %v1517_v17 = vadd.f32 %v1515_v61, %v1512_v13 }
 0x1e8   : > { %v1548_v0 = vadd.f32 %v1546_v36, %v1543_v19  ;;  %v9650_v50 = vstv %s9620_s30  ;;  %v1552_v59 = vadd.f32 %v1550_v3, %v1547_v1  ;;  %v1577_v12 = vadd.f32 %v1575_v41, %v1572_v44  ;;  %s9668_s30 = sld [smem:[#allocation69_spill]] }
 0x1e9   : > { %v1576_v43 = vmul.f32 %v9650_v50, %v6490_v38  ;;  %v9651_v21 = vstv %s9623_s4  ;;  %v9652_v57 = vstv %s9642_s10  ;;  %v1518_v28 = vadd.f32 %v1516_v24, %v1513_v39  ;;  %s9661_s4 = sld [smem:[#allocation65_spill]]  ;;  %s9674_s10 = sld [smem:[#allocation71_spill]] }
 0x1ea   : > { %v1581_v20 = vmul.f32 %v9651_v21, %v6502_v14  ;;  %v1585_v42 = vmul.f32 %v9652_v57, %v6511_v10  ;;  %v9654_v27 = vstv %s9643_s22  ;;  %v1553_v53 = vadd.f32 %v1551_v32, %v1548_v0  ;;  %s9700_s22 = sld [smem:[#allocation81_spill]] }
 0x1eb   : > { %v6560_v25 = vadd.f32 %v9654_v27, %v1517_v17  ;;  %v1578_v36 = vadd.f32 %v1576_v43, %v1573_v52  ;;  %v9655_v13 = vstv %s9646_s29  ;;  %v1582_v19 = vadd.f32 %v1580_v58, %v1577_v12  ;;  %s9678_s29 = sld [smem:[#allocation72_spill]] }
 0x1ec   : > { %v6564_v61 = vadd.f32 %v9655_v13, %v1552_v59  ;;  %v9656_v41 = vmov %v9652_v57  ;;  %v9658_v1 = vstv %s9649_s21  ;;  %v9659_v50 = vmov %v9654_v27  ;;  %s9681_s21 = sld [smem:[#allocation73_spill]] }
 0x1ed   : > { %v1586_v44 = vmul.f32 %v9656_v41, %v6522_v46  ;;  %v1607_v3 = vmul.f32 %v9658_v1, %v6452_v33  ;;  %v6574_v21 = vadd.f32 %v9659_v50, %v1518_v28  ;;  %v4189_v27 = vmul.f32 -1.442695, %v6560_v25 }
 0x1ee   : > { %v9660_v24 = vmov %v9655_v13  ;;  %v1583_v52 = vadd.f32 %v1581_v20, %v1578_v36  ;;  %v4191_v12 = vmul.f32 -1.442695, %v6564_v61  ;;  %v1587_v58 = vadd.f32 %v1585_v42, %v1582_v19 }
 0x1ef   : > { %v6579_v32 = vadd.f32 %v9660_v24, %v1553_v53  ;;  %v9662_v39 = vmov %v9658_v1  ;;  %v9663_v0 = vstv %s9653_s16  ;;  %4714 = vpow2.f32 %v4189_v27  ;;  %s9684_s16 = sld [smem:[#allocation74_spill]] }
 0x1f0   : > { %v1608_v17 = vmul.f32 %v9662_v39, %v6478_v8  ;;  %v1610_v43 = vmul.f32 %v9663_v0, %v6459_v2  ;;  %v4190_v59 = vmul.f32 -1.442695, %v6574_v21  ;;  %v1588_v28 = vadd.f32 %v1586_v44, %v1583_v52 }
 0x1f1   : > { %v4192_v57 = vmul.f32 -1.442695, %v6579_v32  ;;  %4716 = vpow2.f32 %v4191_v12  ;;  %v9666_v20 = vstv %s9657_s0  ;;  %v9667_v42 = vmov %v9663_v0  ;;  %s9710_s0 = sld [smem:[#allocation78_spill]] }
 0x1f2   : > { %v6592_v53 = vadd.f32 %v9666_v20, %v1587_v58  ;;  %v1611_v36 = vmul.f32 %v9667_v42, %v6490_v38  ;;  %v1612_v13 = vadd.f32 %v1610_v43, %v1607_v3  ;;  %4718 = vpow2.f32 %v4190_v59 }
 0x1f3   : > { %v9669_v19 = vmov %v9666_v20  ;;  %v9670_v1 = vstv %s9661_s4  ;;  %4720 = vpow2.f32 %v4192_v57  ;;  %v9673_v12 = vstv %s9664_s27  ;;  %s9712_s4 = sld [smem:[#allocation90_spill]]  ;;  %s9713_s27 = sld [smem:[#allocation91_spill]] }
 0x1f4   : > { %v6599_v41 = vadd.f32 %v9669_v19, %v1588_v28  ;;  %v1615_v50 = vmul.f32 %v9670_v1, %v6466_v56  ;;  %v9671_v44 = vmov %v9670_v1  ;;  %v4193_v24 = vmul.f32 -1.442695, %v6592_v53 }
 0x1f5   : > { %v1616_v27 = vmul.f32 %v9671_v44, %v6502_v14  ;;  %v1613_v52 = vadd.f32 %v1611_v36, %v1608_v17  ;;  %v1620_v3 = vmul.f32 %v9673_v12, %v6511_v10  ;;  %v9676_v0 = vmov %v9673_v12 }
 0x1f6   : > { %v4194_v58 = vmul.f32 -1.442695, %v6599_v41  ;;  %v1617_v39 = vadd.f32 %v1615_v50, %v1612_v13  ;;  %v1621_v43 = vmul.f32 %v9676_v0, %v6522_v46  ;;  %v9677_v59 = vstv %s9665_s2  ;;  %s9714_s2 = sld [smem:[#allocation92_spill]] }
 0x1f7   : > { %v1782_v28 = vmul.f32 %v9677_v59, %v6452_v33  ;;  %4722 = vpow2.f32 %v4193_v24  ;;  %v1618_v17 = vadd.f32 %v1616_v27, %v1613_v52  ;;  %v9679_v57 = vmov %v9677_v59 }
 0x1f8   : > { %v1783_v20 = vmul.f32 %v9679_v57, %v6478_v8  ;;  %v9680_v42 = vstv %s9668_s30  ;;  %4724 = vpow2.f32 %v4194_v58  ;;  %v1622_v13 = vadd.f32 %v1620_v3, %v1617_v39  ;;  %s9716_s30 = sld [smem:[#allocation97_spill]] }
 0x1f9   : > { %v1785_v36 = vmul.f32 %v9680_v42, %v6459_v2  ;;  %v9682_v19 = vmov %v9680_v42  ;;  %v9683_v50 = vstv %s9672_s13  ;;  %v1623_v24 = vadd.f32 %v1621_v43, %v1618_v17  ;;  %s9723_s13 = sld [smem:[#allocation93_spill]] }
 0x1fa   : > { %v1786_v1 = vmul.f32 %v9682_v19, %v6490_v38  ;;  %v1790_v44 = vmul.f32 %v9683_v50, %v6466_v56  ;;  %v9685_v52 = vmov %v9683_v50  ;;  %v9686_v0 = vstv %s9674_s10  ;;  %s9699_s10 = sld [smem:[#allocation85_spill]] }
 0x1fb   : > { %v1787_v27 = vadd.f32 %v1785_v36, %v1782_v28  ;;  %v1791_v12 = vmul.f32 %v9685_v52, %v6502_v14  ;;  %v1795_v59 = vmul.f32 %v9686_v0, %v6511_v10  ;;  %v6638_v57 = vadd.f32 %v1624_v54, %v1622_v13 }
 0x1fc   : > { %v1788_v3 = vadd.f32 %v1786_v1, %v1783_v20  ;;  %v9687_v58 = vmov %v9686_v0  ;;  %v9688_v42 = vstv %s9678_s29  ;;  %v6648_v43 = vadd.f32 %v1624_v54, %v1623_v24  ;;  %v4715_v0 = vpop.eup %4714  ;;  %s9701_s29 = sld [smem:[#allocation84_spill]] }
 0x1fd   : > { %v1796_v39 = vmul.f32 %v9687_v58, %v6522_v46  ;;  %v1806_v19 = vmul.f32 %v9688_v42, %v6452_v33  ;;  %v1792_v28 = vadd.f32 %v1790_v44, %v1787_v27  ;;  %v9689_v17 = vmov %v9688_v42  ;;  %v4717_v24 = vpop.eup %4716 }
 0x1fe   : > { %v1807_v36 = vmul.f32 %v9689_v17, %v6478_v8  ;;  %v9690_v50 = vstv %s9681_s21  ;;  %v4195_v13 = vmul.f32 -1.442695, %v6638_v57  ;;  %v1793_v20 = vadd.f32 %v1791_v12, %v1788_v3  ;;  %s9702_s21 = sld [smem:[#allocation88_spill]] }
 0x1ff   : > { %v1809_v52 = vmul.f32 %v9690_v50, %v6459_v2  ;;  %v9691_v1 = vmov %v9690_v50  ;;  %v9693_v42 = vstv %s9684_s16  ;;  %v1528_v44 = vadd.f32 1.0, %v4715_v0  ;;  %v4719_v50 = vpop.eup %4718  ;;  %s9708_s16 = sld [smem:[#allocation77_spill]] }
 0x200   : > { %v1810_v58 = vmul.f32 %v9691_v1, %v6490_v38  ;;  %v1814_v54 = vmul.f32 %v9693_v42, %v6466_v56  ;;  %v4196_v27 = vmul.f32 -1.442695, %v6648_v43  ;;  %v1797_v17 = vadd.f32 %v1795_v59, %v1792_v28  ;;  %v4721_v30 = vpop.eup %4720 }
 0x201   : > { %v1811_v35 = vadd.f32 %v1809_v52, %v1806_v19  ;;  %v1563_v40 = vadd.f32 1.0, %v4717_v24  ;;  %4726 = vpow2.f32 %v4195_v13  ;;  %v1798_v12 = vadd.f32 %v1796_v39, %v1793_v20  ;;  %v4723_v28 = vpop.eup %4722 }
 0x202   : > { %v1812_v3 = vadd.f32 %v1810_v58, %v1807_v36  ;;  %v1529_v6 = vadd.f32 1.0, %v4719_v50  ;;  %4728 = vrcp.f32 %v1528_v44  ;;  %v1800_v1 = vadd.f32 %v1799_v31, %v1797_v17  ;;  %v4725_v13 = vpop.eup %4724 }
 0x203   : > { %v1815_v0 = vmul.f32 %v9693_v42, %v6502_v14  ;;  %v1564_v45 = vadd.f32 1.0, %v4721_v30  ;;  %4730 = vrcp.f32 %v1563_v40  ;;  %v1801_v59 = vadd.f32 %v1799_v31, %v1798_v12 }
 0x204   : > { %v1816_v19 = vadd.f32 %v1814_v54, %v1811_v35  ;;  %4732 = vrcp.f32 %v1529_v6  ;;  %v6672_v39 = vmul.f32 %v6063_v63, %v1800_v1  ;;  %v1819_v52 = vmul.f32 %v1818_v60, %v6511_v10 }
 0x205   : > { %v1817_v36 = vadd.f32 %v1815_v0, %v1812_v3  ;;  %4734 = vrcp.f32 %v1564_v45  ;;  %v1598_v40 = vadd.f32 1.0, %v4723_v28  ;;  %v6678_v31 = vmul.f32 %v6063_v63, %v1801_v59 }
 0x206   : > { %v1820_v6 = vmul.f32 %v1818_v60, %v6522_v46  ;;  %v1599_v30 = vadd.f32 1.0, %v4725_v13  ;;  %4736 = vpow2.f32 %v4196_v27  ;;  %v1821_v35 = vadd.f32 %v1819_v52, %v1816_v19 }
 0x207   : > { %v1829_v20 = vmul.f32 %v1828_v4, %v6452_v33  ;;  %4738 = vrcp.f32 %v1598_v40  ;;  %v1830_v58 = vmul.f32 %v1828_v4, %v6478_v8  ;;  %v1832_v54 = vmul.f32 %v1831_v5, %v6459_v2 }
 0x208   : > { %v1822_v45 = vadd.f32 %v1820_v6, %v1817_v36  ;;  %4740 = vrcp.f32 %v1599_v30  ;;  %v1824_v60 = vadd.f32 %v1823_v9, %v1821_v35  ;;  %v1833_v24 = vmul.f32 %v1831_v5, %v6490_v38 }
 0x209   : > { %v1837_v44 = vmul.f32 %v1836_v55, %v6466_v56  ;;  %v1834_v17 = vadd.f32 %v1832_v54, %v1829_v20  ;;  %v1838_v4 = vmul.f32 %v1836_v55, %v6502_v14  ;;  %v9703_v50 = vstv %s9699_s10  ;;  %s9725_s10 = sld [smem:[#allocation96_spill]] }
 0x20a   : > { %v1825_v27 = vadd.f32 %v1823_v9, %v1822_v45  ;;  %v1842_v12 = vmul.f32 %v9703_v50, %v6511_v10  ;;  %v6709_v3 = vmul.f32 %v1824_v60, %v6063_v63  ;;  %v1835_v1 = vadd.f32 %v1833_v24, %v1830_v58 }
 0x20b   : > { %v9704_v5 = vmov %v9703_v50  ;;  %v9705_v0 = vstv %s9700_s22  ;;  %v4727_v59 = vpop.eup %4726  ;;  %v1839_v28 = vadd.f32 %v1837_v44, %v1834_v17  ;;  %v9707_v52 = vstv %s9701_s29  ;;  %s9730_s22 = sld [smem:[#allocation101_spill]]  ;;  %s9732_s29 = sld [smem:[#allocation95_spill]] }
 0x20c   : > { %v1843_v42 = vmul.f32 %v9704_v5, %v6522_v46  ;;  %v1852_v9 = vmul.f32 %v9705_v0, %v6452_v33  ;;  %v6718_v19 = vmul.f32 %v1825_v27, %v6063_v63  ;;  %v9706_v55 = vmov %v9705_v0  ;;  %v4729_v40 = vpop.eup %4728 }
 0x20d   : > { %v1853_v36 = vmul.f32 %v9706_v55, %v6478_v8  ;;  %v1855_v13 = vmul.f32 %v9707_v52, %v6459_v2  ;;  %v1633_v6 = vadd.f32 1.0, %v4727_v59  ;;  %v1840_v30 = vadd.f32 %v1838_v4, %v1835_v1  ;;  %v4731_v58 = vpop.eup %4730 }
 0x20e   : > { %v9709_v35 = vmov %v9707_v52  ;;  %v9711_v33 = vstv %s9702_s21  ;;  %v6735_v54 = vmul.f32 %v4729_v40, %v6560_v25  ;;  %v1844_v8 = vadd.f32 %v1842_v12, %v1839_v28  ;;  %v4733_v44 = vpop.eup %4732  ;;  %s9736_s21 = sld [smem:[#allocation99_spill]] }
 0x20f   : > { %v1856_v20 = vmul.f32 %v9709_v35, %v6490_v38  ;;  %v6732_v45 = vmul.f32 %v9711_v33, %v6466_v56  ;;  %v1857_v2 = vadd.f32 %v1855_v13, %v1852_v9  ;;  %v9715_v60 = vmov %v9711_v33  ;;  %v4735_v27 = vpop.eup %4734 }
 0x210   : > { %v6740_v24 = vmul.f32 %v9715_v60, %v6502_v14  ;;  %v6743_v38 = vmul.f32 %v4731_v58, %v6564_v61  ;;  %4742 = vrcp.f32 %v1633_v6  ;;  %v1845_v56 = vadd.f32 %v1843_v42, %v1840_v30  ;;  %v4737_v5 = vpop.eup %4736 }
 0x211   : > { %v6745_v25 = vadd.f32 %v1856_v20, %v1853_v36  ;;  %v6748_v17 = vmul.f32 %v4733_v44, %v6574_v21  ;;  %v9717_v4 = vstv %s9708_s16  ;;  %v9718_v50 = vstv %s9710_s0  ;;  %v4739_v36 = vpop.eup %4738  ;;  %s9738_s16 = sld [smem:[#allocation103_spill]] }
 0x212   : > { %v1642_v14 = vmul.f32 %v9717_v4, %v6735_v54  ;;  %v1677_v12 = vmul.f32 %v9718_v50, %v6735_v54  ;;  %v9719_v61 = vstv %s9712_s4  ;;  %v6760_v42 = vmul.f32 %v4735_v27, %v6579_v32  ;;  %v4741_v20 = vpop.eup %4740  ;;  %s9739_s0 = sld [smem:[#allocation87_spill]]  ;;  %s9743_s4 = sld [smem:[#allocation94_spill]] }
 0x213   : > { %v1712_v1 = vmul.f32 %v9719_v61, %v6735_v54  ;;  %v9720_v0 = vstv %s9713_s27  ;;  %v9721_v21 = vstv %s9714_s2  ;;  %v9722_v28 = vstv %s9716_s30  ;;  %s9745_s27 = sld [smem:[#allocation100_spill]]  ;;  %s9746_s2 = sld [smem:[#allocation102_spill]] }
 0x214   : > { %v1645_v9 = vmul.f32 %v9720_v0, %v6743_v38  ;;  %v1680_v59 = vmul.f32 %v9721_v21, %v6743_v38  ;;  %v1715_v55 = vmul.f32 %v9722_v28, %v6743_v38  ;;  %v1634_v52 = vadd.f32 1.0, %v4737_v5  ;;  %s9747_s30 = sld [smem:[#allocation104_spill]] }
 0x215   : > { %v9724_v13 = vmov %v9717_v4  ;;  %v9726_v32 = vmov %v9718_v50  ;;  %v9727_v30 = vmov %v9719_v61  ;;  %v6781_v33 = vmul.f32 %v4739_v36, %v6592_v53 }
 0x216   : > { %v1643_v40 = vmul.f32 %v9724_v13, %v6748_v17  ;;  %v1678_v6 = vmul.f32 %v9726_v32, %v6748_v17  ;;  %v1713_v35 = vmul.f32 %v9727_v30, %v6748_v17  ;;  %v9728_v58 = vmov %v9720_v0 }
 0x217   : > { %v1646_v60 = vmul.f32 %v9728_v58, %v6760_v42  ;;  %v1647_v44 = vadd.f32 %v1645_v9, %v1642_v14  ;;  %v9729_v27 = vmov %v9721_v21  ;;  %v6790_v50 = vmul.f32 %v4741_v20, %v6599_v41 }
 0x218   : > { %v1681_v4 = vmul.f32 %v9729_v27, %v6760_v42  ;;  %4744 = vrcp.f32 %v1634_v52  ;;  %v1682_v61 = vadd.f32 %v1680_v59, %v1677_v12  ;;  %v9731_v5 = vmov %v9722_v28 }
 0x219   : > { %v1716_v0 = vmul.f32 %v9731_v5, %v6760_v42  ;;  %v1648_v53 = vadd.f32 %v1646_v60, %v1643_v40  ;;  %v9733_v21 = vstv %s9723_s13  ;;  %v9734_v9 = vstv %s9725_s10  ;;  %s9755_s13 = sld [smem:[#allocation89_spill]]  ;;  %s9758_s10 = sld [smem:[#allocation98_spill]] }
 0x21a   : > { %v1650_v28 = vmul.f32 %v9733_v21, %v6781_v33  ;;  %v1683_v14 = vadd.f32 %v1681_v4, %v1678_v6  ;;  %v1685_v36 = vmul.f32 %v9734_v9, %v6781_v33  ;;  %v9735_v13 = vmov %v9733_v21 }
 0x21b   : > { %v1651_v41 = vmul.f32 %v9735_v13, %v6790_v50  ;;  %v9737_v52 = vmov %v9734_v9  ;;  %v1717_v59 = vadd.f32 %v1715_v55, %v1712_v1  ;;  %v1718_v32 = vadd.f32 %v1716_v0, %v1713_v35  ;;  %v4743_v35 = vpop.eup %4742 }
 0x21c   : > { %v1686_v12 = vmul.f32 %v9737_v52, %v6790_v50  ;;  %v1652_v40 = vadd.f32 %v1650_v28, %v1647_v44  ;;  %v1687_v30 = vadd.f32 %v1685_v36, %v1682_v61  ;;  %v9740_v6 = vstv %s9730_s22  ;;  %s9760_s22 = sld [smem:[#allocation106_spill]] }
 0x21d   : > { %v1720_v20 = vmul.f32 %v9740_v6, %v6781_v33  ;;  %v9741_v58 = vmov %v9740_v6  ;;  %v1653_v27 = vadd.f32 %v1651_v41, %v1648_v53  ;;  %v9742_v5 = vstv %s9732_s29  ;;  %s9761_s29 = sld [smem:[#allocation107_spill]] }
 0x21e   : > { %v1721_v60 = vmul.f32 %v9741_v58, %v6790_v50  ;;  %v1688_v4 = vadd.f32 %v1686_v12, %v1683_v14  ;;  %v1747_v21 = vmul.f32 %v9742_v5, %v6735_v54  ;;  %v9744_v1 = vmov %v9742_v5 }
 0x21f   : > { %v1748_v55 = vmul.f32 %v9744_v1, %v6748_v17  ;;  %v1722_v44 = vadd.f32 %v1720_v20, %v1717_v59  ;;  %v9748_v0 = vstv %s9736_s21  ;;  %v6826_v14 = vmul.f32 %v4743_v35, %v6638_v57  ;;  %s9762_s21 = sld [smem:[#allocation36_spill]] }
 0x220   : > { %v1723_v61 = vadd.f32 %v1721_v60, %v1718_v32  ;;  %v1750_v28 = vmul.f32 %v9748_v0, %v6743_v38  ;;  %v9749_v9 = vmov %v9748_v0  ;;  %v9750_v36 = vstv %s9738_s16  ;;  %s9763_s16 = sld [smem:[#allocation108_spill]] }
 0x221   : > { %v1751_v53 = vmul.f32 %v9749_v9, %v6760_v42  ;;  %v1755_v13 = vmul.f32 %v9750_v36, %v6781_v33  ;;  %v9751_v41 = vmov %v9750_v36  ;;  %v9752_v12 = vstv %s9739_s0  ;;  %s9775_s0 = sld [smem:[#allocation105_spill]] }
 0x222   : > { %v1756_v52 = vmul.f32 %v9751_v41, %v6790_v50  ;;  %v1847_v6 = vadd.f32 %v9752_v12, %v1844_v8  ;;  %v1752_v58 = vadd.f32 %v1750_v28, %v1747_v21  ;;  %v9753_v32 = vmov %v9752_v12  ;;  %v4745_v28 = vpop.eup %4744 }
 0x223   : > { %v1753_v59 = vadd.f32 %v1751_v53, %v1748_v55  ;;  %v1848_v20 = vadd.f32 %v9753_v32, %v1845_v56  ;;  %v1862_v60 = vadd.f32 %v6732_v45, %v1857_v2  ;;  %v9754_v5 = vstv %s9743_s4 }
 0x224   : > { %v1655_v1 = vmul.f32 %v9754_v5, %v6826_v14  ;;  %v9756_v57 = vstv %s9745_s27  ;;  %v9757_v0 = vstv %s9746_s2  ;;  %v9759_v8 = vstv %s9747_s30  ;;  %s9785_s2 = sld [smem:[#allocation38_spill]]  ;;  %s9792_s30 = sld [smem:[#allocation40_spill]] }
 0x225   : > { %v1690_v35 = vmul.f32 %v9756_v57, %v6826_v14  ;;  %v1725_v9 = vmul.f32 %v9757_v0, %v6826_v14  ;;  %v1760_v21 = vmul.f32 %v9759_v8, %v6826_v14  ;;  %v1757_v56 = vadd.f32 %v1755_v13, %v1752_v58 }
 0x226   : > { %v1758_v45 = vadd.f32 %v1756_v52, %v1753_v59  ;;  %v6852_v2 = vmul.f32 %v1847_v6, %v6063_v63  ;;  %v6855_v55 = vmul.f32 %v1848_v20, %v6063_v63  ;;  %v1657_v53 = vadd.f32 %v1655_v1, %v1652_v40 }
 0x227   : > { %v1692_v36 = vadd.f32 %v1690_v35, %v1687_v30  ;;  %v1727_v41 = vadd.f32 %v1725_v9, %v1722_v44  ;;  %v1863_v12 = vadd.f32 %v6740_v24, %v6745_v25  ;;  %v6860_v13 = vmul.f32 %v4745_v28, %v6648_v43 }
 0x228   : > { %v1762_v52 = vadd.f32 %v1760_v21, %v1757_v56  ;;  %v9764_v6 = vstv %s9755_s13  ;;  %v9766_v20 = vstv %s9758_s10  ;;  %v9767_v40 = vstv %s9760_s22  ;;  %s9796_s13 = sld [smem:[#allocation110_spill]] }
 0x229   : > { %v1865_v58 = vmul.f32 %v9764_v6, %v6511_v10  ;;  %v9765_v59 = vmov %v9764_v6  ;;  %v6870_v5 = vadd.f32 %v9766_v20, %v1657_v53  ;;  %v6874_v30 = vadd.f32 %v9767_v40, %v1692_v36 }
 0x22a   : > { %v1866_v32 = vmul.f32 %v9765_v59, %v6522_v46  ;;  %v9768_v44 = vstv %s9761_s29  ;;  %v9769_v24 = vstv %s9762_s21  ;;  %v9770_v25 = vstv %s9743_s4  ;;  %s9778_s4 = sld [smem:[#allocation37_spill]] }
 0x22b   : > { %v6878_v1 = vadd.f32 %v9768_v44, %v1727_v41  ;;  %v1875_v43 = vmul.f32 %v9769_v24, %v6735_v54  ;;  %v1656_v57 = vmul.f32 %v9770_v25, %v6860_v13  ;;  %v9771_v10 = vstv %s9745_s27  ;;  %s9780_s27 = sld [smem:[#allocation39_spill]] }
 0x22c   : > { %v1691_v35 = vmul.f32 %v9771_v10, %v6860_v13  ;;  %v9772_v46 = vmov %v9757_v0  ;;  %v9773_v9 = vmov %v9759_v8  ;;  %v4197_v21 = vmul.f32 -1.442695, %v6870_v5 }
 0x22d   : > { %v1726_v0 = vmul.f32 %v9772_v46, %v6860_v13  ;;  %v1761_v8 = vmul.f32 %v9773_v9, %v6860_v13  ;;  %v4199_v56 = vmul.f32 -1.442695, %v6874_v30  ;;  %v4201_v28 = vmul.f32 -1.442695, %v6878_v1 }
 0x22e   : > { %v9774_v53 = vstv %s9763_s16  ;;  %v1658_v41 = vadd.f32 %v1656_v57, %v1653_v27  ;;  %v1693_v6 = vadd.f32 %v1691_v35, %v1688_v4  ;;  %4746 = vpow2.f32 %v4197_v21  ;;  %s7298_s16 = sld [smem:[#allocation13 + $0x181]] }
 0x22f   : > { %v6900_v36 = vadd.f32 %v9774_v53, %v1762_v52  ;;  %v1728_v59 = vadd.f32 %v1726_v0, %v1723_v61  ;;  %v1763_v20 = vadd.f32 %v1761_v8, %v1758_v45  ;;  %v1867_v44 = vadd.f32 %v1865_v58, %v1862_v60 }
 0x230   : > { %v1868_v24 = vadd.f32 %v1866_v32, %v1863_v12  ;;  %v9776_v25 = vstv %s9758_s10  ;;  %v9777_v46 = vstv %s9760_s22  ;;  %4748 = vpow2.f32 %v4199_v56  ;;  %s9818_s10 = sld [smem:[#allocation48_spill]]  ;;  %s7246_s22 = sld [smem:[#allocation13 + $0x102]] }
 0x231   : > { %v4203_v40 = vmul.f32 -1.442695, %v6900_v36  ;;  %v6905_v10 = vadd.f32 %v9776_v25, %v1658_v41  ;;  %v6909_v9 = vadd.f32 %v9777_v46, %v1693_v6  ;;  %v9779_v52 = vstv %s9761_s29  ;;  %s7265_s29 = sld [smem:[#allocation13 + $0x103]] }
 0x232   : > { %v6913_v27 = vadd.f32 %v9779_v52, %v1728_v59  ;;  %4750 = vpow2.f32 %v4201_v28  ;;  %v9781_v4 = vmov %v9774_v53  ;;  %v9782_v60 = vstv %s9775_s0  ;;  %s7304_s0 = sld [smem:[#allocation13 + $0x182]] }
 0x233   : > { %v6917_v61 = vadd.f32 %v9781_v4, %v1763_v20  ;;  %v1870_v45 = vadd.f32 %v9782_v60, %v1867_v44  ;;  %v9783_v12 = vmov %v9782_v60  ;;  %v4198_v32 = vmul.f32 -1.442695, %v6905_v10 }
 0x234   : > { %v1871_v58 = vadd.f32 %v9783_v12, %v1868_v24  ;;  %v4200_v57 = vmul.f32 -1.442695, %v6909_v9  ;;  %v4202_v35 = vmul.f32 -1.442695, %v6913_v27  ;;  %4752 = vpow2.f32 %v4203_v40 }
 0x235   : > { %v4204_v0 = vmul.f32 -1.442695, %v6917_v61  ;;  %v6928_v8 = vmul.f32 %v1870_v45, %v6063_v63  ;;  %v9784_v56 = vstv %s9762_s21  ;;  %4754 = vpow2.f32 %v4198_v32  ;;  %s7296_s21 = sld [smem:[#allocation13 + $0x180]] }
 0x236   : > { %v6931_v21 = vmul.f32 %v1871_v58, %v6063_v63  ;;  %v1876_v28 = vmul.f32 %v9784_v56, %v6748_v17  ;;  %v9786_v53 = vstv %s9778_s4  ;;  %v9788_v20 = vstv %s9780_s27  ;;  %s7310_s4 = sld [smem:[#allocation13 + $0x183]]  ;;  %s7312_s27 = sld [smem:[#allocation13 + $0x4]] }
 0x237   : > { %v1878_v41 = vmul.f32 %v9786_v53, %v6743_v38  ;;  %v9787_v6 = vmov %v9786_v53  ;;  %v1883_v40 = vmul.f32 %v9788_v20, %v6781_v33  ;;  %4756 = vpow2.f32 %v4200_v57 }
 0x238   : > { %v1879_v59 = vmul.f32 %v9787_v6, %v6760_v42  ;;  %v9789_v44 = vmov %v9788_v20  ;;  %v9790_v25 = vstv %s6241_s23  ;;  %4758 = vpow2.f32 %v4202_v35  ;;  %s9801_s23 = sld [smem:[#allocation44_spill]] }
 0x239   : > { %v1884_v24 = vmul.f32 %v9789_v44, %v6790_v50  ;;  %v1888_v46 = vmul.f32 %v9790_v25, %v6826_v14  ;;  %v9791_v52 = vmov %v9790_v25  ;;  %v1880_v60 = vadd.f32 %v1878_v41, %v1875_v43 }
 0x23a   : > { %v1889_v4 = vmul.f32 %v9791_v52, %v6860_v13  ;;  %v1881_v45 = vadd.f32 %v1879_v59, %v1876_v28  ;;  %v9793_v12 = vstv %s6187_s18  ;;  %4760 = vpow2.f32 %v4204_v0  ;;  %v4747_v0 = vpop.eup %4746  ;;  %s9805_s18 = sld [smem:[#allocation46_spill]] }
 0x23b   : > { %v1898_v58 = vmul.f32 %v9793_v12, %v6735_v54  ;;  %v9794_v32 = vmov %v9793_v12  ;;  %v9795_v56 = vstv %s9785_s2  ;;  %v1885_v44 = vadd.f32 %v1883_v40, %v1880_v60  ;;  %v4749_v40 = vpop.eup %4748  ;;  %s7316_s2 = sld [smem:[#allocation13 + $0x84]] }
 0x23c   : > { %v1899_v57 = vmul.f32 %v9794_v32, %v6748_v17  ;;  %v1901_v53 = vmul.f32 %v9795_v56, %v6743_v38  ;;  %v9797_v6 = vmov %v9795_v56  ;;  %v1886_v25 = vadd.f32 %v1884_v24, %v1881_v45  ;;  %v4751_v37 = vpop.eup %4750 }
 0x23d   : > { %v1902_v20 = vmul.f32 %v9797_v6, %v6760_v42  ;;  %v9798_v35 = vstv %s6223_s12  ;;  %v9800_v12 = vstv %s9792_s30  ;;  %v1668_v24 = vadd.f32 1.0, %v4747_v0  ;;  %s9811_s12 = sld [smem:[#allocation41_spill]]  ;;  %s7318_s30 = sld [smem:[#allocation13 + $0x104]] }
 0x23e   : > { %v1906_v43 = vmul.f32 %v9798_v35, %v6781_v33  ;;  %v9799_v28 = vmov %v9798_v35  ;;  %v1903_v59 = vadd.f32 %v1901_v53, %v1898_v58  ;;  %v1911_v32 = vmul.f32 %v9800_v12, %v6826_v14 }
 0x23f   : > { %v1907_v41 = vmul.f32 %v9799_v28, %v6790_v50  ;;  %v1904_v52 = vadd.f32 %v1902_v20, %v1899_v57  ;;  %v9802_v56 = vmov %v9800_v12  ;;  %v1890_v60 = vadd.f32 %v1888_v46, %v1885_v44  ;;  %v4753_v20 = vpop.eup %4752 }
 0x240   : > { %v1912_v6 = vmul.f32 %v9802_v56, %v6860_v13  ;;  %v1891_v45 = vadd.f32 %v1889_v4, %v1886_v25  ;;  %v9803_v35 = vstv %s9796_s13  ;;  %v1703_v28 = vadd.f32 1.0, %v4749_v40  ;;  %s7324_s13 = sld [smem:[#allocation13 + $0x184]] }
 0x241   : > { %v1921_v18 = vmul.f32 %v9803_v35, %v6735_v54  ;;  %v1908_v23 = vadd.f32 %v1906_v43, %v1903_v59  ;;  %v1909_v58 = vadd.f32 %v1907_v41, %v1904_v52  ;;  %v9804_v57 = vmov %v9803_v35  ;;  %v4755_v59 = vpop.eup %4754 }
 0x242   : > { %v1922_v53 = vmul.f32 %v9804_v57, %v6748_v17  ;;  %4762 = vrcp.f32 %v1668_v24  ;;  %v1738_v12 = vadd.f32 1.0, %v4751_v37  ;;  %v9806_v56 = vstv %s9801_s23  ;;  %v4757_v24 = vpop.eup %4756  ;;  %s7326_s23 = sld [smem:[#allocation13 + $0x5]] }
 0x243   : > { %v1893_v0 = vadd.f32 %v9806_v56, %v1890_v60  ;;  %v9807_v46 = vmov %v9806_v56  ;;  %4764 = vrcp.f32 %v1703_v28  ;;  %v1773_v44 = vadd.f32 1.0, %v4753_v20 }
 0x244   : > { %v1894_v4 = vadd.f32 %v9807_v46, %v1891_v45  ;;  %v1913_v25 = vadd.f32 %v1911_v32, %v1908_v23  ;;  %v1914_v43 = vadd.f32 %v1912_v6, %v1909_v58  ;;  %4766 = vrcp.f32 %v1738_v12  ;;  %v4759_v23 = vpop.eup %4758 }
 0x245   : > { %v1895_v41 = vmul.f32 %v1893_v0, %v6063_v63  ;;  %v9808_v40 = vstv %s6216_s25  ;;  %v1669_v35 = vadd.f32 1.0, %v4755_v59  ;;  %4768 = vrcp.f32 %v1773_v44  ;;  %v4761_v0 = vpop.eup %4760  ;;  %s9814_s25 = sld [smem:[#allocation111_spill]] }
 0x246   : > { %v1896_v52 = vmul.f32 %v1894_v4, %v6063_v63  ;;  %v1924_v37 = vmul.f32 %v9808_v40, %v6743_v38  ;;  %v9809_v60 = vstv %s9805_s18  ;;  %v1704_v32 = vadd.f32 1.0, %v4757_v24  ;;  %s7336_s18 = sld [smem:[#allocation13 + $0x85]] }
 0x247   : > { %v1916_v45 = vadd.f32 %v9809_v60, %v1913_v25  ;;  %v9810_v28 = vmov %v9809_v60  ;;  %v9812_v6 = vmov %v9808_v40  ;;  %v9813_v12 = vstv %s6231_s3  ;;  %s9831_s3 = sld [smem:[#allocation47_spill]] }
 0x248   : > { %v1917_v57 = vadd.f32 %v9810_v28, %v1914_v43  ;;  %v1925_v58 = vmul.f32 %v9812_v6, %v6760_v42  ;;  %v1926_v20 = vadd.f32 %v1924_v37, %v1921_v18  ;;  %v1929_v56 = vmul.f32 %v9813_v12, %v6781_v33 }
 0x249   : > { %4770 = vrcp.f32 %v1669_v35  ;;  %v1739_v46 = vadd.f32 1.0, %v4759_v23  ;;  %v7004_v4 = vmul.f32 %v1916_v45, %v6063_v63  ;;  %v1774_v25 = vadd.f32 1.0, %v4761_v0 }
 0x24a   : > { %v7007_v44 = vmul.f32 %v1917_v57, %v6063_v63  ;;  %4772 = vrcp.f32 %v1704_v32  ;;  %v1927_v18 = vadd.f32 %v1925_v58, %v1922_v53  ;;  %v9815_v43 = vmov %v9813_v12 }
 0x24b   : > { %v1930_v59 = vmul.f32 %v9815_v43, %v6790_v50  ;;  %4774 = vrcp.f32 %v1739_v46  ;;  %v1931_v40 = vadd.f32 %v1929_v56, %v1926_v20  ;;  %v9816_v37 = vstv %s9811_s12  ;;  %s7338_s12 = sld [smem:[#allocation13 + $0x105]] }
 0x24c   : > { %v1934_v24 = vmul.f32 %v9816_v37, %v6826_v14  ;;  %v9817_v35 = vmov %v9816_v37  ;;  %4776 = vrcp.f32 %v1774_v25  ;;  %v9819_v28 = vstv %s6199_s20  ;;  %v4763_v46 = vpop.eup %4762  ;;  %s9840_s20 = sld [smem:[#allocation112_spill]] }
 0x24d   : > { %v1935_v60 = vmul.f32 %v9817_v35, %v6860_v13  ;;  %v1932_v45 = vadd.f32 %v1930_v59, %v1927_v18  ;;  %v1944_v53 = vmul.f32 %v9819_v28, %v6735_v54  ;;  %v9820_v57 = vmov %v9819_v28  ;;  %v4765_v37 = vpop.eup %4764 }
 0x24e   : > { %v1945_v23 = vmul.f32 %v9820_v57, %v6748_v17  ;;  %v1936_v32 = vadd.f32 %v1934_v24, %v1931_v40  ;;  %v9821_v6 = vstv %s6218_s19  ;;  %v9823_v56 = vstv %s9814_s25  ;;  %s9842_s19 = sld [smem:[#allocation42_spill]]  ;;  %s7345_s25 = sld [smem:[#allocation13 + $0x185]] }
 0x24f   : > { %v1947_v58 = vmul.f32 %v9821_v6, %v6743_v38  ;;  %v9822_v20 = vmov %v9821_v6  ;;  %v1952_v0 = vmul.f32 %v9823_v56, %v6781_v33  ;;  %v1937_v25 = vadd.f32 %v1935_v60, %v1932_v45  ;;  %v4767_v60 = vpop.eup %4766 }
 0x250   : > { %v1948_v12 = vmul.f32 %v9822_v20, %v6760_v42  ;;  %v9824_v18 = vmov %v9823_v56  ;;  %v9825_v54 = vstv %s6248_s1  ;;  %v7043_v38 = vmul.f32 %v4763_v46, %v6870_v5  ;;  %v4769_v28 = vpop.eup %4768  ;;  %s7198_s1 = sld [smem:[#allocation13 + $0x82]] }
 0x251   : > { %v1953_v43 = vmul.f32 %v9824_v18, %v6790_v50  ;;  %v1957_v59 = vmul.f32 %v9825_v54, %v6826_v14  ;;  %v9826_v17 = vmov %v9825_v54  ;;  %v9827_v24 = vstv %s9818_s10  ;;  %s7347_s10 = sld [smem:[#allocation13 + $0x6]] }
 0x252   : > { %v1958_v40 = vmul.f32 %v9826_v17, %v6860_v13  ;;  %v1939_v42 = vadd.f32 %v9827_v24, %v1936_v32  ;;  %v1949_v33 = vadd.f32 %v1947_v58, %v1944_v53  ;;  %v1950_v35 = vadd.f32 %v1948_v12, %v1945_v23 }
 0x253   : > { %v7048_v45 = vmul.f32 %v4765_v37, %v6874_v30  ;;  %v9828_v50 = vmov %v9827_v24  ;;  %v7053_v13 = vadd.f32 %v1895_v41, %v6672_v39  ;;  %v7056_v5 = vadd.f32 %v1896_v52, %v6678_v31  ;;  %v4771_v6 = vpop.eup %4770 }
 0x254   : > { %v1940_v14 = vadd.f32 %v9828_v50, %v1937_v25  ;;  %v7059_v57 = vmul.f32 %v4767_v60, %v6878_v1  ;;  %v7062_v53 = vmul.f32 %v1939_v42, %v6063_v63  ;;  %v1954_v30 = vadd.f32 %v1952_v0, %v1949_v33  ;;  %v4773_v46 = vpop.eup %4772 }
 0x255   : > { %v1955_v23 = vadd.f32 %v1953_v43, %v1950_v35  ;;  %v7065_v32 = vmul.f32 %v4769_v28, %v6900_v36  ;;  %v9829_v31 = vstv %s6252_s28  ;;  %v9830_v1 = vstv %s6272_s26  ;;  %s9845_s28 = sld [smem:[#allocation45_spill]] }
 0x256   : > { %v7068_v39 = vmul.f32 %v1940_v14, %v6063_v63  ;;  %v1967_v41 = vmul.f32 %v9829_v31, %v7043_v38  ;;  %v1970_v52 = vmul.f32 %v9830_v1, %v7048_v45  ;;  %v1959_v58 = vadd.f32 %v1957_v59, %v1954_v30 }
 0x257   : > { %v1960_v20 = vadd.f32 %v1958_v40, %v1955_v23  ;;  %v9832_v12 = vstv %s6288_s9  ;;  %v9833_v56 = vstv %s6254_s7  ;;  %v1675_v25 = vmul.f32 %v4771_v6, %v6905_v10  ;;  %v4775_v40 = vpop.eup %4774  ;;  %s9851_s7 = sld [smem:[#allocation113_spill]]  ;;  %s9861_s9 = sld [smem:[#allocation115_spill]] }
 0x258   : > { %v1975_v36 = vmul.f32 %v9832_v12, %v7059_v57  ;;  %v1990_v0 = vmul.f32 %v9833_v56, %v7043_v38  ;;  %v1972_v18 = vadd.f32 %v1970_v52, %v1967_v41  ;;  %v9834_v43 = vstv %s6335_s5  ;;  %v4777_v50 = vpop.eup %4776  ;;  %s9867_s5 = sld [smem:[#allocation116_spill]]  ;;  %9893 = sst [smem:[#allocation35_spill]] %s7347_s10 }
 0x259   : > { %v1980_v54 = vmul.f32 %v9834_v43, %v7065_v32  ;;  %v9835_v17 = vstv %s6276_s15  ;;  %v1710_v37 = vmul.f32 %v4773_v46, %v6909_v9  ;;  %v9836_v24 = vstv %s6317_s8  ;;  %s9863_s15 = sld [smem:[#allocation114_spill]]  ;;  %s9879_s8 = sld [smem:[#allocation43_spill]] }
 0x25a   : > { %v1993_v59 = vmul.f32 %v9835_v17, %v7048_v45  ;;  %v1962_v42 = vadd.f32 %v9836_v24, %v1959_v58  ;;  %v9837_v33 = vmov %v9836_v24  ;;  %v9838_v60 = vstv %s9831_s3  ;;  %s7351_s3 = sld [smem:[#allocation13 + $0x86]] }
 0x25b   : > { %v1963_v35 = vadd.f32 %v9837_v33, %v1960_v20  ;;  %v1998_v10 = vmul.f32 %v9838_v60, %v7059_v57  ;;  %v1745_v14 = vmul.f32 %v4775_v40, %v6913_v27  ;;  %v9839_v28 = vmov %v9829_v31 }
 0x25c   : > { %v1968_v30 = vmul.f32 %v9839_v28, %v1675_v25  ;;  %v1977_v23 = vadd.f32 %v1975_v36, %v1972_v18  ;;  %v9841_v31 = vmov %v9833_v56  ;;  %v1780_v9 = vmul.f32 %v4777_v50, %v6917_v61 }
 0x25d   : > { %v1991_v41 = vmul.f32 %v9841_v31, %v1675_v25  ;;  %v7104_v1 = vmul.f32 %v1962_v42, %v6063_v63  ;;  %v7107_v52 = vmul.f32 %v1963_v35, %v6063_v63  ;;  %v9843_v6 = vstv %s6272_s26  ;;  %s7186_s26 = sld [smem:[#allocation13 + $0x81]] }
 0x25e   : > { %v1971_v58 = vmul.f32 %v9843_v6, %v1710_v37  ;;  %v9844_v27 = vmov %v9832_v12  ;;  %v1982_v12 = vadd.f32 %v1980_v54, %v1977_v23  ;;  %v9846_v36 = vmov %v9835_v17 }
 0x25f   : > { %v1976_v20 = vmul.f32 %v9844_v27, %v1745_v14  ;;  %v1994_v56 = vmul.f32 %v9846_v36, %v1710_v37  ;;  %v1995_v46 = vadd.f32 %v1993_v59, %v1990_v0  ;;  %v9847_v61 = vmov %v9834_v43 }
 0x260   : > { %v1973_v18 = vadd.f32 %v1971_v58, %v1968_v30  ;;  %v1981_v43 = vmul.f32 %v9847_v61, %v1780_v9  ;;  %v9848_v17 = vmov %v9838_v60  ;;  %v9849_v24 = vstv %s6345_s11  ;;  %s7223_s11 = sld [smem:[#allocation13 + $0x100]]  ;;  %9894 = sst [smem:[#allocation109_spill]] %s7351_s3 }
 0x261   : > { %v1999_v40 = vmul.f32 %v9848_v17, %v1745_v14  ;;  %v2003_v42 = vmul.f32 %v9849_v24, %v7065_v32  ;;  %v9850_v33 = vstv %s9840_s20  ;;  %v1996_v60 = vadd.f32 %v1994_v56, %v1991_v41 }
 0x262   : > { %v1985_v35 = vadd.f32 %v9850_v33, %v1982_v12  ;;  %v2000_v50 = vadd.f32 %v1998_v10, %v1995_v46  ;;  %v9852_v54 = vmov %v9849_v24  ;;  %v1978_v0 = vadd.f32 %v1976_v20, %v1973_v18 }
 0x263   : > { %v2004_v28 = vmul.f32 %v9852_v54, %v1780_v9  ;;  %v9853_v59 = vstv %s9842_s19  ;;  %v9855_v6 = vstv %s9845_s28  ;;  %v2001_v41 = vadd.f32 %v1999_v40, %v1996_v60  ;;  %s7358_s19 = sld [smem:[#allocation13 + $0x7]]  ;;  %s7360_s28 = sld [smem:[#allocation15 + $0x80]] }
 0x264   : > { %v2013_v30 = vmul.f32 %v9853_v59, %v7043_v38  ;;  %v9854_v23 = vmov %v9853_v59  ;;  %v2016_v58 = vmul.f32 %v9855_v6, %v7048_v45  ;;  %v1987_v27 = vmul.f32 %v1985_v35, %v6063_v63 }
 0x265   : > { %v2014_v31 = vmul.f32 %v9854_v23, %v1675_v25  ;;  %v2005_v10 = vadd.f32 %v2003_v42, %v2000_v50  ;;  %v9856_v12 = vmov %v9855_v6  ;;  %v1983_v20 = vadd.f32 %v1981_v43, %v1978_v0 }
 0x266   : > { %v2017_v36 = vmul.f32 %v9856_v12, %v1710_v37  ;;  %v2018_v56 = vadd.f32 %v2016_v58, %v2013_v30  ;;  %v9857_v46 = vstv %s6315_s14  ;;  %v2006_v24 = vadd.f32 %v2004_v28, %v2001_v41  ;;  %s9878_s14 = sld [smem:[#allocation34_spill]] }
 0x267   : > { %v2021_v18 = vmul.f32 %v9857_v46, %v7059_v57  ;;  %v9858_v61 = vmov %v9857_v46  ;;  %v9859_v33 = vstv %s9851_s7  ;;  %v9860_v35 = vstv %s6352_s17  ;;  %s7225_s17 = sld [smem:[#allocation13 + $0x101]]  ;;  %s7363_s7 = sld [smem:[#allocation13 + $0x186]] }
 0x268   : > { %v2022_v17 = vmul.f32 %v9858_v61, %v1745_v14  ;;  %v2008_v54 = vadd.f32 %v9859_v33, %v2005_v10  ;;  %v2019_v59 = vadd.f32 %v2017_v36, %v2014_v31  ;;  %v2026_v40 = vmul.f32 %v9860_v35, %v7065_v32 }
 0x269   : > { %v9862_v42 = vstv %s9840_s20  ;;  %v2023_v43 = vadd.f32 %v2021_v18, %v2018_v56  ;;  %v9864_v50 = vmov %v9860_v35  ;;  %v9865_v30 = vstv %s9607_s6  ;;  %s7200_s6 = sld [smem:[#allocation13 + $0x83]]  ;;  %s7353_s20 = sld [smem:[#allocation13 + $0x106]] }
 0x26a   : > { %v1986_v60 = vadd.f32 %v9862_v42, %v1983_v20  ;;  %v2027_v0 = vmul.f32 %v9864_v50, %v1780_v9  ;;  %v2036_v23 = vmul.f32 %v9865_v30, %v7043_v38  ;;  %v9866_v6 = vmov %v9859_v33  ;;  %9896 = sst [smem:[#allocation54_spill]] %s7358_s19 }
 0x26b   : > { %v2009_v28 = vadd.f32 %v9866_v6, %v2006_v24  ;;  %v2010_v31 = vmul.f32 %v2008_v54, %v6063_v63  ;;  %v2024_v58 = vadd.f32 %v2022_v17, %v2019_v59  ;;  %v9868_v41 = vmov %v9865_v30  ;;  %9897 = sst [smem:[#allocation55_spill]] %s7360_s28 }
 0x26c   : > { %v2037_v10 = vmul.f32 %v9868_v41, %v1675_v25  ;;  %v1988_v12 = vmul.f32 %v1986_v60, %v6063_v63  ;;  %v2028_v36 = vadd.f32 %v2026_v40, %v2023_v43  ;;  %v9869_v20 = vstv %s6359_s24  ;;  %s9877_s24 = sld [smem:[#allocation117_spill]] }
 0x26d   : > { %v2039_v56 = vmul.f32 %v9869_v20, %v7048_v45  ;;  %v9870_v46 = vmov %v9869_v20  ;;  %v2011_v38 = vmul.f32 %v2009_v28, %v6063_v63  ;;  %v2029_v61 = vadd.f32 %v2027_v0, %v2024_v58 }
 0x26e   : > { %v2040_v18 = vmul.f32 %v9870_v46, %v1710_v37  ;;  %v9871_v24 = vstv %s9861_s9  ;;  %v9873_v42 = vstv %s9863_s15  ;;  %v9874_v60 = vstv %s9867_s5  ;;  %s7365_s9 = sld [smem:[#allocation13 + $0x87]]  ;;  %s7371_s5 = sld [smem:[#allocation15 + $0x81]] }
 0x26f   : > { %v2044_v33 = vmul.f32 %v9871_v24, %v7059_v57  ;;  %v9872_v35 = vmov %v9871_v24  ;;  %v2031_v17 = vadd.f32 %v9873_v42, %v2028_v36  ;;  %v2041_v59 = vadd.f32 %v2039_v56, %v2036_v23  ;;  %v7241_v36 = vld [vmem:[%s9878_s14 + $0x8] sm:$0xfe]  ;;  %v7262_v24 = vld [vmem:[%s9878_s14 + $0x18] sm:$0xfe]  ;;  %9895 = sst [smem:[#allocation49_spill]] %s7353_s20  ;;  %s7369_s15 = sld [smem:[#allocation13 + $0x107]] }
 0x270   : > { %v2045_v54 = vmul.f32 %v9872_v35, %v1745_v14  ;;  %v2042_v25 = vadd.f32 %v2040_v18, %v2037_v10  ;;  %v2049_v40 = vmul.f32 %v9874_v60, %v7065_v32  ;;  %v9875_v43 = vmov %v9873_v42  ;;  %v7233_v10 = vld [vmem:[%s9878_s14] sm:$0xfe]  ;;  %v2430_v35 = vpop.permute.xlu1 %2429 }
 0x271   : > { %v2032_v50 = vadd.f32 %v9875_v43, %v2029_v61  ;;  %v9876_v45 = vmov %v9874_v60  ;;  %v7181_v37 = vadd.f32 %v7053_v13, %v1987_v27  ;;  %v7184_v0 = vadd.f32 %v7056_v5, %v1988_v12  ;;  %v7278_v43 = vld [vmem:[%s9878_s14 + $0x20] sm:$0xfe] }
 0x272   : > { %v2050_v30 = vmul.f32 %v9876_v45, %v1780_v9  ;;  %v2033_v57 = vmul.f32 %v2031_v17, %v6063_v63  ;;  %v2046_v14 = vadd.f32 %v2044_v33, %v2041_v59  ;;  %v2047_v23 = vadd.f32 %v2045_v54, %v2042_v25  ;;  %v7282_v45 = vld [vmem:[%s9878_s14 + $0x28] sm:$0xfe] }
 0x273   : > { %v2062_v32 = vadd.f32 %v7004_v4, %v6709_v3  ;;  %v2034_v6 = vmul.f32 %v2032_v50, %v6063_v63  ;;  %v2063_v13 = vadd.f32 %v7007_v44, %v6718_v19  ;;  %v2066_v5 = vadd.f32 %v7062_v53, %v6852_v2 }
 0x274   : > { %v2067_v9 = vadd.f32 %v7068_v39, %v6855_v55  ;;  %v2051_v27 = vadd.f32 %v2049_v40, %v2046_v14  ;;  %v2052_v28 = vadd.f32 %v2050_v30, %v2047_v23  ;;  %v2070_v4 = vadd.f32 %v7104_v1, %v6928_v8  ;;  %v7292_v23 = vld [vmem:[%s9878_s14 + $0x38] sm:$0xfe]  ;;  %9898 = sst [smem:[#allocation50_spill]] %s7365_s9 }
 0x275   : > { %v7202_v3 = vadd.f32 %v2062_v32, %v2010_v31  ;;  %v7206_v19 = vadd.f32 %v2063_v13, %v2011_v38  ;;  %v7208_v44 = vadd.f32 %v2066_v5, %v2033_v57  ;;  %v2071_v55 = vadd.f32 %v7107_v52, %v6931_v21  ;;  %v7258_v38 = vld [vmem:[%s9878_s14 + $0x10] sm:$0xfe]  ;;  %9899 = sst [smem:[#allocation56_spill]] %s7369_s15 }
 0x276   : > { %v7210_v2 = vadd.f32 %v2067_v9, %v2034_v6  ;;  %v9880_v53 = vstv %s9877_s24  ;;  %v7220_v41 = vmul.f32 %v6519_v51, %v6100_v22  ;;  %v2346_v8 = vadd.f32 1.0, %v6530_v15  ;;  %v7288_v57 = vld [vmem:[%s9878_s14 + $0x30] sm:$0xfe]  ;;  %9900 = sst [smem:[#allocation61_spill]] %s7371_s5  ;;  %s7379_s24 = sld [smem:[#allocation15 + $0x82]] }
 0x277   : > { %v2054_v39 = vadd.f32 %v9880_v53, %v2051_v27  ;;  %v9881_v58 = vmov %v9880_v53  ;;  %v2347_v1 = vadd.f32 1.0, %v6535_v7  ;;  %v2377_v21 = vadd.f32 %v6446_v11, %v6454_v29  ;;  %s7420_s14 = sld [smem:[#allocation13 + $0x10a]] }
 0x278   : > { %v2055_v31 = vadd.f32 %v9881_v58, %v2052_v28  ;;  %v2378_v52 = vadd.f32 %v6449_v47, %v6461_v34  ;;  %v9882_v22 = vstv %s9879_s8  ;;  %4778 = vrcp.f32 %v2346_v8  ;;  %s7391_s8 = sld [smem:[#allocation13 + $0x88]] }
 0x279   : > { %v2410_v51 = vmul.f32 %v7233_v10, %v9882_v22  ;;  %v2056_v15 = vmul.f32 %v2054_v39, %v6063_v63  ;;  %v9883_v7 = vmov %v9882_v22  ;;  %4780 = vrcp.f32 %v2347_v1 }
 0x27a   : > { %v2057_v12 = vmul.f32 %v2055_v31, %v6063_v63  ;;  %v2411_v11 = vmul.f32 %v7241_v36, %v9883_v7  ;;  %v9884_v47 = vrot.slane %v6438_v16, 7  ;;  %v2412_v56 = vstv %s7186_s26  ;;  %s7377_s26 = sld [smem:[#allocation13 + $0x187]] }
 0x27b   : > { %v7253_v46 = vadd.f32 %v2070_v4, %v2056_v15  ;;  %v2413_v61 = vmul.f32 %v7258_v38, %v2412_v56  ;;  %v2414_v33 = vmul.f32 %v7262_v24, %v2412_v56  ;;  %v9888_v16 = vrot.slane %v6137_v48, 7 }
 0x27c   : > { %v2385_v29 = vadd.f32 %v9884_v47, %v2377_v21  ;;  %v9885_v34 = vmov %v9884_v47  ;;  %v7255_v18 = vadd.f32 %v2071_v55, %v2057_v12  ;;  %v9889_v42 = vrot.slane %v6140_v49, 7  ;;  %v2478_v21 = vpop.permute.xlu1 %2477  ;;  %v9890_v12 = vld [vmem:[#allocation119_spill] sm:$0xff]  ;;  %9902 = sst [smem:[#allocation57_spill]] %s7379_s24 }
 0x27d   : > { %v2386_v20 = vadd.f32 %v9885_v34, %v2378_v52  ;;  %9886 = vst [vmem:[#allocation121_spill] sm:$0xff] %v7253_v46  ;;  %v2417_v59 = vstv %s7198_s1  ;;  %v2422_v25 = vstv %s7200_s6  ;;  %v2415_v60 = vadd.f32 %v2413_v61, %v2410_v51  ;;  %v9891_v34 = vld [vmem:[#allocation120_spill] sm:$0xff]  ;;  %s7384_s1 = sld [smem:[#allocation15 + $0x83]]  ;;  %s7389_s6 = sld [smem:[#allocation13 + $0x8]] }
 0x27e   : > { %9887 = vst [vmem:[#allocation122_spill] sm:$0xff] %v7255_v18  ;;  %v7269_v54 = vadd.f32 %v9888_v16, %v2385_v29  ;;  %v2416_v40 = vadd.f32 %v2414_v33, %v2411_v11  ;;  %v2418_v50 = vmul.f32 %v7278_v43, %v2417_v59  ;;  %v2419_v30 = vmul.f32 %v7282_v45, %v2417_v59  ;;  %9905 = sst [smem:[#allocation58_spill]] %s7391_s8 }
 0x27f   : > { %v7273_v17 = vadd.f32 %v9889_v42, %v2386_v20  ;;  %v2423_v14 = vmul.f32 %v7288_v57, %v2422_v25  ;;  %v2424_v32 = vmul.f32 %v7292_v23, %v2422_v25  ;;  %v2431_v5 = vrot.slane %v2430_v35, 7  ;;  %9914 = sst [smem:[#allocation68_spill]] %s7420_s14 }
 0x280   : > { %v4369_v48 = vmul.f32 -1.442695, %v7269_v54  ;;  %v2420_v6 = vadd.f32 %v2418_v50, %v2415_v60  ;;  %v2421_v13 = vadd.f32 %v2419_v30, %v2416_v40  ;;  %v2437_v9 = vrot.slane %v6169_v62, 7  ;;  %v9892_v40 = vld [vmem:[#allocation118_spill] sm:$0xff]  ;;  %9901 = sst [smem:[#allocation51_spill]] %s7377_s26 }
 0x281   : > { %v4370_v49 = vmul.f32 -1.442695, %v7273_v17  ;;  %v2438_v27 = vrot.slane %v6411_v26, 7  ;;  %v2457_v28 = vstv %s7223_s11  ;;  %v2460_v4 = vstv %s7225_s17  ;;  %s7394_s11 = sld [smem:[#allocation13 + $0x108]] }
 0x282   : > { %4782 = vpow2.f32 %v4369_v48  ;;  %v2425_v55 = vadd.f32 %v2423_v14, %v2420_v6  ;;  %v2426_v53 = vadd.f32 %v2424_v32, %v2421_v13  ;;  %v2458_v39 = vmul.f32 %v7233_v10, %v2457_v28  ;;  %v4779_v1 = vpop.eup %4778  ;;  %s7396_s17 = sld [smem:[#allocation13 + $0x188]] }
 0x283   : > { %4784 = vpow2.f32 %v4370_v49  ;;  %v2459_v58 = vmul.f32 %v7241_v36, %v2457_v28  ;;  %v2461_v62 = vmul.f32 %v7258_v38, %v2460_v4  ;;  %v2462_v31 = vmul.f32 %v7262_v24, %v2460_v4  ;;  %v4781_v15 = vpop.eup %4780  ;;  %9903 = sst [smem:[#allocation63_spill]] %s7384_s1 }
 0x284   : > { %v2465_v8 = vstv %s7246_s22  ;;  %v2433_v26 = vadd.f32 %v2431_v5, %v2425_v55  ;;  %v2434_v52 = vadd.f32 %v2431_v5, %v2426_v53  ;;  %v7321_v7 = vmul.f32 %v4779_v1, %v9890_v12  ;;  %9904 = sst [smem:[#allocation52_spill]] %s7389_s6  ;;  %s7401_s22 = sld [smem:[#allocation13 + $0x9]] }
 0x285   : > { %v2466_v22 = vmul.f32 %v7278_v43, %v2465_v8  ;;  %v2467_v51 = vmul.f32 %v7282_v45, %v2465_v8  ;;  %v2463_v11 = vadd.f32 %v2461_v62, %v2458_v39  ;;  %v2464_v47 = vadd.f32 %v2462_v31, %v2459_v58 }
 0x286   : > { %v2470_v29 = vstv %s7265_s29  ;;  %v7329_v20 = vmul.f32 %v4781_v15, %v9891_v34  ;;  %v7331_v56 = vadd.f32 %v2437_v9, %v2433_v26  ;;  %v7333_v61 = vadd.f32 %v2438_v27, %v2434_v52  ;;  %s7403_s29 = sld [smem:[#allocation13 + $0x89]] }
 0x287   : > { %v2471_v33 = vmul.f32 %v7288_v57, %v2470_v29  ;;  %v2468_v35 = vadd.f32 %v2466_v22, %v2463_v11  ;;  %v2469_v16 = vadd.f32 %v2467_v51, %v2464_v47  ;;  %v2472_v42 = vmul.f32 %v7292_v23, %v2470_v29  ;;  %9906 = sst [smem:[#allocation64_spill]] %s7394_s11 }
 0x288   : > { %v2479_v59 = vrot.slane %v2478_v21, 7  ;;  %v4371_v25 = vmul.f32 -1.442695, %v7331_v56  ;;  %v4372_v60 = vmul.f32 -1.442695, %v7333_v61  ;;  %v2485_v50 = vrot.slane %v9892_v40, 7 }
 0x289   : > { %v2486_v30 = vrot.slane %v7220_v41, 7  ;;  %v2473_v48 = vadd.f32 %v2471_v33, %v2468_v35  ;;  %v2474_v49 = vadd.f32 %v2472_v42, %v2469_v16  ;;  %v2505_v14 = vstv %s7296_s21  ;;  %9907 = sst [smem:[#allocation53_spill]] %s7396_s17  ;;  %s7628_s17 = sld [smem:[#allocation15 + $0x202]] }
 0x28a   : > { %v2508_v32 = vstv %s7298_s16  ;;  %4786 = vpow2.f32 %v4371_v25  ;;  %v2506_v6 = vmul.f32 %v7233_v10, %v2505_v14  ;;  %v2507_v13 = vmul.f32 %v7241_v36, %v2505_v14  ;;  %9908 = sst [smem:[#allocation60_spill]] %s7401_s22  ;;  %s7406_s21 = sld [smem:[#allocation13 + $0x109]] }
 0x28b   : > { %v2509_v41 = vmul.f32 %v7258_v38, %v2508_v32  ;;  %4788 = vpow2.f32 %v4372_v60  ;;  %v2481_v9 = vadd.f32 %v2479_v59, %v2473_v48  ;;  %v2482_v27 = vadd.f32 %v2479_v59, %v2474_v49  ;;  %v2526_v38 = vpop.permute.xlu1 %2525  ;;  %s7408_s16 = sld [smem:[#allocation13 + $0x189]] }
 0x28c   : > { %v4783_v5 = vpop.eup %4782  ;;  %v2510_v28 = vmul.f32 %v7262_v24, %v2508_v32  ;;  %v2513_v36 = vstv %s7304_s0  ;;  %v2518_v53 = vstv %s7310_s4  ;;  %v2527_v22 = vrot.slane %v2526_v38, 7  ;;  %9909 = sst [smem:[#allocation59_spill]] %s7403_s29  ;;  %s7414_s0 = sld [smem:[#allocation13 + $0xa]] }
 0x28d   : > { %v4785_v4 = vpop.eup %4784  ;;  %v2401_v10 = vadd.f32 1.0, %v4783_v5  ;;  %v2511_v55 = vadd.f32 %v2509_v41, %v2506_v6  ;;  %v7373_v58 = vadd.f32 %v2485_v50, %v2481_v9  ;;  %v7375_v62 = vadd.f32 %v2486_v30, %v2482_v27  ;;  %s7416_s4 = sld [smem:[#allocation13 + $0x8a]] }
 0x28e   : > { %v2402_v39 = vadd.f32 1.0, %v4785_v4  ;;  %v2512_v24 = vadd.f32 %v2510_v28, %v2507_v13  ;;  %v2514_v31 = vmul.f32 %v7278_v43, %v2513_v36  ;;  %v2515_v8 = vmul.f32 %v7282_v45, %v2513_v36 }
 0x28f   : > { %4790 = vrcp.f32 %v2401_v10  ;;  %v2519_v1 = vmul.f32 %v7288_v57, %v2518_v53  ;;  %v4373_v21 = vmul.f32 -1.442695, %v7373_v58  ;;  %v4374_v26 = vmul.f32 -1.442695, %v7375_v62  ;;  %9964 = sst [smem:[#allocation44_spill]] %s7628_s17 }
 0x290   : > { %4792 = vrcp.f32 %v2402_v39  ;;  %v2520_v52 = vmul.f32 %v7292_v23, %v2518_v53  ;;  %v2516_v43 = vadd.f32 %v2514_v31, %v2511_v55  ;;  %v2517_v45 = vadd.f32 %v2515_v8, %v2512_v24  ;;  %9910 = sst [smem:[#allocation62_spill]] %s7406_s21  ;;  %s7783_s17 = sld [smem:[#allocation13 + $0x198]] }
 0x291   : > { %v2533_v57 = vrot.slane %v7321_v7, 7  ;;  %4794 = vpow2.f32 %v4373_v21  ;;  %v2534_v23 = vrot.slane %v7329_v20, 7  ;;  %v2553_v51 = vstv %s7312_s27  ;;  %9911 = sst [smem:[#allocation66_spill]] %s7408_s16  ;;  %s7492_s27 = sld [smem:[#allocation13 + $0x110]] }
 0x292   : > { %v2556_v15 = vstv %s7326_s23  ;;  %4796 = vpow2.f32 %v4374_v26  ;;  %v2521_v12 = vadd.f32 %v2519_v1, %v2516_v43  ;;  %v2522_v7 = vadd.f32 %v2520_v52, %v2517_v45  ;;  %9912 = sst [smem:[#allocation65_spill]] %s7414_s0  ;;  %s7540_s16 = sld [smem:[#allocation13 + $0x12]] }
 0x293   : > { %v2561_v11 = vstv %s7347_s10  ;;  %v2566_v47 = vstv %s7358_s19  ;;  %v2571_v29 = vstv %s7360_s28  ;;  %v2588_v34 = vstv %s7316_s2  ;;  %9913 = sst [smem:[#allocation67_spill]] %s7416_s4  ;;  %s7422_s19 = sld [smem:[#allocation13 + $0x18a]] }
 0x294   : > { %v2591_v20 = vstv %s7336_s18  ;;  %v4787_v33 = vpop.eup %4786  ;;  %v2529_v35 = vadd.f32 %v2527_v22, %v2521_v12  ;;  %v2530_v16 = vadd.f32 %v2527_v22, %v2522_v7  ;;  %v2596_v42 = vstv %s7351_s3  ;;  %s7427_s2 = sld [smem:[#allocation13 + $0xb]]  ;;  %s7429_s28 = sld [smem:[#allocation15 + $0x100]] }
 0x295   : > { %v2601_v59 = vstv %s7365_s9  ;;  %v4789_v25 = vpop.eup %4788  ;;  %v2449_v60 = vadd.f32 1.0, %v4787_v33  ;;  %v2606_v40 = vstv %s7371_s5  ;;  %v2623_v50 = vstv %s7318_s30  ;;  %s7436_s9 = sld [smem:[#allocation13 + $0x8b]]  ;;  %s7443_s30 = sld [smem:[#allocation15 + $0x101]] }
 0x296   : > { %v2626_v30 = vstv %s7338_s12  ;;  %v2450_v48 = vadd.f32 1.0, %v4789_v25  ;;  %v7431_v49 = vadd.f32 %v2533_v57, %v2529_v35  ;;  %v7433_v14 = vadd.f32 %v2534_v23, %v2530_v16  ;;  %s7438_s3 = sld [smem:[#allocation13 + $0x10b]]  ;;  %s7465_s10 = sld [smem:[#allocation13 + $0xe]] }
 0x297   : > { %v2631_v32 = vstv %s7353_s20  ;;  %4798 = vrcp.f32 %v2449_v60  ;;  %v2636_v6 = vstv %s7369_s15  ;;  %v2641_v13 = vstv %s7379_s24  ;;  %s7448_s5 = sld [smem:[#allocation13 + $0x18b]]  ;;  %s7450_s20 = sld [smem:[#allocation15 + $0x102]] }
 0x298   : > { %v2658_v41 = vstv %s7324_s13  ;;  %4800 = vrcp.f32 %v2450_v48  ;;  %v4375_v9 = vmul.f32 -1.442695, %v7431_v49  ;;  %v4376_v27 = vmul.f32 -1.442695, %v7433_v14  ;;  %s7456_s13 = sld [smem:[#allocation13 + $0xc]]  ;;  %s7458_s24 = sld [smem:[#allocation15 + $0x103]] }
 0x299   : > { %9915 = sst [smem:[#allocation69_spill]] %s7422_s19  ;;  %v4791_v5 = vpop.eup %4790  ;;  %v2661_v28 = vstv %s7345_s25  ;;  %v2666_v55 = vstv %s7363_s7  ;;  %v2671_v36 = vstv %s7377_s26  ;;  %v2676_v53 = vstv %s7384_s1  ;;  %s7463_s15 = sld [smem:[#allocation13 + $0xd]] }
 0x29a   : > { %9916 = sst [smem:[#allocation70_spill]] %s7427_s2  ;;  %v4793_v4 = vpop.eup %4792  ;;  %v2407_v10 = vmul.f32 %v4791_v5, %v7269_v54  ;;  %4802 = vpow2.f32 %v4375_v9  ;;  %v2693_v39 = vstv %s7389_s6  ;;  %v2696_v24 = vstv %s7401_s22  ;;  %s7483_s22 = sld [smem:[#allocation13 + $0x10]] }
 0x29b   : > { %9917 = sst [smem:[#allocation71_spill]] %s7429_s28  ;;  %v2408_v38 = vmul.f32 %v4793_v4, %v7273_v17  ;;  %v4795_v31 = vpop.eup %4794  ;;  %4804 = vpow2.f32 %v4376_v27  ;;  %s7485_s6 = sld [smem:[#allocation13 + $0x90]]  ;;  %v2701_v23 = vstv %s7414_s0  ;;  %v2711_v12 = vstv %s7429_s28 }
 0x29c   : > { %9918 = sst [smem:[#allocation75_spill]] %s7436_s9  ;;  %v7469_v54 = vmul.f32 %v2553_v51, %v2407_v10  ;;  %v7471_v8 = vmul.f32 %v2588_v34, %v2407_v10  ;;  %v7473_v1 = vmul.f32 %v2623_v50, %v2407_v10  ;;  %v4797_v17 = vpop.eup %4796  ;;  %v2497_v21 = vadd.f32 1.0, %v4795_v31  ;;  %s7494_s1 = sld [smem:[#allocation13 + $0x190]] }
 0x29d   : > { %9919 = sst [smem:[#allocation72_spill]] %s7438_s3  ;;  %v7477_v26 = vmul.f32 %v2553_v51, %v2408_v38  ;;  %v7479_v52 = vmul.f32 %v2588_v34, %v2408_v38  ;;  %v7481_v43 = vmul.f32 %v2623_v50, %v2408_v38  ;;  %v2498_v45 = vadd.f32 1.0, %v4797_v17  ;;  %s7499_s26 = sld [smem:[#allocation13 + $0x11]] }
 0x29e   : > { %9920 = sst [smem:[#allocation73_spill]] %s7443_s30  ;;  %v7487_v22 = vmul.f32 %v2658_v41, %v2407_v10  ;;  %v7489_v57 = vmul.f32 %v2658_v41, %v2408_v38  ;;  %4806 = vrcp.f32 %v2497_v21  ;;  %v2706_v51 = vstv %s7427_s2  ;;  %s7506_s0 = sld [smem:[#allocation13 + $0x8c]] }
 0x29f   : > { %9921 = sst [smem:[#allocation74_spill]] %s7448_s5  ;;  %v2728_v7 = vstv %s7391_s8  ;;  %4808 = vrcp.f32 %v2498_v45  ;;  %v2731_v34 = vstv %s7403_s29  ;;  %v2736_v33 = vstv %s7416_s4  ;;  %s7514_s28 = sld [smem:[#allocation13 + $0x8d]] }
 0x2a0   : > { %9922 = sst [smem:[#allocation80_spill]] %s7450_s20  ;;  %v2741_v35 = vstv %s7436_s9  ;;  %v2763_v25 = vstv %s7394_s11  ;;  %v2766_v60 = vstv %s7406_s21  ;;  %v2771_v50 = vstv %s7420_s14  ;;  %s7516_s2 = sld [smem:[#allocation15 + $0x180]] }
 0x2a1   : > { %9923 = sst [smem:[#allocation76_spill]] %s7456_s13  ;;  %v4799_v48 = vpop.eup %4798  ;;  %s7522_s30 = sld [smem:[#allocation13 + $0x8e]] }
 0x2a2   : > { %9924 = sst [smem:[#allocation79_spill]] %s7458_s24  ;;  %v4801_v4 = vpop.eup %4800  ;;  %s7524_s9 = sld [smem:[#allocation13 + $0x8f]]  ;;  %v2455_v10 = vmul.f32 %v4799_v48, %v7331_v56 }
 0x2a3   : > { %9925 = sst [smem:[#allocation82_spill]] %s7463_s15  ;;  %s7530_s14 = sld [smem:[#allocation13 + $0x111]]  ;;  %v2456_v21 = vmul.f32 %v4801_v4, %v7333_v61 }
 0x2a4   : > { %9926 = sst [smem:[#allocation86_spill]] %s7465_s10  ;;  %s7532_s3 = sld [smem:[#allocation13 + $0x191]]  ;;  %v4803_v9 = vpop.eup %4802  ;;  %v2557_v56 = vmul.f32 %v2556_v15, %v2455_v10  ;;  %v2592_v48 = vmul.f32 %v2591_v20, %v2455_v10  ;;  %v2627_v17 = vmul.f32 %v2626_v30, %v2455_v10  ;;  %v2662_v31 = vmul.f32 %v2661_v28, %v2455_v10 }
 0x2a5   : > { %9927 = sst [smem:[#allocation83_spill]] %s7483_s22  ;;  %s7538_s20 = sld [smem:[#allocation13 + $0x10c]]  ;;  %v4805_v38 = vpop.eup %4804  ;;  %v2545_v61 = vadd.f32 1.0, %v4803_v9  ;;  %v2558_v4 = vmul.f32 %v2556_v15, %v2456_v21  ;;  %v2593_v27 = vmul.f32 %v2591_v20, %v2456_v21  ;;  %v2628_v5 = vmul.f32 %v2626_v30, %v2456_v21 }
 0x2a6   : > { %9928 = sst [smem:[#allocation85_spill]] %s7485_s6  ;;  %s7550_s24 = sld [smem:[#allocation13 + $0x18c]]  ;;  %v2546_v45 = vadd.f32 1.0, %v4805_v38  ;;  %v2559_v10 = vadd.f32 %v2557_v56, %v7469_v54  ;;  %v2594_v16 = vadd.f32 %v2592_v48, %v7471_v8  ;;  %v2629_v41 = vadd.f32 %v2627_v17, %v7473_v1 }
 0x2a7   : > { %9929 = sst [smem:[#allocation81_spill]] %s7494_s1  ;;  %s7501_s6 = sld [smem:[#allocation13 + $0x91]]  ;;  %4810 = vrcp.f32 %v2545_v61  ;;  %v2560_v15 = vadd.f32 %v2558_v4, %v7477_v26  ;;  %v2595_v20 = vadd.f32 %v2593_v27, %v7479_v52  ;;  %v2630_v30 = vadd.f32 %v2628_v5, %v7481_v43 }
 0x2a8   : > { %9930 = sst [smem:[#allocation84_spill]] %s7499_s26  ;;  %s7508_s1 = sld [smem:[#allocation13 + $0xf]]  ;;  %v4807_v9 = vpop.eup %4806  ;;  %4812 = vrcp.f32 %v2546_v45  ;;  %v2663_v54 = vmul.f32 %v2661_v28, %v2456_v21  ;;  %v2664_v8 = vadd.f32 %v2662_v31, %v7487_v22 }
 0x2a9   : > { %9932 = sst [smem:[#allocation77_spill]] %s7506_s0  ;;  %s7552_s13 = sld [smem:[#allocation13 + $0x10d]]  ;;  %v4809_v26 = vpop.eup %4808  ;;  %v2503_v52 = vmul.f32 %v4807_v9, %v7373_v58 }
 0x2aa   : > { %9934 = sst [smem:[#allocation90_spill]] %s7514_s28  ;;  %s7560_s10 = sld [smem:[#allocation13 + $0x18d]]  ;;  %v2504_v28 = vmul.f32 %v4809_v26, %v7375_v62  ;;  %v2665_v22 = vadd.f32 %v2663_v54, %v7489_v57 }
 0x2ab   : > { %9935 = sst [smem:[#allocation91_spill]] %s7516_s2  ;;  %s7562_s15 = sld [smem:[#allocation13 + $0x10e]]  ;;  %v2562_v58 = vmul.f32 %v2561_v11, %v2503_v52  ;;  %v2597_v17 = vmul.f32 %v2596_v42, %v2503_v52  ;;  %v2632_v21 = vmul.f32 %v2631_v32, %v2503_v52  ;;  %v2667_v45 = vmul.f32 %v2666_v55, %v2503_v52 }
 0x2ac   : > { %9936 = sst [smem:[#allocation92_spill]] %s7522_s30  ;;  %s7567_s5 = sld [smem:[#allocation13 + $0x18e]]  ;;  %v2563_v62 = vmul.f32 %v2561_v11, %v2504_v28  ;;  %v2598_v57 = vmul.f32 %v2596_v42, %v2504_v28  ;;  %v2633_v56 = vmul.f32 %v2631_v32, %v2504_v28  ;;  %v2668_v48 = vmul.f32 %v2666_v55, %v2504_v28 }
 0x2ad   : > { %9931 = sst [smem:[#allocation88_spill]] %s7501_s6  ;;  %s7569_s23 = sld [smem:[#allocation15 + $0x181]]  ;;  %v2564_v61 = vadd.f32 %v2562_v58, %v2559_v10  ;;  %v2599_v4 = vadd.f32 %v2597_v17, %v2594_v16  ;;  %v2634_v9 = vadd.f32 %v2632_v21, %v2629_v41  ;;  %v2669_v54 = vadd.f32 %v2667_v45, %v2664_v8 }
 0x2ae   : > { %9933 = sst [smem:[#allocation78_spill]] %s7508_s1  ;;  %s7574_s18 = sld [smem:[#allocation13 + $0x10f]]  ;;  %v2565_v11 = vadd.f32 %v2563_v62, %v2560_v15  ;;  %v2600_v42 = vadd.f32 %v2598_v57, %v2595_v20  ;;  %v2635_v32 = vadd.f32 %v2633_v56, %v2630_v30  ;;  %v2670_v55 = vadd.f32 %v2668_v48, %v2665_v22 }
 0x2af   : > { %9937 = sst [smem:[#allocation97_spill]] %s7524_s9  ;;  %s7576_s12 = sld [smem:[#allocation15 + $0x182]]  ;;  %v2973_v17 = vstv %s7483_s22  ;;  %v2976_v62 = vstv %s7499_s26  ;;  %v2981_v57 = vstv %s7540_s16  ;;  %v2999_v16 = vstv %s7501_s6 }
 0x2b0   : > { %9938 = sst [smem:[#allocation93_spill]] %s7530_s14  ;;  %s7582_s4 = sld [smem:[#allocation13 + $0x18f]] }
 0x2b1   : > { %9939 = sst [smem:[#allocation96_spill]] %s7532_s3  ;;  %s7584_s29 = sld [smem:[#allocation15 + $0x183]]  ;;  %v4811_v52 = vpop.eup %4810 }
 0x2b2   : > { %9940 = sst [smem:[#allocation101_spill]] %s7538_s20  ;;  %s7590_s25 = sld [smem:[#allocation13 + $0x92]]  ;;  %v4813_v21 = vpop.eup %4812  ;;  %v2551_v45 = vmul.f32 %v4811_v52, %v7431_v49 }
 0x2b3   : > { %9941 = sst [smem:[#allocation95_spill]] %s7540_s16  ;;  %s7598_s11 = sld [smem:[#allocation13 + $0x112]]  ;;  %v2552_v48 = vmul.f32 %v4813_v21, %v7433_v14 }
 0x2b4   : > { %9942 = sst [smem:[#allocation99_spill]] %s7550_s24  ;;  %s7592_s1 = sld [smem:[#allocation13 + $0x13]]  ;;  %v2567_v49 = vmul.f32 %v2566_v47, %v2551_v45  ;;  %v2602_v52 = vmul.f32 %v2601_v59, %v2551_v45  ;;  %v2637_v43 = vmul.f32 %v2636_v6, %v2551_v45  ;;  %v2672_v22 = vmul.f32 %v2671_v36, %v2551_v45 }
 0x2b5   : > { %9943 = sst [smem:[#allocation103_spill]] %s7552_s13  ;;  %s7600_s8 = sld [smem:[#allocation15 + $0x200]]  ;;  %v2568_v14 = vmul.f32 %v2566_v47, %v2552_v48  ;;  %v2603_v21 = vmul.f32 %v2601_v59, %v2552_v48  ;;  %v2638_v15 = vmul.f32 %v2636_v6, %v2552_v48  ;;  %v2673_v31 = vmul.f32 %v2671_v36, %v2552_v48 }
 0x2b6   : > { %9944 = sst [smem:[#allocation87_spill]] %s7560_s10  ;;  %s7610_s2 = sld [smem:[#allocation13 + $0x192]]  ;;  %v2569_v45 = vadd.f32 %v2567_v49, %v2564_v61  ;;  %v2604_v1 = vadd.f32 %v2602_v52, %v2599_v4  ;;  %v2639_v28 = vadd.f32 %v2637_v43, %v2634_v9  ;;  %v2674_v26 = vadd.f32 %v2672_v22, %v2669_v54 }
 0x2b7   : > { %9945 = sst [smem:[#allocation94_spill]] %s7562_s15  ;;  %s7612_s28 = sld [smem:[#allocation13 + $0x93]]  ;;  %v2570_v47 = vadd.f32 %v2568_v14, %v2565_v11  ;;  %v2605_v59 = vadd.f32 %v2603_v21, %v2600_v42  ;;  %v2640_v6 = vadd.f32 %v2638_v15, %v2635_v32  ;;  %v2675_v36 = vadd.f32 %v2673_v31, %v2670_v55 }
 0x2b8   : > { %9946 = sst [smem:[#allocation100_spill]] %s7567_s5  ;;  %s7622_s9 = sld [smem:[#allocation13 + $0x113]]  ;;  %v7708_v43 = vadd.f32 %v2571_v29, %v2569_v45  ;;  %v7712_v61 = vadd.f32 %v2606_v40, %v2604_v1  ;;  %v7716_v4 = vadd.f32 %v2641_v13, %v2639_v28  ;;  %v7720_v9 = vadd.f32 %v2676_v53, %v2674_v26 }
 0x2b9   : > { %9947 = sst [smem:[#allocation102_spill]] %s7569_s23  ;;  %s7624_s30 = sld [smem:[#allocation13 + $0x193]]  ;;  %v7728_v31 = vadd.f32 %v2571_v29, %v2570_v47  ;;  %v7732_v54 = vadd.f32 %v2606_v40, %v2605_v59  ;;  %v7736_v1 = vadd.f32 %v2641_v13, %v2640_v6  ;;  %v7740_v11 = vadd.f32 %v2676_v53, %v2675_v36 }
 0x2ba   : > { %9948 = sst [smem:[#allocation104_spill]] %s7574_s18  ;;  %s7626_s19 = sld [smem:[#allocation15 + $0x201]]  ;;  %v2986_v56 = vstv %s7592_s1  ;;  %v4377_v42 = vmul.f32 -1.442695, %v7708_v43  ;;  %v4379_v32 = vmul.f32 -1.442695, %v7712_v61  ;;  %v3004_v29 = vstv %s7590_s25 }
 0x2bb   : > { %9949 = sst [smem:[#allocation89_spill]] %s7576_s12  ;;  %s7630_s7 = sld [smem:[#allocation13 + $0x14]]  ;;  %v2991_v58 = vstv %s7600_s8  ;;  %v4381_v55 = vmul.f32 -1.442695, %v7716_v4  ;;  %v4378_v15 = vmul.f32 -1.442695, %v7728_v31 }
 0x2bc   : > { %9952 = sst [smem:[#allocation98_spill]] %s7582_s4  ;;  %s7632_s21 = sld [smem:[#allocation15 + $0x203]]  ;;  %v4380_v40 = vmul.f32 -1.442695, %v7732_v54  ;;  %v4382_v13 = vmul.f32 -1.442695, %v7736_v1  ;;  %4814 = vpow2.f32 %v4377_v42 }
 0x2bd   : > { %9954 = sst [smem:[#allocation106_spill]] %s7584_s29  ;;  %s7638_s0 = sld [smem:[#allocation13 + $0x94]]  ;;  %v4383_v53 = vmul.f32 -1.442695, %v7720_v9  ;;  %v4384_v28 = vmul.f32 -1.442695, %v7740_v11  ;;  %4816 = vpow2.f32 %v4378_v15 }
 0x2be   : > { %9955 = sst [smem:[#allocation107_spill]] %s7590_s25  ;;  %s7648_s23 = sld [smem:[#allocation13 + $0x15]]  ;;  %4818 = vpow2.f32 %v4379_v32 }
 0x2bf   : > { %9956 = sst [smem:[#allocation36_spill]] %s7592_s1  ;;  %s9970_s20 = sld [smem:[#allocation85_spill]]  ;;  %4820 = vpow2.f32 %v4380_v40 }
 0x2c0   : > { %9957 = sst [smem:[#allocation108_spill]] %s7598_s11  ;;  %s7654_s13 = sld [smem:[#allocation13 + $0x95]]  ;;  %4822 = vpow2.f32 %v4381_v55 }
 0x2c1   : > { %9958 = sst [smem:[#allocation105_spill]] %s7600_s8  ;;  %s7664_s29 = sld [smem:[#allocation13 + $0x16]]  ;;  %4824 = vpow2.f32 %v4382_v13 }
 0x2c2   : > { %9959 = sst [smem:[#allocation37_spill]] %s7610_s2  ;;  %s7656_s24 = sld [smem:[#allocation13 + $0x115]]  ;;  %4826 = vpow2.f32 %v4383_v53 }
 0x2c3   : > { %9960 = sst [smem:[#allocation39_spill]] %s7612_s28  ;;  %s7662_s5 = sld [smem:[#allocation13 + $0x195]]  ;;  %4828 = vpow2.f32 %v4384_v28 }
 0x2c4   : > { %9961 = sst [smem:[#allocation38_spill]] %s7622_s9  ;;  %s7670_s4 = sld [smem:[#allocation13 + $0x96]] }
 0x2c5   : > { %9962 = sst [smem:[#allocation40_spill]] %s7624_s30  ;;  %v2996_v20 = vstv %s9970_s20  ;;  %s7672_s22 = sld [smem:[#allocation13 + $0x116]] }
 0x2c6   : > { %9963 = sst [smem:[#allocation110_spill]] %s7626_s19  ;;  %s7640_s30 = sld [smem:[#allocation13 + $0x114]]  ;;  %v4815_v15 = vpop.eup %4814 }
 0x2c7   : > { %9965 = sst [smem:[#allocation46_spill]] %s7630_s7  ;;  %s7646_s7 = sld [smem:[#allocation13 + $0x194]]  ;;  %v4817_v55 = vpop.eup %4816  ;;  %v2580_v21 = vadd.f32 1.0, %v4815_v15 }
 0x2c8   : > { %9966 = sst [smem:[#allocation41_spill]] %s7632_s21  ;;  %s7682_s1 = sld [smem:[#allocation13 + $0x196]]  ;;  %v4819_v6 = vpop.eup %4818  ;;  %v2581_v42 = vadd.f32 1.0, %v4817_v55 }
 0x2c9   : > { %9967 = sst [smem:[#allocation111_spill]] %s7638_s0  ;;  %s7684_s16 = sld [smem:[#allocation13 + $0x17]]  ;;  %v4821_v30 = vpop.eup %4820  ;;  %4830 = vrcp.f32 %v2580_v21  ;;  %v2615_v8 = vadd.f32 1.0, %v4819_v6 }
 0x2ca   : > { %9969 = sst [smem:[#allocation47_spill]] %s7648_s23  ;;  %s7694_s20 = sld [smem:[#allocation13 + $0x97]]  ;;  %v4823_v40 = vpop.eup %4822  ;;  %4832 = vrcp.f32 %v2581_v42  ;;  %v2616_v55 = vadd.f32 1.0, %v4821_v30 }
 0x2cb   : > { %9973 = sst [smem:[#allocation112_spill]] %s7654_s13  ;;  %s7698_s15 = sld [smem:[#allocation13 + $0x197]]  ;;  %v4825_v21 = vpop.eup %4824  ;;  %4834 = vrcp.f32 %v2615_v8  ;;  %v2650_v6 = vadd.f32 1.0, %v4823_v40 }
 0x2cc   : > { %9976 = sst [smem:[#allocation42_spill]] %s7662_s5  ;;  %s7696_s5 = sld [smem:[#allocation13 + $0x117]]  ;;  %v4827_v30 = vpop.eup %4826  ;;  %4836 = vrcp.f32 %v2616_v55  ;;  %v2651_v42 = vadd.f32 1.0, %v4825_v21 }
 0x2cd   : > { %9968 = sst [smem:[#allocation48_spill]] %s7646_s7  ;;  %s7700_s18 = sld [smem:[#allocation15 + $0x280]]  ;;  %v4829_v15 = vpop.eup %4828  ;;  %4838 = vrcp.f32 %v2650_v6  ;;  %v2685_v28 = vadd.f32 1.0, %v4827_v30 }
 0x2ce   : > { %9977 = sst [smem:[#allocation45_spill]] %s7664_s29  ;;  %s7704_s12 = sld [smem:[#allocation15 + $0x282]]  ;;  %4840 = vrcp.f32 %v2651_v42  ;;  %v2686_v55 = vadd.f32 1.0, %v4829_v15 }
 0x2cf   : > { %9978 = sst [smem:[#allocation113_spill]] %s7670_s4  ;;  %s7702_s10 = sld [smem:[#allocation15 + $0x281]]  ;;  %4842 = vrcp.f32 %v2685_v28 }
 0x2d0   : > { %9979 = sst [smem:[#allocation115_spill]] %s7672_s22  ;;  %s7750_s26 = sld [smem:[#allocation13 + $0x98]]  ;;  %4844 = vrcp.f32 %v2686_v55 }
 0x2d1   : > { %9980 = sst [smem:[#allocation114_spill]] %s7682_s1  ;;  %s7724_s1 = sld [smem:[#allocation15 + $0x283]] }
 0x2d2   : > { %9981 = sst [smem:[#allocation116_spill]] %s7684_s16  ;;  %s7757_s7 = sld [smem:[#allocation13 + $0x19]] }
 0x2d3   : > { %9984 = sst [smem:[#allocation117_spill]] %s7694_s20  ;;  %s7755_s8 = sld [smem:[#allocation13 + $0x118]]  ;;  %v4831_v49 = vpop.eup %4830 }
 0x2d4   : > { %9986 = sst [smem:[#allocation43_spill]] %s7696_s5  ;;  %s7762_s28 = sld [smem:[#allocation13 + $0x99]] }
 0x2d5   : > { %9988 = sst [smem:[#allocation35_spill]] %s7698_s15  ;;  %s7722_s15 = sld [smem:[#allocation13 + $0x18]] }
 0x2d6   : > { %9989 = sst [smem:[#allocation109_spill]] %s7700_s18  ;;  %s7769_s19 = sld [smem:[#allocation13 + $0x1b]] }
 0x2d7   : > { %9990 = sst [smem:[#allocation49_spill]] %s7702_s10  ;;  %s7776_s11 = sld [smem:[#allocation13 + $0x9a]] }
 0x2d8   : > { %9991 = sst [smem:[#allocation54_spill]] %s7704_s12  ;;  %s7778_s14 = sld [smem:[#allocation13 + $0x9b]] }
 0x2d9   : > { %9993 = sst [smem:[#allocation56_spill]] %s7724_s1  ;;  %s7785_s6 = sld [smem:[#allocation15 + $0x301]] }
 0x2da   : > { %9994 = sst [smem:[#allocation51_spill]] %s7750_s26  ;;  %s7790_s25 = sld [smem:[#allocation13 + $0x119]] }
 0x2db   : > { %9992 = sst [smem:[#allocation50_spill]] %s7722_s15  ;;  %s7764_s15 = sld [smem:[#allocation13 + $0x1a]] }
 0x2dc   : > { %9996 = sst [smem:[#allocation55_spill]] %s7755_s8  ;;  %s7771_s8 = sld [smem:[#allocation15 + $0x300]] }
 0x2dd   : > { %9998 = sst [smem:[#allocation61_spill]] %s7762_s28  ;;  %s7792_s2 = sld [smem:[#allocation13 + $0x11a]] }
 0x2de   : > { %10001 = sst [smem:[#allocation63_spill]] %s7776_s11  ;;  %s10004_s23 = sld [smem:[#allocation48_spill]] }
 0x2df   : > { %10002 = sst [smem:[#allocation123_spill]] %s7778_s14  ;;  %s10005_s21 = sld [smem:[#allocation42_spill]] }
 0x2e0   : > { %10003 = sst [smem:[#allocation124_spill]] %s7785_s6  ;;  %s10006_s3 = sld [smem:[#allocation114_spill]] }
 0x2e1   : > { %s7797_s26 = sld [smem:[#allocation13 + $0x11b]]  ;;  %s7799_s29 = sld [smem:[#allocation15 + $0x302]] }
 0x2e2   : > { %10000 = sst [smem:[#allocation57_spill]] %s7771_s8  ;;  %s10008_s18 = sld [smem:[#allocation50_spill]] }
 0x2e3   : > { %s7804_s9 = sld [smem:[#allocation13 + $0x199]]  ;;  %s7806_s13 = sld [smem:[#allocation13 + $0x19a]] }
 0x2e4   : > { %s10009_s4 = sld [smem:[#allocation29_spill]]  ;;  %s10010_s10 = sld [smem:[#allocation51_spill]] }
 0x2e5   : > { %s7812_s0 = sld [smem:[#allocation13 + $0x19b]]  ;;  %s7824_s12 = sld [smem:[#allocation19]] }
 0x2e6   : > { %s7814_s20 = sld [smem:[#allocation15 + $0x303]]  ;;  %s7832_s16 = sld [smem:[#allocation19 + $0x1]] }
 0x2e7   : > { %s10012_s22 = sld [smem:[#allocation55_spill]]  ;;  %s7837_s1 = sld [smem:[#allocation19 + $0x2]] }
 0x2e8   : > { %s10014_s14 = sld [smem:[#allocation34_spill]]  ;;  %s7848_s11 = sld [smem:[#allocation19 + $0x80]] }
 0x2e9   : > { %s7850_s28 = sld [smem:[#allocation19 + $0x81]]  ;;  %s7856_s6 = sld [smem:[#allocation19 + $0x83]] }
 0x2ea   : > { %s7827_s5 = sshll.u32 %s10009_s4, 7  ;;  %s7841_s4 = sld [smem:[#allocation19 + $0x3]] }
 0x2eb   : > { %10011 = sst [smem:[#allocation48_spill]] %s7827_s5  ;;  %v3325_v27 = vstv %s7824_s12  ;;  %s10033_s12 = sld [smem:[#allocation66_spill]] }
 0x2ec   : > { %s7844_s8 = sld [smem:[#allocation18 + %s7827_s5]]  ;;  %v3328_v30 = vstv %s7832_s16 }
 0x2ed   : > { %s7854_s5 = sld [smem:[#allocation19 + $0x82]]  ;;  %v3333_v15 = vstv %s7837_s1  ;;  %s10031_s16 = sld [smem:[#allocation53_spill]] }
 0x2ee   : > { %v3317_v32 = vld [vmem:[%s10014_s14] sm:$0xff]  ;;  %v3318_v40 = vld [vmem:[%s10014_s14 + $0x8] sm:$0xff]  ;;  %v4436_v38 = vld [vmem:[%s10014_s14 + $0x10] sm:$0xff]  ;;  %s10041_s1 = sld [smem:[#allocation74_spill]] }
 0x2ef   : > { %10015 = sst [smem:[#allocation114_spill]] %s7856_s6  ;;  %v4437_v10 = vld [vmem:[%s10014_s14 + $0x18] sm:$0xff]  ;;  %v4438_v53 = vld [vmem:[%s10014_s14 + $0x20] sm:$0xff]  ;;  %v4439_v8 = vld [vmem:[%s10014_s14 + $0x28] sm:$0xff]  ;;  %v3326_v59 = vmul.f32 %v3325_v27, %v3317_v32  ;;  %v3327_v6 = vmul.f32 %v3325_v27, %v3318_v40  ;;  %v3329_v13 = vmul.f32 %v4436_v38, %v3328_v30  ;;  %v3360_v27 = vstv %s7848_s11  ;;  %s10029_s11 = sld [smem:[#allocation72_spill]] }
 0x2f0   : > { %v4440_v41 = vld [vmem:[%s10014_s14 + $0x30] sm:$0xff]  ;;  %v4441_v5 = vld [vmem:[%s10014_s14 + $0x38] sm:$0xff]  ;;  %v3330_v42 = vmul.f32 %v4437_v10, %v3328_v30  ;;  %v3334_v21 = vmul.f32 %v4438_v53, %v3333_v15  ;;  %v3335_v36 = vmul.f32 %v4439_v8, %v3333_v15  ;;  %v3338_v47 = vstv %s7841_s4  ;;  %v4833_v30 = vpop.eup %4832  ;;  %s10030_s4 = sld [smem:[#allocation73_spill]]  ;;  %s10034_s14 = sld [smem:[#allocation80_spill]] }
 0x2f1   : > { %v3331_v14 = vadd.f32 %v3329_v13, %v3326_v59  ;;  %v7876_v28 = vmul.f32 %v4440_v41, %v3338_v47  ;;  %v7878_v22 = vmul.f32 %v4441_v5, %v3338_v47  ;;  %v3363_v48 = vstv %s7850_s28  ;;  %v4835_v47 = vpop.eup %4834  ;;  %s10039_s28 = sld [smem:[#allocation69_spill]] }
 0x2f2   : > { %10013 = sst [smem:[#allocation42_spill]] %s7844_s8  ;;  %v3332_v52 = vadd.f32 %v3330_v42, %v3327_v6  ;;  %v7885_v53 = vmul.f32 %v4831_v49, %v7708_v43  ;;  %v7891_v5 = vmul.f32 %v3360_v27, %v3317_v32  ;;  %v7894_v59 = vmul.f32 %v4833_v30, %v7728_v31  ;;  %v4837_v49 = vpop.eup %4836  ;;  %s10062_s6 = sld [smem:[#allocation93_spill]] }
 0x2f3   : > { %v7887_v8 = vadd.f32 %v3334_v21, %v3331_v14  ;;  %v7896_v13 = vmul.f32 %v3360_v27, %v3318_v40  ;;  %v7898_v6 = vmul.f32 %v4436_v38, %v3363_v48  ;;  %v7900_v43 = vmul.f32 %v4437_v10, %v3363_v48  ;;  %s10139_s8 = sld [smem:[#allocation106_spill]] }
 0x2f4   : > { %v7889_v41 = vadd.f32 %v3335_v36, %v3332_v52  ;;  %v7903_v52 = vmul.f32 %v4835_v47, %v7712_v61  ;;  %v2694_v14 = vmul.f32 %v2693_v39, %v7885_v53  ;;  %v2729_v31 = vmul.f32 %v2728_v7, %v7885_v53  ;;  %v4839_v36 = vpop.eup %4838 }
 0x2f5   : > { %10022 = vst [vmem:[#allocation119_spill] sm:$0xff] %v7900_v43  ;;  %v2764_v38 = vmul.f32 %v2763_v25, %v7885_v53  ;;  %v7915_v10 = vmul.f32 %v4837_v49, %v7732_v54  ;;  %v2695_v61 = vmul.f32 %v2693_v39, %v7894_v59  ;;  %v2730_v48 = vmul.f32 %v2728_v7, %v7894_v59  ;;  %v4841_v40 = vpop.eup %4840 }
 0x2f6   : > { %v2765_v32 = vmul.f32 %v2763_v25, %v7894_v59  ;;  %v7927_v21 = vmul.f32 %v4839_v36, %v7716_v4  ;;  %v2697_v42 = vmul.f32 %v2696_v24, %v7903_v52  ;;  %v2732_v54 = vmul.f32 %v2731_v34, %v7903_v52  ;;  %v4843_v15 = vpop.eup %4842 }
 0x2f7   : > { %v2767_v39 = vmul.f32 %v2766_v60, %v7903_v52  ;;  %v7939_v7 = vmul.f32 %v4841_v40, %v7736_v1  ;;  %v2698_v25 = vmul.f32 %v2696_v24, %v7915_v10  ;;  %v2733_v4 = vmul.f32 %v2731_v34, %v7915_v10  ;;  %v4845_v30 = vpop.eup %4844 }
 0x2f8   : > { %v2768_v27 = vmul.f32 %v2766_v60, %v7915_v10  ;;  %v7951_v47 = vmul.f32 %v4843_v15, %v7720_v9  ;;  %v2699_v49 = vadd.f32 %v2697_v42, %v2694_v14  ;;  %v2702_v1 = vmul.f32 %v2701_v23, %v7927_v21 }
 0x2f9   : > { %v2734_v36 = vadd.f32 %v2732_v54, %v2729_v31  ;;  %v7957_v24 = vmul.f32 %v4845_v30, %v7740_v11  ;;  %v2700_v40 = vadd.f32 %v2698_v25, %v2695_v61  ;;  %v2703_v34 = vmul.f32 %v2701_v23, %v7939_v7 }
 0x2fa   : > { %v2735_v60 = vadd.f32 %v2733_v4, %v2730_v48  ;;  %v2704_v26 = vadd.f32 %v2702_v1, %v2699_v49  ;;  %v2707_v9 = vmul.f32 %v2706_v51, %v7951_v47  ;;  %v2737_v14 = vmul.f32 %v2736_v33, %v7927_v21 }
 0x2fb   : > { %v2738_v31 = vmul.f32 %v2736_v33, %v7939_v7  ;;  %v2705_v11 = vadd.f32 %v2703_v34, %v2700_v40  ;;  %v2708_v23 = vmul.f32 %v2706_v51, %v7957_v24  ;;  %v2742_v61 = vmul.f32 %v2741_v35, %v7951_v47 }
 0x2fc   : > { %v2743_v48 = vmul.f32 %v2741_v35, %v7957_v24  ;;  %v2709_v42 = vadd.f32 %v2707_v9, %v2704_v26  ;;  %v2739_v54 = vadd.f32 %v2737_v14, %v2734_v36  ;;  %v2769_v25 = vadd.f32 %v2767_v39, %v2764_v38 }
 0x2fd   : > { %v2740_v15 = vadd.f32 %v2738_v31, %v2735_v60  ;;  %v2710_v33 = vadd.f32 %v2708_v23, %v2705_v11  ;;  %v2770_v4 = vadd.f32 %v2768_v27, %v2765_v32  ;;  %v2772_v30 = vmul.f32 %v2771_v50, %v7927_v21 }
 0x2fe   : > { %v2773_v51 = vmul.f32 %v2771_v50, %v7939_v7  ;;  %v7988_v49 = vadd.f32 %v2711_v12, %v2709_v42  ;;  %v2744_v35 = vadd.f32 %v2742_v61, %v2739_v54  ;;  %v10032_v1 = vstv %s10029_s11  ;;  %s10084_s11 = sld [smem:[#allocation76_spill]] }
 0x2ff   : > { %v2745_v26 = vadd.f32 %v2743_v48, %v2740_v15  ;;  %v2777_v36 = vmul.f32 %v10032_v1, %v7951_v47  ;;  %v7995_v38 = vadd.f32 %v2711_v12, %v2710_v33  ;;  %v2774_v32 = vadd.f32 %v2772_v30, %v2769_v25 }
 0x300   : > { %v2775_v39 = vadd.f32 %v2773_v51, %v2770_v4  ;;  %v10035_v27 = vmov %v10032_v1  ;;  %v4385_v40 = vmul.f32 -1.442695, %v7988_v49  ;;  %v10036_v34 = vstv %s10030_s4  ;;  %s10061_s4 = sld [smem:[#allocation39_spill]] }
 0x301   : > { %v2778_v50 = vmul.f32 %v10035_v27, %v7957_v24  ;;  %v8003_v60 = vadd.f32 %v10036_v34, %v2744_v35  ;;  %v10037_v9 = vmov %v10036_v34  ;;  %v10038_v31 = vstv %s10031_s16  ;;  %s10064_s16 = sld [smem:[#allocation110_spill]] }
 0x302   : > { %v8007_v14 = vadd.f32 %v10037_v9, %v2745_v26  ;;  %v2799_v12 = vmul.f32 %v10038_v31, %v7885_v53  ;;  %v4386_v11 = vmul.f32 -1.442695, %v7995_v38  ;;  %v2779_v23 = vadd.f32 %v2777_v36, %v2774_v32 }
 0x303   : > { %v2780_v61 = vadd.f32 %v2778_v50, %v2775_v39  ;;  %v10040_v48 = vmov %v10038_v31  ;;  %4846 = vpow2.f32 %v4385_v40  ;;  %v4387_v54 = vmul.f32 -1.442695, %v8003_v60 }
 0x304   : > { %v2800_v42 = vmul.f32 %v10040_v48, %v7894_v59  ;;  %v4388_v15 = vmul.f32 -1.442695, %v8007_v14  ;;  %v10042_v25 = vstv %s10033_s12  ;;  %4848 = vpow2.f32 %v4386_v11  ;;  %s10065_s12 = sld [smem:[#allocation108_spill]] }
 0x305   : > { %v2802_v33 = vmul.f32 %v10042_v25, %v7903_v52  ;;  %v10044_v4 = vstv %s10034_s14  ;;  %v10046_v26 = vmov %v10042_v25  ;;  %4850 = vpow2.f32 %v4387_v54  ;;  %s10053_s14 = sld [smem:[#allocation79_spill]] }
 0x306   : > { %v8023_v30 = vadd.f32 %v10044_v4, %v2779_v23  ;;  %v10045_v51 = vmov %v10044_v4  ;;  %v2803_v1 = vmul.f32 %v10046_v26, %v7915_v10  ;;  %v10048_v32 = vstv %s10039_s28  ;;  %s10069_s28 = sld [smem:[#allocation81_spill]] }
 0x307   : > { %v8027_v35 = vadd.f32 %v10045_v51, %v2780_v61  ;;  %v2804_v36 = vadd.f32 %v2802_v33, %v2799_v12  ;;  %v2807_v39 = vmul.f32 %v10048_v32, %v7927_v21  ;;  %v10049_v27 = vmov %v10048_v32 }
 0x308   : > { %v2808_v50 = vmul.f32 %v10049_v27, %v7939_v7  ;;  %4852 = vpow2.f32 %v4388_v15  ;;  %v4389_v40 = vmul.f32 -1.442695, %v8023_v30  ;;  %v2805_v9 = vadd.f32 %v2803_v1, %v2800_v42 }
 0x309   : > { %v4390_v34 = vmul.f32 -1.442695, %v8027_v35  ;;  %v2809_v31 = vadd.f32 %v2807_v39, %v2804_v36  ;;  %v10052_v11 = vstv %s10041_s1  ;;  %v2974_v48 = vmul.f32 %v2973_v17, %v7885_v53  ;;  %s10073_s1 = sld [smem:[#allocation96_spill]] }
 0x30a   : > { %v2812_v12 = vmul.f32 %v10052_v11, %v7951_v47  ;;  %v10054_v23 = vmov %v10052_v11  ;;  %4854 = vpow2.f32 %v4389_v40  ;;  %v2810_v54 = vadd.f32 %v2808_v50, %v2805_v9 }
 0x30b   : > { %v2813_v61 = vmul.f32 %v10054_v23, %v7957_v24  ;;  %v2975_v42 = vmul.f32 %v2973_v17, %v7894_v59  ;;  %v2977_v15 = vmul.f32 %v2976_v62, %v7903_v52  ;;  %4856 = vpow2.f32 %v4390_v34 }
 0x30c   : > { %v2814_v25 = vadd.f32 %v2812_v12, %v2809_v31  ;;  %v2978_v33 = vmul.f32 %v2976_v62, %v7915_v10  ;;  %v2982_v4 = vmul.f32 %v2981_v57, %v7927_v21  ;;  %v2983_v17 = vmul.f32 %v2981_v57, %v7939_v7 }
 0x30d   : > { %v2815_v51 = vadd.f32 %v2813_v61, %v2810_v54  ;;  %v2979_v26 = vadd.f32 %v2977_v15, %v2974_v48  ;;  %v2987_v1 = vmul.f32 %v2986_v56, %v7951_v47  ;;  %v10058_v36 = vstv %s10053_s14  ;;  %v4847_v31 = vpop.eup %4846  ;;  %s10067_s14 = sld [smem:[#allocation38_spill]] }
 0x30e   : > { %v8069_v32 = vadd.f32 %v10058_v36, %v2814_v25  ;;  %v2980_v39 = vadd.f32 %v2978_v33, %v2975_v42  ;;  %v2988_v62 = vmul.f32 %v2986_v56, %v7957_v24  ;;  %v2997_v27 = vmul.f32 %v2996_v20, %v7885_v53  ;;  %v4849_v61 = vpop.eup %4848 }
 0x30f   : > { %v10059_v50 = vmov %v10058_v36  ;;  %v2984_v34 = vadd.f32 %v2982_v4, %v2979_v26  ;;  %v2998_v57 = vmul.f32 %v2996_v20, %v7894_v59  ;;  %v3000_v9 = vmul.f32 %v2999_v16, %v7903_v52  ;;  %v4851_v15 = vpop.eup %4850 }
 0x310   : > { %v8079_v40 = vadd.f32 %v10059_v50, %v2815_v51  ;;  %v4391_v11 = vmul.f32 -1.442695, %v8069_v32  ;;  %v2985_v12 = vadd.f32 %v2983_v17, %v2980_v39  ;;  %v3001_v56 = vmul.f32 %v2999_v16, %v7915_v10 }
 0x311   : > { %v3005_v23 = vmul.f32 %v3004_v29, %v7927_v21  ;;  %v2720_v48 = vadd.f32 1.0, %v4847_v31  ;;  %v2989_v54 = vadd.f32 %v2987_v1, %v2984_v34  ;;  %v3002_v42 = vadd.f32 %v3000_v9, %v2997_v27 }
 0x312   : > { %v4392_v20 = vmul.f32 -1.442695, %v8079_v40  ;;  %v2721_v25 = vadd.f32 1.0, %v4849_v61  ;;  %4858 = vpow2.f32 %v4391_v11  ;;  %v2990_v33 = vadd.f32 %v2988_v62, %v2985_v12  ;;  %v4853_v51 = vpop.eup %4852 }
 0x313   : > { %v3003_v4 = vadd.f32 %v3001_v56, %v2998_v57  ;;  %4860 = vrcp.f32 %v2720_v48  ;;  %v2755_v16 = vadd.f32 1.0, %v4851_v15  ;;  %v2992_v26 = vadd.f32 %v2991_v58, %v2989_v54 }
 0x314   : > { %v3006_v17 = vmul.f32 %v3004_v29, %v7939_v7  ;;  %4862 = vrcp.f32 %v2721_v25  ;;  %v2756_v36 = vadd.f32 1.0, %v4853_v51  ;;  %v2993_v1 = vadd.f32 %v2991_v58, %v2990_v33  ;;  %v4855_v27 = vpop.eup %4854 }
 0x315   : > { %v3007_v39 = vadd.f32 %v3005_v23, %v3002_v42  ;;  %4864 = vrcp.f32 %v2755_v16  ;;  %v8103_v62 = vmul.f32 %v2992_v26, %v6063_v63  ;;  %v10063_v34 = vstv %s10061_s4  ;;  %v4857_v29 = vpop.eup %4856  ;;  %s10086_s4 = sld [smem:[#allocation77_spill]] }
 0x316   : > { %v3008_v50 = vadd.f32 %v3006_v17, %v3003_v4  ;;  %v3010_v57 = vmul.f32 %v10063_v34, %v7951_v47  ;;  %4866 = vrcp.f32 %v2756_v36  ;;  %v2790_v9 = vadd.f32 1.0, %v4855_v27 }
 0x317   : > { %v8109_v58 = vmul.f32 %v2993_v1, %v6063_v63  ;;  %v10066_v31 = vmov %v10063_v34  ;;  %v2791_v12 = vadd.f32 1.0, %v4857_v29  ;;  %4868 = vpow2.f32 %v4392_v20 }
 0x318   : > { %v3011_v11 = vmul.f32 %v10066_v31, %v7957_v24  ;;  %v3012_v56 = vadd.f32 %v3010_v57, %v3007_v39  ;;  %v10068_v23 = vstv %s7492_s27  ;;  %4870 = vrcp.f32 %v2790_v9  ;;  %s10078_s27 = sld [smem:[#allocation37_spill]] }
 0x319   : > { %v3020_v61 = vmul.f32 %v10068_v23, %v7885_v53  ;;  %v10070_v54 = vmov %v10068_v23  ;;  %v10071_v15 = vstv %s10062_s6  ;;  %4872 = vrcp.f32 %v2791_v12  ;;  %s10088_s6 = sld [smem:[#allocation101_spill]] }
 0x31a   : > { %v3013_v48 = vadd.f32 %v3011_v11, %v3008_v50  ;;  %v3021_v42 = vmul.f32 %v10070_v54, %v7894_v59  ;;  %v3023_v25 = vmul.f32 %v10071_v15, %v7903_v52  ;;  %v10072_v33 = vstv %s10064_s16  ;;  %s10090_s16 = sld [smem:[#allocation82_spill]] }
 0x31b   : > { %v3015_v4 = vadd.f32 %v10072_v33, %v3012_v56  ;;  %v10074_v20 = vmov %v10071_v15  ;;  %v10075_v16 = vstv %s10065_s12  ;;  %v10076_v17 = vmov %v10072_v33  ;;  %s10091_s12 = sld [smem:[#allocation90_spill]] }
 0x31c   : > { %v3024_v51 = vmul.f32 %v10074_v20, %v7915_v10  ;;  %v3028_v26 = vmul.f32 %v10075_v16, %v7927_v21  ;;  %v3016_v36 = vadd.f32 %v10076_v17, %v3013_v48  ;;  %v3025_v1 = vadd.f32 %v3023_v25, %v3020_v61  ;;  %v4859_v56 = vpop.eup %4858 }
 0x31d   : > { %v10077_v39 = vmov %v10075_v16  ;;  %v10079_v50 = vstv %s10067_s14  ;;  %v8140_v57 = vmul.f32 %v3015_v4, %v6063_v63  ;;  %v10081_v11 = vstv %s10069_s28  ;;  %v4861_v33 = vpop.eup %4860  ;;  %s10092_s14 = sld [smem:[#allocation103_spill]]  ;;  %s10099_s28 = sld [smem:[#allocation86_spill]] }
 0x31e   : > { %v3029_v27 = vmul.f32 %v10077_v39, %v7939_v7  ;;  %v3033_v34 = vmul.f32 %v10079_v50, %v7951_v47  ;;  %v3026_v29 = vadd.f32 %v3024_v51, %v3021_v42  ;;  %v10080_v9 = vmov %v10079_v50 }
 0x31f   : > { %v3034_v31 = vmul.f32 %v10080_v9, %v7957_v24  ;;  %v3043_v12 = vmul.f32 %v10081_v11, %v7885_v53  ;;  %v8149_v23 = vmul.f32 %v3016_v36, %v6063_v63  ;;  %v3030_v61 = vadd.f32 %v3028_v26, %v3025_v1  ;;  %v4863_v26 = vpop.eup %4862 }
 0x320   : > { %v10082_v48 = vmov %v10081_v11  ;;  %v10083_v15 = vstv %s10073_s1  ;;  %v2825_v42 = vadd.f32 1.0, %v4859_v56  ;;  %v3031_v4 = vadd.f32 %v3029_v27, %v3026_v29  ;;  %v4865_v39 = vpop.eup %4864  ;;  %s10101_s1 = sld [smem:[#allocation92_spill]] }
 0x321   : > { %v3044_v54 = vmul.f32 %v10082_v48, %v7894_v59  ;;  %v3046_v25 = vmul.f32 %v10083_v15, %v7903_v52  ;;  %v10085_v20 = vmov %v10083_v15  ;;  %v10087_v53 = vstv %s10078_s27  ;;  %v4867_v27 = vpop.eup %4866  ;;  %s10107_s27 = sld [smem:[#allocation94_spill]] }
 0x322   : > { %v3047_v51 = vmul.f32 %v10085_v20, %v7915_v10  ;;  %v8163_v16 = vmul.f32 %v10087_v53, %v7927_v21  ;;  %v8166_v17 = vmul.f32 %v4861_v33, %v7988_v49  ;;  %v3035_v59 = vadd.f32 %v3033_v34, %v3030_v61 }
 0x323   : > { %v3048_v52 = vadd.f32 %v3046_v25, %v3043_v12  ;;  %v10089_v36 = vmov %v10087_v53  ;;  %v8174_v10 = vmul.f32 %v4863_v26, %v7995_v38  ;;  %4874 = vrcp.f32 %v2825_v42 }
 0x324   : > { %v8171_v1 = vmul.f32 %v10089_v36, %v7939_v7  ;;  %v3036_v21 = vadd.f32 %v3034_v31, %v3031_v4  ;;  %v8176_v49 = vadd.f32 %v3047_v51, %v3044_v54  ;;  %v8179_v50 = vmul.f32 %v4865_v39, %v8003_v60  ;;  %v4869_v31 = vpop.eup %4868 }
 0x325   : > { %v10093_v34 = vstv %s10084_s11  ;;  %v10094_v29 = vstv %s10086_s4  ;;  %v10095_v9 = vstv %s10088_s6  ;;  %v8191_v12 = vmul.f32 %v4867_v27, %v8007_v14  ;;  %v4871_v25 = vpop.eup %4870  ;;  %s10108_s11 = sld [smem:[#allocation99_spill]]  ;;  %s10112_s4 = sld [smem:[#allocation87_spill]] }
 0x326   : > { %v2834_v7 = vmul.f32 %v10093_v34, %v8166_v17  ;;  %v2869_v38 = vmul.f32 %v10094_v29, %v8166_v17  ;;  %v2904_v11 = vmul.f32 %v10095_v9, %v8166_v17  ;;  %v10096_v56 = vmov %v10093_v34  ;;  %v4873_v26 = vpop.eup %4872  ;;  %s10114_s6 = sld [smem:[#allocation100_spill]] }
 0x327   : > { %v2835_v60 = vmul.f32 %v10096_v56, %v8174_v10  ;;  %v10097_v61 = vmov %v10094_v29  ;;  %v10098_v54 = vmov %v10095_v9  ;;  %v2826_v33 = vadd.f32 1.0, %v4869_v31 }
 0x328   : > { %v2870_v48 = vmul.f32 %v10097_v61, %v8174_v10  ;;  %v2905_v15 = vmul.f32 %v10098_v54, %v8174_v10  ;;  %v10100_v42 = vstv %s10090_s16  ;;  %v10102_v20 = vstv %s10091_s12  ;;  %s10115_s16 = sld [smem:[#allocation44_spill]]  ;;  %s10119_s12 = sld [smem:[#allocation78_spill]] }
 0x329   : > { %v2837_v4 = vmul.f32 %v10100_v42, %v8179_v50  ;;  %v2872_v14 = vmul.f32 %v10102_v20, %v8179_v50  ;;  %v10103_v51 = vstv %s10092_s14  ;;  %v8212_v36 = vmul.f32 %v4871_v25, %v8023_v30  ;;  %s10121_s14 = sld [smem:[#allocation97_spill]] }
 0x32a   : > { %v2907_v53 = vmul.f32 %v10103_v51, %v8179_v50  ;;  %v10104_v39 = vmov %v10100_v42  ;;  %v10105_v34 = vmov %v10102_v20  ;;  %v10106_v9 = vmov %v10103_v51 }
 0x32b   : > { %v2838_v27 = vmul.f32 %v10104_v39, %v8191_v12  ;;  %v2873_v29 = vmul.f32 %v10105_v34, %v8191_v12  ;;  %v2908_v31 = vmul.f32 %v10106_v9, %v8191_v12  ;;  %v8224_v56 = vmul.f32 %v4873_v26, %v8027_v35 }
 0x32c   : > { %4876 = vrcp.f32 %v2826_v33  ;;  %v2839_v61 = vadd.f32 %v2837_v4, %v2834_v7  ;;  %v2874_v54 = vadd.f32 %v2872_v14, %v2869_v38  ;;  %v10109_v25 = vstv %s10099_s28  ;;  %s10122_s28 = sld [smem:[#allocation104_spill]] }
 0x32d   : > { %v2840_v30 = vadd.f32 %v2838_v27, %v2835_v60  ;;  %v2842_v42 = vmul.f32 %v10109_v25, %v8212_v36  ;;  %v2875_v20 = vadd.f32 %v2873_v29, %v2870_v48  ;;  %v10110_v51 = vstv %s10101_s1  ;;  %s10123_s1 = sld [smem:[#allocation98_spill]] }
 0x32e   : > { %v2877_v39 = vmul.f32 %v10110_v51, %v8212_v36  ;;  %v10111_v34 = vmov %v10109_v25  ;;  %v10113_v35 = vmov %v10110_v51  ;;  %v2909_v7 = vadd.f32 %v2907_v53, %v2904_v11  ;;  %v4875_v53 = vpop.eup %4874 }
 0x32f   : > { %v2843_v9 = vmul.f32 %v10111_v34, %v8224_v56  ;;  %v2878_v33 = vmul.f32 %v10113_v35, %v8224_v56  ;;  %v2910_v38 = vadd.f32 %v2908_v31, %v2905_v15  ;;  %v2844_v60 = vadd.f32 %v2842_v42, %v2839_v61 }
 0x330   : > { %v2879_v4 = vadd.f32 %v2877_v39, %v2874_v54  ;;  %v10116_v48 = vstv %s10107_s27  ;;  %v10118_v51 = vstv %s10108_s11  ;;  %v10124_v54 = vstv %s10112_s4  ;;  %s10131_s27 = sld [smem:[#allocation40_spill]]  ;;  %s10134_s11 = sld [smem:[#allocation91_spill]] }
 0x331   : > { %v2912_v14 = vmul.f32 %v10116_v48, %v8212_v36  ;;  %v10117_v26 = vmov %v10116_v48  ;;  %v2845_v29 = vadd.f32 %v2843_v9, %v2840_v30  ;;  %v2880_v25 = vadd.f32 %v2878_v33, %v2875_v20  ;;  %s10136_s4 = sld [smem:[#allocation102_spill]] }
 0x332   : > { %v2913_v27 = vmul.f32 %v10117_v26, %v8224_v56  ;;  %v2939_v34 = vmul.f32 %v10118_v51, %v8166_v17  ;;  %v10120_v11 = vmov %v10118_v51  ;;  %v2942_v42 = vmul.f32 %v10124_v54, %v8179_v50 }
 0x333   : > { %v2940_v15 = vmul.f32 %v10120_v11, %v8174_v10  ;;  %v2914_v31 = vadd.f32 %v2912_v14, %v2909_v7  ;;  %v10125_v39 = vmov %v10124_v54  ;;  %v8257_v20 = vmul.f32 %v4875_v53, %v8069_v32 }
 0x334   : > { %v2915_v61 = vadd.f32 %v2913_v27, %v2910_v38  ;;  %v2943_v30 = vmul.f32 %v10125_v39, %v8191_v12  ;;  %v10126_v9 = vstv %s10114_s6  ;;  %v10128_v26 = vstv %s10115_s16  ;;  %s10137_s6 = sld [smem:[#allocation89_spill]]  ;;  %s10138_s16 = sld [smem:[#allocation46_spill]] }
 0x335   : > { %v2947_v35 = vmul.f32 %v10126_v9, %v8212_v36  ;;  %v10127_v33 = vmov %v10126_v9  ;;  %v3038_v51 = vadd.f32 %v10128_v26, %v3035_v59  ;;  %v2944_v11 = vadd.f32 %v2942_v42, %v2939_v34 }
 0x336   : > { %v2948_v48 = vmul.f32 %v10127_v33, %v8224_v56  ;;  %v2945_v7 = vadd.f32 %v2943_v30, %v2940_v15  ;;  %v10129_v38 = vmov %v10128_v26  ;;  %v3053_v27 = vadd.f32 %v8163_v16, %v3048_v52  ;;  %v4877_v42 = vpop.eup %4876 }
 0x337   : > { %v3039_v14 = vadd.f32 %v10129_v38, %v3036_v21  ;;  %v10130_v54 = vstv %s10119_s12  ;;  %v10132_v32 = vstv %s10121_s14  ;;  %v10133_v9 = vstv %s10122_s28 }
 0x338   : > { %v2847_v39 = vmul.f32 %v10130_v54, %v8257_v20  ;;  %v2882_v53 = vmul.f32 %v10132_v32, %v8257_v20  ;;  %v2917_v33 = vmul.f32 %v10133_v9, %v8257_v20  ;;  %v10135_v59 = vstv %s10123_s1 }
 0x339   : > { %v2952_v34 = vmul.f32 %v10135_v59, %v8257_v20  ;;  %v2949_v21 = vadd.f32 %v2947_v35, %v2944_v11  ;;  %v2950_v16 = vadd.f32 %v2948_v48, %v2945_v7  ;;  %v8283_v52 = vmul.f32 %v3038_v51, %v6063_v63 }
 0x33a   : > { %v8286_v15 = vmul.f32 %v3039_v14, %v6063_v63  ;;  %v2849_v30 = vadd.f32 %v2847_v39, %v2844_v60  ;;  %v2884_v26 = vadd.f32 %v2882_v53, %v2879_v4  ;;  %v2919_v38 = vadd.f32 %v2917_v33, %v2914_v31 }
 0x33b   : > { %v3054_v54 = vadd.f32 %v8171_v1, %v8176_v49  ;;  %v8291_v35 = vmul.f32 %v4877_v42, %v8079_v40  ;;  %v2954_v48 = vadd.f32 %v2952_v34, %v2949_v21  ;;  %v10140_v51 = vstv %s10131_s27  ;;  %s10161_s27 = sld [smem:[#allocation111_spill]] }
 0x33c   : > { %v3056_v11 = vmul.f32 %v10140_v51, %v7951_v47  ;;  %v10141_v7 = vmov %v10140_v51  ;;  %v10142_v32 = vstv %s10134_s11  ;;  %v10143_v60 = vstv %s10136_s4 }
 0x33d   : > { %v3057_v14 = vmul.f32 %v10141_v7, %v7957_v24  ;;  %v8301_v9 = vadd.f32 %v10142_v32, %v2849_v30  ;;  %v8305_v4 = vadd.f32 %v10143_v60, %v2884_v26  ;;  %v10144_v31 = vstv %s10137_s6 }
 0x33e   : > { %v8309_v39 = vadd.f32 %v10144_v31, %v2919_v38  ;;  %v10145_v1 = vstv %s10138_s16  ;;  %v10146_v49 = vstv %s10119_s12  ;;  %v10147_v47 = vstv %s10121_s14  ;;  %s10151_s12 = sld [smem:[#allocation41_spill]]  ;;  %s10154_s14 = sld [smem:[#allocation47_spill]] }
 0x33f   : > { %v3066_v40 = vmul.f32 %v10145_v1, %v8166_v17  ;;  %v2848_v53 = vmul.f32 %v10146_v49, %v8291_v35  ;;  %v2883_v33 = vmul.f32 %v10147_v47, %v8291_v35  ;;  %v10148_v24 = vstv %s10122_s28  ;;  %s10156_s28 = sld [smem:[#allocation45_spill]] }
 0x340   : > { %v2918_v59 = vmul.f32 %v10148_v24, %v8291_v35  ;;  %v10149_v34 = vstv %s10123_s1  ;;  %v4393_v42 = vmul.f32 -1.442695, %v8301_v9  ;;  %v4395_v30 = vmul.f32 -1.442695, %v8305_v4  ;;  %s10160_s1 = sld [smem:[#allocation116_spill]] }
 0x341   : > { %v2953_v21 = vmul.f32 %v10149_v34, %v8291_v35  ;;  %v4397_v26 = vmul.f32 -1.442695, %v8309_v39  ;;  %v10150_v38 = vstv %s10139_s8  ;;  %v2850_v7 = vadd.f32 %v2848_v53, %v2845_v29  ;;  %s10163_s8 = sld [smem:[#allocation112_spill]] }
 0x342   : > { %v8331_v51 = vadd.f32 %v10150_v38, %v2954_v48  ;;  %v2885_v32 = vadd.f32 %v2883_v33, %v2880_v25  ;;  %v2920_v60 = vadd.f32 %v2918_v59, %v2915_v61  ;;  %4878 = vpow2.f32 %v4393_v42 }
 0x343   : > { %v2955_v31 = vadd.f32 %v2953_v21, %v2950_v16  ;;  %v3058_v49 = vadd.f32 %v3056_v11, %v3053_v27  ;;  %v3059_v47 = vadd.f32 %v3057_v14, %v3054_v54  ;;  %v10152_v24 = vstv %s10134_s11  ;;  %s10167_s11 = sld [smem:[#allocation113_spill]] }
 0x344   : > { %v4399_v1 = vmul.f32 -1.442695, %v8331_v51  ;;  %v8336_v34 = vadd.f32 %v10152_v24, %v2850_v7  ;;  %v10153_v45 = vstv %s10136_s4  ;;  %4880 = vpow2.f32 %v4395_v30  ;;  %s10171_s4 = sld [smem:[#allocation117_spill]] }
 0x345   : > { %v8340_v55 = vadd.f32 %v10153_v45, %v2885_v32  ;;  %v10155_v48 = vstv %s10137_s6  ;;  %4882 = vpow2.f32 %v4397_v26  ;;  %v10157_v25 = vmov %v10150_v38  ;;  %s10179_s6 = sld [smem:[#allocation109_spill]] }
 0x346   : > { %v8344_v29 = vadd.f32 %v10155_v48, %v2920_v60  ;;  %v8348_v61 = vadd.f32 %v10157_v25, %v2955_v31  ;;  %v10158_v27 = vstv %s10151_s12  ;;  %v4394_v45 = vmul.f32 -1.442695, %v8336_v34  ;;  %s10186_s12 = sld [smem:[#allocation115_spill]] }
 0x347   : > { %v3061_v16 = vadd.f32 %v10158_v27, %v3058_v49  ;;  %v10159_v54 = vmov %v10158_v27  ;;  %v4396_v14 = vmul.f32 -1.442695, %v8340_v55  ;;  %4884 = vpow2.f32 %v4399_v1 }
 0x348   : > { %v3062_v11 = vadd.f32 %v10159_v54, %v3059_v47  ;;  %v4398_v53 = vmul.f32 -1.442695, %v8344_v29  ;;  %v4400_v33 = vmul.f32 -1.442695, %v8348_v61  ;;  %v10162_v42 = vstv %s10138_s16  ;;  %s10183_s16 = sld [smem:[#allocation49_spill]] }
 0x349   : > { %v8359_v59 = vmul.f32 %v3061_v16, %v6063_v63  ;;  %v3067_v30 = vmul.f32 %v10162_v42, %v8174_v10  ;;  %4886 = vpow2.f32 %v4394_v45  ;;  %v10164_v26 = vstv %s10154_s14  ;;  %s10197_s14 = sld [smem:[#allocation54_spill]] }
 0x34a   : > { %v8362_v21 = vmul.f32 %v3062_v11, %v6063_v63  ;;  %v3069_v38 = vmul.f32 %v10164_v26, %v8179_v50  ;;  %v10165_v7 = vmov %v10164_v26  ;;  %v10166_v60 = vstv %s10156_s28  ;;  %s10220_s28 = sld [smem:[#allocation123_spill]] }
 0x34b   : > { %v3070_v32 = vmul.f32 %v10165_v7, %v8191_v12  ;;  %v3074_v31 = vmul.f32 %v10166_v60, %v8212_v36  ;;  %4888 = vpow2.f32 %v4396_v14  ;;  %v10168_v1 = vmov %v10166_v60 }
 0x34c   : > { %v3075_v49 = vmul.f32 %v10168_v1, %v8224_v56  ;;  %v10169_v47 = vstv %s10160_s1  ;;  %4890 = vpow2.f32 %v4398_v53  ;;  %v3071_v27 = vadd.f32 %v3069_v38, %v3066_v40  ;;  %s10222_s1 = sld [smem:[#allocation57_spill]] }
 0x34d   : > { %v3079_v24 = vmul.f32 %v10169_v47, %v8257_v20  ;;  %v10170_v48 = vmov %v10169_v47  ;;  %v3072_v16 = vadd.f32 %v3070_v32, %v3067_v30  ;;  %v10172_v54 = vstv %s10161_s27  ;;  %s8718_s27 = sld [smem:[#allocation19 + $0x182]] }
 0x34e   : > { %v3080_v25 = vmul.f32 %v10170_v48, %v8291_v35  ;;  %v3089_v11 = vmul.f32 %v10172_v54, %v8166_v17  ;;  %4892 = vpow2.f32 %v4400_v33  ;;  %v10173_v45 = vmov %v10172_v54  ;;  %v4879_v33 = vpop.eup %4878 }
 0x34f   : > { %v3090_v14 = vmul.f32 %v10173_v45, %v8174_v10  ;;  %v10174_v42 = vstv %s10163_s8  ;;  %v3076_v1 = vadd.f32 %v3074_v31, %v3071_v27  ;;  %v3077_v47 = vadd.f32 %v3075_v49, %v3072_v16  ;;  %v4881_v31 = vpop.eup %4880  ;;  %s8722_s8 = sld [smem:[#allocation19 + $0x183]] }
 0x350   : > { %v3092_v26 = vmul.f32 %v10174_v42, %v8179_v50  ;;  %v10175_v7 = vmov %v10174_v42  ;;  %v10176_v53 = vstv %s10167_s11  ;;  %v10178_v54 = vstv %s10171_s4  ;;  %v4883_v46 = vpop.eup %4882  ;;  %s8734_s4 = sld [smem:[#allocation19 + $0x4]] }
 0x351   : > { %v3093_v60 = vmul.f32 %v10175_v7, %v8191_v12  ;;  %v3097_v40 = vmul.f32 %v10176_v53, %v8212_v36  ;;  %v10177_v30 = vmov %v10176_v53  ;;  %v3102_v45 = vmul.f32 %v10178_v54, %v8257_v20 }
 0x352   : > { %v3098_v38 = vmul.f32 %v10177_v30, %v8224_v56  ;;  %v3094_v32 = vadd.f32 %v3092_v26, %v3089_v11  ;;  %v10180_v42 = vmov %v10178_v54  ;;  %v2860_v49 = vadd.f32 1.0, %v4879_v33 }
 0x353   : > { %v3095_v48 = vadd.f32 %v3093_v60, %v3090_v14  ;;  %v3103_v7 = vmul.f32 %v10180_v42, %v8291_v35  ;;  %v3081_v27 = vadd.f32 %v3079_v24, %v3076_v1  ;;  %v3082_v16 = vadd.f32 %v3080_v25, %v3077_v47  ;;  %v4885_v60 = vpop.eup %4884 }
 0x354   : > { %v10181_v53 = vstv %s7640_s30  ;;  %v2895_v30 = vadd.f32 1.0, %v4881_v31  ;;  %v3099_v43 = vadd.f32 %v3097_v40, %v3094_v32  ;;  %4894 = vrcp.f32 %v2860_v49  ;;  %v4887_v32 = vpop.eup %4886  ;;  %s10190_s30 = sld [smem:[#allocation43_spill]] }
 0x355   : > { %v3112_v18 = vmul.f32 %v10181_v53, %v8166_v17  ;;  %v3100_v11 = vadd.f32 %v3098_v38, %v3095_v48  ;;  %v10182_v14 = vmov %v10181_v53  ;;  %v2930_v54 = vadd.f32 1.0, %v4883_v46  ;;  %v4889_v49 = vpop.eup %4888 }
 0x356   : > { %v3113_v26 = vmul.f32 %v10182_v14, %v8174_v10  ;;  %v10184_v42 = vstv %s10179_s6  ;;  %4896 = vrcp.f32 %v2895_v30  ;;  %v2965_v1 = vadd.f32 1.0, %v4885_v60  ;;  %s8736_s6 = sld [smem:[#allocation19 + $0x84]] }
 0x357   : > { %v3084_v33 = vadd.f32 %v10184_v42, %v3081_v27  ;;  %v10185_v24 = vmov %v10184_v42  ;;  %v3104_v47 = vadd.f32 %v3102_v45, %v3099_v43  ;;  %v3105_v40 = vadd.f32 %v3103_v7, %v3100_v11  ;;  %v4891_v43 = vpop.eup %4890 }
 0x358   : > { %v3085_v25 = vadd.f32 %v10185_v24, %v3082_v16  ;;  %4898 = vrcp.f32 %v2930_v54  ;;  %v10187_v31 = vstv %s7656_s24  ;;  %v2861_v53 = vadd.f32 1.0, %v4887_v32  ;;  %s10194_s24 = sld [smem:[#allocation35_spill]] }
 0x359   : > { %v3086_v38 = vmul.f32 %v3084_v33, %v6063_v63  ;;  %v3115_v46 = vmul.f32 %v10187_v31, %v8179_v50  ;;  %4900 = vrcp.f32 %v2965_v1  ;;  %v10188_v27 = vstv %s10183_s16  ;;  %v4893_v33 = vpop.eup %4892  ;;  %s8742_s16 = sld [smem:[#allocation19 + $0x104]] }
 0x35a   : > { %v3087_v48 = vmul.f32 %v3085_v25, %v6063_v63  ;;  %v3107_v16 = vadd.f32 %v10188_v27, %v3104_v47  ;;  %v10189_v30 = vmov %v10188_v27  ;;  %v2896_v45 = vadd.f32 1.0, %v4889_v49 }
 0x35b   : > { %v3108_v14 = vadd.f32 %v10189_v30, %v3105_v40  ;;  %v10191_v7 = vmov %v10187_v31  ;;  %v3117_v60 = vadd.f32 %v3115_v46, %v3112_v18  ;;  %v10192_v54 = vstv %s10186_s12  ;;  %s8747_s12 = sld [smem:[#allocation19 + $0x184]] }
 0x35c   : > { %v3116_v11 = vmul.f32 %v10191_v7, %v8191_v12  ;;  %v3120_v42 = vmul.f32 %v10192_v54, %v8212_v36  ;;  %4902 = vrcp.f32 %v2861_v53  ;;  %v2931_v24 = vadd.f32 1.0, %v4891_v43 }
 0x35d   : > { %v8435_v25 = vmul.f32 %v3107_v16, %v6063_v63  ;;  %v8438_v1 = vmul.f32 %v3108_v14, %v6063_v63  ;;  %4904 = vrcp.f32 %v2896_v45  ;;  %v2966_v47 = vadd.f32 1.0, %v4893_v33 }
 0x35e   : > { %v3118_v18 = vadd.f32 %v3116_v11, %v3113_v26  ;;  %v10193_v40 = vmov %v10192_v54  ;;  %4906 = vrcp.f32 %v2931_v24  ;;  %v3122_v31 = vadd.f32 %v3120_v42, %v3117_v60  ;;  %v4895_v24 = vpop.eup %4894 }
 0x35f   : > { %v3121_v32 = vmul.f32 %v10193_v40, %v8224_v56  ;;  %v10195_v46 = vstv %s10190_s30  ;;  %4908 = vrcp.f32 %v2966_v47  ;;  %v10198_v30 = vstv %s10004_s23  ;;  %s10209_s23 = sld [smem:[#allocation56_spill]]  ;;  %s8749_s30 = sld [smem:[#allocation19 + $0x5]] }
 0x360   : > { %v3125_v49 = vmul.f32 %v10195_v46, %v8257_v20  ;;  %v10196_v53 = vmov %v10195_v46  ;;  %v3135_v26 = vmul.f32 %v10198_v30, %v8166_v17  ;;  %v10199_v14 = vmov %v10198_v30  ;;  %v4897_v46 = vpop.eup %4896 }
 0x361   : > { %v3126_v27 = vmul.f32 %v10196_v53, %v8291_v35  ;;  %v3123_v16 = vadd.f32 %v3121_v32, %v3118_v18  ;;  %v3136_v43 = vmul.f32 %v10199_v14, %v8174_v10  ;;  %v10200_v7 = vstv %s10005_s21  ;;  %s10212_s21 = sld [smem:[#allocation63_spill]] }
 0x362   : > { %v3127_v45 = vadd.f32 %v3125_v49, %v3122_v31  ;;  %v3138_v11 = vmul.f32 %v10200_v7, %v8179_v50  ;;  %v10201_v60 = vmov %v10200_v7  ;;  %v10202_v42 = vstv %s10006_s3  ;;  %s10208_s3 = sld [smem:[#allocation61_spill]] }
 0x363   : > { %v3139_v54 = vmul.f32 %v10201_v60, %v8191_v12  ;;  %v3143_v33 = vmul.f32 %v10202_v42, %v8212_v36  ;;  %v3128_v47 = vadd.f32 %v3126_v27, %v3123_v16  ;;  %v10203_v18 = vmov %v10202_v42  ;;  %v4899_v27 = vpop.eup %4898 }
 0x364   : > { %v3144_v40 = vmul.f32 %v10203_v18, %v8224_v56  ;;  %v10204_v17 = vstv %s10194_s24  ;;  %v8474_v50 = vmul.f32 %v4895_v24, %v8301_v9  ;;  %v10206_v49 = vstv %s10197_s14  ;;  %v4901_v30 = vpop.eup %4900  ;;  %s8754_s24 = sld [smem:[#allocation19 + $0x85]]  ;;  %s8756_s14 = sld [smem:[#allocation19 + $0x6]] }
 0x365   : > { %v3148_v32 = vmul.f32 %v10204_v17, %v8257_v20  ;;  %v10205_v10 = vmov %v10204_v17  ;;  %v3130_v12 = vadd.f32 %v10206_v49, %v3127_v45  ;;  %v3140_v36 = vadd.f32 %v3138_v11, %v3135_v26 }
 0x366   : > { %v3149_v31 = vmul.f32 %v10205_v10, %v8291_v35  ;;  %v3141_v53 = vadd.f32 %v3139_v54, %v3136_v43  ;;  %v8479_v16 = vmul.f32 %v4897_v46, %v8305_v4  ;;  %v10207_v56 = vmov %v10206_v49  ;;  %v4903_v7 = vpop.eup %4902 }
 0x367   : > { %v3131_v20 = vadd.f32 %v10207_v56, %v3128_v47  ;;  %v8484_v35 = vadd.f32 %v3086_v38, %v8103_v62  ;;  %v8487_v9 = vadd.f32 %v3087_v48, %v8109_v58  ;;  %v8490_v14 = vmul.f32 %v4899_v27, %v8309_v39  ;;  %v4905_v24 = vpop.eup %4904 }
 0x368   : > { %v8493_v26 = vmul.f32 %v3130_v12, %v6063_v63  ;;  %v3145_v4 = vadd.f32 %v3143_v33, %v3140_v36  ;;  %v3146_v43 = vadd.f32 %v3144_v40, %v3141_v53  ;;  %v8496_v45 = vmul.f32 %v4901_v30, %v8331_v51 }
 0x369   : > { %v8499_v62 = vmul.f32 %v3131_v20, %v6063_v63  ;;  %v10210_v58 = vstv %s10008_s18  ;;  %v10211_v39 = vstv %s7757_s7  ;;  %v10213_v54 = vstv %s7764_s15  ;;  %s10231_s15 = sld [smem:[#allocation124_spill]] }
 0x36a   : > { %v3158_v38 = vmul.f32 %v10210_v58, %v8474_v50  ;;  %v3161_v48 = vmul.f32 %v10211_v39, %v8479_v16  ;;  %v3150_v11 = vadd.f32 %v3148_v32, %v3145_v4  ;;  %v3151_v60 = vadd.f32 %v3149_v31, %v3146_v43  ;;  %v4907_v31 = vpop.eup %4906 }
 0x36b   : > { %v3166_v51 = vmul.f32 %v10213_v54, %v8490_v14  ;;  %v10214_v42 = vstv %s10010_s10  ;;  %v2867_v47 = vmul.f32 %v4903_v7, %v8336_v34  ;;  %v10215_v40 = vstv %s7769_s19  ;;  %v4909_v56 = vpop.eup %4908  ;;  %s8657_s19 = sld [smem:[#allocation19 + $0x102]]  ;;  %s10259_s10 = sld [smem:[#allocation114_spill]] }
 0x36c   : > { %v3181_v33 = vmul.f32 %v10214_v42, %v8474_v50  ;;  %v3163_v18 = vadd.f32 %v3161_v48, %v3158_v38  ;;  %v3171_v17 = vmul.f32 %v10215_v40, %v8496_v45  ;;  %v10216_v10 = vstv %s10208_s3  ;;  %s8760_s3 = sld [smem:[#allocation19 + $0x7]] }
 0x36d   : > { %v3184_v32 = vmul.f32 %v10216_v10, %v8479_v16  ;;  %v2902_v46 = vmul.f32 %v4905_v24, %v8340_v55  ;;  %v10217_v49 = vstv %s10209_s23  ;;  %v10219_v27 = vstv %s10212_s21  ;;  %s8762_s23 = sld [smem:[#allocation21]]  ;;  %s8764_s21 = sld [smem:[#allocation19 + $0x105]] }
 0x36e   : > { %v3153_v12 = vadd.f32 %v10217_v49, %v3150_v11  ;;  %v10218_v36 = vmov %v10217_v49  ;;  %v3189_v34 = vmul.f32 %v10219_v27, %v8490_v14  ;;  %v2937_v20 = vmul.f32 %v4907_v31, %v8344_v29 }
 0x36f   : > { %v3154_v53 = vadd.f32 %v10218_v36, %v3151_v60  ;;  %v10221_v30 = vmov %v10210_v58  ;;  %v3168_v43 = vadd.f32 %v3166_v51, %v3163_v18  ;;  %v10223_v58 = vmov %v10214_v42 }
 0x370   : > { %v3159_v4 = vmul.f32 %v10221_v30, %v2867_v47  ;;  %v3182_v38 = vmul.f32 %v10223_v58, %v2867_v47  ;;  %v2972_v55 = vmul.f32 %v4909_v56, %v8348_v61  ;;  %v8535_v39 = vmul.f32 %v3153_v12, %v6063_v63 }
 0x371   : > { %v8538_v48 = vmul.f32 %v3154_v53, %v6063_v63  ;;  %v10224_v7 = vstv %s7757_s7  ;;  %v10225_v29 = vmov %v10213_v54  ;;  %v3173_v54 = vadd.f32 %v3171_v17, %v3168_v43  ;;  %s8695_s7 = sld [smem:[#allocation19 + $0x181]] }
 0x372   : > { %v3162_v11 = vmul.f32 %v10224_v7, %v2902_v46  ;;  %v3167_v60 = vmul.f32 %v10225_v29, %v2937_v20  ;;  %v10226_v51 = vmov %v10216_v10  ;;  %v3186_v24 = vadd.f32 %v3184_v32, %v3181_v33 }
 0x373   : > { %v3185_v42 = vmul.f32 %v10226_v51, %v2902_v46  ;;  %v10227_v61 = vmov %v10215_v40  ;;  %v10228_v10 = vmov %v10219_v27  ;;  %v10229_v49 = vstv %s10220_s28  ;;  %s8766_s28 = sld [smem:[#allocation19 + $0x185]] }
 0x374   : > { %v3164_v18 = vadd.f32 %v3162_v11, %v3159_v4  ;;  %v3172_v40 = vmul.f32 %v10227_v61, %v2972_v55  ;;  %v3190_v31 = vmul.f32 %v10228_v10, %v2937_v20  ;;  %v3194_v12 = vmul.f32 %v10229_v49, %v8496_v45 }
 0x375   : > { %v10230_v36 = vstv %s10222_s1  ;;  %v3187_v27 = vadd.f32 %v3185_v42, %v3182_v38  ;;  %v3191_v56 = vadd.f32 %v3189_v34, %v3186_v24  ;;  %v10232_v17 = vmov %v10229_v49 }
 0x376   : > { %v3176_v53 = vadd.f32 %v10230_v36, %v3173_v54  ;;  %v3195_v30 = vmul.f32 %v10232_v17, %v2972_v55  ;;  %v3169_v33 = vadd.f32 %v3167_v60, %v3164_v18  ;;  %v10233_v32 = vstv %s10012_s22  ;;  %s10248_s22 = sld [smem:[#allocation48_spill]] }
 0x377   : > { %v3204_v4 = vmul.f32 %v10233_v32, %v8474_v50  ;;  %v10234_v43 = vmov %v10233_v32  ;;  %v10235_v7 = vstv %s7790_s25  ;;  %v3192_v38 = vadd.f32 %v3190_v31, %v3187_v27  ;;  %s8643_s25 = sld [smem:[#allocation19 + $0x101]] }
 0x378   : > { %v3205_v58 = vmul.f32 %v10234_v43, %v2867_v47  ;;  %v3207_v11 = vmul.f32 %v10235_v7, %v8479_v16  ;;  %v3178_v29 = vmul.f32 %v3176_v53, %v6063_v63  ;;  %v3196_v34 = vadd.f32 %v3194_v12, %v3191_v56 }
 0x379   : > { %v10236_v54 = vmov %v10235_v7  ;;  %v3174_v60 = vadd.f32 %v3172_v40, %v3169_v33  ;;  %v10237_v24 = vstv %s7792_s2  ;;  %v3197_v49 = vadd.f32 %v3195_v30, %v3192_v38 }
 0x37a   : > { %v3208_v51 = vmul.f32 %v10236_v54, %v2902_v46  ;;  %v3209_v42 = vadd.f32 %v3207_v11, %v3204_v4  ;;  %v3212_v18 = vmul.f32 %v10237_v24, %v8490_v14  ;;  %v10238_v61 = vmov %v10237_v24 }
 0x37b   : > { %v3213_v10 = vmul.f32 %v10238_v61, %v2937_v20  ;;  %v10239_v36 = vstv %s10231_s15  ;;  %v10240_v53 = vstv %s7797_s26  ;;  %v10241_v12 = vstv %s10222_s1  ;;  %s8693_s26 = sld [smem:[#allocation19 + $0x180]]  ;;  %s8769_s1 = sld [smem:[#allocation19 + $0x86]] }
 0x37c   : > { %v3199_v17 = vadd.f32 %v10239_v36, %v3196_v34  ;;  %v3210_v32 = vadd.f32 %v3208_v51, %v3205_v58  ;;  %v3217_v31 = vmul.f32 %v10240_v53, %v8496_v45  ;;  %v3177_v27 = vadd.f32 %v10241_v12, %v3174_v60  ;;  %s3309_s2 = sadd.s32 2, %s10248_s22  ;;  %s8771_s15 = sld [smem:[#allocation19 + $0x87]] }
 0x37d   : > { %v3214_v40 = vadd.f32 %v3212_v18, %v3209_v42  ;;  %v10242_v56 = vmov %v10240_v53  ;;  %v10243_v4 = vstv %s7783_s17  ;;  %v10244_v7 = vmov %v10239_v36  ;;  %s8661_s17 = sld [smem:[#allocation19 + $0x103]] }
 0x37e   : > { %v3218_v33 = vmul.f32 %v10242_v56, %v2972_v55  ;;  %v3227_v43 = vmul.f32 %v10243_v4, %v8474_v50  ;;  %v3200_v30 = vadd.f32 %v10244_v7, %v3197_v49  ;;  %v3201_v58 = vmul.f32 %v3199_v17, %v6063_v63  ;;  %s8663_s18 = sld [smem:[#allocation18 + %s3309_s2]] }
 0x37f   : > { %v3215_v11 = vadd.f32 %v3213_v10, %v3210_v32  ;;  %v10245_v38 = vmov %v10243_v4  ;;  %v3179_v54 = vmul.f32 %v3177_v27, %v6063_v63  ;;  %v3219_v51 = vadd.f32 %v3217_v31, %v3214_v40  ;;  %s8791_s2 = sld [smem:[#allocation21 + $0x2]] }
 0x380   : > { %v3228_v34 = vmul.f32 %v10245_v38, %v2867_v47  ;;  %v10246_v60 = vstv %s7804_s9  ;;  %v3202_v50 = vmul.f32 %v3200_v30, %v6063_v63  ;;  %v10249_v49 = vstv %s7806_s13  ;;  %s3307_s9 = sadd.s32 1, %s10248_s22  ;;  %s10257_s13 = sld [smem:[#allocation34_spill]] }
 0x381   : > { %v3230_v42 = vmul.f32 %v10246_v60, %v8479_v16  ;;  %v10247_v24 = vmov %v10246_v60  ;;  %v3220_v61 = vadd.f32 %v3218_v33, %v3215_v11  ;;  %v3235_v36 = vmul.f32 %v10249_v49, %v8490_v14 }
 0x382   : > { %v3231_v18 = vmul.f32 %v10247_v24, %v2902_v46  ;;  %v10250_v17 = vmov %v10249_v49  ;;  %v10251_v10 = vstv %s7799_s29  ;;  %v10252_v31 = vstv %s7812_s0  ;;  %s8626_s29 = sld [smem:[#allocation19 + $0x100]] }
 0x383   : > { %v3236_v53 = vmul.f32 %v10250_v17, %v2937_v20  ;;  %v3222_v32 = vadd.f32 %v10251_v10, %v3219_v51  ;;  %v3232_v47 = vadd.f32 %v3230_v42, %v3227_v43  ;;  %v3240_v27 = vmul.f32 %v10252_v31, %v8496_v45  ;;  %s8630_s0 = sld [smem:[#allocation18 + %s3307_s9]] }
 0x384   : > { %v3233_v12 = vadd.f32 %v3231_v18, %v3228_v34  ;;  %v10253_v40 = vmov %v10251_v10  ;;  %v10254_v56 = vmov %v10252_v31  ;;  %v3251_v4 = vadd.f32 %v8484_v35, %v3178_v29  ;;  %s8778_s9 = sld [smem:[#allocation21 + $0x1]] }
 0x385   : > { %v3223_v16 = vadd.f32 %v10253_v40, %v3220_v61  ;;  %v3241_v46 = vmul.f32 %v10254_v56, %v2972_v55  ;;  %v3252_v33 = vadd.f32 %v8487_v9, %v3179_v54  ;;  %v3224_v7 = vmul.f32 %v3222_v32, %v6063_v63  ;;  %v10267_v32 = vld [vmem:[#allocation121_spill] sm:$0xff] }
 0x386   : > { %v3237_v14 = vadd.f32 %v3235_v36, %v3232_v47  ;;  %v3238_v30 = vadd.f32 %v3236_v53, %v3233_v12  ;;  %v3253_v20 = vadd.f32 %v8435_v25, %v8140_v57  ;;  %v3254_v55 = vadd.f32 %v8438_v1, %v8149_v23  ;;  %v8680_v42 = vld [vmem:[%s10257_s13 + $0x28] sm:$0xff]  ;;  %v8698_v61 = vld [vmem:[%s10257_s13 + $0x30] sm:$0xff]  ;;  %v8704_v17 = vld [vmem:[%s10257_s13 + $0x38] sm:$0xff] }
 0x387   : > { %v3225_v45 = vmul.f32 %v3223_v16, %v6063_v63  ;;  %v3257_v35 = vadd.f32 %v8493_v26, %v8283_v52  ;;  %v3258_v9 = vadd.f32 %v8499_v62, %v8286_v15  ;;  %v3261_v57 = vadd.f32 %v8535_v39, %v8359_v59  ;;  %v10268_v12 = vld [vmem:[#allocation122_spill] sm:$0xff] }
 0x388   : > { %v3242_v29 = vadd.f32 %v3240_v27, %v3237_v14  ;;  %v3243_v43 = vadd.f32 %v3241_v46, %v3238_v30  ;;  %v3255_v11 = vadd.f32 %v3253_v20, %v3201_v58  ;;  %v3256_v25 = vadd.f32 %v3254_v55, %v3202_v50  ;;  %v4964_v14 = vld [vmem:[%s10257_s13 + $0x8] sm:$0xff] }
 0x389   : > { %v3259_v38 = vadd.f32 %v3257_v35, %v3224_v7  ;;  %v3260_v34 = vadd.f32 %v3258_v9, %v3225_v45  ;;  %v3262_v23 = vadd.f32 %v8538_v48, %v8362_v21  ;;  %v10255_v52 = vstv %s7814_s20  ;;  %s10258_s20 = sld [smem:[#allocation42_spill]]  ;;  %v4965_v35 = vld [vmem:[%s10257_s13 + $0x10] sm:$0xff] }
 0x38a   : > { %v3245_v1 = vadd.f32 %v10255_v52, %v3242_v29  ;;  %v10256_v15 = vmov %v10255_v52  ;;  %v8638_v62 = vadd.f32 %v3251_v4, %v7181_v37  ;;  %v8641_v59 = vadd.f32 %v3252_v33, %v7184_v0  ;;  %v4963_v33 = vld [vmem:[%s10257_s13] sm:$0xff]  ;;  %v4966_v29 = vld [vmem:[%s10257_s13 + $0x18] sm:$0xff] }
 0x38b   : > { %v3246_v26 = vadd.f32 %v10256_v15, %v3243_v43  ;;  %v8646_v21 = vadd.f32 %v3255_v11, %v7202_v3  ;;  %v8649_v39 = vadd.f32 %v3256_v25, %v7206_v19  ;;  %v8652_v48 = vadd.f32 %v3259_v38, %v7208_v44 }
 0x38c   : > { %v8655_v37 = vadd.f32 %v3260_v34, %v7210_v2  ;;  %v3247_v0 = vmul.f32 %v3245_v1, %v6063_v63  ;;  %v3341_v3 = vadd.f32 %v7876_v28, %v7887_v8  ;;  %v3342_v19 = vadd.f32 %v7878_v22, %v7889_v41  ;;  %v10260_v2 = vld [vmem:[#allocation119_spill] sm:$0xff] }
 0x38d   : > { %v3248_v58 = vmul.f32 %v3246_v26, %v6063_v63  ;;  %v3366_v44 = vadd.f32 %v7898_v6, %v7891_v5  ;;  %v3367_v54 = vadd.f32 %v10260_v2, %v7896_v13  ;;  %v8674_v63 = vld [vmem:[%s10257_s13 + $0x20] sm:$0xff]  ;;  %v10261_v51 = vstv %s7854_s5  ;;  %s3311_s5 = sadd.s32 3, %s10248_s22  ;;  %s8776_s22 = sld [smem:[#allocation19 + $0x106]] }
 0x38e   : > { %v3369_v60 = vmul.f32 %v8674_v63, %v10261_v51  ;;  %v10262_v28 = vmov %v10261_v51  ;;  %v3263_v8 = vadd.f32 %v3261_v57, %v3247_v0  ;;  %v10265_v49 = vstv %s10259_s10  ;;  %s8727_s11 = sld [smem:[#allocation18 + %s3311_s5]] }
 0x38f   : > { %v3370_v22 = vmul.f32 %v8680_v42, %v10262_v28  ;;  %v3264_v41 = vadd.f32 %v3262_v23, %v3248_v58  ;;  %v10263_v24 = vstv %s10258_s20  ;;  %v3374_v36 = vmul.f32 %v8698_v61, %v10265_v49  ;;  %s8794_s13 = sld [smem:[#allocation19 + $0x187]]  ;;  %s10273_s20 = sld [smem:[#allocation33_spill]] }
 0x390   : > { %v8687_v5 = vadd.f32 %v10263_v24, %v3341_v3  ;;  %v10264_v6 = vmov %v10263_v24  ;;  %v3371_v13 = vadd.f32 %v3369_v60, %v3366_v44  ;;  %v10266_v53 = vmov %v10265_v49 }
 0x391   : > { %v8691_v18 = vadd.f32 %v10264_v6, %v3342_v19  ;;  %v3372_v50 = vadd.f32 %v3370_v22, %v3367_v54  ;;  %v3375_v10 = vmul.f32 %v8704_v17, %v10266_v53  ;;  %v8710_v47 = vadd.f32 %v3263_v8, %v10267_v32 }
 0x392   : > { %v8713_v31 = vadd.f32 %v3264_v41, %v10268_v12  ;;  %v4442_v27 = vmul.f32 -1.442695, %v8687_v5  ;;  %v3376_v16 = vadd.f32 %v3374_v36, %v3371_v13  ;;  %v3378_v46 = vstv %s8630_s0  ;;  %s8785_s0 = sld [smem:[#allocation19 + $0x107]] }
 0x393   : > { %v4443_v40 = vmul.f32 -1.442695, %v8691_v18  ;;  %v3377_v56 = vadd.f32 %v3375_v10, %v3372_v50  ;;  %v3395_v4 = vstv %s8626_s29  ;;  %v3398_v20 = vstv %s8643_s25  ;;  %s8783_s29 = sld [smem:[#allocation19 + $0x186]]  ;;  %s8806_s25 = sld [smem:[#allocation21 + $0x3]] }
 0x394   : > { %4910 = vpow2.f32 %v4442_v27  ;;  %v3396_v7 = vmul.f32 %v4963_v33, %v3395_v4  ;;  %v3397_v30 = vmul.f32 %v4964_v14, %v3395_v4  ;;  %v8729_v45 = vadd.f32 %v3378_v46, %v3376_v16 }
 0x395   : > { %4912 = vpow2.f32 %v4443_v40  ;;  %v8731_v55 = vadd.f32 %v3378_v46, %v3377_v56  ;;  %v3399_v9 = vmul.f32 %v4965_v35, %v3398_v20  ;;  %v3400_v43 = vmul.f32 %v4966_v29, %v3398_v20 }
 0x396   : > { %v3403_v11 = vstv %s8657_s19  ;;  %v3408_v57 = vstv %s8661_s17  ;;  %v3413_v25 = vstv %s8663_s18  ;;  %v4444_v38 = vmul.f32 -1.442695, %v8729_v45  ;;  %s10274_s19 = sshll.u32 %s10273_s20, 6  ;;  %s10275_s18 = sld [smem:[#allocation32_spill]] }
 0x397   : > { %v4445_v34 = vmul.f32 -1.442695, %v8731_v55  ;;  %v3401_v23 = vadd.f32 %v3399_v9, %v3396_v7  ;;  %v3404_v52 = vmul.f32 %v8674_v63, %v3403_v11  ;;  %v3402_v1 = vadd.f32 %v3400_v43, %v3397_v30  ;;  %s8983_s17 = scalar_lea.vmem [#allocation22], %s10274_s19 }
 0x398   : > { %v3405_v15 = vmul.f32 %v8680_v42, %v3403_v11  ;;  %v3409_v26 = vmul.f32 %v8698_v61, %v3408_v57  ;;  %v3410_v0 = vmul.f32 %v8704_v17, %v3408_v57  ;;  %4914 = vpow2.f32 %v4444_v38 }
 0x399   : > { %v3406_v58 = vadd.f32 %v3404_v52, %v3401_v23  ;;  %v3430_v3 = vstv %s8693_s26  ;;  %v3433_v19 = vstv %s8695_s7  ;;  %4916 = vpow2.f32 %v4445_v34 }
 0x39a   : > { %v3407_v44 = vadd.f32 %v3405_v15, %v3402_v1  ;;  %v3431_v2 = vmul.f32 %v4963_v33, %v3430_v3  ;;  %v3432_v54 = vmul.f32 %v4964_v14, %v3430_v3  ;;  %v3434_v60 = vmul.f32 %v4965_v35, %v3433_v19 }
 0x39b   : > { %v3411_v51 = vadd.f32 %v3409_v26, %v3406_v58  ;;  %v3435_v28 = vmul.f32 %v4966_v29, %v3433_v19  ;;  %v3438_v22 = vstv %s8718_s27  ;;  %v3443_v6 = vstv %s8722_s8 }
 0x39c   : > { %v3412_v8 = vadd.f32 %v3410_v0, %v3407_v44  ;;  %v3439_v41 = vmul.f32 %v8674_v63, %v3438_v22  ;;  %v3440_v24 = vmul.f32 %v8680_v42, %v3438_v22  ;;  %v3436_v50 = vadd.f32 %v3434_v60, %v3431_v2  ;;  %p10276_p13 = scmp.ne.s32.totalorder %s10275_s18, 0 }
 0x39d   : > { %v8780_v13 = vadd.f32 %v3413_v25, %v3411_v51  ;;  %v3437_v49 = vadd.f32 %v3435_v28, %v3432_v54  ;;  %v3444_v36 = vmul.f32 %v8698_v61, %v3443_v6  ;;  %v3445_v42 = vmul.f32 %v8704_v17, %v3443_v6  ;;  %s10277_s10 = sld [smem:[#allocation29_spill]] (%p10276_p13)  ;;  %s10278_s27 = sld [smem:[#allocation139_spill]] (%p10276_p13) }
 0x39e   : > { %v4911_v53 = vpop.eup %4910  ;;  %v8787_v63 = vadd.f32 %v3413_v25, %v3412_v8  ;;  %v3448_v10 = vstv %s8727_s11  ;;  %v3441_v27 = vadd.f32 %v3439_v41, %v3436_v50  ;;  %v8798_v17 = vstv %s8734_s4 }
 0x39f   : > { %v4913_v32 = vpop.eup %4912  ;;  %v3352_v12 = vadd.f32 1.0, %v4911_v53  ;;  %v4446_v61 = vmul.f32 -1.442695, %v8780_v13  ;;  %v3442_v40 = vadd.f32 %v3440_v24, %v3437_v49  ;;  %v8801_v46 = vstv %s8749_s30 }
 0x3a0   : > { %v3353_v16 = vadd.f32 1.0, %v4913_v32  ;;  %v4447_v56 = vmul.f32 -1.442695, %v8787_v63  ;;  %v3446_v4 = vadd.f32 %v3444_v36, %v3441_v27  ;;  %v8804_v7 = vstv %s8756_s14 }
 0x3a1   : > { %4918 = vrcp.f32 %v3352_v12  ;;  %v3447_v33 = vadd.f32 %v3445_v42, %v3442_v40  ;;  %v8809_v14 = vstv %s8760_s3  ;;  %v3483_v30 = vstv %s8762_s23 }
 0x3a2   : > { %4920 = vrcp.f32 %v3353_v16  ;;  %v3486_v20 = vstv %s8736_s6  ;;  %v4915_v35 = vpop.eup %4914  ;;  %v8813_v9 = vadd.f32 %v3448_v10, %v3446_v4  ;;  %v8818_v43 = vstv %s8754_s24 }
 0x3a3   : > { %4922 = vpow2.f32 %v4446_v61  ;;  %v8815_v29 = vadd.f32 %v3448_v10, %v3447_v33  ;;  %v4917_v11 = vpop.eup %4916  ;;  %v3387_v57 = vadd.f32 1.0, %v4915_v35  ;;  %v8821_v25 = vstv %s8769_s1  ;;  %s4467_s26 = sshll.u32 (%p10276_p13), %s10277_s10, 4 }
 0x3a4   : > { %4924 = vpow2.f32 %v4447_v56  ;;  %v8824_v38 = vstv %s8771_s15  ;;  %v3388_v34 = vadd.f32 1.0, %v4917_v11  ;;  %v4448_v23 = vmul.f32 -1.442695, %v8813_v9  ;;  %s3717_s8 = scalar_lea.vmem (%p10276_p13), %s10278_s27, %s4467_s26 }
 0x3a5   : > { %v4449_v52 = vmul.f32 -1.442695, %v8815_v29  ;;  %v3504_v1 = vstv %s8778_s9  ;;  %4926 = vrcp.f32 %v3387_v57  ;;  %v8830_v15 = vstv %s8742_s16 }
 0x3a6   : > { %v8833_v26 = vstv %s8764_s21  ;;  %v8836_v0 = vstv %s8776_s22  ;;  %4928 = vrcp.f32 %v3388_v34  ;;  %v8839_v58 = vstv %s8785_s0 }
 0x3a7   : > { %v8843_v19 = vstv %s8747_s12  ;;  %4930 = vpow2.f32 %v4448_v23  ;;  %v8846_v44 = vstv %s8766_s28  ;;  %v8849_v2 = vstv %s8783_s29 }
 0x3a8   : > { %v8852_v54 = vstv %s8794_s13  ;;  %4932 = vpow2.f32 %v4449_v52  ;;  %v3549_v51 = vmul.f32 %v8798_v17, %v8638_v62  ;;  %v3550_v60 = vmul.f32 %v8798_v17, %v8641_v59 }
 0x3a9   : > { %v3551_v28 = vmul.f32 %v8801_v46, %v8646_v21  ;;  %v3552_v8 = vmul.f32 %v8801_v46, %v8649_v39  ;;  %v3555_v41 = vmul.f32 %v8804_v7, %v8652_v48  ;;  %v3556_v24 = vmul.f32 %v8804_v7, %v8655_v37 }
 0x3aa   : > { %v3559_v49 = vmul.f32 %v8809_v14, %v8710_v47  ;;  %v3560_v36 = vmul.f32 %v8809_v14, %v8713_v31  ;;  %v3563_v53 = vmul.f32 %v3486_v20, %v8638_v62  ;;  %v3564_v12 = vmul.f32 %v3486_v20, %v8641_v59 }
 0x3ab   : > { %v4919_v6 = vpop.eup %4918  ;;  %v3553_v50 = vadd.f32 %v3551_v28, %v3549_v51  ;;  %v3554_v32 = vadd.f32 %v3552_v8, %v3550_v60  ;;  %v3565_v61 = vmul.f32 %v8818_v43, %v8646_v21  ;;  %v3566_v56 = vmul.f32 %v8818_v43, %v8649_v39 }
 0x3ac   : > { %v4921_v42 = vpop.eup %4920  ;;  %v3358_v10 = vmul.f32 %v4919_v6, %v8687_v5  ;;  %v3569_v4 = vmul.f32 %v8821_v25, %v8652_v48  ;;  %v3570_v57 = vmul.f32 %v8821_v25, %v8655_v37 }
 0x3ad   : > { %v4923_v27 = vpop.eup %4922  ;;  %v3359_v40 = vmul.f32 %v4921_v42, %v8691_v18  ;;  %v3557_v16 = vadd.f32 %v3555_v41, %v3553_v50  ;;  %v3558_v8 = vadd.f32 %v3556_v24, %v3554_v32  ;;  %v3567_v42 = vadd.f32 %v3565_v61, %v3563_v53 }
 0x3ae   : > { %v4925_v33 = vpop.eup %4924  ;;  %v3422_v35 = vadd.f32 1.0, %v4923_v27  ;;  %v3466_v5 = vmul.f32 %v8798_v17, %v3358_v10  ;;  %v3487_v11 = vmul.f32 %v3486_v20, %v3358_v10  ;;  %v3508_v18 = vmul.f32 %v8830_v15, %v3358_v10 }
 0x3af   : > { %v3423_v34 = vadd.f32 1.0, %v4925_v33  ;;  %v3467_v23 = vmul.f32 %v8798_v17, %v3359_v40  ;;  %v3488_v52 = vmul.f32 %v3486_v20, %v3359_v40  ;;  %v4927_v51 = vpop.eup %4926  ;;  %v3509_v60 = vmul.f32 %v8830_v15, %v3359_v40 }
 0x3b0   : > { %4934 = vrcp.f32 %v3422_v35  ;;  %v3529_v28 = vmul.f32 %v8843_v19, %v3358_v10  ;;  %v4929_v41 = vpop.eup %4928  ;;  %v3393_v6 = vmul.f32 %v4927_v51, %v8729_v45  ;;  %v8889_v50 = vadd.f32 %v3559_v49, %v3557_v16 }
 0x3b1   : > { %4936 = vrcp.f32 %v3423_v34  ;;  %v4931_v27 = vpop.eup %4930  ;;  %v3394_v17 = vmul.f32 %v4929_v41, %v8731_v55  ;;  %v3530_v20 = vmul.f32 %v8843_v19, %v3359_v40  ;;  %v8893_v33 = vadd.f32 %v3560_v36, %v3558_v8 }
 0x3b2   : > { %v3568_v35 = vadd.f32 %v3566_v56, %v3564_v12  ;;  %v4933_v22 = vpop.eup %4932  ;;  %v3457_v3 = vadd.f32 1.0, %v4931_v27  ;;  %v3469_v10 = vmul.f32 %v8801_v46, %v3393_v6  ;;  %v3490_v24 = vmul.f32 %v8818_v43, %v3393_v6 }
 0x3b3   : > { %v3511_v45 = vmul.f32 %v8833_v26, %v3393_v6  ;;  %v3458_v32 = vadd.f32 1.0, %v4933_v22  ;;  %v3470_v49 = vmul.f32 %v8801_v46, %v3394_v17  ;;  %v3491_v53 = vmul.f32 %v8818_v43, %v3394_v17 }
 0x3b4   : > { %v3573_v55 = vmul.f32 %v8824_v38, %v8710_v47  ;;  %4938 = vrcp.f32 %v3457_v3  ;;  %v3471_v36 = vadd.f32 %v3469_v10, %v3466_v5  ;;  %v3492_v61 = vadd.f32 %v3490_v24, %v3487_v11 }
 0x3b5   : > { %v3512_v12 = vmul.f32 %v8833_v26, %v3394_v17  ;;  %4940 = vrcp.f32 %v3458_v32  ;;  %v3472_v40 = vadd.f32 %v3470_v49, %v3467_v23  ;;  %v3493_v16 = vadd.f32 %v3491_v53, %v3488_v52 }
 0x3b6   : > { %v3513_v56 = vadd.f32 %v3511_v45, %v3508_v18  ;;  %v3532_v34 = vmul.f32 %v8846_v44, %v3393_v6  ;;  %v3533_v22 = vmul.f32 %v8846_v44, %v3394_v17  ;;  %v3571_v51 = vadd.f32 %v3569_v4, %v3567_v42 }
 0x3b7   : > { %v3572_v46 = vadd.f32 %v3570_v57, %v3568_v35  ;;  %v3574_v43 = vmul.f32 %v8824_v38, %v8713_v31  ;;  %v3577_v3 = vmul.f32 %v8830_v15, %v8638_v62  ;;  %v3578_v5 = vmul.f32 %v8830_v15, %v8641_v59 }
 0x3b8   : > { %v3579_v11 = vmul.f32 %v8833_v26, %v8646_v21  ;;  %v3514_v23 = vadd.f32 %v3512_v12, %v3509_v60  ;;  %v3534_v52 = vadd.f32 %v3532_v34, %v3529_v28  ;;  %v8913_v18 = vadd.f32 %v3573_v55, %v3571_v51 }
 0x3b9   : > { %v3580_v4 = vmul.f32 %v8833_v26, %v8649_v39  ;;  %v3535_v8 = vadd.f32 %v3533_v22, %v3530_v20  ;;  %v8917_v41 = vadd.f32 %v3574_v43, %v3572_v46  ;;  %v3583_v42 = vmul.f32 %v8836_v0, %v8652_v48 }
 0x3ba   : > { %v4935_v57 = vpop.eup %4934  ;;  %v3581_v6 = vadd.f32 %v3579_v11, %v3577_v3  ;;  %v3584_v60 = vmul.f32 %v8836_v0, %v8655_v37  ;;  %v3587_v28 = vmul.f32 %v8839_v58, %v8710_v47  ;;  %v3588_v20 = vmul.f32 %v8839_v58, %v8713_v31 }
 0x3bb   : > { %v4937_v27 = vpop.eup %4936  ;;  %v3428_v15 = vmul.f32 %v4935_v57, %v8780_v13  ;;  %v3582_v17 = vadd.f32 %v3580_v4, %v3578_v5  ;;  %v3591_v10 = vmul.f32 %v8843_v19, %v8638_v62 }
 0x3bc   : > { %v3429_v26 = vmul.f32 %v4937_v27, %v8787_v63  ;;  %v3585_v35 = vadd.f32 %v3583_v42, %v3581_v6 }
 0x3bd   : > { %v3474_v24 = vmul.f32 %v8804_v7, %v3428_v15  ;;  %v3495_v13 = vmul.f32 %v8821_v25, %v3428_v15  ;;  %v3516_v45 = vmul.f32 %v8836_v0, %v3428_v15  ;;  %v3537_v32 = vmul.f32 %v8849_v2, %v3428_v15 }
 0x3be   : > { %v3475_v49 = vmul.f32 %v8804_v7, %v3429_v26  ;;  %v3496_v53 = vmul.f32 %v8821_v25, %v3429_v26  ;;  %v3517_v63 = vmul.f32 %v8836_v0, %v3429_v26  ;;  %v3538_v55 = vmul.f32 %v8849_v2, %v3429_v26  ;;  %v4939_v12 = vpop.eup %4938 }
 0x3bf   : > { %v3476_v34 = vadd.f32 %v3474_v24, %v3471_v36  ;;  %v3497_v22 = vadd.f32 %v3495_v13, %v3492_v61  ;;  %v3518_v62 = vadd.f32 %v3516_v45, %v3513_v56  ;;  %v3539_v51 = vadd.f32 %v3537_v32, %v3534_v52  ;;  %v4941_v46 = vpop.eup %4940 }
 0x3c0   : > { %v3463_v43 = vmul.f32 %v4939_v12, %v8813_v9  ;;  %v3477_v3 = vadd.f32 %v3475_v49, %v3472_v40  ;;  %v3498_v5 = vadd.f32 %v3496_v53, %v3493_v16  ;;  %v3519_v11 = vadd.f32 %v3517_v63, %v3514_v23 }
 0x3c1   : > { %v3464_v4 = vmul.f32 %v4941_v46, %v8815_v29  ;;  %v3540_v7 = vadd.f32 %v3538_v55, %v3535_v8  ;;  %v3586_v57 = vadd.f32 %v3584_v60, %v3582_v17  ;;  %v3589_v25 = vadd.f32 %v3587_v28, %v3585_v35 }
 0x3c2   : > { %v3479_v0 = vmul.f32 %v8809_v14, %v3463_v43  ;;  %v3500_v6 = vmul.f32 %v8824_v38, %v3463_v43  ;;  %v3521_v36 = vmul.f32 %v8839_v58, %v3463_v43  ;;  %v3542_v61 = vmul.f32 %v8852_v54, %v3463_v43 }
 0x3c3   : > { %v3480_v9 = vmul.f32 %v8809_v14, %v3464_v4  ;;  %v3501_v40 = vmul.f32 %v8824_v38, %v3464_v4  ;;  %v3522_v29 = vmul.f32 %v8839_v58, %v3464_v4  ;;  %v3543_v16 = vmul.f32 %v8852_v54, %v3464_v4 }
 0x3c4   : > { %v3481_v56 = vadd.f32 %v3479_v0, %v3476_v34  ;;  %v3502_v23 = vadd.f32 %v3500_v6, %v3497_v22  ;;  %v3523_v52 = vadd.f32 %v3521_v36, %v3518_v62  ;;  %v3544_v8 = vadd.f32 %v3542_v61, %v3539_v51 }
 0x3c5   : > { %v3482_v42 = vadd.f32 %v3480_v9, %v3477_v3  ;;  %v3503_v27 = vadd.f32 %v3501_v40, %v3498_v5  ;;  %v3524_v15 = vadd.f32 %v3522_v29, %v3519_v11  ;;  %v3545_v17 = vadd.f32 %v3543_v16, %v3540_v7 }
 0x3c6   : > { %v3484_v14 = vadd.f32 %v3483_v30, %v3481_v56  ;;  %v3505_v38 = vadd.f32 %v3504_v1, %v3502_v23  ;;  %v10269_v60 = vstv %s8791_s2  ;;  %v3592_v58 = vmul.f32 %v8843_v19, %v8641_v59 }
 0x3c7   : > { %v3526_v28 = vadd.f32 %v10269_v60, %v3523_v52  ;;  %v3485_v26 = vadd.f32 %v3483_v30, %v3482_v42  ;;  %v3506_v35 = vadd.f32 %v3504_v1, %v3503_v27  ;;  %v10270_v24 = vmov %v10269_v60 }
 0x3c8   : > { %v3527_v13 = vadd.f32 %v10270_v24, %v3524_v15  ;;  %v10271_v45 = vstv %s8806_s25  ;;  %v3590_v63 = vadd.f32 %v3588_v20, %v3586_v57  ;;  %v3593_v55 = vmul.f32 %v8846_v44, %v8646_v21 }
 0x3c9   : > { %v3547_v32 = vadd.f32 %v10271_v45, %v3544_v8  ;;  %v10272_v49 = vmov %v10271_v45  ;;  %v3594_v12 = vmul.f32 %v8846_v44, %v8649_v39  ;;  %v3597_v59 = vmul.f32 %v8849_v2, %v8652_v48 }
 0x3ca   : > { %v3548_v53 = vadd.f32 %v10272_v49, %v3545_v17  ;;  %v3598_v30 = vmul.f32 %v8849_v2, %v8655_v37  ;;  %v3601_v1 = vmul.f32 %v8852_v54, %v8710_v47  ;;  %v3602_v19 = vmul.f32 %v8852_v54, %v8713_v31 }
 0x3cb   : > { %v3595_v20 = vadd.f32 %v3593_v55, %v3591_v10  ;;  %v3596_v34 = vadd.f32 %v3594_v12, %v3592_v58  ;;  %v3611_v22 = vlaneseq  ;;  %v3607_v21 = vcombine.low %v3484_v14, %v3485_v26 }
 0x3cc   : > { %v5156_v62 = vmov 1966171168   ;;  %v3629_v39 = vadd.f32 %v8889_v50, %v3484_v14  ;;  %v3630_v48 = vadd.f32 %v8893_v33, %v3485_v26  ;;  %v3635_v2 = vcombine.low %v3505_v38, %v3506_v35 }
 0x3cd   : > { %v3609_v51 = vunpack.c.l.s4 %v5156_v62  ;;  %v3599_v44 = vadd.f32 %v3597_v59, %v3595_v20  ;;  %v3600_v46 = vadd.f32 %v3598_v30, %v3596_v34  ;;  %v3612_v37 = vshrl.u32 %v3611_v22, 7 }
 0x3ce   : > { %3631 = vst [vmem:[%s8983_s17] sm:$0xfe] %v3629_v39  ;;  %3632 = vst [vmem:[%s8983_s17 + $0x8] sm:$0xfe] %v3630_v48  ;;  %v3654_v47 = vadd.f32 %v8913_v18, %v3505_v38  ;;  %v3655_v31 = vadd.f32 %v8917_v41, %v3506_v35  ;;  %v3660_v54 = vcombine.low %v3526_v28, %v3527_v13  ;;  %vm3625_vm0 = vcmp.lt.s32.totalorder %v3611_v22, 256 }
 0x3cf   : > { %v3610_v43 = vunpack.c.0.s8 %v3609_v51  ;;  %v3603_v50 = vadd.f32 %v3601_v1, %v3599_v44  ;;  %v3604_v33 = vadd.f32 %v3602_v19, %v3600_v46  ;;  %v3679_v10 = vadd.f32 %v3589_v25, %v3526_v28 }
 0x3d0   : > { %v3680_v3 = vadd.f32 %v3590_v63, %v3527_v13  ;;  %4451 = vst [vmem:[%s8983_s17 + $0x10] sm:$0xfe] %v3654_v47  ;;  %4452 = vst [vmem:[%s8983_s17 + $0x18] sm:$0xfe] %v3655_v31  ;;  %v3685_v11 = vcombine.low %v3547_v32, %v3548_v53 }
 0x3d1   : > { %v3613_v5 = vsub.s32 %v3610_v43, %v3612_v37  ;;  %4454 = vst [vmem:[%s8983_s17 + $0x20] sm:$0xfe] %v3679_v10  ;;  %v3704_v4 = vadd.f32 %v3603_v50, %v3547_v32  ;;  %v3705_v18 = vadd.f32 %v3604_v33, %v3548_v53 }
 0x3d2   : > { %4455 = vst [vmem:[%s8983_s17 + $0x28] sm:$0xfe] %v3680_v3  ;;  %3714 = sbr.rel (!%p10276_p13) target bundleno = 996 (0x3e4), region = 265 }
 0x3d3   : > { %v3614_v41 = vrot.slane %v3607_v21, %v3613_v5  ;;  %v3642_v7 = vrot.slane %v3635_v2, %v3613_v5  ;;  %v3667_v57 = vrot.slane %v3660_v54, %v3613_v5  ;;  %v3692_v0 = vrot.slane %v3685_v11, %v3613_v5  ;;  %4457 = vst [vmem:[%s8983_s17 + $0x30] sm:$0xfe] %v3704_v4 }
 0x3d4   : > { %4458 = vst [vmem:[%s8983_s17 + $0x38] sm:$0xfe] %v3705_v18 }
 0x3d5   : > { %v3621_v25 = vrot.slane %v3614_v41, %v3613_v5  ;;  %v3649_v6 = vrot.slane %v3642_v7, %v3613_v5  ;;  %v3674_v36 = vrot.slane %v3667_v57, %v3613_v5  ;;  %v3699_v61 = vrot.slane %v3692_v0, %v3613_v5 }
 0x3d7   : > { %3627 = vst.msk [vmem:[%s8983_s17] ss:$8 sm:$0x3] %vm3625_vm0, %v3621_v25  ;;  %4450 = vst.msk [vmem:[%s8983_s17 + $0x10] ss:$8 sm:$0x3] %vm3625_vm0, %v3649_v6 }
 0x3d8   : > { %4453 = vst.msk [vmem:[%s8983_s17 + $0x20] ss:$8 sm:$0x3] %vm3625_vm0, %v3674_v36  ;;  %4456 = vst.msk [vmem:[%s8983_s17 + $0x30] ss:$8 sm:$0x3] %vm3625_vm0, %v3699_v61 }
 0x3de   : > { %v3730_v9 = vld [vmem:[%s8983_s17] sm:$0xff]  ;;  %v3732_v40 = vld [vmem:[%s8983_s17 + $0x8] sm:$0xff]  ;;  %v3734_v29 = vld [vmem:[%s8983_s17 + $0x10] sm:$0xff] }
 0x3df   : > { %v3736_v16 = vld [vmem:[%s8983_s17 + $0x18] sm:$0xff]  ;;  %v3738_v56 = vld [vmem:[%s8983_s17 + $0x20] sm:$0xff]  ;;  %v3740_v23 = vld [vmem:[%s8983_s17 + $0x28] sm:$0xff]  ;;  %3731 = vst [vmem:[%s3717_s8] sm:$0xff] %v3730_v9 }
 0x3e0   : > { %3733 = vst [vmem:[%s3717_s8 + $0x8] sm:$0xff] %v3732_v40  ;;  %3735 = vst [vmem:[%s3717_s8 + $0x20] sm:$0xff] %v3734_v29  ;;  %v3742_v52 = vld [vmem:[%s8983_s17 + $0x30] sm:$0xff]  ;;  %v3744_v8 = vld [vmem:[%s8983_s17 + $0x38] sm:$0xff] }
 0x3e1   : > { %3737 = vst [vmem:[%s3717_s8 + $0x28] sm:$0xff] %v3736_v16  ;;  %3739 = vst [vmem:[%s3717_s8 + $0x40] sm:$0xff] %v3738_v56 }
 0x3e2   : > { %3741 = vst [vmem:[%s3717_s8 + $0x48] sm:$0xff] %v3740_v23  ;;  %3743 = vst [vmem:[%s3717_s8 + $0x60] sm:$0xff] %v3742_v52 }
 0x3e3   : > { %3745 = vst [vmem:[%s3717_s8 + $0x68] sm:$0xff] %v3744_v8 }
 0x3e4 PF: > { %s10279_s22 = sld [smem:[#allocation30_spill]]  ;;  %s10280_s20 = sld [smem:[#allocation28_spill]] }
 0x3e5   : > { %s10281_s21 = sld [smem:[#allocation31_spill]] }
 0x3ea   : > { %p28_p8 = scmp.ge.s32.totalorder %s10279_s22, 4  }
 0x3ec   :  { %30 = sbr.rel (!%p28_p8) target bundleno = 23 (0x17), region = 368 }
 0x3f3   :  { %3761 = vsyncpa [#allocation9], 1 }
 0x3f4   :  { %3763 = vsyncpa [#allocation9 + $0x1], 1 }
 0x3f5   :  { %3764 = vsyncpa [#allocation11], 1 }
 0x3f6   :  { %3765 = vsyncpa [#allocation14], 1 }
 0x3f7   :  { %3766 = vsyncpa [#allocation17], 1 }
 0x3f8   :  { %3767 = vsyncpa [#allocation20], 1 }

</bundles_post_ra>
